<compile_context>
chip_gen: v7x
topology: tpu7x:2x2x1
jax: 0.10.0
libtpu: 0.0.40
codegen_flags: <defaults>
</compile_context>

<pallas_src>
import jax
import jax.numpy as jnp
from jax.experimental import pallas as pl
from jax.experimental.pallas import tpu as pltpu


def resnet_block_kernel(
    x_ref,                    # (B_t, Cp, T_t)  bf16 NCT input slab (channel padded)
    w1_ref, s1_ref, u1_ref,   # conv1 weight (Cp,Cp) bf16; BN1 scale / folded shift (1,Cp) f32
    w2_ref, s2_ref, u2_ref,   # conv2 weight (Cp,Cp) bf16; BN2 scale / folded shift (1,Cp) f32
    alpha_ref,                # (2,) f32 in SMEM: PReLU1, PReLU2 alphas
    out_ref,                  # (B_t, C, T_t // 3) f32 NCT output slab (real channels only)
    y_scr,                    # VMEM scratch (B_t * T_t, Cp) f32
):
    f32 = jnp.float32
    b_t, cp, t_t = x_ref.shape
    c_out = out_ref.shape[1]
    t_out = t_t // 3
    rows = b_t * t_t
    n_pool = b_t * t_out

    a1 = alpha_ref[0]          # SMEM scalars, read once (hoisted broadcast)
    a2 = alpha_ref[1]

    # NCT -> channels-last rows in ONE fused relayout (bf16, packed vregs):
    # both 1x1 convs become a single lane-dense (rows, Cp) @ (Cp, Cp) matmul.
    xb = jnp.transpose(x_ref[...], (0, 2, 1)).reshape(rows, cp)          # bf16

    # conv1 -> BatchNorm1d (eval mode; conv bias folded into the shift) -> PReLU
    x2 = jnp.dot(xb, w1_ref[...], preferred_element_type=f32)
    x2 = x2 * s1_ref[...] + u1_ref[...]
    x2 = jnp.where(x2 >= 0, x2, a1 * x2)

    # conv2 -> BatchNorm1d (eval mode, folded)
    x2 = jnp.dot(x2.astype(w2_ref.dtype), w2_ref[...], preferred_element_type=f32)
    x2 = x2 * s2_ref[...] + u2_ref[...]

    # residual (bf16-rounded x, exact upcast) + PReLU (activ2)
    y = xb.astype(f32) + x2
    y = jnp.where(y >= 0, y, a2 * y)

    # MaxPool1d(kernel_size=3, stride=3) over time: pre-reduce with two
    # sublane-shifted maxima (VPU), one scratch store, one stride-3 sublane
    # read.  Rows near batch-element boundaries mix neighbours, but only row
    # indices that are multiples of 3 are read back and T_t % 3 == 0, so
    # pooling windows never cross a batch element.
    m = jnp.maximum(jnp.maximum(y[0:rows - 2, :], y[1:rows - 1, :]), y[2:rows, :])
    y_scr[0:rows - 2, :] = m
    pooled = y_scr[pl.ds(0, n_pool, stride=3), :]                        # (n_pool, Cp) f32
    # TODO(synk): audit the stride-3 sublane read in a bundle dump; if it lowers
    # to per-row loads, switch to pooled = y.reshape(n_pool, 3, cp).max(axis=1).

    # channels-last -> NCT output slab; drop the zero padded channels.
    outv = jnp.transpose(pooled.reshape(b_t, t_out, cp), (0, 2, 1))      # (B_t, Cp, T_out)
    out_ref[...] = outv[:, :c_out, :].astype(out_ref.dtype)


def resnet_block_forward(x_nct, params, *, b_tile=None, t_tile=None):
    """x_nct: (B, C, T) float32 in the PyTorch NCT convention.
    params: output of init_params(...) (eval-mode BatchNorm already folded).
    Returns (B, C, T // 3) float32 = eval-mode ResNetBlock.forward."""
    (w1, b1, s1, t1, a1, w2, b2, s2, t2, a2) = params
    B, C, T = x_nct.shape
    cp = ((C + 127) // 128) * 128            # lane-dense channel count

    # ---- fold & pad parameters (tiny, done once per call) -------------------
    def pad_w(w):                            # (C, C) -> (Cp, Cp), zero padded
        return jnp.zeros((cp, cp), w.dtype).at[:C, :C].set(w) if cp != C else w

    def pad_row(v):                          # (1, C) -> (1, Cp), zero padded
        return jnp.zeros((1, cp), v.dtype).at[:, :C].set(v) if cp != C else v

    u1 = b1 * s1 + t1                        # conv bias folded into BN shift
    u2 = b2 * s2 + t2
    alphas = jnp.stack([a1.reshape(()), a2.reshape(())]).astype(jnp.float32)  # (2,)
    kparams = (pad_w(w1), pad_row(s1), pad_row(u1),
               pad_w(w2), pad_row(s2), pad_row(u2))

    # bf16 input DMA + zero channel padding so every in-kernel lane is dense.
    # For production C % 128 == 0 the pad is a no-op; in the padded case the
    # bf16 cast keeps HBM read bytes <= the original f32 unpadded path.
    xb = x_nct.astype(jnp.bfloat16)
    if cp != C:
        xb = jnp.pad(xb, ((0, 0), (0, cp - C), (0, 0)))

    # ---- tiling --------------------------------------------------------------
    if b_tile is None:
        b_tile = B
    if t_tile is None:
        # Largest multiple of 384 dividing T whose per-step working set fits a
        # ~24 MiB budget (safe for v7x's 64 MiB VMEM); fall back to whole-T.
        budget = 24 << 20
        t_tile = 0
        cand = 384
        while cand <= T:
            if T % cand == 0 and 7 * b_tile * cand * cp * 4 <= budget:
                t_tile = cand
            cand += 384
        if t_tile == 0:
            t_tile = T
    assert B % b_tile == 0, "B must be divisible by b_tile"
    assert T % t_tile == 0 and t_tile % 3 == 0, \
        "time tile must divide T and be a multiple of 3"
    # Mosaic (8,128) lane rule on the NCT blocks' time dims: a partial time tile
    # must be a multiple of lcm(3, 128) = 384 so the stride-3 pool stays
    # tile-local and input/output lane dims stay dense.
    assert t_tile == T or t_tile % 384 == 0, \
        "partial time tiles must be multiples of 384"
    # TODO(synk): PyTorch MaxPool1d silently drops trailing frames when
    # T % 3 != 0; supporting ragged T would need a -inf-padded tail tile.

    t_out_tile = t_tile // 3
    T_out = T // 3
    grid = (B // b_tile, T // t_tile)        # keep total even & >=4 when targeting v7x

    vmem_spec = pl.BlockSpec(memory_space=pltpu.MemorySpace.VMEM)   # resident, un-pipelined
    smem_spec = pl.BlockSpec(memory_space=pltpu.MemorySpace.SMEM)   # scalar PReLU alphas
    in_specs = ([pl.BlockSpec((b_tile, cp, t_tile), lambda i, j: (i, 0, j))]
                + [vmem_spec] * len(kparams) + [smem_spec])
    out_specs = pl.BlockSpec((b_tile, C, t_out_tile), lambda i, j: (i, 0, j))
    out_shape = jax.ShapeDtypeStruct((B, C, T_out), jnp.float32)

    # ---- explicit VMEM budget (double-buffered blocks x2, scratch x1,
    #      resident params x1, live f32 temporaries, 2 MiB slack) -------------
    rows = b_tile * t_tile
    blk_in = b_tile * cp * t_tile * 2                     # bf16 input block
    blk_out = b_tile * C * t_out_tile * 4                 # f32 output block
    scr = rows * cp * 4                                   # f32 pool scratch
    live = 5 * rows * cp * 4                              # live f32 (rows, Cp) temporaries
    w_bytes = sum(int(p.size) * jnp.dtype(p.dtype).itemsize for p in kparams)
    est = 2 * blk_in + 2 * blk_out + scr + live + w_bytes + (2 << 20)
    assert est <= (100 << 20), f"tile too large: VMEM estimate {est >> 20} MiB"
    # NOTE: keep est <= ~48 MiB when targeting v7x (64 MiB physical VMEM / TC);
    # v5e / v6e (128 MiB) tolerate roughly 2x larger tiles.
    vmem_limit = max(est, 16 << 20)

    return pl.pallas_call(
        resnet_block_kernel,
        grid=grid,
        in_specs=in_specs,
        out_specs=out_specs,
        out_shape=out_shape,
        scratch_shapes=[pltpu.VMEM((rows, cp), jnp.float32)],
        compiler_params=pltpu.CompilerParams(
            dimension_semantics=("parallel", "parallel"),
            vmem_limit_bytes=vmem_limit),
    )(xb, *kparams, alphas)


def init_params(key, C):
    """Deterministic synthetic parameters.

    Mapping from PyTorch:
      w  = conv.weight[:, :, 0].T              (C_in, C_out), stored in bf16
      b  = conv.bias[None, :]                  (1, C)
      s  = bn.weight / sqrt(bn.running_var + eps)         (1, C)   [eval mode]
      t  = bn.bias - bn.running_mean * s                   (1, C)
      a  = PReLU weight (num_parameters=1, default 0.25)   (1, 1)
    """
    eps = 1e-5
    ks = jax.random.split(key, 8)

    def nrm(k, shape, scale):
        return (scale * jax.random.normal(k, shape)).astype(jnp.float32)

    def bn_fold(k):
        k1, k2, k3, k4 = jax.random.split(k, 4)
        gamma = jax.random.uniform(k1, (1, C), jnp.float32, 0.5, 1.5)
        beta = 0.1 * jax.random.normal(k2, (1, C))
        mean = 0.1 * jax.random.normal(k3, (1, C))
        var = jax.random.uniform(k4, (1, C), jnp.float32, 0.5, 1.5)
        scale = gamma * jax.lax.rsqrt(var + eps)
        shift = beta - mean * scale
        return scale.astype(jnp.float32), shift.astype(jnp.float32)

    w1 = nrm(ks[0], (C, C), 1.0 / float(C) ** 0.5).astype(jnp.bfloat16)
    b1 = nrm(ks[1], (1, C), 0.05)
    s1, t1 = bn_fold(ks[2])
    a1 = jnp.full((1, 1), 0.25, jnp.float32)            # PReLU default init

    w2 = nrm(ks[3], (C, C), 1.0 / float(C) ** 0.5).astype(jnp.bfloat16)
    b2 = nrm(ks[4], (1, C), 0.05)
    s2, t2 = bn_fold(ks[5])
    a2 = jnp.full((1, 1), 0.25, jnp.float32)

    return (w1, b1, s1, t1, a1, w2, b2, s2, t2, a2)


def reference_forward(x_nct, params):
    """Pure-JAX reference mirroring PyTorch ResNetBlock.forward in eval mode
    with the kernel's precision policy (bf16 input DMA, bf16 matmul operands,
    f32 accumulation and f32 elementwise math)."""
    (w1, b1, s1, t1, a1, w2, b2, s2, t2, a2) = params
    f32, bf16 = jnp.float32, jnp.bfloat16

    def mm(a, w):
        # bf16-rounded operands, f32 math (bf16 x bf16 products are exact in f32).
        return a.astype(bf16).astype(f32) @ w.astype(f32)

    # bf16-rounded input (matches the kernel's bf16 HBM->VMEM DMA)
    x = jnp.transpose(x_nct, (0, 2, 1)).astype(bf16).astype(f32)      # (B, T, C)
    x2 = mm(x, w1) + b1
    x2 = x2 * s1 + t1
    x2 = jnp.where(x2 >= 0, x2, a1 * x2)
    x2 = mm(x2, w2) + b2
    x2 = x2 * s2 + t2
    y = x + x2
    y = jnp.where(y >= 0, y, a2 * y)
    B, T, C = y.shape
    t_out = T // 3
    y = y[:, :t_out * 3, :].reshape(B, t_out, 3, C).max(axis=2)
    return jnp.transpose(y, (0, 2, 1))                                # (B, C, T//3)


if __name__ == "__main__":
    # ResNetBlock(C=64) demo, PyTorch NCT input (B, C, T).  T = 1536 with
    # b_tile = 2, t_tile = 768 gives a 2x2 grid (4 fully parallel steps, even
    # for v7x's two TensorCores) with 1536 rows x 128 dense lanes per step.
    B, C, T = 4, 64, 1536
    key = jax.random.PRNGKey(0)
    kx, kp = jax.random.split(key)
    x = jax.random.normal(kx, (B, C, T), jnp.float32)
    params = init_params(kp, C)

    out = resnet_block_forward(x, params, b_tile=2, t_tile=768)
    out = jax.block_until_ready(out)

    ref = reference_forward(x, params)
    assert out.shape == (B, C, T // 3), out.shape
    max_err = float(jnp.max(jnp.abs(out - ref)))
    assert max_err < 1e-2, f"max abs error {max_err}"
    print("KERNEL_OK")
</pallas_src>

<mosaic_0001>
module attributes {stable_mosaic.version = 11 : i64} {
  func.func @resnet_block_kernel(%arg0: i32, %arg1: i32, %arg2: memref<2x128x768xbf16, #tpu.memory_space<vmem>>, %arg3: memref<128x128xbf16, #tpu.memory_space<vmem>>, %arg4: memref<1x128xf32, #tpu.memory_space<vmem>>, %arg5: memref<1x128xf32, #tpu.memory_space<vmem>>, %arg6: memref<128x128xbf16, #tpu.memory_space<vmem>>, %arg7: memref<1x128xf32, #tpu.memory_space<vmem>>, %arg8: memref<1x128xf32, #tpu.memory_space<vmem>>, %arg9: memref<2xf32, #tpu.memory_space<smem>>, %arg10: memref<2x64x256xf32, #tpu.memory_space<vmem>>, %arg11: memref<1536x128xf32, #tpu.memory_space<vmem>>) attributes {dimension_semantics = [#tpu.dimension_semantics<parallel>, #tpu.dimension_semantics<parallel>], iteration_bounds = array<i64: 2, 2>, scalar_prefetch = 0 : i64, scratch_operands = 1 : i64, tpu.core_type = #tpu.core_type<tc>, window_params = [{transform_indices = @transform_0, window_bounds = array<i64: 2, 128, 768>}, {pipeline_mode = #tpu.pipeline_mode<synchronous>, transform_indices = @transform_1, window_bounds = array<i64: 128, 128>}, {pipeline_mode = #tpu.pipeline_mode<synchronous>, transform_indices = @transform_2, window_bounds = array<i64: 1, 128>}, {pipeline_mode = #tpu.pipeline_mode<synchronous>, transform_indices = @transform_3, window_bounds = array<i64: 1, 128>}, {pipeline_mode = #tpu.pipeline_mode<synchronous>, transform_indices = @transform_4, window_bounds = array<i64: 128, 128>}, {pipeline_mode = #tpu.pipeline_mode<synchronous>, transform_indices = @transform_5, window_bounds = array<i64: 1, 128>}, {pipeline_mode = #tpu.pipeline_mode<synchronous>, transform_indices = @transform_6, window_bounds = array<i64: 1, 128>}, {transform_indices = @transform_7, window_bounds = array<i64: 2>}, {transform_indices = @transform_8, window_bounds = array<i64: 2, 64, 256>}]} {
    %c0 = arith.constant 0 : index
    %0 = memref.load %arg9[%c0] : memref<2xf32, #tpu.memory_space<smem>>
    %c1 = arith.constant 1 : index
    %1 = memref.load %arg9[%c1] : memref<2xf32, #tpu.memory_space<smem>>
    %c0_0 = arith.constant 0 : index
    %c0_1 = arith.constant 0 : index
    %c0_2 = arith.constant 0 : index
    %2 = vector.load %arg2[%c0_0, %c0_1, %c0_2] : memref<2x128x768xbf16, #tpu.memory_space<vmem>>, vector<2x128x768xbf16>
    %3 = tpu.transpose %2, [0, 2, 1] : vector<2x128x768xbf16> -> vector<2x768x128xbf16>
    %4 = vector.shape_cast %3 : vector<2x768x128xbf16> to vector<1536x128xbf16>
    %c0_3 = arith.constant 0 : index
    %c0_4 = arith.constant 0 : index
    %5 = vector.load %arg3[%c0_3, %c0_4] : memref<128x128xbf16, #tpu.memory_space<vmem>>, vector<128x128xbf16>
    %cst = arith.constant dense<0.000000e+00> : vector<1536x128xf32>
    %6 = tpu.matmul %4, %5, %cst {dimension_numbers = #tpu.dot_dimension_numbers<[1], [0], [0], [1], [0, 0, 1, 1], [], []>} : vector<1536x128xbf16>, vector<128x128xbf16>, vector<1536x128xf32> -> vector<1536x128xf32>
    %c0_5 = arith.constant 0 : index
    %c0_6 = arith.constant 0 : index
    %7 = vector.load %arg4[%c0_5, %c0_6] : memref<1x128xf32, #tpu.memory_space<vmem>>, vector<1x128xf32>
    %8 = vector.broadcast %7 : vector<1x128xf32> to vector<1536x128xf32>
    %9 = arith.mulf %6, %8 : vector<1536x128xf32>
    %c0_7 = arith.constant 0 : index
    %c0_8 = arith.constant 0 : index
    %10 = vector.load %arg5[%c0_7, %c0_8] : memref<1x128xf32, #tpu.memory_space<vmem>>, vector<1x128xf32>
    %11 = vector.broadcast %10 : vector<1x128xf32> to vector<1536x128xf32>
    %12 = arith.addf %9, %11 : vector<1536x128xf32>
    %cst_9 = arith.constant 0.000000e+00 : f32
    %13 = vector.broadcast %cst_9 : f32 to vector<1536x128xf32>
    %14 = arith.cmpf oge, %12, %13 : vector<1536x128xf32>
    %15 = vector.broadcast %0 : f32 to vector<1536x128xf32>
    %16 = arith.mulf %15, %12 : vector<1536x128xf32>
    %17 = arith.select %14, %12, %16 : vector<1536x128xi1>, vector<1536x128xf32>
    %18 = arith.truncf %17 : vector<1536x128xf32> to vector<1536x128xbf16>
    %c0_10 = arith.constant 0 : index
    %c0_11 = arith.constant 0 : index
    %19 = vector.load %arg6[%c0_10, %c0_11] : memref<128x128xbf16, #tpu.memory_space<vmem>>, vector<128x128xbf16>
    %cst_12 = arith.constant dense<0.000000e+00> : vector<1536x128xf32>
    %20 = tpu.matmul %18, %19, %cst_12 {dimension_numbers = #tpu.dot_dimension_numbers<[1], [0], [0], [1], [0, 0, 1, 1], [], []>} : vector<1536x128xbf16>, vector<128x128xbf16>, vector<1536x128xf32> -> vector<1536x128xf32>
    %c0_13 = arith.constant 0 : index
    %c0_14 = arith.constant 0 : index
    %21 = vector.load %arg7[%c0_13, %c0_14] : memref<1x128xf32, #tpu.memory_space<vmem>>, vector<1x128xf32>
    %22 = vector.broadcast %21 : vector<1x128xf32> to vector<1536x128xf32>
    %23 = arith.mulf %20, %22 : vector<1536x128xf32>
    %c0_15 = arith.constant 0 : index
    %c0_16 = arith.constant 0 : index
    %24 = vector.load %arg8[%c0_15, %c0_16] : memref<1x128xf32, #tpu.memory_space<vmem>>, vector<1x128xf32>
    %25 = vector.broadcast %24 : vector<1x128xf32> to vector<1536x128xf32>
    %26 = arith.addf %23, %25 : vector<1536x128xf32>
    %27 = arith.extf %4 : vector<1536x128xbf16> to vector<1536x128xf32>
    %28 = arith.addf %27, %26 : vector<1536x128xf32>
    %cst_17 = arith.constant 0.000000e+00 : f32
    %29 = vector.broadcast %cst_17 : f32 to vector<1536x128xf32>
    %30 = arith.cmpf oge, %28, %29 : vector<1536x128xf32>
    %31 = vector.broadcast %1 : f32 to vector<1536x128xf32>
    %32 = arith.mulf %31, %28 : vector<1536x128xf32>
    %33 = arith.select %30, %28, %32 : vector<1536x128xi1>, vector<1536x128xf32>
    %34 = vector.extract_strided_slice %33 {offsets = [0, 0], sizes = [1534, 128], strides = [1, 1]} : vector<1536x128xf32> to vector<1534x128xf32>
    %35 = vector.extract_strided_slice %33 {offsets = [1, 0], sizes = [1534, 128], strides = [1, 1]} : vector<1536x128xf32> to vector<1534x128xf32>
    %36 = arith.maximumf %34, %35 : vector<1534x128xf32>
    %37 = vector.extract_strided_slice %33 {offsets = [2, 0], sizes = [1534, 128], strides = [1, 1]} : vector<1536x128xf32> to vector<1534x128xf32>
    %38 = arith.maximumf %36, %37 : vector<1534x128xf32>
    %c0_18 = arith.constant 0 : index
    %c0_19 = arith.constant 0 : index
    %39 = vector.load %arg11[%c0_18, %c0_19] : memref<1536x128xf32, #tpu.memory_space<vmem>>, vector<1534x128xf32>
    tpu.vector_store %arg11[%c0_18, %c0_19], %38 {strides = array<i32>} : memref<1536x128xf32, #tpu.memory_space<vmem>>, vector<1534x128xf32>,
    %c0_20 = arith.constant 0 : index
    %c0_21 = arith.constant 0 : index
    %40 = tpu.strided_load %arg11[%c0_20, %c0_21] {strides = array<i32: 3, 1>} : memref<1536x128xf32, #tpu.memory_space<vmem>>, vector<512x128xf32>
    %41 = vector.shape_cast %40 : vector<512x128xf32> to vector<2x256x128xf32>
    %42 = tpu.transpose %41, [0, 2, 1] : vector<2x256x128xf32> -> vector<2x128x256xf32>
    %43 = vector.extract_strided_slice %42 {offsets = [0, 0, 0], sizes = [2, 64, 256], strides = [1, 1, 1]} : vector<2x128x256xf32> to vector<2x64x256xf32>
    %c0_22 = arith.constant 0 : index
    %c0_23 = arith.constant 0 : index
    %c0_24 = arith.constant 0 : index
    %44 = vector.load %arg10[%c0_22, %c0_23, %c0_24] : memref<2x64x256xf32, #tpu.memory_space<vmem>>, vector<2x64x256xf32>
    tpu.vector_store %arg10[%c0_22, %c0_23, %c0_24], %43 {strides = array<i32>} : memref<2x64x256xf32, #tpu.memory_space<vmem>>, vector<2x64x256xf32>,
    return
  }
  func.func @transform_0(%arg0: i32, %arg1: i32) -> (i32, i32, i32) {
    %c0_i32 = arith.constant 0 : i32
    %c0_i32_0 = arith.constant 0 : i32
    return %arg0, %c0_i32, %arg1 : i32, i32, i32
  }
  func.func @transform_1(%arg0: i32, %arg1: i32) -> (i32, i32) {
    %c0_i32 = arith.constant 0 : i32
    %c0_i32_0 = arith.constant 0 : i32
    %c0_i32_1 = arith.constant 0 : i32
    return %c0_i32, %c0_i32_0 : i32, i32
  }
  func.func @transform_2(%arg0: i32, %arg1: i32) -> (i32, i32) {
    %c0_i32 = arith.constant 0 : i32
    %c0_i32_0 = arith.constant 0 : i32
    %c0_i32_1 = arith.constant 0 : i32
    return %c0_i32, %c0_i32_0 : i32, i32
  }
  func.func @transform_3(%arg0: i32, %arg1: i32) -> (i32, i32) {
    %c0_i32 = arith.constant 0 : i32
    %c0_i32_0 = arith.constant 0 : i32
    %c0_i32_1 = arith.constant 0 : i32
    return %c0_i32, %c0_i32_0 : i32, i32
  }
  func.func @transform_4(%arg0: i32, %arg1: i32) -> (i32, i32) {
    %c0_i32 = arith.constant 0 : i32
    %c0_i32_0 = arith.constant 0 : i32
    %c0_i32_1 = arith.constant 0 : i32
    return %c0_i32, %c0_i32_0 : i32, i32
  }
  func.func @transform_5(%arg0: i32, %arg1: i32) -> (i32, i32) {
    %c0_i32 = arith.constant 0 : i32
    %c0_i32_0 = arith.constant 0 : i32
    %c0_i32_1 = arith.constant 0 : i32
    return %c0_i32, %c0_i32_0 : i32, i32
  }
  func.func @transform_6(%arg0: i32, %arg1: i32) -> (i32, i32) {
    %c0_i32 = arith.constant 0 : i32
    %c0_i32_0 = arith.constant 0 : i32
    %c0_i32_1 = arith.constant 0 : i32
    return %c0_i32, %c0_i32_0 : i32, i32
  }
  func.func @transform_7(%arg0: i32, %arg1: i32) -> i32 {
    %c0_i32 = arith.constant 0 : i32
    %c0_i32_0 = arith.constant 0 : i32
    return %c0_i32 : i32
  }
  func.func @transform_8(%arg0: i32, %arg1: i32) -> (i32, i32, i32) {
    %c0_i32 = arith.constant 0 : i32
    %c0_i32_0 = arith.constant 0 : i32
    return %arg0, %c0_i32, %arg1 : i32, i32, i32
  }
}

</mosaic_0001>

<bundles_post_ra>
// kernel: tpu_custom_call.1
= control target key start
LH: loop header
LB: loop body
LE: loop exit
PB: predicated region body
PF: predicated region fallthrough
CT: control target
= control target key end

     0   :  { %s14172_s0 = inlined_call_operand.hbm [shape: bf16[4,128,1536], index: 0, kind: input, shape index: {}]   ;;  %s14173_s1 = inlined_call_operand.hbm [shape: bf16[128,128], index: 1, kind: input, shape index: {}]   ;;  %s14174_s2 = inlined_call_operand.hbm [shape: f32[1,128], index: 2, kind: input, shape index: {}]   ;;  %s14175_s3 = inlined_call_operand.hbm [shape: f32[1,128], index: 3, kind: input, shape index: {}]   ;;  %s14176_s4 = inlined_call_operand.hbm [shape: bf16[128,128], index: 4, kind: input, shape index: {}]   ;;  %s14177_s5 = inlined_call_operand.hbm [shape: f32[1,128], index: 5, kind: input, shape index: {}]   ;;  %s14178_s6 = inlined_call_operand.hbm [shape: f32[1,128], index: 6, kind: input, shape index: {}]   ;;  %s14179_s7 = inlined_call_operand.hbm [shape: f32[2], index: 7, kind: input, shape index: {}]   ;;  %s14180_s8 = inlined_call_operand.hbm [shape: f32[4,64,512], index: 8, kind: output, shape index: {}]  }
   0x1   :  { %14447 = sst [smem:[#allocation142_spill]] %s14173_s1 }
   0x2   :  { %14448 = sst [smem:[#allocation143_spill]] %s14174_s2 }
   0x3   :  { %14449 = sst [smem:[#allocation144_spill]] %s14175_s3 }
   0x4   :  { %14450 = sst [smem:[#allocation145_spill]] %s14180_s8 }
   0x5   :  { %13 = vsyncpa [#allocation4], 0 }
   0x6   :  { %15 = vsyncpa [#allocation4 + $0x1], 0 }
   0x7   :  { %16 = vsyncpa [#allocation8], 0 }
   0x8   :  { %17 = vsyncpa [#allocation11], 0 }
   0x9   :  { %18 = vsyncpa [#allocation14], 0 }
   0xa   :  { %19 = vsyncpa [#allocation6], 0 }
   0xb   :  { %20 = vsyncpa [#allocation5], 0 }
   0xc   :  { %22 = vsyncpa [#allocation5 + $0x1], 0  ;;  %s9255_s27 = smov 0   ;;  %s9257_s28 = smov 0  }
   0xd   :  { %s9259_s29 = smov 0   ;;  %s9261_s30 = smov 0  }
   0xe   :  { %s9263_s9 = smov 0   ;;  %s9265_s10 = smov 0  }
   0xf   :  { %s9267_s11 = smov 0   ;;  %s9269_s12 = smov 0  }
  0x10 LB: > { %14451 = sst [smem:[#allocation24_spill]] %s9175_s30  ;;  %s14181_s13 = sadd.s32 4294967295, %s9191_s12   ;;  %s9191_s12 = sphi %s9269_s12, %s28_s12   ;;  %s9187_s11 = sphi %s9267_s11, %s15116_s11   ;;  %s9183_s10 = sphi %s9265_s10, %s15115_s10   ;;  %s9179_s9 = sphi %s9263_s9, %s15114_s9   ;;  %s9175_s30 = sphi %s9261_s30, %s15113_s30   ;;  %s9171_s29 = sphi %s9259_s29, %s15112_s29   ;;  %s9167_s28 = sphi %s9257_s28, %s15111_s28   ;;  %s9163_s27 = sphi %s9255_s27, %s15110_s27  }
  0x11   : > { %14452 = sst [smem:[#allocation25_spill]] %s9179_s9  ;;  %p7754_p0 = scmp.ge.s32.totalorder %s9191_s12, 1 }
  0x12   : > { %p9299_p1 = scmp.eq.s32.totalorder %s14181_s13, 0  ;;  %p248_p2 = scmp.lt.s32.totalorder %s9191_s12, 5 }
  0x13   : > { %s9193_s16 = smov [#allocation7]   ;;  %s9194_s19 = smov [#allocation10]  }
  0x14   : > { %s14453_s14 = scalar_select %p9299_p1, 1, 0 }
  0x15   : > { %p9304_p3 = pnand %p7754_p0, %p248_p2  ;;  %s260_s17 = sshll.u32 %s9193_s16, 4  ;;  %s9308_s17 = int_to_ptr.vmem [resolvable:$true] %s260_s17 }
  0x16   : > { %s285_s20 = sshll.u32 %s9194_s19, 4  ;;  %s9195_s21 = smov [#allocation13]   ;;  %s9318_s20 = int_to_ptr.vmem [resolvable:$true] %s285_s20 }
  0x17   : > { %s14454_s15 = scalar_select %p9304_p3, 1, 0 }
  0x18   : > { %p8559_p4 = pneg %p9304_p3  ;;  %s9320_s22 = sshll.u32 %s9195_s21, 4  ;;  %s310_s22 = int_to_ptr.vmem [resolvable:$true] %s9320_s22 }
  0x19   : > { %14455 = sst [smem:[#allocation26_spill]] %s14454_s15  ;;  %s14457_s1 = sld [smem:[#allocation142_spill]] }
  0x1a   : > { %p9314_p5 = pnand %p8559_p4, %p9299_p1 }
  0x1c   : > { %p9330_p7 = pneg %p9314_p5 }
  0x1f   : > { %s8866_s25 = scalar_lea.hbm %s14457_s1, 1024 }
  0x20   : > { %p8867_p6 = scmp.ne.s32.totalorder %s14457_s1, %s8866_s25  ;;  %p8873_p10 = scmp.lt.u32.totalorder %s8866_s25, %s14457_s1 }
  0x22   : > { %p8869_p8 = pnand %p9330_p7, %p8867_p6 }
  0x24   : > { %p8870_p9 = pneg %p8869_p8 }
  0x26   : > { %p8875_p11 = pnand %p8873_p10, %p8870_p9 }
  0x28   : > { %8878 = shalt.err (!%p8875_p11)
}
  0x29   : > { %s8879_s23 = scalar_lea.vmem %s9308_s17, 1024  ;;  %p8887_p2 = scmp.lt.s32.totalorder %s9308_s17, %s9308_s17 }
  0x2a   : > { %p8880_p12 = scmp.ne.s32.totalorder %s9308_s17, %s8879_s23  ;;  %p8888_p4 = scmp.lt.s32.totalorder %s8879_s23, %s8879_s23 }
  0x2c   : > { %p8882_p13 = pnand %p8880_p12, %p9330_p7  ;;  %p8889_p6 = por %p8888_p4, %p8887_p2 }
  0x2e   : > { %p8883_p0 = pneg %p8882_p13 }
  0x30   : > { %p8890_p8 = pnand %p8889_p6, %p8883_p0 }
  0x32   : > { %8893 = shalt.err (!%p8890_p8)
}
  0x33   : > { %s14187_s24 = smov 64   ;;  %s9197_s25 = smov 4  }
  0x34   : > { %8562 = dma.hbm_to_vmem [thread:$0]  (!%p9314_p5), %s14457_s1, 1024, %s9308_s17, [#allocation8], %s14187_s24, %s14187_s24, %s9197_s25  }
  0x35   : > { %s14459_s3 = sld [smem:[#allocation144_spill]] }
  0x3b   : > { %s8894_s23 = scalar_lea.hbm %s14459_s3, 16 }
  0x3c   : > { %p8895_p9 = scmp.ne.s32.totalorder %s14459_s3, %s8894_s23  ;;  %p8901_p12 = scmp.lt.u32.totalorder %s8894_s23, %s14459_s3 }
  0x3e   : > { %p8897_p10 = pnand %p8895_p9, %p9330_p7 }
  0x40   : > { %p8898_p11 = pneg %p8897_p10 }
  0x42   : > { %p8903_p13 = pnand %p8901_p12, %p8898_p11 }
  0x44   : > { %8906 = shalt.err (!%p8903_p13)
}
  0x45   : > { %s8907_s17 = scalar_lea.vmem %s9318_s20, 16  ;;  %s8914_s8 = scalar_lea.vmem %s9318_s20, 32 }
  0x46   : > { %p8908_p0 = scmp.ne.s32.totalorder %s9318_s20, %s8907_s17  ;;  %p8915_p6 = scmp.lt.s32.totalorder %s9318_s20, %s9318_s20 }
  0x47   : > { %p8916_p8 = scmp.lt.s32.totalorder %s8914_s8, %s8907_s17 }
  0x48   : > { %p8910_p2 = pnand %p8908_p0, %p9330_p7 }
  0x49   : > { %p8917_p9 = por %p8916_p8, %p8915_p6 }
  0x4a   : > { %p8911_p4 = pneg %p8910_p2 }
  0x4c   : > { %p8918_p10 = pnand %p8917_p9, %p8911_p4 }
  0x4e   : > { %8921 = shalt.err (!%p8918_p10)
}
  0x4f   : > { %8568 = dma.hbm_to_vmem [thread:$0]  (!%p9314_p5), %s14459_s3, 16, %s9318_s20, [#allocation11]  }
  0x50   : > { %s8922_s16 = scalar_lea.hbm %s14177_s5, 16 }
  0x51   : > { %p8923_p11 = scmp.ne.s32.totalorder %s14177_s5, %s8922_s16  ;;  %p8929_p0 = scmp.lt.u32.totalorder %s8922_s16, %s14177_s5 }
  0x53   : > { %p8925_p12 = pnand %p8923_p11, %p9330_p7 }
  0x55   : > { %p8926_p13 = pneg %p8925_p12 }
  0x57   : > { %p8931_p2 = pnand %p8929_p0, %p8926_p13 }
  0x59   : > { %8934 = shalt.err (!%p8931_p2)
}
  0x5a   : > { %s8935_s8 = scalar_lea.vmem %s310_s22, 16  ;;  %s8942_s20 = scalar_lea.vmem %s310_s22, 32 }
  0x5b   : > { %p8936_p4 = scmp.ne.s32.totalorder %s310_s22, %s8935_s8  ;;  %p8943_p9 = scmp.lt.s32.totalorder %s310_s22, %s310_s22 }
  0x5c   : > { %p8944_p10 = scmp.lt.s32.totalorder %s8942_s20, %s8935_s8 }
  0x5d   : > { %p8938_p6 = pnand %p8936_p4, %p9330_p7 }
  0x5e   : > { %p8945_p3 = por %p8944_p10, %p8943_p9 }
  0x5f   : > { %p8939_p8 = pneg %p8938_p6 }
  0x61   : > { %p8946_p1 = pnand %p8945_p3, %p8939_p8 }
  0x63   : > { %8949 = shalt.err (!%p8946_p1)
}
  0x64   : > { %8574 = dma.hbm_to_vmem [thread:$0]  (!%p9314_p5), %s14177_s5, 16, %s310_s22, [#allocation14]  }
  0x65   : > { %s9198_s15 = smov [#allocation9]   ;;  %s9199_s16 = smov [#allocation12]  }
  0x66   : > { %s274_s26 = sshll.u32 %s9198_s15, 4  ;;  %s295_s19 = sshll.u32 %s9199_s16, 4  ;;  %s275_s26 = int_to_ptr.vmem [resolvable:$true] %s274_s26  ;;  %s296_s19 = int_to_ptr.vmem [resolvable:$true] %s295_s19 }
  0x67   : > { %s14460_s2 = sld [smem:[#allocation143_spill]] }
  0x6d   : > { %s8950_s17 = scalar_lea.hbm %s14460_s2, 16 }
  0x6e   : > { %p8951_p1 = scmp.ne.s32.totalorder %s14460_s2, %s8950_s17  ;;  %p8957_p12 = scmp.lt.u32.totalorder %s8950_s17, %s14460_s2 }
  0x70   : > { %p8953_p3 = pnand %p8951_p1, %p9330_p7 }
  0x72   : > { %p8954_p11 = pneg %p8953_p3 }
  0x74   : > { %p8959_p13 = pnand %p8957_p12, %p8954_p11 }
  0x76   : > { %8962 = shalt.err (!%p8959_p13)
}
  0x77   : > { %s8963_s22 = scalar_lea.vmem %s275_s26, 16  ;;  %s8970_s9 = scalar_lea.vmem %s275_s26, 32 }
  0x78   : > { %p8964_p0 = scmp.ne.s32.totalorder %s275_s26, %s8963_s22  ;;  %p8971_p6 = scmp.lt.s32.totalorder %s275_s26, %s275_s26 }
  0x79   : > { %p8972_p8 = scmp.lt.s32.totalorder %s8970_s9, %s8963_s22 }
  0x7a   : > { %p8966_p2 = pnand %p8964_p0, %p9330_p7 }
  0x7b   : > { %p8973_p9 = por %p8972_p8, %p8971_p6 }
  0x7c   : > { %p8967_p4 = pneg %p8966_p2 }
  0x7e   : > { %p8974_p10 = pnand %p8973_p9, %p8967_p4 }
  0x80   : > { %8977 = shalt.err (!%p8974_p10)
}
  0x81   : > { %8565 = dma.hbm_to_vmem [thread:$0]  (!%p9314_p5), %s14460_s2, 16, %s275_s26, [#allocation8]  }
  0x82   : > { %s8978_s23 = scalar_lea.hbm %s14176_s4, 1024 }
  0x83   : > { %p8979_p1 = scmp.ne.s32.totalorder %s14176_s4, %s8978_s23  ;;  %p8985_p12 = scmp.lt.u32.totalorder %s8978_s23, %s14176_s4 }
  0x85   : > { %p8981_p3 = pnand %p8979_p1, %p9330_p7 }
  0x87   : > { %p8982_p11 = pneg %p8981_p3 }
  0x89   : > { %p8987_p13 = pnand %p8985_p12, %p8982_p11 }
  0x8b   : > { %8990 = shalt.err (!%p8987_p13)
}
  0x8c   : > { %s8991_s22 = scalar_lea.vmem %s296_s19, 1024  ;;  %p8999_p6 = scmp.lt.s32.totalorder %s296_s19, %s296_s19 }
  0x8d   : > { %p8992_p0 = scmp.ne.s32.totalorder %s296_s19, %s8991_s22  ;;  %p9000_p8 = scmp.lt.s32.totalorder %s8991_s22, %s8991_s22 }
  0x8f   : > { %p8994_p2 = pnand %p8992_p0, %p9330_p7  ;;  %p9001_p9 = por %p9000_p8, %p8999_p6 }
  0x91   : > { %p8995_p4 = pneg %p8994_p2 }
  0x93   : > { %p9002_p10 = pnand %p9001_p9, %p8995_p4 }
  0x95   : > { %9005 = shalt.err (!%p9002_p10)
}
  0x96   : > { %s14461_s26 = smov 64   ;;  %s9200_s16 = smov [#allocation15]  }
  0x97   : > { %8571 = dma.hbm_to_vmem [thread:$0]  (!%p9314_p5), %s14176_s4, 1024, %s296_s19, [#allocation11], %s14461_s26, %s14461_s26, %s9197_s25  }
  0x98   : > { %s320_s24 = sshll.u32 %s9200_s16, 4  ;;  %s9006_s17 = scalar_lea.hbm %s14178_s6, 16  ;;  %s321_s24 = int_to_ptr.vmem [resolvable:$true] %s320_s24 }
  0x99   : > { %p9007_p1 = scmp.ne.s32.totalorder %s14178_s6, %s9006_s17  ;;  %p9013_p12 = scmp.lt.u32.totalorder %s9006_s17, %s14178_s6 }
  0x9b   : > { %p9009_p3 = pnand %p9007_p1, %p9330_p7 }
  0x9d   : > { %p9010_p11 = pneg %p9009_p3 }
  0x9f   : > { %p9015_p13 = pnand %p9013_p12, %p9010_p11 }
  0xa1   : > { %9018 = shalt.err (!%p9015_p13)
}
  0xa2   : > { %s9019_s25 = scalar_lea.vmem %s321_s24, 16  ;;  %s9026_s19 = scalar_lea.vmem %s321_s24, 32 }
  0xa3   : > { %p9020_p0 = scmp.ne.s32.totalorder %s321_s24, %s9019_s25  ;;  %p9027_p6 = scmp.lt.s32.totalorder %s321_s24, %s321_s24 }
  0xa4   : > { %p9028_p8 = scmp.lt.s32.totalorder %s9026_s19, %s9019_s25 }
  0xa5   : > { %p9022_p2 = pnand %p9020_p0, %p9330_p7 }
  0xa6   : > { %p9029_p9 = por %p9028_p8, %p9027_p6 }
  0xa7   : > { %p9023_p4 = pneg %p9022_p2 }
  0xa9   : > { %p9030_p10 = pnand %p9029_p9, %p9023_p4 }
  0xab   : > { %9033 = shalt.err (!%p9030_p10)
}
  0xac   : > { %8577 = dma.hbm_to_vmem [thread:$0]  (!%p9314_p5), %s14178_s6, 16, %s321_s24, [#allocation14]  }
  0xad   : > { %s9034_s21 = scalar_lea.hbm %s14179_s7, 16 }
  0xae   : > { %p9035_p1 = scmp.ne.s32.totalorder %s14179_s7, %s9034_s21  ;;  %p9041_p12 = scmp.lt.u32.totalorder %s9034_s21, %s14179_s7 }
  0xb0   : > { %p9037_p3 = pnand %p9035_p1, %p9330_p7 }
  0xb2   : > { %p9038_p11 = pneg %p9037_p3 }
  0xb4   : > { %p9043_p13 = pnand %p9041_p12, %p9038_p11 }
  0xb6   : > { %9046 = shalt.err (!%p9043_p13)
}
  0xb7   : > { %s9201_s30 = smov [#allocation16]   ;;  %s7753_s13 = sadd.s32 4294967294, %s9191_s12  }
  0xb8   : > { %8580 = dma.hbm_to_smem (!%p9314_p5), %s14179_s7, 16, %s9201_s30, [#allocation6]  }
  0xb9   : > { %s37_s25 = sadd.s32 1, %s9183_s10  ;;  %s40_s18 = sadd.s32 1, %s9187_s11 }
  0xba   : > { %p38_p7 = scmp.ge.s32.totalorder %s37_s25, 2  ;;  %s49_s19 = sadd.s32 1, %s9171_s29 }
  0xbb   : > { %p56_p0 = scmp.ne.s32.totalorder %s9171_s29, %s9167_s28  ;;  %p57_p2 = scmp.eq.s32.totalorder %s9191_s12, 0 }
  0xbc   : > { %s15118_s25 = smov (%p38_p7, %s37_s25), 0  ;;  %s15120_s18 = smov (!%p38_p7, %s40_s18), %s9187_s11 }
  0xbd   : > { %s45_s26 = ssub.s32 %s9183_s10, %s15118_s25  ;;  %p9482_p4 = por %p57_p2, %p56_p0 }
  0xbe   : > { %p42_p5 = scmp.ge.s32.totalorder %s15120_s18, 2  ;;  %p62_p6 = scmp.ne.s32.totalorder %s9167_s28, %s9163_s27 }
  0xbf   : > { %s14463_s15 = sadd.s32 4294967295, %s9191_s12   ;;  %p241_p9 = scmp.eq.s32.totalorder %s7753_s13, 3 }
  0xc0   : > { %p235_p8 = scmp.eq.s32.totalorder %s14463_s15, 3  ;;  %s15122_s18 = smov (%p42_p5, %s15120_s18), 0 }
  0xc1   : > { %p14464_p10 = scmp.ne.s32.totalorder %s14453_s14, 0  ;;  %s44_s23 = ssub.s32 %s9187_s11, %s15122_s18 }
  0xc2   : > { %p9498_p3 = por %p235_p8, %p56_p0  ;;  %p9504_p11 = por %p241_p9, %p62_p6 }
  0xc3   : > { %p9494_p1 = por %p14464_p10, %p62_p6  ;;  %s46_s8 = sor.u32 %s45_s26, %s44_s23 }
  0xc4   : > { %s14466_s21 = scalar_select %p9498_p3, 1, 0 }
  0xc5   : > { %s14467_s17 = scalar_select %p9504_p11, 1, 0 }
  0xc6   : > { %p8596_p12 = scmp.lt.s32.totalorder %s9191_s12, 4  ;;  %p47_p13 = scmp.eq.s32.totalorder %s46_s8, 0 }
  0xc7   : > { %s340_s20 = sand.u32 1, %s9171_s29   ;;  %s346_s22 = smul.u32 6, %s9183_s10 }
  0xc8   : > { %s8524_s30 = smul.u32 768, %s340_s20  ;;  %p9519_p7 = pnand %p8596_p12, %p9482_p4 }
  0xc9   : > { %s9511_s24 = scalar_select %p47_p13, %s9171_s29, %s49_s19  }
  0xca   : > { %s8525_s13 = smul.u32 384, %s9187_s11  ;;  %s344_s15 = scalar_lea.vmem [#allocation3], %s8524_s30 }
  0xcb   : > { %s354_s1 = sshll.u32 %s344_s15, 4  ;;  %s9528_s30 = scalar_lea.sflag [#allocation4], %s340_s20  ;;  %s9515_s1 = int_to_ptr.vmem [resolvable:$true] %s354_s1 }
  0xcc   : > { %s351_s26 = sadd.s32 %s8525_s13, %s346_s22  ;;  %p9049_p2 = pneg %p9519_p7 }
  0xcd   : > { %s7765_s23 = sshll.u32 %s351_s26, 6  ;;  %s9052_s3 = scalar_lea.hbm %s14172_s0, 49152 }
  0xce   : > { %s9526_s19 = scalar_lea.hbm %s14172_s0, %s7765_s23 }
  0xcf   : > { %s9047_s9 = scalar_lea.hbm %s9526_s19, 12288  ;;  %p9053_p6 = scmp.lt.u32.totalorder %s9526_s19, %s14172_s0 }
  0xd0   : > { %p9048_p0 = scmp.ne.s32.totalorder %s9526_s19, %s9047_s9  ;;  %p9054_p8 = scmp.lt.u32.totalorder %s9052_s3, %s9047_s9 }
  0xd1   : > { %p9056_p10 = scmp.lt.u32.totalorder %s9047_s9, %s9526_s19 }
  0xd2   : > { %p9050_p4 = pnand %p9049_p2, %p9048_p0  ;;  %p9055_p9 = por %p9054_p8, %p9053_p6 }
  0xd4   : > { %p9051_p5 = pneg %p9050_p4  ;;  %p9057_p12 = por %p9056_p10, %p9055_p9 }
  0xd6   : > { %p9058_p13 = pnand %p9057_p12, %p9051_p5 }
  0xd8   : > { %9061 = shalt.err (!%p9058_p13)
}
  0xd9   : > { %s9062_s20 = scalar_lea.vmem %s9515_s1, 12288  ;;  %s9202_s23 = smov [#allocation3]  }
  0xda   : > { %p9063_p0 = scmp.ne.s32.totalorder %s9515_s1, %s9062_s20  ;;  %s9067_s8 = sshll.u32 %s9202_s23, 4  ;;  %s9068_s8 = int_to_ptr.vmem [resolvable:$false] %s9067_s8 }
  0xdb   : > { %s9069_s22 = scalar_lea.vmem %s9068_s8, 24576  ;;  %p9070_p3 = scmp.lt.s32.totalorder %s9515_s1, %s9068_s8 }
  0xdc   : > { %p9065_p4 = pnand %p9063_p0, %p9049_p2  ;;  %p9071_p6 = scmp.lt.s32.totalorder %s9069_s22, %s9062_s20 }
  0xde   : > { %p9066_p11 = pneg %p9065_p4  ;;  %p9072_p8 = por %p9071_p6, %p9070_p3 }
  0xe0   : > { %p9073_p9 = pnand %p9072_p8, %p9066_p11 }
  0xe2   : > { %9076 = shalt.err (!%p9073_p9)
}
  0xe3   : > { %s9203_s9 = smov 768   ;;  %s9204_s13 = smov 384  }
  0xe4   : > { %s9205_s3 = smov 24   ;;  %s14469_s15 = sld [smem:[#allocation26_spill]] }
  0xe5   : > { %8584 = dma.hbm_to_vmem [thread:$0]  (!%p9519_p7), %s9526_s19, 12288, %s9515_s1, %s9528_s30, %s9203_s9, %s9204_s13, %s9205_s3  }
  0xea   : > { %p14470_p2 = scmp.ne.s32.totalorder %s14469_s15, 0 }
  0xec   : > { %366 = sbr.rel (%p14470_p2) target bundleno = 1687 (0x697), region = 52 }
  0xf3   : > { %s9559_s26 = sand.u32 1, %s9167_s28  }
  0xf4   : > { %s8526_s20 = smul.u32 768, %s9559_s26  ;;  %s369_s23 = scalar_lea.sflag [#allocation4], %s9559_s26 }
  0xf6   : > { %s9563_s8 = scalar_lea.vmem [#allocation3], %s8526_s20 }
  0xf7   : > { %9138 = dma.done.wait (%p9494_p1), %s369_s23, 12288  }
  0xf8   : > { %9140 = vsyncadd (%p9494_p1), %s369_s23, 4294955008  ;;  %p14471_p3 = scmp.ne.s32.totalorder %s14453_s14, 0 }
  0xfa   : > { %9142 = dma.done.wait (%p14471_p3), [#allocation8], 1040  }
  0xfb   : > { %9144 = vsyncadd (%p14471_p3), [#allocation8], 4294966256 }
  0xfc   : > { %9146 = dma.done.wait (%p14471_p3), [#allocation11], 1040  }
  0xfd   : > { %9148 = vsyncadd (%p14471_p3), [#allocation11], 4294966256 }
  0xfe   : > { %9150 = dma.done.wait (%p14471_p3), [#allocation14], 32  }
  0xff   : > { %9152 = vsyncadd (%p14471_p3), [#allocation14], 4294967264 }
 0x100   : > { %9154 = dma.done.wait (%p14471_p3), [#allocation6], 16  }
 0x101   : > { %9156 = vsyncadd (%p14471_p3), [#allocation6], 4294967280 }
 0x102   : > { %405 = sfence }
 0x103   : > { %v8684_v0 = vld [vmem:[%s9563_s8] ss:$24 sps:$4 sm:$0xff]   ;;  %v8686_v1 = vld [vmem:[%s9563_s8 + $0x30] ss:$24 sps:$4 sm:$0xff]   ;;  %v8700_v3 = vld [vmem:[%s9563_s8 + $0x4] ss:$24 sps:$4 sm:$0xff]  }
 0x104   : > { %1017 = vxpose.xlu0.c.b16.start [1/8] %v8684_v0, 128  ;;  %v8688_v2 = vld [vmem:[%s9563_s8 + $0x60] ss:$24 sps:$4 sm:$0xff]   ;;  %v8690_v4 = vld [vmem:[%s9563_s8 + $0x90] ss:$24 sps:$4 sm:$0xff]   ;;  %1033 = vxpose.xlu1.c.b16.start [1/8] %v8700_v3, 128  ;;  %v8701_v5 = vld [vmem:[%s9563_s8 + $0x34] ss:$24 sps:$4 sm:$0xff]  }
 0x105   : > { %v8692_v6 = vld [vmem:[%s9563_s8 + $0xc0] ss:$24 sps:$4 sm:$0xff]   ;;  %v8702_v7 = vld [vmem:[%s9563_s8 + $0x64] ss:$24 sps:$4 sm:$0xff]   ;;  %v8717_v9 = vld [vmem:[#allocation7 + $0x8] sm:$0xff]   ;;  %s439_s1 = sld [smem:[#allocation16]] }
 0x106   : > { %v8714_v8 = vld [vmem:[#allocation7] sm:$0xff]   ;;  %v8694_v10 = vld [vmem:[%s9563_s8 + $0xf0] ss:$24 sps:$4 sm:$0xff]   ;;  %v8703_v11 = vld [vmem:[%s9563_s8 + $0x94] ss:$24 sps:$4 sm:$0xff]   ;;  %s10510_s2 = sld [smem:[#allocation16 + $0x1]] }
 0x107   : > { %8108 = vmatprep.subr.bf16.mxu0 %v8714_v8  ;;  %v8720_v12 = vld [vmem:[#allocation7 + $0x10] sm:$0xff]   ;;  %v8696_v13 = vld [vmem:[%s9563_s8 + $0x120] ss:$24 sps:$4 sm:$0xff]   ;;  %v8704_v14 = vld [vmem:[%s9563_s8 + $0xc4] ss:$24 sps:$4 sm:$0xff]   ;;  %s7774_s14 = sshll.u32 %s9559_s26, 8 }
 0x108   : > { %1018 = vxpose.xlu0.c.b16.cont [2/8] %v8686_v1, 128  ;;  %1034 = vxpose.xlu1.c.b16.cont [2/8] %v8701_v5, 128  ;;  %v8723_v15 = vld [vmem:[#allocation7 + $0x18] sm:$0xff]   ;;  %v8698_v16 = vld [vmem:[%s9563_s8 + $0x150] ss:$24 sps:$4 sm:$0xff]   ;;  %v8705_v17 = vld [vmem:[%s9563_s8 + $0xf4] ss:$24 sps:$4 sm:$0xff]   ;;  %s13660_s16 = scalar_lea.vmem [#allocation17], %s7774_s14 }
 0x109   : > { %8109 = vmatpush3.bf16.msra.mxu0 %v8714_v8  ;;  %v8726_v18 = vld [vmem:[#allocation7 + $0x20] sm:$0xff]   ;;  %v8729_v21 = vld [vmem:[#allocation7 + $0x28] sm:$0xff]   ;;  %v8710_v23 = vld [vmem:[%s9563_s8 + $0x38] ss:$24 sps:$4 sm:$0xff]   ;;  %s15105_s19 = sld [smem:[#allocation24_spill]]  ;;  %s15106_s30 = sld [smem:[#allocation25_spill]] }
 0x10a   : > { %8110 = vmatprep.subr.bf16.mxu0 %v8717_v9  ;;  %v8706_v19 = vld [vmem:[%s9563_s8 + $0x124] ss:$24 sps:$4 sm:$0xff]   ;;  %v8708_v20 = vld [vmem:[%s9563_s8 + $0x8] ss:$24 sps:$4 sm:$0xff]   ;;  %v8707_v22 = vld [vmem:[%s9563_s8 + $0x154] ss:$24 sps:$4 sm:$0xff]  }
 0x10b   : > { %v8731_v24 = vld [vmem:[#allocation7 + $0x30] sm:$0xff]   ;;  %v8712_v25 = vld [vmem:[%s9563_s8 + $0x68] ss:$24 sps:$4 sm:$0xff]   ;;  %v8730_v26 = vld [vmem:[%s9563_s8 + $0xc] ss:$24 sps:$4 sm:$0xff]   ;;  %s7593_s15 = sshll.u32 %s13660_s16, 4  ;;  %s14117_s15 = int_to_ptr.vmem [resolvable:$true] %s7593_s15 }
 0x10c   : > { %1019 = vxpose.xlu0.c.b16.cont [3/8] %v8688_v2, 128  ;;  %1035 = vxpose.xlu1.c.b16.cont [3/8] %v8702_v7, 128  ;;  %v8733_v27 = vld [vmem:[#allocation7 + $0x38] sm:$0xff]   ;;  %v8718_v30 = vld [vmem:[%s9563_s8 + $0xc8] ss:$24 sps:$4 sm:$0xff]   ;;  %v8734_v31 = vld [vmem:[%s9563_s8 + $0x6c] ss:$24 sps:$4 sm:$0xff]   ;;  %s9077_s14 = scalar_lea.vmem %s14117_s15, 4096 }
 0x10d   : > { %8111 = vmatpush3.bf16.msra.mxu0 %v8717_v9  ;;  %v8715_v28 = vld [vmem:[%s9563_s8 + $0x98] ss:$24 sps:$4 sm:$0xff]   ;;  %v8732_v29 = vld [vmem:[%s9563_s8 + $0x3c] ss:$24 sps:$4 sm:$0xff]   ;;  %v8724_v34 = vld [vmem:[%s9563_s8 + $0x128] ss:$24 sps:$4 sm:$0xff]   ;;  %p9078_p1 = scmp.ne.s32.totalorder %s14117_s15, %s9077_s14 }
 0x10e   : > { %8112 = vmatprep.subr.bf16.mxu0 %v8720_v12  ;;  %v8721_v32 = vld [vmem:[%s9563_s8 + $0xf8] ss:$24 sps:$4 sm:$0xff]   ;;  %v8735_v33 = vld [vmem:[%s9563_s8 + $0x9c] ss:$24 sps:$4 sm:$0xff]   ;;  %v8736_v35 = vld [vmem:[%s9563_s8 + $0xcc] ss:$24 sps:$4 sm:$0xff]  }
 0x10f   : > { %v8727_v36 = vld [vmem:[%s9563_s8 + $0x158] ss:$24 sps:$4 sm:$0xff]   ;;  %v8737_v37 = vld [vmem:[%s9563_s8 + $0xfc] ss:$24 sps:$4 sm:$0xff]   ;;  %v8738_v38 = vld [vmem:[%s9563_s8 + $0x12c] ss:$24 sps:$4 sm:$0xff]  }
 0x110   : > { %1020 = vxpose.xlu0.c.b16.cont [4/8] %v8690_v4, 128  ;;  %1036 = vxpose.xlu1.c.b16.cont [4/8] %v8703_v11, 128  ;;  %v8740_v39 = vld [vmem:[%s9563_s8 + $0x10] ss:$24 sps:$4 sm:$0xff]   ;;  %v8739_v40 = vld [vmem:[%s9563_s8 + $0x15c] ss:$24 sps:$4 sm:$0xff]   ;;  %v8742_v41 = vld [vmem:[%s9563_s8 + $0x40] ss:$24 sps:$4 sm:$0xff]  }
 0x111   : > { %8113 = vmatpush3.bf16.msra.mxu0 %v8720_v12  ;;  %v8744_v42 = vld [vmem:[%s9563_s8 + $0x70] ss:$24 sps:$4 sm:$0xff]   ;;  %v8756_v43 = vld [vmem:[%s9563_s8 + $0x14] ss:$24 sps:$4 sm:$0xff]   ;;  %v8746_v44 = vld [vmem:[%s9563_s8 + $0xa0] ss:$24 sps:$4 sm:$0xff]  }
 0x112   : > { %8114 = vmatprep.subr.bf16.mxu0 %v8723_v15  ;;  %v8757_v45 = vld [vmem:[%s9563_s8 + $0x44] ss:$24 sps:$4 sm:$0xff]   ;;  %v8748_v46 = vld [vmem:[%s9563_s8 + $0xd0] ss:$24 sps:$4 sm:$0xff]   ;;  %v8758_v47 = vld [vmem:[%s9563_s8 + $0x74] ss:$24 sps:$4 sm:$0xff]  }
 0x113   : > { %v8750_v48 = vld [vmem:[%s9563_s8 + $0x100] ss:$24 sps:$4 sm:$0xff]   ;;  %v8759_v49 = vld [vmem:[%s9563_s8 + $0xa4] ss:$24 sps:$4 sm:$0xff]   ;;  %v8752_v50 = vld [vmem:[%s9563_s8 + $0x130] ss:$24 sps:$4 sm:$0xff]  }
 0x114   : > { %1021 = vxpose.xlu0.c.b16.cont [5/8] %v8692_v6, 128  ;;  %1037 = vxpose.xlu1.c.b16.cont [5/8] %v8704_v14, 128  ;;  %v8760_v51 = vld [vmem:[%s9563_s8 + $0xd4] ss:$24 sps:$4 sm:$0xff]   ;;  %v8754_v52 = vld [vmem:[%s9563_s8 + $0x160] ss:$24 sps:$4 sm:$0xff]   ;;  %v8761_v53 = vld [vmem:[%s9563_s8 + $0x104] ss:$24 sps:$4 sm:$0xff]  }
 0x115   : > { %8115 = vmatpush3.bf16.msra.mxu0 %v8723_v15  ;;  %v8762_v54 = vld [vmem:[%s9563_s8 + $0x134] ss:$24 sps:$4 sm:$0xff]   ;;  %v8764_v55 = vld [vmem:[%s9563_s8 + $0x180] ss:$24 sps:$4 sm:$0xff]   ;;  %v8763_v56 = vld [vmem:[%s9563_s8 + $0x164] ss:$24 sps:$4 sm:$0xff]  }
 0x116   : > { %8116 = vmatprep.subr.bf16.mxu0 %v8726_v18  ;;  %v8766_v57 = vld [vmem:[%s9563_s8 + $0x1b0] ss:$24 sps:$4 sm:$0xff]   ;;  %v8768_v58 = vld [vmem:[%s9563_s8 + $0x1e0] ss:$24 sps:$4 sm:$0xff]   ;;  %v8780_v59 = vld [vmem:[%s9563_s8 + $0x184] ss:$24 sps:$4 sm:$0xff]  }
 0x117   : > { %v8770_v61 = vld [vmem:[%s9563_s8 + $0x210] ss:$24 sps:$4 sm:$0xff]   ;;  %v8781_v62 = vld [vmem:[%s9563_s8 + $0x1b4] ss:$24 sps:$4 sm:$0xff]   ;;  %v8772_v0 = vld [vmem:[%s9563_s8 + $0x240] ss:$24 sps:$4 sm:$0xff]  }
 0x118   : > { %1022 = vxpose.xlu0.c.b16.cont [6/8] %v8694_v10, 128  ;;  %1038 = vxpose.xlu1.c.b16.cont [6/8] %v8705_v17, 128  ;;  %v8782_v1 = vld [vmem:[%s9563_s8 + $0x1e4] ss:$24 sps:$4 sm:$0xff]   ;;  %v8774_v3 = vld [vmem:[%s9563_s8 + $0x270] ss:$24 sps:$4 sm:$0xff]   ;;  %v8783_v4 = vld [vmem:[%s9563_s8 + $0x214] ss:$24 sps:$4 sm:$0xff]  }
 0x119   : > { %8117 = vmatpush3.bf16.msra.mxu0 %v8726_v18  ;;  %v8776_v6 = vld [vmem:[%s9563_s8 + $0x2a0] ss:$24 sps:$4 sm:$0xff]   ;;  %v8784_v7 = vld [vmem:[%s9563_s8 + $0x244] ss:$24 sps:$4 sm:$0xff]   ;;  %v8778_v10 = vld [vmem:[%s9563_s8 + $0x2d0] ss:$24 sps:$4 sm:$0xff]  }
 0x11a   : > { %8118 = vmatprep.subr.bf16.mxu0 %v8729_v21  ;;  %v8785_v11 = vld [vmem:[%s9563_s8 + $0x274] ss:$24 sps:$4 sm:$0xff]   ;;  %v8786_v14 = vld [vmem:[%s9563_s8 + $0x2a4] ss:$24 sps:$4 sm:$0xff]   ;;  %v8788_v15 = vld [vmem:[%s9563_s8 + $0x188] ss:$24 sps:$4 sm:$0xff]  }
 0x11b   : > { %v8787_v17 = vld [vmem:[%s9563_s8 + $0x2d4] ss:$24 sps:$4 sm:$0xff]   ;;  %s7894_s22 = sshll.u32 %s15105_s19, 1  ;;  %s7899_s9 = sshll.u32 %s15106_s30, 6 }
 0x11c   : > { %1023 = vxpose.xlu0.c.b16.cont [7/8] %v8696_v13, 128  ;;  %1039 = vxpose.xlu1.c.b16.cont [7/8] %v8706_v19, 128  ;;  %s7590_s13 = sadd.s32 %s7899_s9, %s7894_s22  ;;  %p15108_p11 = scmp.ne.s32.totalorder %s14466_s21, 0 }
 0x11d   : > { %8119 = vmatpush3.bf16.msra.mxu0 %v8729_v21  ;;  %v8792_v21 = vld [vmem:[%s9563_s8 + $0x1e8] ss:$24 sps:$4 sm:$0xff]   ;;  %s7896_s3 = sshll.u32 %s7590_s13, 7  ;;  %s9206_s19 = smov [#allocation17]  }
 0x11e   : > { %8120 = vmatprep.subr.bf16.mxu0 %v8731_v24  ;;  %p9079_p7 = pnand %p9078_p1, %p15108_p11  ;;  %s9081_s30 = sshll.u32 %s9206_s19, 4  ;;  %s9082_s30 = int_to_ptr.vmem [resolvable:$false] %s9081_s30 }
 0x11f   : > { %s9083_s22 = scalar_lea.vmem %s9082_s30, 8192  ;;  %p9084_p10 = scmp.lt.s32.totalorder %s14117_s15, %s9082_s30 }
 0x120   : > { %1024 = vxpose.xlu0.c.b16.end [8/8] %v8698_v16, 128  ;;  %1040 = vxpose.xlu1.c.b16.end [8/8] %v8707_v22, 128  ;;  %p9080_p5 = pneg %p9079_p7  ;;  %p9085_p12 = scmp.lt.s32.totalorder %s9083_s22, %s9077_s14 }
 0x121   : > { %8121 = vmatpush3.bf16.msra.mxu0 %v8731_v24 }
 0x122   : > { %8122 = vmatprep.subr.bf16.mxu0 %v8733_v27  ;;  %p9086_p13 = por %p9085_p12, %p9084_p10 }
 0x124   : > { %1049 = vxpose.xlu0.c.b16.start [1/8] %v8708_v20, 128  ;;  %1065 = vxpose.xlu1.c.b16.start [1/8] %v8730_v26, 128  ;;  %v8790_v20 = vld [vmem:[%s9563_s8 + $0x1b8] ss:$24 sps:$4 sm:$0xff]   ;;  %p9087_p0 = pnand %p9086_p13, %p9080_p5 }
 0x125   : > { %8123 = vmatpush3.bf16.msra.mxu0 %v8733_v27  ;;  %v8798_v26 = vld [vmem:[%s9563_s8 + $0x278] ss:$24 sps:$4 sm:$0xff]  }
 0x128   : > { %1050 = vxpose.xlu0.c.b16.cont [2/8] %v8710_v23, 128  ;;  %1066 = vxpose.xlu1.c.b16.cont [2/8] %v8732_v29, 128  ;;  %v8794_v23 = vld [vmem:[%s9563_s8 + $0x218] ss:$24 sps:$4 sm:$0xff]   ;;  %v8800_v29 = vld [vmem:[%s9563_s8 + $0x2a8] ss:$24 sps:$4 sm:$0xff]  }
 0x12c   : > { %1051 = vxpose.xlu0.c.b16.cont [3/8] %v8712_v25, 128  ;;  %1067 = vxpose.xlu1.c.b16.cont [3/8] %v8734_v31, 128  ;;  %v8796_v25 = vld [vmem:[%s9563_s8 + $0x248] ss:$24 sps:$4 sm:$0xff]   ;;  %v8802_v31 = vld [vmem:[%s9563_s8 + $0x2d8] ss:$24 sps:$4 sm:$0xff]  }
 0x130   : > { %1052 = vxpose.xlu0.c.b16.cont [4/8] %v8715_v28, 128  ;;  %1068 = vxpose.xlu1.c.b16.cont [4/8] %v8735_v33, 128  ;;  %v8804_v33 = vld [vmem:[%s9563_s8 + $0x18c] ss:$24 sps:$4 sm:$0xff]  }
 0x134   : > { %1053 = vxpose.xlu0.c.b16.cont [5/8] %v8718_v30, 128  ;;  %1069 = vxpose.xlu1.c.b16.cont [5/8] %v8736_v35, 128 }
 0x138   : > { %1054 = vxpose.xlu0.c.b16.cont [6/8] %v8721_v32, 128  ;;  %1070 = vxpose.xlu1.c.b16.cont [6/8] %v8737_v37, 128  ;;  %v8806_v37 = vld [vmem:[%s9563_s8 + $0x1ec] ss:$24 sps:$4 sm:$0xff]  }
 0x13c   : > { %1055 = vxpose.xlu0.c.b16.cont [7/8] %v8724_v34, 128  ;;  %1071 = vxpose.xlu1.c.b16.cont [7/8] %v8738_v38, 128 }
 0x140   : > { %1056 = vxpose.xlu0.c.b16.end [8/8] %v8727_v36, 128  ;;  %1072 = vxpose.xlu1.c.b16.end [8/8] %v8739_v40, 128  ;;  %v8805_v36 = vld [vmem:[%s9563_s8 + $0x1bc] ss:$24 sps:$4 sm:$0xff]  }
 0x141   : > { %v8808_v40 = vld [vmem:[%s9563_s8 + $0x21c] ss:$24 sps:$4 sm:$0xff]  }
 0x144   : > { %1081 = vxpose.xlu0.c.b16.start [1/8] %v8740_v39, 128  ;;  %1097 = vxpose.xlu1.c.b16.start [1/8] %v8756_v43, 128  ;;  %v8807_v39 = vld [vmem:[#allocation12] sm:$0xff]  }
 0x145   : > { %8316 = vmatprep.subr.bf16.mxu1 %v8807_v39  ;;  %v8810_v43 = vld [vmem:[%s9563_s8 + $0x24c] ss:$24 sps:$4 sm:$0xff]  }
 0x146   : > { %8317 = vmatpush3.bf16.msra.mxu1 %v8807_v39 }
 0x148   : > { %1082 = vxpose.xlu0.c.b16.cont [2/8] %v8742_v41, 128  ;;  %1098 = vxpose.xlu1.c.b16.cont [2/8] %v8757_v45, 128  ;;  %v8809_v41 = vld [vmem:[#allocation12 + $0x8] sm:$0xff]   ;;  %v8812_v45 = vld [vmem:[%s9563_s8 + $0x27c] ss:$24 sps:$4 sm:$0xff]  }
 0x149   : > { %8318 = vmatprep.subr.bf16.mxu1 %v8809_v41 }
 0x14a   : > { %8319 = vmatpush3.bf16.msra.mxu1 %v8809_v41  ;;  %v8842_v41 = vld [vmem:[%s9563_s8 + $0x2b4] ss:$24 sps:$4 sm:$0xff]  }
 0x14c   : > { %1083 = vxpose.xlu0.c.b16.cont [3/8] %v8744_v42, 128  ;;  %1099 = vxpose.xlu1.c.b16.cont [3/8] %v8758_v47, 128  ;;  %v8813_v47 = vld [vmem:[#allocation12 + $0x18] sm:$0xff]  }
 0x150   : > { %1084 = vxpose.xlu0.c.b16.cont [4/8] %v8746_v44, 128  ;;  %1100 = vxpose.xlu1.c.b16.cont [4/8] %v8759_v49, 128  ;;  %v8811_v44 = vld [vmem:[#allocation12 + $0x10] sm:$0xff]   ;;  %v8814_v49 = vld [vmem:[%s9563_s8 + $0x2ac] ss:$24 sps:$4 sm:$0xff]  }
 0x151   : > { %8320 = vmatprep.subr.bf16.mxu1 %v8811_v44 }
 0x152   : > { %8321 = vmatpush3.bf16.msra.mxu1 %v8811_v44  ;;  %v8843_v44 = vld [vmem:[%s9563_s8 + $0x2e4] ss:$24 sps:$4 sm:$0xff]  }
 0x153   : > { %8322 = vmatprep.subr.bf16.mxu1 %v8813_v47 }
 0x154   : > { %1085 = vxpose.xlu0.c.b16.cont [5/8] %v8748_v46, 128  ;;  %1101 = vxpose.xlu1.c.b16.cont [5/8] %v8760_v51, 128  ;;  %v8815_v51 = vld [vmem:[#allocation12 + $0x20] sm:$0xff]  }
 0x156   : > { %8323 = vmatpush3.bf16.msra.mxu1 %v8813_v47 }
 0x157   : > { %8324 = vmatprep.subr.bf16.mxu1 %v8815_v51 }
 0x158   : > { %1086 = vxpose.xlu0.c.b16.cont [6/8] %v8750_v48, 128  ;;  %1102 = vxpose.xlu1.c.b16.cont [6/8] %v8761_v53, 128 }
 0x15a   : > { %8325 = vmatpush3.bf16.msra.mxu1 %v8815_v51 }
 0x15c   : > { %1087 = vxpose.xlu0.c.b16.cont [7/8] %v8752_v50, 128  ;;  %1103 = vxpose.xlu1.c.b16.cont [7/8] %v8762_v54, 128  ;;  %v8817_v54 = vld [vmem:[#allocation12 + $0x28] sm:$0xff]  }
 0x15d   : > { %8326 = vmatprep.subr.bf16.mxu1 %v8817_v54 }
 0x15e   : > { %8327 = vmatpush3.bf16.msra.mxu1 %v8817_v54 }
 0x160   : > { %1088 = vxpose.xlu0.c.b16.end [8/8] %v8754_v52, 128  ;;  %1104 = vxpose.xlu1.c.b16.end [8/8] %v8763_v56, 128  ;;  %v8816_v52 = vld [vmem:[%s9563_s8 + $0x2dc] ss:$24 sps:$4 sm:$0xff]  }
 0x164   : > { %1113 = vxpose.xlu0.c.b16.start [1/8] %v8764_v55, 128  ;;  %1129 = vxpose.xlu1.c.b16.start [1/8] %v8780_v59, 128  ;;  %v8818_v55 = vld [vmem:[%s9563_s8 + $0x190] ss:$24 sps:$4 sm:$0xff]   ;;  %v8821_v59 = vld [vmem:[%s9563_s8 + $0x1c0] ss:$24 sps:$4 sm:$0xff]  }
 0x168   : > { %1114 = vxpose.xlu0.c.b16.cont [2/8] %v8766_v57, 128  ;;  %1130 = vxpose.xlu1.c.b16.cont [2/8] %v8781_v62, 128  ;;  %v8824_v62 = vld [vmem:[%s9563_s8 + $0x1f0] ss:$24 sps:$4 sm:$0xff]  }
 0x16a   : > { %v9637_v60 = vpop.trf.xlu0  ;;  %v9657_v8 = vpop.trf.xlu1 }
 0x16b   : > { %8124 = vmatprep.mubr.bf16.mxu0 %v9637_v60  ;;  %14472 = vst [vmem:[#allocation27_spill] sm:$0xff] %v9657_v8 }
 0x16c   : > { %1115 = vxpose.xlu0.c.b16.cont [3/8] %v8768_v58, 128  ;;  %1131 = vxpose.xlu1.c.b16.cont [3/8] %v8782_v1, 128  ;;  %v8820_v58 = vld [vmem:[#allocation12 + $0x30] sm:$0xff]  }
 0x16d   : > { %8328 = vmatprep.subr.bf16.mxu1 %v8820_v58  ;;  %v8826_v1 = vld [vmem:[%s9563_s8 + $0x220] ss:$24 sps:$4 sm:$0xff]  }
 0x16e   : > { %v9642_v63 = vpop.trf.xlu0  ;;  %v9667_v13 = vpop.trf.xlu1  ;;  %8329 = vmatpush3.bf16.msra.mxu1 %v8820_v58 }
 0x16f   : > { %8125 = vmatmul.mubr.bf16.vlgmr.msra.gmra.mrb[0].mxu0 %v9642_v63  ;;  %14474 = vst [vmem:[#allocation29_spill] sm:$0xff] %v9667_v13 }
 0x170   : > { %1116 = vxpose.xlu0.c.b16.cont [4/8] %v8770_v61, 128  ;;  %1132 = vxpose.xlu1.c.b16.cont [4/8] %v8783_v4, 128  ;;  %v8823_v61 = vld [vmem:[#allocation12 + $0x38] sm:$0xff]   ;;  %v8828_v4 = vld [vmem:[%s9563_s8 + $0x250] ss:$24 sps:$4 sm:$0xff]  }
 0x171   : > { %8330 = vmatprep.subr.bf16.mxu1 %v8823_v61 }
 0x172   : > { %v9647_v2 = vpop.trf.xlu0  ;;  %v9675_v18 = vpop.trf.xlu1  ;;  %8331 = vmatpush3.bf16.msra.mxu1 %v8823_v61 }
 0x173   : > { %8128 = vmatprep.mubr.bf16.mxu0 %v9647_v2  ;;  %14475 = vst [vmem:[#allocation30_spill] sm:$0xff] %v9675_v18 }
 0x174   : > { %1117 = vxpose.xlu0.c.b16.cont [5/8] %v8772_v0, 128  ;;  %1133 = vxpose.xlu1.c.b16.cont [5/8] %v8784_v7, 128 }
 0x176   : > { %v9652_v5 = vpop.trf.xlu0  ;;  %v9683_v22 = vpop.trf.xlu1 }
 0x177   : > { %8129 = vmatmul.mubr.bf16.gmra.mrb[4].mxu0 %v9652_v5 }
 0x178   : > { %1118 = vxpose.xlu0.c.b16.cont [6/8] %v8774_v3, 128  ;;  %1134 = vxpose.xlu1.c.b16.cont [6/8] %v8785_v11, 128  ;;  %v8832_v11 = vld [vmem:[%s9563_s8 + $0x2b0] ss:$24 sps:$4 sm:$0xff]  }
 0x17a   : > { %v9659_v9 = vpop.trf.xlu0  ;;  %v9688_v24 = vpop.trf.xlu1 }
 0x17b   : > { %14473 = vst [vmem:[#allocation28_spill] sm:$0xff] %v9659_v9  ;;  %8132 = vmatprep.mubr.bf16.mxu0 %v9659_v9  ;;  %14476 = vst [vmem:[#allocation31_spill] sm:$0xff] %v9688_v24 }
 0x17c   : > { %1119 = vxpose.xlu0.c.b16.cont [7/8] %v8776_v6, 128  ;;  %1135 = vxpose.xlu1.c.b16.cont [7/8] %v8786_v14, 128  ;;  %v8830_v6 = vld [vmem:[%s9563_s8 + $0x280] ss:$24 sps:$4 sm:$0xff]  }
 0x17e   : > { %v9664_v12 = vpop.trf.xlu0  ;;  %v9693_v27 = vpop.trf.xlu1 }
 0x17f   : > { %8133 = vmatmul.mubr.bf16.gmra.mrb[8].mxu0 %v9664_v12  ;;  %14477 = vst [vmem:[#allocation32_spill] sm:$0xff] %v9693_v27 }
 0x180   : > { %1120 = vxpose.xlu0.c.b16.end [8/8] %v8778_v10, 128  ;;  %1136 = vxpose.xlu1.c.b16.end [8/8] %v8787_v17, 128 }
 0x182   : > { %v9671_v16 = vpop.trf.xlu0  ;;  %v9699_v30 = vpop.trf.xlu1 }
 0x183   : > { %8136 = vmatprep.mubr.bf16.mxu0 %v9671_v16  ;;  %14479 = vst [vmem:[#allocation34_spill] sm:$0xff] %v9699_v30 }
 0x184   : > { %1145 = vxpose.xlu0.c.b16.start [1/8] %v8788_v15, 128  ;;  %1161 = vxpose.xlu1.c.b16.start [1/8] %v8804_v33, 128  ;;  %v8834_v15 = vld [vmem:[%s9563_s8 + $0x2e0] ss:$24 sps:$4 sm:$0xff]  }
 0x186   : > { %v9677_v19 = vpop.trf.xlu0  ;;  %v9707_v34 = vpop.trf.xlu1 }
 0x187   : > { %8137 = vmatmul.mubr.bf16.gmra.mrb[12].mxu0 %v9677_v19  ;;  %14481 = vst [vmem:[#allocation36_spill] sm:$0xff] %v9707_v34 }
 0x188   : > { %8140 = vmatprep.mubr.bf16.mxu0 %v9657_v8  ;;  %1146 = vxpose.xlu0.c.b16.cont [2/8] %v8790_v20, 128  ;;  %v8836_v20 = vld [vmem:[%s9563_s8 + $0x194] ss:$24 sps:$4 sm:$0xff]  }
 0x189   : > { %1162 = vxpose.xlu1.c.b16.cont [2/8] %v8805_v36, 128  ;;  %v8840_v36 = vld [vmem:[%s9563_s8 + $0x254] ss:$24 sps:$4 sm:$0xff]  }
 0x18a   : > { %v9696_v28 = vpop.trf.xlu0  ;;  %v9728_v48 = vpop.trf.xlu1 }
 0x18b   : > { %14478 = vst [vmem:[#allocation33_spill] sm:$0xff] %v9696_v28  ;;  %14486 = vst [vmem:[#allocation41_spill] sm:$0xff] %v9728_v48 }
 0x18c   : > { %1147 = vxpose.xlu0.c.b16.cont [3/8] %v8792_v21, 128 }
 0x18d   : > { %1163 = vxpose.xlu1.c.b16.cont [3/8] %v8806_v37, 128  ;;  %v8841_v37 = vld [vmem:[%s9563_s8 + $0x284] ss:$24 sps:$4 sm:$0xff]  }
 0x18e   : > { %v9703_v32 = vpop.trf.xlu0  ;;  %v9735_v53 = vpop.trf.xlu1 }
 0x18f   : > { %8141 = vmatmul.mubr.bf16.gmra.mrb[16].mxu0 %v9667_v13  ;;  %14480 = vst [vmem:[#allocation35_spill] sm:$0xff] %v9703_v32  ;;  %14488 = vst [vmem:[#allocation43_spill] sm:$0xff] %v9735_v53 }
 0x190   : > { %8144 = vmatprep.mubr.bf16.mxu0 %v9675_v18  ;;  %1148 = vxpose.xlu0.c.b16.cont [4/8] %v8794_v23, 128 }
 0x191   : > { %1164 = vxpose.xlu1.c.b16.cont [4/8] %v8808_v40, 128 }
 0x192   : > { %v9709_v35 = vpop.trf.xlu0  ;;  %v9741_v57 = vpop.trf.xlu1 }
 0x193   : > { %14482 = vst [vmem:[#allocation37_spill] sm:$0xff] %v9709_v35  ;;  %14490 = vst [vmem:[#allocation45_spill] sm:$0xff] %v9741_v57 }
 0x194   : > { %1149 = vxpose.xlu0.c.b16.cont [5/8] %v8796_v25, 128  ;;  %v8837_v25 = vld [vmem:[%s9563_s8 + $0x1c4] ss:$24 sps:$4 sm:$0xff]  }
 0x195   : > { %1165 = vxpose.xlu1.c.b16.cont [5/8] %v8810_v43, 128 }
 0x196   : > { %v9715_v38 = vpop.trf.xlu0  ;;  %v9747_v0 = vpop.trf.xlu1 }
 0x197   : > { %8145 = vmatmul.mubr.bf16.gmra.mrb[20].mxu0 %v9683_v22  ;;  %14483 = vst [vmem:[#allocation38_spill] sm:$0xff] %v9715_v38  ;;  %14491 = vst [vmem:[#allocation46_spill] sm:$0xff] %v9747_v0 }
 0x198   : > { %8148 = vmatprep.mubr.bf16.mxu0 %v9688_v24  ;;  %1150 = vxpose.xlu0.c.b16.cont [6/8] %v8798_v26, 128  ;;  %v8838_v26 = vld [vmem:[%s9563_s8 + $0x1f4] ss:$24 sps:$4 sm:$0xff]  }
 0x199   : > { %1166 = vxpose.xlu1.c.b16.cont [6/8] %v8812_v45, 128 }
 0x19a   : > { %v9720_v42 = vpop.trf.xlu0  ;;  %v9752_v3 = vpop.trf.xlu1 }
 0x19b   : > { %14484 = vst [vmem:[#allocation39_spill] sm:$0xff] %v9720_v42  ;;  %14492 = vst [vmem:[#allocation47_spill] sm:$0xff] %v9752_v3 }
 0x19c   : > { %1151 = vxpose.xlu0.c.b16.cont [7/8] %v8800_v29, 128 }
 0x19d   : > { %1167 = vxpose.xlu1.c.b16.cont [7/8] %v8814_v49, 128 }
 0x19e   : > { %v9725_v46 = vpop.trf.xlu0  ;;  %v9757_v7 = vpop.trf.xlu1 }
 0x19f   : > { %8149 = vmatmul.mubr.bf16.gmra.mrb[24].mxu0 %v9693_v27  ;;  %14485 = vst [vmem:[#allocation40_spill] sm:$0xff] %v9725_v46  ;;  %14493 = vst [vmem:[#allocation48_spill] sm:$0xff] %v9757_v7 }
 0x1a0   : > { %8152 = vmatprep.mubr.bf16.mxu0 %v9699_v30  ;;  %1152 = vxpose.xlu0.c.b16.end [8/8] %v8802_v31, 128  ;;  %v8839_v31 = vld [vmem:[%s9563_s8 + $0x224] ss:$24 sps:$4 sm:$0xff]   ;;  %s15107_s8 = sld [smem:[#allocation145_spill]] }
 0x1a1   : > { %1168 = vxpose.xlu1.c.b16.end [8/8] %v8816_v52, 128 }
 0x1a2   : > { %v9731_v50 = vpop.trf.xlu0  ;;  %v9763_v14 = vpop.trf.xlu1 }
 0x1a3   : > { %14487 = vst [vmem:[#allocation42_spill] sm:$0xff] %v9731_v50  ;;  %14495 = vst [vmem:[#allocation50_spill] sm:$0xff] %v9763_v14 }
 0x1a4   : > { %1177 = vxpose.xlu0.c.b16.start [1/8] %v8818_v55, 128 }
 0x1a5   : > { %1193 = vxpose.xlu1.c.b16.start [1/8] %v8836_v20, 128 }
 0x1a6   : > { %v9739_v56 = vpop.trf.xlu0  ;;  %v9771_v21 = vpop.trf.xlu1 }
 0x1a7   : > { %8153 = vmatmul.mubr.bf16.gmra.mrb[28].mxu0 %v9707_v34  ;;  %14489 = vst [vmem:[#allocation44_spill] sm:$0xff] %v9739_v56  ;;  %14497 = vst [vmem:[#allocation52_spill] sm:$0xff] %v9771_v21 }
 0x1a8   : > { %8156 = vmatprep.mubr.bf16.mxu0 %v9696_v28  ;;  %1178 = vxpose.xlu0.c.b16.cont [2/8] %v8821_v59, 128 }
 0x1a9   : > { %1194 = vxpose.xlu1.c.b16.cont [2/8] %v8837_v25, 128  ;;  %v9849_v25 = vld [vmem:[#allocation9] ss:$0 sm:$0xff] }
 0x1aa   : > { %v9760_v10 = vpop.trf.xlu0  ;;  %v9792_v40 = vpop.trf.xlu1 }
 0x1ab   : > { %14494 = vst [vmem:[#allocation49_spill] sm:$0xff] %v9760_v10  ;;  %14502 = vst [vmem:[#allocation57_spill] sm:$0xff] %v9792_v40 }
 0x1ac   : > { %1179 = vxpose.xlu0.c.b16.cont [3/8] %v8824_v62, 128 }
 0x1ad   : > { %1195 = vxpose.xlu1.c.b16.cont [3/8] %v8838_v26, 128 }
 0x1ae   : > { %v9767_v17 = vpop.trf.xlu0  ;;  %v9799_v45 = vpop.trf.xlu1 }
 0x1af   : > { %8157 = vmatmul.mubr.bf16.gmra.mrb[32].mxu0 %v9703_v32  ;;  %14496 = vst [vmem:[#allocation51_spill] sm:$0xff] %v9767_v17  ;;  %14504 = vst [vmem:[#allocation59_spill] sm:$0xff] %v9799_v45 }
 0x1b0   : > { %8160 = vmatprep.mubr.bf16.mxu0 %v9709_v35  ;;  %1180 = vxpose.xlu0.c.b16.cont [4/8] %v8826_v1, 128 }
 0x1b1   : > { %1196 = vxpose.xlu1.c.b16.cont [4/8] %v8839_v31, 128  ;;  %v9852_v31 = vld [vmem:[#allocation10] ss:$0 sm:$0xff] }
 0x1b2   : > { %v9773_v23 = vpop.trf.xlu0  ;;  %v9804_v49 = vpop.trf.xlu1 }
 0x1b3   : > { %14498 = vst [vmem:[#allocation53_spill] sm:$0xff] %v9773_v23  ;;  %14506 = vst [vmem:[#allocation61_spill] sm:$0xff] %v9804_v49 }
 0x1b4   : > { %1181 = vxpose.xlu0.c.b16.cont [5/8] %v8828_v4, 128 }
 0x1b5   : > { %1197 = vxpose.xlu1.c.b16.cont [5/8] %v8840_v36, 128 }
 0x1b6   : > { %v9779_v29 = vpop.trf.xlu0  ;;  %v9808_v51 = vpop.trf.xlu1 }
 0x1b7   : > { %8161 = vmatmul.mubr.bf16.gmra.mrb[36].mxu0 %v9715_v38  ;;  %14499 = vst [vmem:[#allocation54_spill] sm:$0xff] %v9779_v29  ;;  %14507 = vst [vmem:[#allocation62_spill] sm:$0xff] %v9808_v51 }
 0x1b8   : > { %8164 = vmatprep.mubr.bf16.mxu0 %v9720_v42  ;;  %1182 = vxpose.xlu0.c.b16.cont [6/8] %v8830_v6, 128 }
 0x1b9   : > { %1198 = vxpose.xlu1.c.b16.cont [6/8] %v8841_v37, 128 }
 0x1ba   : > { %v9784_v33 = vpop.trf.xlu0  ;;  %v9812_v52 = vpop.trf.xlu1 }
 0x1bb   : > { %14500 = vst [vmem:[#allocation55_spill] sm:$0xff] %v9784_v33  ;;  %14508 = vst [vmem:[#allocation63_spill] sm:$0xff] %v9812_v52 }
 0x1bc   : > { %1183 = vxpose.xlu0.c.b16.cont [7/8] %v8832_v11, 128 }
 0x1bd   : > { %1199 = vxpose.xlu1.c.b16.cont [7/8] %v8842_v41, 128  ;;  %v9855_v41 = vstv %s439_s1  ;;  %s14115_s1 = scalar_lea.hbm %s15107_s8, %s7896_s3 }
 0x1be   : > { %v9789_v39 = vpop.trf.xlu0  ;;  %v9815_v54 = vpop.trf.xlu1 }
 0x1bf   : > { %8165 = vmatmul.mubr.bf16.gmra.mrb[40].mxu0 %v9725_v46  ;;  %14501 = vst [vmem:[#allocation56_spill] sm:$0xff] %v9789_v39  ;;  %14509 = vst [vmem:[#allocation64_spill] sm:$0xff] %v9815_v54 }
 0x1c0   : > { %8168 = vmatprep.mubr.bf16.mxu0 %v9731_v50  ;;  %1184 = vxpose.xlu0.c.b16.end [8/8] %v8834_v15, 128 }
 0x1c1   : > { %1200 = vxpose.xlu1.c.b16.end [8/8] %v8843_v44, 128 }
 0x1c2   : > { %v9795_v43 = vpop.trf.xlu0  ;;  %v9820_v58 = vpop.trf.xlu1 }
 0x1c3   : > { %14503 = vst [vmem:[#allocation58_spill] sm:$0xff] %v9795_v43  ;;  %14511 = vst [vmem:[#allocation66_spill] sm:$0xff] %v9820_v58 }
 0x1c6   : > { %v9802_v47 = vpop.trf.xlu0  ;;  %v9826_v61 = vpop.trf.xlu1 }
 0x1c7   : > { %8169 = vmatmul.mubr.bf16.gmra.mrb[44].mxu0 %v9739_v56  ;;  %14505 = vst [vmem:[#allocation60_spill] sm:$0xff] %v9802_v47  ;;  %14513 = vst [vmem:[#allocation68_spill] sm:$0xff] %v9826_v61 }
 0x1c8   : > { %8172 = vmatprep.mubr.bf16.mxu0 %v9728_v48 }
 0x1ca   : > { %v9818_v55 = vpop.trf.xlu0  ;;  %v9842_v11 = vpop.trf.xlu1 }
 0x1cb   : > { %14510 = vst [vmem:[#allocation65_spill] sm:$0xff] %v9818_v55  ;;  %14518 = vst [vmem:[#allocation73_spill] sm:$0xff] %v9842_v11 }
 0x1ce   : > { %v9823_v59 = vpop.trf.xlu0  ;;  %v9847_v20 = vpop.trf.xlu1 }
 0x1cf   : > { %8173 = vmatmul.mubr.bf16.gmra.mrb[48].mxu0 %v9735_v53  ;;  %14512 = vst [vmem:[#allocation67_spill] sm:$0xff] %v9823_v59  ;;  %14520 = vst [vmem:[#allocation75_spill] sm:$0xff] %v9847_v20 }
 0x1d0   : > { %8176 = vmatprep.mubr.bf16.mxu0 %v9741_v57 }
 0x1d2   : > { %v9828_v62 = vpop.trf.xlu0 }
 0x1d3   : > { %14514 = vst [vmem:[#allocation69_spill] sm:$0xff] %v9828_v62 }
 0x1d6   : > { %v9832_v1 = vpop.trf.xlu0 }
 0x1d7   : > { %8177 = vmatmul.mubr.bf16.gmra.mrb[52].mxu0 %v9747_v0  ;;  %14515 = vst [vmem:[#allocation70_spill] sm:$0xff] %v9832_v1 }
 0x1d8   : > { %8180 = vmatprep.mubr.bf16.mxu0 %v9752_v3 }
 0x1da   : > { %v9836_v4 = vpop.trf.xlu0 }
 0x1db   : > { %14516 = vst [vmem:[#allocation71_spill] sm:$0xff] %v9836_v4 }
 0x1de   : > { %v9839_v6 = vpop.trf.xlu0 }
 0x1df   : > { %8181 = vmatmul.mubr.bf16.gmra.mrb[56].mxu0 %v9757_v7  ;;  %14517 = vst [vmem:[#allocation72_spill] sm:$0xff] %v9839_v6 }
 0x1e0   : > { %8184 = vmatprep.mubr.bf16.mxu0 %v9763_v14 }
 0x1e2   : > { %v9844_v15 = vpop.trf.xlu0 }
 0x1e3   : > { %14519 = vst [vmem:[#allocation74_spill] sm:$0xff] %v9844_v15 }
 0x1e7   : > { %8185 = vmatmul.mubr.bf16.gmra.mrb[60].mxu0 %v9771_v21 }
 0x1e8   : > { %8188 = vmatprep.mubr.bf16.mxu0 %v9760_v10 }
 0x1ef   : > { %8189 = vmatmul.mubr.bf16.gmra.mrb[64].mxu0 %v9767_v17 }
 0x1f0   : > { %8192 = vmatprep.mubr.bf16.mxu0 %v9773_v23 }
 0x1f7   : > { %8193 = vmatmul.mubr.bf16.gmra.mrb[68].mxu0 %v9779_v29 }
 0x1f8   : > { %8196 = vmatprep.mubr.bf16.mxu0 %v9784_v33 }
 0x1ff   : > { %8197 = vmatmul.mubr.bf16.gmra.mrb[72].mxu0 %v9789_v39 }
 0x200   : > { %8200 = vmatprep.mubr.bf16.mxu0 %v9795_v43 }
 0x207   : > { %8201 = vmatmul.mubr.bf16.gmra.mrb[76].mxu0 %v9802_v47 }
 0x208   : > { %8204 = vmatprep.mubr.bf16.mxu0 %v9792_v40 }
 0x20f   : > { %8205 = vmatmul.mubr.bf16.gmra.mrb[80].mxu0 %v9799_v45 }
 0x210   : > { %8208 = vmatprep.mubr.bf16.mxu0 %v9804_v49 }
 0x217   : > { %8209 = vmatmul.mubr.bf16.gmra.mrb[84].mxu0 %v9808_v51 }
 0x218   : > { %8212 = vmatprep.mubr.bf16.mxu0 %v9812_v52 }
 0x21f   : > { %8213 = vmatmul.mubr.bf16.gmra.mrb[88].mxu0 %v9815_v54 }
 0x220   : > { %8216 = vmatprep.mubr.bf16.mxu0 %v9820_v58 }
 0x227   : > { %8217 = vmatmul.mubr.bf16.gmra.mrb[92].mxu0 %v9826_v61  ;;  %v9862_v61 = vpop.trf.xlu1 }
 0x228   : > { %8220 = vmatprep.mubr.bf16.mxu0 %v9818_v55  ;;  %14522 = vst [vmem:[#allocation77_spill] sm:$0xff] %v9862_v61 }
 0x22b   : > { %v9875_v52 = vpop.trf.xlu1 }
 0x22c   : > { %14523 = vst [vmem:[#allocation78_spill] sm:$0xff] %v9875_v52 }
 0x22f   : > { %8221 = vmatmul.mubr.bf16.gmra.mrb[96].mxu0 %v9823_v59 }
 0x230   : > { %8224 = vmatprep.mubr.bf16.mxu0 %v9828_v62 }
 0x237   : > { %8225 = vmatmul.mubr.bf16.gmra.mrb[100].mxu0 %v9832_v1  ;;  %v9858_v1 = vpop.trf.xlu0 }
 0x238   : > { %8228 = vmatprep.mubr.bf16.mxu0 %v9836_v4  ;;  %14521 = vst [vmem:[#allocation76_spill] sm:$0xff] %v9858_v1 }
 0x23f   : > { %8229 = vmatmul.mubr.bf16.gmra.mrb[104].mxu0 %v9839_v6 }
 0x240   : > { %8232 = vmatprep.mubr.bf16.mxu0 %v9844_v15 }
 0x242   : > { %v8126_v26 = vpop.f32.mrb[0].mxu0 }
 0x243   : > { %v2083_v36 = vmul.f32 %v8126_v26, %v9849_v25  ;;  %v1307_v37 = vpop.f32.mrb[1].mxu0 }
 0x244   : > { %v2081_v44 = vmul.f32 %v9849_v25, %v1307_v37  ;;  %v8127_v4 = vpop.f32.mrb[2].mxu0 }
 0x245   : > { %v2282_v6 = vadd.f32 %v9852_v31, %v2083_v36  ;;  %v2084_v62 = vmul.f32 %v8127_v4, %v9849_v25  ;;  %v1310_v59 = vpop.f32.mrb[3].mxu0 }
 0x246   : > { %v2280_v15 = vadd.f32 %v9852_v31, %v2081_v44  ;;  %v2082_v55 = vmul.f32 %v9849_v25, %v1310_v59 }
 0x247   : > { %v2667_v26 = vmul.f32 %v9855_v41, %v2282_v6  ;;  %v2283_v58 = vadd.f32 %v9852_v31, %v2084_v62  ;;  %8233 = vmatmul.mubr.bf16.gmra.mrb[108].mxu0 %v9858_v1  ;;  %vm2474_vm0 = vcmp.ge.f32.partialorder %v2282_v6, 0.0 }
 0x248   : > { %v2281_v37 = vadd.f32 %v9852_v31, %v2082_v55  ;;  %8236 = vmatprep.mubr.bf16.mxu0 %v9842_v11  ;;  %v2665_v4 = vmul.f32 %v9855_v41, %v2280_v15  ;;  %vm2472_vm2 = vcmp.ge.f32.partialorder %v2280_v15, 0.0 }
 0x249   : > { %vm2475_vm1 = vcmp.ge.f32.partialorder %v2283_v58, 0.0  ;;  %v2668_v36 = vmul.f32 %v9855_v41, %v2283_v58  ;;  %v2859_v47 = vsel %vm2474_vm0, %v2282_v6, %v2667_v26 }
 0x24a   : > { %v8130_v44 = vpop.f32.mrb[4].mxu0  ;;  %vm2473_vm3 = vcmp.ge.f32.partialorder %v2281_v37, 0.0  ;;  %v2666_v59 = vmul.f32 %v9855_v41, %v2281_v37  ;;  %v2857_v43 = vsel %vm2472_vm2, %v2280_v15, %v2665_v4 }
 0x24b   : > { %v2087_v54 = vmul.f32 %v8130_v44, %v9849_v25  ;;  %v1323_v62 = vpop.f32.mrb[5].mxu0  ;;  %v2860_v1 = vsel %vm2475_vm1, %v2283_v58, %v2668_v36 }
 0x24c   : > { %v2085_v55 = vmul.f32 %v9849_v25, %v1323_v62  ;;  %v8131_v11 = vpop.f32.mrb[6].mxu0  ;;  %v2858_v51 = vsel %vm2473_vm3, %v2281_v37, %v2666_v59  ;;  %v3050_v39 = vpack.c.bf16 %v2860_v1, %v2859_v47 }
 0x24d   : > { %v2286_v49 = vadd.f32 %v9852_v31, %v2087_v54  ;;  %v2088_v33 = vmul.f32 %v8131_v11, %v9849_v25  ;;  %v1326_v45 = vpop.f32.mrb[7].mxu0  ;;  %v3049_v29 = vpack.c.bf16 %v2858_v51, %v2857_v43 }
 0x24e   : > { %v2284_v40 = vadd.f32 %v9852_v31, %v2085_v55  ;;  %v2086_v44 = vmul.f32 %v9849_v25, %v1326_v45  ;;  %v9889_v45 = vpop.trf.xlu1 }
 0x24f   : > { %v2671_v58 = vmul.f32 %v9855_v41, %v2286_v49  ;;  %v2287_v6 = vadd.f32 %v9852_v31, %v2088_v33  ;;  %8237 = vmatmul.mubr.bf16.gmra.mrb[112].mxu0 %v9847_v20  ;;  %8332 = vmatprep.mubr.bf16.mxu1 %v3049_v29  ;;  %vm2478_vm4 = vcmp.ge.f32.partialorder %v2286_v49, 0.0  ;;  %14524 = vst [vmem:[#allocation79_spill] sm:$0xff] %v9889_v45 }
 0x250   : > { %v2669_v47 = vmul.f32 %v9855_v41, %v2284_v40  ;;  %v2285_v54 = vadd.f32 %v9852_v31, %v2086_v44  ;;  %8333 = vmatmul.mubr.bf16.vlgmr.msra.gmra.mrb[0].mxu1 %v3050_v39  ;;  %8240 = vmatprep.mubr.bf16.mxu0 %v9862_v61  ;;  %vm2476_vm5 = vcmp.ge.f32.partialorder %v2284_v40, 0.0 }
 0x251   : > { %vm2479_vm6 = vcmp.ge.f32.partialorder %v2287_v6, 0.0  ;;  %v2672_v43 = vmul.f32 %v9855_v41, %v2287_v6  ;;  %v2863_v11 = vsel %vm2478_vm4, %v2286_v49, %v2671_v58 }
 0x252   : > { %vm2477_vm7 = vcmp.ge.f32.partialorder %v2285_v54, 0.0  ;;  %v2670_v33 = vmul.f32 %v9855_v41, %v2285_v54  ;;  %v8134_v51 = vpop.f32.mrb[8].mxu0  ;;  %v2861_v37 = vsel %vm2476_vm5, %v2284_v40, %v2669_v47  ;;  %v9901_v40 = vpop.trf.xlu1 }
 0x253   : > { %v2091_v29 = vmul.f32 %v8134_v51, %v9849_v25  ;;  %v1339_v1 = vpop.f32.mrb[9].mxu0  ;;  %v2864_v15 = vsel %vm2479_vm6, %v2287_v6, %v2672_v43  ;;  %14525 = vst [vmem:[#allocation80_spill] sm:$0xff] %v9901_v40 }
 0x254   : > { %v2089_v26 = vmul.f32 %v9849_v25, %v1339_v1  ;;  %v8135_v39 = vpop.f32.mrb[10].mxu0  ;;  %v2862_v4 = vsel %vm2477_vm7, %v2285_v54, %v2670_v33  ;;  %v3052_v36 = vpack.c.bf16 %v2864_v15, %v2863_v11  ;;  %v9907_v54 = vpop.trf.xlu0 }
 0x255   : > { %v2290_v59 = vadd.f32 %v9852_v31, %v2091_v29  ;;  %v2092_v62 = vmul.f32 %v8135_v39, %v9849_v25  ;;  %v1342_v55 = vpop.f32.mrb[11].mxu0  ;;  %v3051_v44 = vpack.c.bf16 %v2862_v4, %v2861_v37  ;;  %14526 = vst [vmem:[#allocation81_spill] sm:$0xff] %v9907_v54 }
 0x256   : > { %v2288_v61 = vadd.f32 %v9852_v31, %v2089_v26  ;;  %v2090_v20 = vmul.f32 %v9849_v25, %v1342_v55 }
 0x257   : > { %v2675_v51 = vmul.f32 %v9855_v41, %v2290_v59  ;;  %v2291_v49 = vadd.f32 %v9852_v31, %v2092_v62  ;;  %8241 = vmatmul.mubr.bf16.gmra.mrb[116].mxu0 %v9875_v52  ;;  %8336 = vmatprep.mubr.bf16.mxu1 %v3051_v44  ;;  %vm2482_vm8 = vcmp.ge.f32.partialorder %v2290_v59, 0.0 }
 0x258   : > { %v2673_v58 = vmul.f32 %v9855_v41, %v2288_v61  ;;  %v2289_v6 = vadd.f32 %v9852_v31, %v2090_v20  ;;  %8337 = vmatmul.mubr.bf16.gmra.mrb[4].mxu1 %v3052_v36  ;;  %8244 = vmatprep.mubr.bf16.mxu0 %v9889_v45  ;;  %vm2480_vm9 = vcmp.ge.f32.partialorder %v2288_v61, 0.0  ;;  %v9914_v45 = vpop.trf.xlu1 }
 0x259   : > { %vm2483_vm10 = vcmp.ge.f32.partialorder %v2291_v49, 0.0  ;;  %v2676_v47 = vmul.f32 %v9855_v41, %v2291_v49  ;;  %v2867_v11 = vsel %vm2482_vm8, %v2290_v59, %v2675_v51  ;;  %14527 = vst [vmem:[#allocation82_spill] sm:$0xff] %v9914_v45 }
 0x25a   : > { %vm2481_vm11 = vcmp.ge.f32.partialorder %v2289_v6, 0.0  ;;  %v2674_v43 = vmul.f32 %v9855_v41, %v2289_v6  ;;  %v8138_v33 = vpop.f32.mrb[12].mxu0  ;;  %v2865_v39 = vsel %vm2480_vm9, %v2288_v61, %v2673_v58  ;;  %v9921_v61 = vpop.trf.xlu0 }
 0x25b   : > { %v2095_v29 = vmul.f32 %v8138_v33, %v9849_v25  ;;  %v1355_v1 = vpop.f32.mrb[13].mxu0  ;;  %v2868_v15 = vsel %vm2483_vm10, %v2291_v49, %v2676_v47  ;;  %14528 = vst [vmem:[#allocation83_spill] sm:$0xff] %v9921_v61 }
 0x25c   : > { %v2093_v20 = vmul.f32 %v9849_v25, %v1355_v1  ;;  %v8139_v26 = vpop.f32.mrb[14].mxu0  ;;  %v2866_v37 = vsel %vm2481_vm11, %v2289_v6, %v2674_v43  ;;  %v3054_v4 = vpack.c.bf16 %v2868_v15, %v2867_v11 }
 0x25d   : > { %v2294_v36 = vadd.f32 %v9852_v31, %v2095_v29  ;;  %v2096_v62 = vmul.f32 %v8139_v26, %v9849_v25  ;;  %v1358_v55 = vpop.f32.mrb[15].mxu0  ;;  %v3053_v44 = vpack.c.bf16 %v2866_v37, %v2865_v39  ;;  %v9930_v39 = vpop.trf.xlu1 }
 0x25e   : > { %v2292_v52 = vadd.f32 %v9852_v31, %v2093_v20  ;;  %v2094_v33 = vmul.f32 %v9849_v25, %v1358_v55  ;;  %14529 = vst [vmem:[#allocation84_spill] sm:$0xff] %v9930_v39 }
 0x25f   : > { %v2679_v59 = vmul.f32 %v9855_v41, %v2294_v36  ;;  %v2295_v51 = vadd.f32 %v9852_v31, %v2096_v62  ;;  %8245 = vmatmul.mubr.bf16.gmra.mrb[120].mxu0 %v9901_v40  ;;  %8340 = vmatprep.mubr.bf16.mxu1 %v3053_v44  ;;  %vm2486_vm12 = vcmp.ge.f32.partialorder %v2294_v36, 0.0  ;;  %v9934_v40 = vpop.trf.xlu0 }
 0x260   : > { %v2677_v49 = vmul.f32 %v9855_v41, %v2292_v52  ;;  %v2293_v58 = vadd.f32 %v9852_v31, %v2094_v33  ;;  %8341 = vmatmul.mubr.bf16.gmra.mrb[8].mxu1 %v3054_v4  ;;  %8248 = vmatprep.mubr.bf16.mxu0 %v9914_v45  ;;  %vm2484_vm13 = vcmp.ge.f32.partialorder %v2292_v52, 0.0  ;;  %14530 = vst [vmem:[#allocation85_spill] sm:$0xff] %v9934_v40 }
 0x261   : > { %vm2487_vm14 = vcmp.ge.f32.partialorder %v2295_v51, 0.0  ;;  %v2680_v6 = vmul.f32 %v9855_v41, %v2295_v51  ;;  %v2871_v11 = vsel %vm2486_vm12, %v2294_v36, %v2679_v59 }
 0x262   : > { %vm2485_vm15 = vcmp.ge.f32.partialorder %v2293_v58, 0.0  ;;  %v2678_v47 = vmul.f32 %v9855_v41, %v2293_v58  ;;  %v8142_v43 = vpop.f32.mrb[16].mxu0  ;;  %v2869_v37 = vsel %vm2484_vm13, %v2292_v52, %v2677_v49 }
 0x263   : > { %v2099_v29 = vmul.f32 %v8142_v43, %v9849_v25  ;;  %v1371_v1 = vpop.f32.mrb[17].mxu0  ;;  %v2872_v15 = vsel %vm2487_vm14, %v2295_v51, %v2680_v6 }
 0x264   : > { %v2097_v20 = vmul.f32 %v9849_v25, %v1371_v1  ;;  %v8143_v26 = vpop.f32.mrb[18].mxu0  ;;  %v2870_v4 = vsel %vm2485_vm15, %v2293_v58, %v2678_v47  ;;  %v3056_v62 = vpack.c.bf16 %v2872_v15, %v2871_v11  ;;  %v9947_v15 = vpop.trf.xlu0 }
 0x265   : > { %v2298_v55 = vadd.f32 %v9852_v31, %v2099_v29  ;;  %v2100_v44 = vmul.f32 %v8143_v26, %v9849_v25  ;;  %v1374_v33 = vpop.f32.mrb[19].mxu0  ;;  %v3055_v45 = vpack.c.bf16 %v2870_v4, %v2869_v37  ;;  %14531 = vst [vmem:[#allocation86_spill] sm:$0xff] %v9947_v15 }
 0x266   : > { %v2296_v43 = vadd.f32 %v9852_v31, %v2097_v20  ;;  %v2098_v36 = vmul.f32 %v9849_v25, %v1374_v33 }
 0x267   : > { %v2683_v59 = vmul.f32 %v9855_v41, %v2298_v55  ;;  %v2299_v51 = vadd.f32 %v9852_v31, %v2100_v44  ;;  %8249 = vmatmul.mubr.bf16.gmra.mrb[124].mxu0 %v9930_v39  ;;  %8344 = vmatprep.mubr.bf16.mxu1 %v3055_v45  ;;  %vm2490_vm0 = vcmp.ge.f32.partialorder %v2298_v55, 0.0 }
 0x268   : > { %v2681_v52 = vmul.f32 %v9855_v41, %v2296_v43  ;;  %v2297_v49 = vadd.f32 %v9852_v31, %v2098_v36  ;;  %8345 = vmatmul.mubr.bf16.gmra.mrb[12].mxu1 %v3056_v62  ;;  %8252 = vmatprep.mubr.bf16.mxu0 %v9907_v54  ;;  %vm2488_vm1 = vcmp.ge.f32.partialorder %v2296_v43, 0.0 }
 0x269   : > { %vm2491_vm2 = vcmp.ge.f32.partialorder %v2299_v51, 0.0  ;;  %v2684_v58 = vmul.f32 %v9855_v41, %v2299_v51  ;;  %v2875_v45 = vsel %vm2490_vm0, %v2298_v55, %v2683_v59 }
 0x26a   : > { %vm2489_vm3 = vcmp.ge.f32.partialorder %v2297_v49, 0.0  ;;  %v2682_v6 = vmul.f32 %v9855_v41, %v2297_v49  ;;  %v8146_v47 = vpop.f32.mrb[20].mxu0  ;;  %v2873_v37 = vsel %vm2488_vm1, %v2296_v43, %v2681_v52 }
 0x26b   : > { %v2103_v29 = vmul.f32 %v8146_v47, %v9849_v25  ;;  %v1387_v1 = vpop.f32.mrb[21].mxu0  ;;  %v2876_v11 = vsel %vm2491_vm2, %v2299_v51, %v2684_v58 }
 0x26c   : > { %v2101_v20 = vmul.f32 %v9849_v25, %v1387_v1  ;;  %v8147_v26 = vpop.f32.mrb[22].mxu0  ;;  %v2874_v4 = vsel %vm2489_vm3, %v2297_v49, %v2682_v6  ;;  %v3058_v62 = vpack.c.bf16 %v2876_v11, %v2875_v45  ;;  %v9961_v49 = vpop.trf.xlu0 }
 0x26d   : > { %v2302_v44 = vadd.f32 %v9852_v31, %v2103_v29  ;;  %v2104_v33 = vmul.f32 %v8147_v26, %v9849_v25  ;;  %v1390_v36 = vpop.f32.mrb[23].mxu0  ;;  %v3057_v39 = vpack.c.bf16 %v2874_v4, %v2873_v37  ;;  %14532 = vst [vmem:[#allocation87_spill] sm:$0xff] %v9961_v49 }
 0x26e   : > { %v2300_v54 = vadd.f32 %v9852_v31, %v2101_v20  ;;  %v2102_v47 = vmul.f32 %v9849_v25, %v1390_v36 }
 0x26f   : > { %v2687_v55 = vmul.f32 %v9855_v41, %v2302_v44  ;;  %v2303_v59 = vadd.f32 %v9852_v31, %v2104_v33  ;;  %8253 = vmatmul.mubr.bf16.gmra.mrb[128].mxu0 %v9921_v61  ;;  %8348 = vmatprep.mubr.bf16.mxu1 %v3057_v39  ;;  %vm2494_vm4 = vcmp.ge.f32.partialorder %v2302_v44, 0.0 }
 0x270   : > { %v2685_v43 = vmul.f32 %v9855_v41, %v2300_v54  ;;  %v2301_v51 = vadd.f32 %v9852_v31, %v2102_v47  ;;  %8349 = vmatmul.mubr.bf16.gmra.mrb[16].mxu1 %v3058_v62  ;;  %8256 = vmatprep.mubr.bf16.mxu0 %v9934_v40  ;;  %vm2492_vm5 = vcmp.ge.f32.partialorder %v2300_v54, 0.0 }
 0x271   : > { %vm2495_vm6 = vcmp.ge.f32.partialorder %v2303_v59, 0.0  ;;  %v2688_v52 = vmul.f32 %v9855_v41, %v2303_v59  ;;  %v2879_v1 = vsel %vm2494_vm4, %v2302_v44, %v2687_v55 }
 0x272   : > { %vm2493_vm7 = vcmp.ge.f32.partialorder %v2301_v51, 0.0  ;;  %v2686_v58 = vmul.f32 %v9855_v41, %v2301_v51  ;;  %v8150_v6 = vpop.f32.mrb[24].mxu0  ;;  %v2877_v26 = vsel %vm2492_vm5, %v2300_v54, %v2685_v43  ;;  %v9973_v54 = vpop.trf.xlu0 }
 0x273   : > { %v2107_v39 = vmul.f32 %v8150_v6, %v9849_v25  ;;  %v1403_v29 = vpop.f32.mrb[25].mxu0  ;;  %v2880_v45 = vsel %vm2495_vm6, %v2303_v59, %v2688_v52  ;;  %14533 = vst [vmem:[#allocation88_spill] sm:$0xff] %v9973_v54 }
 0x274   : > { %v2105_v11 = vmul.f32 %v9849_v25, %v1403_v29  ;;  %v8151_v20 = vpop.f32.mrb[26].mxu0  ;;  %v2878_v37 = vsel %vm2493_vm7, %v2301_v51, %v2686_v58  ;;  %v3060_v4 = vpack.c.bf16 %v2880_v45, %v2879_v1  ;;  %v9979_v51 = vpop.trf.xlu1 }
 0x275   : > { %v2306_v62 = vadd.f32 %v9852_v31, %v2107_v39  ;;  %v2108_v33 = vmul.f32 %v8151_v20, %v9849_v25  ;;  %v1406_v36 = vpop.f32.mrb[27].mxu0  ;;  %v3059_v47 = vpack.c.bf16 %v2878_v37, %v2877_v26  ;;  %14534 = vst [vmem:[#allocation89_spill] sm:$0xff] %v9979_v51 }
 0x276   : > { %v2304_v40 = vadd.f32 %v9852_v31, %v2105_v11  ;;  %v2106_v61 = vmul.f32 %v9849_v25, %v1406_v36 }
 0x277   : > { %v2691_v6 = vmul.f32 %v9855_v41, %v2306_v62  ;;  %v2307_v44 = vadd.f32 %v9852_v31, %v2108_v33  ;;  %8257 = vmatmul.mubr.bf16.gmra.mrb[132].mxu0 %v9947_v15  ;;  %8352 = vmatprep.mubr.bf16.mxu1 %v3059_v47  ;;  %vm2498_vm8 = vcmp.ge.f32.partialorder %v2306_v62, 0.0 }
 0x278   : > { %v2689_v55 = vmul.f32 %v9855_v41, %v2304_v40  ;;  %v2305_v59 = vadd.f32 %v9852_v31, %v2106_v61  ;;  %8353 = vmatmul.mubr.bf16.gmra.mrb[20].mxu1 %v3060_v4  ;;  %8260 = vmatprep.mubr.bf16.mxu0 %v9961_v49  ;;  %vm2496_vm9 = vcmp.ge.f32.partialorder %v2304_v40, 0.0  ;;  %v9986_v49 = vpop.trf.xlu0 }
 0x279   : > { %vm2499_vm10 = vcmp.ge.f32.partialorder %v2307_v44, 0.0  ;;  %v2692_v43 = vmul.f32 %v9855_v41, %v2307_v44  ;;  %v2883_v1 = vsel %vm2498_vm8, %v2306_v62, %v2691_v6  ;;  %14535 = vst [vmem:[#allocation90_spill] sm:$0xff] %v9986_v49 }
 0x27a   : > { %vm2497_vm11 = vcmp.ge.f32.partialorder %v2305_v59, 0.0  ;;  %v2690_v52 = vmul.f32 %v9855_v41, %v2305_v59  ;;  %v8154_v58 = vpop.f32.mrb[28].mxu0  ;;  %v2881_v20 = vsel %vm2496_vm9, %v2304_v40, %v2689_v55  ;;  %v9993_v40 = vpop.trf.xlu1 }
 0x27b   : > { %v2111_v39 = vmul.f32 %v8154_v58, %v9849_v25  ;;  %v1419_v29 = vpop.f32.mrb[29].mxu0  ;;  %v2884_v45 = vsel %vm2499_vm10, %v2307_v44, %v2692_v43  ;;  %14536 = vst [vmem:[#allocation91_spill] sm:$0xff] %v9993_v40 }
 0x27c   : > { %v2109_v61 = vmul.f32 %v9849_v25, %v1419_v29  ;;  %v8155_v11 = vpop.f32.mrb[30].mxu0  ;;  %v2882_v26 = vsel %vm2497_vm11, %v2305_v59, %v2690_v52  ;;  %v3062_v37 = vpack.c.bf16 %v2884_v45, %v2883_v1 }
 0x27d   : > { %v2310_v4 = vadd.f32 %v9852_v31, %v2111_v39  ;;  %v2112_v33 = vmul.f32 %v8155_v11, %v9849_v25  ;;  %v1422_v36 = vpop.f32.mrb[31].mxu0  ;;  %v3061_v47 = vpack.c.bf16 %v2882_v26, %v2881_v20  ;;  %v10002_v20 = vpop.trf.xlu0 }
 0x27e   : > { %v2308_v15 = vadd.f32 %v9852_v31, %v2109_v61  ;;  %v2110_v58 = vmul.f32 %v9849_v25, %v1422_v36  ;;  %14537 = vst [vmem:[#allocation92_spill] sm:$0xff] %v10002_v20 }
 0x27f   : > { %v2695_v62 = vmul.f32 %v9855_v41, %v2310_v4  ;;  %v2311_v6 = vadd.f32 %v9852_v31, %v2112_v33  ;;  %8261 = vmatmul.mubr.bf16.gmra.mrb[136].mxu0 %v9973_v54  ;;  %8356 = vmatprep.mubr.bf16.mxu1 %v3061_v47  ;;  %vm2502_vm12 = vcmp.ge.f32.partialorder %v2310_v4, 0.0  ;;  %v10006_v54 = vpop.trf.xlu1 }
 0x280   : > { %v2693_v44 = vmul.f32 %v9855_v41, %v2308_v15  ;;  %v2309_v55 = vadd.f32 %v9852_v31, %v2110_v58  ;;  %8357 = vmatmul.mubr.bf16.gmra.mrb[24].mxu1 %v3062_v37  ;;  %8264 = vmatprep.mubr.bf16.mxu0 %v9986_v49  ;;  %vm2500_vm13 = vcmp.ge.f32.partialorder %v2308_v15, 0.0  ;;  %14538 = vst [vmem:[#allocation93_spill] sm:$0xff] %v10006_v54 }
 0x281   : > { %vm2503_vm14 = vcmp.ge.f32.partialorder %v2311_v6, 0.0  ;;  %v2696_v59 = vmul.f32 %v9855_v41, %v2311_v6  ;;  %v2887_v1 = vsel %vm2502_vm12, %v2310_v4, %v2695_v62 }
 0x282   : > { %vm2501_vm15 = vcmp.ge.f32.partialorder %v2309_v55, 0.0  ;;  %v2694_v43 = vmul.f32 %v9855_v41, %v2309_v55  ;;  %v8158_v52 = vpop.f32.mrb[32].mxu0  ;;  %v2885_v26 = vsel %vm2500_vm13, %v2308_v15, %v2693_v44 }
 0x283   : > { %v2115_v39 = vmul.f32 %v8158_v52, %v9849_v25  ;;  %v1435_v29 = vpop.f32.mrb[33].mxu0  ;;  %v2888_v45 = vsel %vm2503_vm14, %v2311_v6, %v2696_v59 }
 0x284   : > { %v2113_v61 = vmul.f32 %v9849_v25, %v1435_v29  ;;  %v8159_v11 = vpop.f32.mrb[34].mxu0  ;;  %v2886_v37 = vsel %vm2501_vm15, %v2309_v55, %v2694_v43  ;;  %v3064_v33 = vpack.c.bf16 %v2888_v45, %v2887_v1  ;;  %v10019_v45 = vpop.trf.xlu1 }
 0x285   : > { %v2314_v36 = vadd.f32 %v9852_v31, %v2115_v39  ;;  %v2116_v47 = vmul.f32 %v8159_v11, %v9849_v25  ;;  %v1438_v58 = vpop.f32.mrb[35].mxu0  ;;  %v3063_v49 = vpack.c.bf16 %v2886_v37, %v2885_v26  ;;  %14539 = vst [vmem:[#allocation94_spill] sm:$0xff] %v10019_v45 }
 0x286   : > { %v2312_v52 = vadd.f32 %v9852_v31, %v2113_v61  ;;  %v2114_v4 = vmul.f32 %v9849_v25, %v1438_v58 }
 0x287   : > { %v2699_v62 = vmul.f32 %v9855_v41, %v2314_v36  ;;  %v2315_v6 = vadd.f32 %v9852_v31, %v2116_v47  ;;  %8265 = vmatmul.mubr.bf16.gmra.mrb[140].mxu0 %v10002_v20  ;;  %8360 = vmatprep.mubr.bf16.mxu1 %v3063_v49  ;;  %vm2506_vm0 = vcmp.ge.f32.partialorder %v2314_v36, 0.0 }
 0x288   : > { %v2697_v15 = vmul.f32 %v9855_v41, %v2312_v52  ;;  %v2313_v44 = vadd.f32 %v9852_v31, %v2114_v4  ;;  %8361 = vmatmul.mubr.bf16.gmra.mrb[28].mxu1 %v3064_v33  ;;  %8268 = vmatprep.mubr.bf16.mxu0 %v9979_v51  ;;  %vm2504_vm1 = vcmp.ge.f32.partialorder %v2312_v52, 0.0 }
 0x289   : > { %vm2507_vm2 = vcmp.ge.f32.partialorder %v2315_v6, 0.0  ;;  %v2700_v55 = vmul.f32 %v9855_v41, %v2315_v6  ;;  %v2891_v49 = vsel %vm2506_vm0, %v2314_v36, %v2699_v62 }
 0x28a   : > { %vm2505_vm3 = vcmp.ge.f32.partialorder %v2313_v44, 0.0  ;;  %v2698_v59 = vmul.f32 %v9855_v41, %v2313_v44  ;;  %v8162_v43 = vpop.f32.mrb[36].mxu0  ;;  %v2889_v26 = vsel %vm2504_vm1, %v2312_v52, %v2697_v15 }
 0x28b   : > { %v2119_v39 = vmul.f32 %v8162_v43, %v9849_v25  ;;  %v1451_v29 = vpop.f32.mrb[37].mxu0  ;;  %v2892_v1 = vsel %vm2507_vm2, %v2315_v6, %v2700_v55 }
 0x28c   : > { %v2117_v61 = vmul.f32 %v9849_v25, %v1451_v29  ;;  %v8163_v11 = vpop.f32.mrb[38].mxu0  ;;  %v2890_v37 = vsel %vm2505_vm3, %v2313_v44, %v2698_v59  ;;  %v3066_v33 = vpack.c.bf16 %v2892_v1, %v2891_v49  ;;  %v10033_v44 = vpop.trf.xlu1 }
 0x28d   : > { %v2318_v47 = vadd.f32 %v9852_v31, %v2119_v39  ;;  %v2120_v58 = vmul.f32 %v8163_v11, %v9849_v25  ;;  %v1454_v4 = vpop.f32.mrb[39].mxu0  ;;  %v3065_v51 = vpack.c.bf16 %v2890_v37, %v2889_v26  ;;  %14540 = vst [vmem:[#allocation95_spill] sm:$0xff] %v10033_v44 }
 0x28e   : > { %v2316_v20 = vadd.f32 %v9852_v31, %v2117_v61  ;;  %v2118_v43 = vmul.f32 %v9849_v25, %v1454_v4 }
 0x28f   : > { %v2703_v36 = vmul.f32 %v9855_v41, %v2318_v47  ;;  %v2319_v62 = vadd.f32 %v9852_v31, %v2120_v58  ;;  %8269 = vmatmul.mubr.bf16.gmra.mrb[144].mxu0 %v9993_v40  ;;  %8364 = vmatprep.mubr.bf16.mxu1 %v3065_v51  ;;  %vm2510_vm4 = vcmp.ge.f32.partialorder %v2318_v47, 0.0 }
 0x290   : > { %v2701_v52 = vmul.f32 %v9855_v41, %v2316_v20  ;;  %v2317_v6 = vadd.f32 %v9852_v31, %v2118_v43  ;;  %8365 = vmatmul.mubr.bf16.gmra.mrb[32].mxu1 %v3066_v33  ;;  %8272 = vmatprep.mubr.bf16.mxu0 %v10006_v54  ;;  %vm2508_vm5 = vcmp.ge.f32.partialorder %v2316_v20, 0.0 }
 0x291   : > { %vm2511_vm6 = vcmp.ge.f32.partialorder %v2319_v62, 0.0  ;;  %v2704_v15 = vmul.f32 %v9855_v41, %v2319_v62  ;;  %v2895_v29 = vsel %vm2510_vm4, %v2318_v47, %v2703_v36 }
 0x292   : > { %vm2509_vm7 = vcmp.ge.f32.partialorder %v2317_v6, 0.0  ;;  %v2702_v55 = vmul.f32 %v9855_v41, %v2317_v6  ;;  %v8166_v59 = vpop.f32.mrb[40].mxu0  ;;  %v2893_v11 = vsel %vm2508_vm5, %v2316_v20, %v2701_v52  ;;  %v10048_v52 = vpop.trf.xlu1 }
 0x293   : > { %v2123_v51 = vmul.f32 %v8166_v59, %v9849_v25  ;;  %v1467_v39 = vpop.f32.mrb[41].mxu0  ;;  %v2896_v49 = vsel %vm2511_vm6, %v2319_v62, %v2704_v15  ;;  %14541 = vst [vmem:[#allocation96_spill] sm:$0xff] %v10048_v52 }
 0x294   : > { %v2121_v1 = vmul.f32 %v9849_v25, %v1467_v39  ;;  %v8167_v61 = vpop.f32.mrb[42].mxu0  ;;  %v2894_v26 = vsel %vm2509_vm7, %v2317_v6, %v2702_v55  ;;  %v3068_v37 = vpack.c.bf16 %v2896_v49, %v2895_v29  ;;  %v10056_v29 = vpop.trf.xlu0 }
 0x295   : > { %v2322_v33 = vadd.f32 %v9852_v31, %v2123_v51  ;;  %v2124_v58 = vmul.f32 %v8167_v61, %v9849_v25  ;;  %v1470_v4 = vpop.f32.mrb[43].mxu0  ;;  %v3067_v43 = vpack.c.bf16 %v2894_v26, %v2893_v11  ;;  %14542 = vst [vmem:[#allocation97_spill] sm:$0xff] %v10056_v29 }
 0x296   : > { %v2320_v40 = vadd.f32 %v9852_v31, %v2121_v1  ;;  %v2122_v59 = vmul.f32 %v9849_v25, %v1470_v4 }
 0x297   : > { %v2707_v20 = vmul.f32 %v9855_v41, %v2322_v33  ;;  %v2323_v62 = vadd.f32 %v9852_v31, %v2124_v58  ;;  %8273 = vmatmul.mubr.bf16.gmra.mrb[148].mxu0 %v10019_v45  ;;  %8368 = vmatprep.mubr.bf16.mxu1 %v3067_v43  ;;  %vm2514_vm8 = vcmp.ge.f32.partialorder %v2322_v33, 0.0 }
 0x298   : > { %v2705_v15 = vmul.f32 %v9855_v41, %v2320_v40  ;;  %v2321_v55 = vadd.f32 %v9852_v31, %v2122_v59  ;;  %8369 = vmatmul.mubr.bf16.gmra.mrb[36].mxu1 %v3068_v37  ;;  %8276 = vmatprep.mubr.bf16.mxu0 %v10033_v44  ;;  %vm2512_vm9 = vcmp.ge.f32.partialorder %v2320_v40, 0.0 }
 0x299   : > { %vm2515_vm10 = vcmp.ge.f32.partialorder %v2323_v62, 0.0  ;;  %v2708_v39 = vmul.f32 %v9855_v41, %v2323_v62  ;;  %v2899_v4 = vsel %vm2514_vm8, %v2322_v33, %v2707_v20 }
 0x29a   : > { %vm2513_vm11 = vcmp.ge.f32.partialorder %v2321_v55, 0.0  ;;  %v2706_v61 = vmul.f32 %v9855_v41, %v2321_v55  ;;  %v8170_v11 = vpop.f32.mrb[44].mxu0  ;;  %v2897_v47 = vsel %vm2512_vm9, %v2320_v40, %v2705_v15 }
 0x29b   : > { %v2127_v37 = vmul.f32 %v8170_v11, %v9849_v25  ;;  %v1483_v58 = vpop.f32.mrb[45].mxu0  ;;  %v2900_v43 = vsel %vm2515_vm10, %v2323_v62, %v2708_v39  ;;  %v10069_v11 = vpop.trf.xlu1 }
 0x29c   : > { %v2125_v59 = vmul.f32 %v9849_v25, %v1483_v58  ;;  %v8171_v51 = vpop.f32.mrb[46].mxu0  ;;  %v2898_v49 = vsel %vm2513_vm11, %v2321_v55, %v2706_v61  ;;  %v3070_v6 = vpack.c.bf16 %v2900_v43, %v2899_v4  ;;  %14543 = vst [vmem:[#allocation98_spill] sm:$0xff] %v10069_v11 }
 0x29d   : > { %v2326_v54 = vadd.f32 %v9852_v31, %v2127_v37  ;;  %v2128_v36 = vmul.f32 %v8171_v51, %v9849_v25  ;;  %v1486_v26 = vpop.f32.mrb[47].mxu0  ;;  %v3069_v8 = vpack.c.bf16 %v2898_v49, %v2897_v47  ;;  %v10080_v47 = vpop.trf.xlu0 }
 0x29e   : > { %v2324_v62 = vadd.f32 %v9852_v31, %v2125_v59  ;;  %v2126_v40 = vmul.f32 %v9849_v25, %v1486_v26  ;;  %14544 = vst [vmem:[#allocation99_spill] sm:$0xff] %v10080_v47 }
 0x29f   : > { %v2711_v39 = vmul.f32 %v9855_v41, %v2326_v54  ;;  %v2327_v51 = vadd.f32 %v9852_v31, %v2128_v36  ;;  %8277 = vmatmul.mubr.bf16.gmra.mrb[152].mxu0 %v10048_v52  ;;  %8372 = vmatprep.mubr.bf16.mxu1 %v3069_v8  ;;  %vm2518_vm12 = vcmp.ge.f32.partialorder %v2326_v54, 0.0  ;;  %v10095_v15 = vpop.trf.xlu1 }
 0x2a0   : > { %v2709_v61 = vmul.f32 %v9855_v41, %v2324_v62  ;;  %v2325_v26 = vadd.f32 %v9852_v31, %v2126_v40  ;;  %8373 = vmatmul.mubr.bf16.gmra.mrb[40].mxu1 %v3070_v6  ;;  %8280 = vmatprep.mubr.bf16.mxu0 %v10069_v11  ;;  %vm2516_vm13 = vcmp.ge.f32.partialorder %v2324_v62, 0.0  ;;  %14545 = vst [vmem:[#allocation100_spill] sm:$0xff] %v10095_v15 }
 0x2a1   : > { %vm2519_vm14 = vcmp.ge.f32.partialorder %v2327_v51, 0.0  ;;  %v2712_v36 = vmul.f32 %v9855_v41, %v2327_v51  ;;  %v2903_v55 = vsel %vm2518_vm12, %v2326_v54, %v2711_v39  ;;  %v10101_v9 = vpop.trf.xlu0 }
 0x2a2   : > { %vm2517_vm15 = vcmp.ge.f32.partialorder %v2325_v26, 0.0  ;;  %v2710_v4 = vmul.f32 %v9855_v41, %v2325_v26  ;;  %v8174_v43 = vpop.f32.mrb[48].mxu0  ;;  %v2901_v8 = vsel %vm2516_vm13, %v2324_v62, %v2709_v61  ;;  %14546 = vst [vmem:[#allocation101_spill] sm:$0xff] %v10101_v9 }
 0x2a3   : > { %v2131_v6 = vmul.f32 %v8174_v43, %v9849_v25  ;;  %v1499_v40 = vpop.f32.mrb[49].mxu0  ;;  %v2904_v37 = vsel %vm2519_vm14, %v2327_v51, %v2712_v36 }
 0x2a4   : > { %v2129_v20 = vmul.f32 %v9849_v25, %v1499_v40  ;;  %v8175_v49 = vpop.f32.mrb[50].mxu0  ;;  %v2902_v58 = vsel %vm2517_vm15, %v2325_v26, %v2710_v4  ;;  %v3072_v33 = vpack.c.bf16 %v2904_v37, %v2903_v55 }
 0x2a5   : > { %v2330_v18 = vadd.f32 %v9852_v31, %v2131_v6  ;;  %v2132_v59 = vmul.f32 %v8175_v49, %v9849_v25  ;;  %v1502_v43 = vpop.f32.mrb[51].mxu0  ;;  %v3071_v13 = vpack.c.bf16 %v2902_v58, %v2901_v8  ;;  %v10124_v61 = vpop.trf.xlu0 }
 0x2a6   : > { %v2328_v51 = vadd.f32 %v9852_v31, %v2129_v20  ;;  %v2130_v62 = vmul.f32 %v9849_v25, %v1502_v43  ;;  %14547 = vst [vmem:[#allocation102_spill] sm:$0xff] %v10124_v61 }
 0x2a7   : > { %v2715_v26 = vmul.f32 %v9855_v41, %v2330_v18  ;;  %v2331_v49 = vadd.f32 %v9852_v31, %v2132_v59  ;;  %8281 = vmatmul.mubr.bf16.gmra.mrb[156].mxu0 %v10095_v15  ;;  %8376 = vmatprep.mubr.bf16.mxu1 %v3071_v13  ;;  %vm2522_vm0 = vcmp.ge.f32.partialorder %v2330_v18, 0.0 }
 0x2a8   : > { %v2713_v36 = vmul.f32 %v9855_v41, %v2328_v51  ;;  %v2329_v20 = vadd.f32 %v9852_v31, %v2130_v62  ;;  %8377 = vmatmul.mubr.bf16.gmra.mrb[44].mxu1 %v3072_v33  ;;  %8284 = vmatprep.mubr.bf16.mxu0 %v10056_v29  ;;  %vm2520_vm1 = vcmp.ge.f32.partialorder %v2328_v51, 0.0 }
 0x2a9   : > { %vm2523_vm2 = vcmp.ge.f32.partialorder %v2331_v49, 0.0  ;;  %v2716_v58 = vmul.f32 %v9855_v41, %v2331_v49  ;;  %v2907_v62 = vsel %vm2522_vm0, %v2330_v18, %v2715_v26 }
 0x2aa   : > { %vm2521_vm3 = vcmp.ge.f32.partialorder %v2329_v20, 0.0  ;;  %v2714_v59 = vmul.f32 %v9855_v41, %v2329_v20  ;;  %v8178_v6 = vpop.f32.mrb[52].mxu0  ;;  %v2905_v55 = vsel %vm2520_vm1, %v2328_v51, %v2713_v36 }
 0x2ab   : > { %v2135_v33 = vmul.f32 %v8178_v6, %v9849_v25  ;;  %v1515_v43 = vpop.f32.mrb[53].mxu0  ;;  %v2908_v37 = vsel %vm2523_vm2, %v2331_v49, %v2716_v58 }
 0x2ac   : > { %v2133_v39 = vmul.f32 %v9849_v25, %v1515_v43  ;;  %v8179_v1 = vpop.f32.mrb[54].mxu0  ;;  %v2906_v13 = vsel %vm2521_vm3, %v2329_v20, %v2714_v59  ;;  %v3074_v4 = vpack.c.bf16 %v2908_v37, %v2907_v62 }
 0x2ad   : > { %v2334_v8 = vadd.f32 %v9852_v31, %v2135_v33  ;;  %v2136_v40 = vmul.f32 %v8179_v1, %v9849_v25  ;;  %v1518_v6 = vpop.f32.mrb[55].mxu0  ;;  %v3073_v24 = vpack.c.bf16 %v2906_v13, %v2905_v55 }
 0x2ae   : > { %v2332_v49 = vadd.f32 %v9852_v31, %v2133_v39  ;;  %v2134_v58 = vmul.f32 %v9849_v25, %v1518_v6 }
 0x2af   : > { %v2719_v36 = vmul.f32 %v9855_v41, %v2334_v8  ;;  %v2335_v20 = vadd.f32 %v9852_v31, %v2136_v40  ;;  %8285 = vmatmul.mubr.bf16.gmra.mrb[160].mxu0 %v10080_v47  ;;  %8380 = vmatprep.mubr.bf16.mxu1 %v3073_v24  ;;  %vm2526_vm4 = vcmp.ge.f32.partialorder %v2334_v8, 0.0  ;;  %v10146_v40 = vpop.trf.xlu0 }
 0x2b0   : > { %v2717_v55 = vmul.f32 %v9855_v41, %v2332_v49  ;;  %v2333_v39 = vadd.f32 %v9852_v31, %v2134_v58  ;;  %8381 = vmatmul.mubr.bf16.gmra.mrb[48].mxu1 %v3074_v4  ;;  %8288 = vmatprep.mubr.bf16.mxu0 %v10101_v9  ;;  %vm2524_vm5 = vcmp.ge.f32.partialorder %v2332_v49, 0.0  ;;  %14548 = vst [vmem:[#allocation103_spill] sm:$0xff] %v10146_v40 }
 0x2b1   : > { %vm2527_vm6 = vcmp.ge.f32.partialorder %v2335_v20, 0.0  ;;  %v2720_v59 = vmul.f32 %v9855_v41, %v2335_v20  ;;  %v2911_v37 = vsel %vm2526_vm4, %v2334_v8, %v2719_v36 }
 0x2b2   : > { %vm2525_vm7 = vcmp.ge.f32.partialorder %v2333_v39, 0.0  ;;  %v2718_v43 = vmul.f32 %v9855_v41, %v2333_v39  ;;  %v8182_v62 = vpop.f32.mrb[56].mxu0  ;;  %v2909_v1 = vsel %vm2524_vm5, %v2332_v49, %v2717_v55  ;;  %v10189_v49 = vld [vmem:[#allocation10] ss:$0 sm:$0xff] }
 0x2b3   : > { %v2139_v6 = vmul.f32 %v8182_v62, %v9849_v25  ;;  %v1531_v58 = vpop.f32.mrb[57].mxu0  ;;  %v2912_v26 = vsel %vm2527_vm6, %v2335_v20, %v2720_v59  ;;  %v10176_v59 = vpop.trf.xlu1 }
 0x2b4   : > { %v2137_v13 = vmul.f32 %v9849_v25, %v1531_v58  ;;  %v8183_v18 = vpop.f32.mrb[58].mxu0  ;;  %v2910_v24 = vsel %vm2525_vm7, %v2333_v39, %v2718_v43  ;;  %v3076_v54 = vpack.c.bf16 %v2912_v26, %v2911_v37  ;;  %14550 = vst [vmem:[#allocation105_spill] sm:$0xff] %v10176_v59 }
 0x2b5   : > { %v2338_v51 = vadd.f32 %v9852_v31, %v2139_v6  ;;  %v2140_v28 = vmul.f32 %v8183_v18, %v9849_v25  ;;  %v1534_v4 = vpop.f32.mrb[59].mxu0  ;;  %v3075_v35 = vpack.c.bf16 %v2910_v24, %v2909_v1  ;;  %v10168_v18 = vpop.trf.xlu0 }
 0x2b6   : > { %v2336_v36 = vadd.f32 %v9852_v31, %v2137_v13  ;;  %v2138_v20 = vmul.f32 %v9849_v25, %v1534_v4  ;;  %14549 = vst [vmem:[#allocation104_spill] sm:$0xff] %v10168_v18 }
 0x2b7   : > { %v2723_v37 = vmul.f32 %v9855_v41, %v2338_v51  ;;  %v2339_v55 = vadd.f32 %v9852_v31, %v2140_v28  ;;  %8289 = vmatmul.mubr.bf16.gmra.mrb[164].mxu0 %v10124_v61  ;;  %8384 = vmatprep.mubr.bf16.mxu1 %v3075_v35  ;;  %vm2530_vm8 = vcmp.ge.f32.partialorder %v2338_v51, 0.0 }
 0x2b8   : > { %v2721_v39 = vmul.f32 %v9855_v41, %v2336_v36  ;;  %v2337_v25 = vadd.f32 %v9852_v31, %v2138_v20  ;;  %8385 = vmatmul.mubr.bf16.gmra.mrb[52].mxu1 %v3076_v54  ;;  %8292 = vmatprep.mubr.bf16.mxu0 %v10146_v40  ;;  %vm2528_vm9 = vcmp.ge.f32.partialorder %v2336_v36, 0.0  ;;  %v10182_v54 = vld [vmem:[#allocation9] ss:$0 sm:$0xff] }
 0x2b9   : > { %vm2531_vm10 = vcmp.ge.f32.partialorder %v2339_v55, 0.0  ;;  %v2724_v28 = vmul.f32 %v9855_v41, %v2339_v55  ;;  %v2915_v20 = vsel %vm2530_vm8, %v2338_v51, %v2723_v37  ;;  %v10193_v48 = vpop.trf.xlu0 }
 0x2ba   : > { %vm2529_vm11 = vcmp.ge.f32.partialorder %v2337_v25, 0.0  ;;  %v2722_v43 = vmul.f32 %v9855_v41, %v2337_v25  ;;  %v8186_v4 = vpop.f32.mrb[60].mxu0  ;;  %v2913_v26 = vsel %vm2528_vm9, %v2336_v36, %v2721_v39  ;;  %14551 = vst [vmem:[#allocation106_spill] sm:$0xff] %v10193_v48 }
 0x2bb   : > { %v2143_v6 = vmul.f32 %v10182_v54, %v8186_v4  ;;  %v1547_v58 = vpop.f32.mrb[61].mxu0  ;;  %v2916_v8 = vsel %vm2531_vm10, %v2339_v55, %v2724_v28 }
 0x2bc   : > { %v2141_v1 = vmul.f32 %v10182_v54, %v1547_v58  ;;  %v8187_v33 = vpop.f32.mrb[62].mxu0  ;;  %v2914_v24 = vsel %vm2529_vm11, %v2337_v25, %v2722_v43  ;;  %v3078_v35 = vpack.c.bf16 %v2916_v8, %v2915_v20 }
 0x2bd   : > { %v2342_v31 = vadd.f32 %v10189_v49, %v2143_v6  ;;  %v2144_v62 = vmul.f32 %v10182_v54, %v8187_v33  ;;  %v1550_v4 = vpop.f32.mrb[63].mxu0  ;;  %v3077_v57 = vpack.c.bf16 %v2914_v24, %v2913_v26  ;;  %v10204_v26 = vpop.trf.xlu1 }
 0x2be   : > { %v2340_v36 = vadd.f32 %v10189_v49, %v2141_v1  ;;  %v2142_v8 = vmul.f32 %v10182_v54, %v1550_v4  ;;  %14552 = vst [vmem:[#allocation107_spill] sm:$0xff] %v10204_v26  ;;  %v10219_v55 = vpop.trf.xlu0 }
 0x2bf   : > { %v2727_v25 = vmul.f32 %v9855_v41, %v2342_v31  ;;  %v2343_v33 = vadd.f32 %v10189_v49, %v2144_v62  ;;  %8293 = vmatmul.mubr.bf16.gmra.mrb[168].mxu0 %v10168_v18  ;;  %8388 = vmatprep.mubr.bf16.mxu1 %v3077_v57  ;;  %vm2534_vm12 = vcmp.ge.f32.partialorder %v2342_v31, 0.0  ;;  %14553 = vst [vmem:[#allocation108_spill] sm:$0xff] %v10219_v55 }
 0x2c0   : > { %v2725_v1 = vmul.f32 %v9855_v41, %v2340_v36  ;;  %v2341_v24 = vadd.f32 %v10189_v49, %v2142_v8  ;;  %8389 = vmatmul.mubr.bf16.gmra.mrb[56].mxu1 %v3078_v35  ;;  %8296 = vmatprep.mubr.bf16.mxu0 %v10193_v48  ;;  %vm2532_vm13 = vcmp.ge.f32.partialorder %v2340_v36, 0.0 }
 0x2c1   : > { %vm2535_vm14 = vcmp.ge.f32.partialorder %v2343_v33, 0.0  ;;  %v2728_v62 = vmul.f32 %v9855_v41, %v2343_v33  ;;  %v2919_v39 = vsel %vm2534_vm12, %v2342_v31, %v2727_v25  ;;  %v10225_v53 = vpop.trf.xlu1 }
 0x2c2   : > { %vm2533_vm15 = vcmp.ge.f32.partialorder %v2341_v24, 0.0  ;;  %v2726_v58 = vmul.f32 %v9855_v41, %v2341_v24  ;;  %v8190_v20 = vpop.f32.mrb[64].mxu0  ;;  %v2917_v57 = vsel %vm2532_vm13, %v2340_v36, %v2725_v1  ;;  %14554 = vst [vmem:[#allocation109_spill] sm:$0xff] %v10225_v53 }
 0x2c3   : > { %v2147_v35 = vmul.f32 %v10182_v54, %v8190_v20  ;;  %v1563_v8 = vpop.f32.mrb[65].mxu0  ;;  %v2920_v43 = vsel %vm2535_vm14, %v2343_v33, %v2728_v62 }
 0x2c4   : > { %v2145_v37 = vmul.f32 %v10182_v54, %v1563_v8  ;;  %v8191_v28 = vpop.f32.mrb[66].mxu0  ;;  %v2918_v6 = vsel %vm2533_vm15, %v2341_v24, %v2726_v58  ;;  %v3080_v51 = vpack.c.bf16 %v2920_v43, %v2919_v39 }
 0x2c5   : > { %v2346_v3 = vadd.f32 %v10189_v49, %v2147_v35  ;;  %v2148_v4 = vmul.f32 %v10182_v54, %v8191_v28  ;;  %v1566_v20 = vpop.f32.mrb[67].mxu0  ;;  %v3079_v0 = vpack.c.bf16 %v2918_v6, %v2917_v57  ;;  %v10248_v1 = vpop.trf.xlu1 }
 0x2c6   : > { %v2344_v33 = vadd.f32 %v10189_v49, %v2145_v37  ;;  %v2146_v36 = vmul.f32 %v10182_v54, %v1566_v20  ;;  %14555 = vst [vmem:[#allocation110_spill] sm:$0xff] %v10248_v1 }
 0x2c7   : > { %v2731_v24 = vmul.f32 %v9855_v41, %v2346_v3  ;;  %v2347_v28 = vadd.f32 %v10189_v49, %v2148_v4  ;;  %8297 = vmatmul.mubr.bf16.gmra.mrb[172].mxu0 %v10219_v55  ;;  %8392 = vmatprep.mubr.bf16.mxu1 %v3079_v0  ;;  %vm2538_vm0 = vcmp.ge.f32.partialorder %v2346_v3, 0.0 }
 0x2c8   : > { %v2729_v62 = vmul.f32 %v9855_v41, %v2344_v33  ;;  %v2345_v37 = vadd.f32 %v10189_v49, %v2146_v36  ;;  %8393 = vmatmul.mubr.bf16.gmra.mrb[60].mxu1 %v3080_v51  ;;  %8300 = vmatprep.mubr.bf16.mxu0 %v10176_v59  ;;  %vm2536_vm1 = vcmp.ge.f32.partialorder %v2344_v33, 0.0 }
 0x2c9   : > { %vm2539_vm2 = vcmp.ge.f32.partialorder %v2347_v28, 0.0  ;;  %v2732_v6 = vmul.f32 %v9855_v41, %v2347_v28  ;;  %v2923_v36 = vsel %vm2538_vm0, %v2346_v3, %v2731_v24 }
 0x2ca   : > { %vm2537_vm3 = vcmp.ge.f32.partialorder %v2345_v37, 0.0  ;;  %v2730_v4 = vmul.f32 %v9855_v41, %v2345_v37  ;;  %v8194_v35 = vpop.f32.mrb[68].mxu0  ;;  %v2921_v58 = vsel %vm2536_vm1, %v2344_v33, %v2729_v62 }
 0x2cb   : > { %v2151_v51 = vmul.f32 %v10182_v54, %v8194_v35  ;;  %v1579_v20 = vpop.f32.mrb[69].mxu0  ;;  %v2924_v43 = vsel %vm2539_vm2, %v2347_v28, %v2732_v6 }
 0x2cc   : > { %v2149_v39 = vmul.f32 %v10182_v54, %v1579_v20  ;;  %v8195_v25 = vpop.f32.mrb[70].mxu0  ;;  %v2922_v0 = vsel %vm2537_vm3, %v2345_v37, %v2730_v4  ;;  %v3082_v57 = vpack.c.bf16 %v2924_v43, %v2923_v36 }
 0x2cd   : > { %v2350_v13 = vadd.f32 %v10189_v49, %v2151_v51  ;;  %v2152_v8 = vmul.f32 %v10182_v54, %v8195_v25  ;;  %v1582_v35 = vpop.f32.mrb[71].mxu0  ;;  %v3081_v10 = vpack.c.bf16 %v2922_v0, %v2921_v58 }
 0x2ce   : > { %v2348_v6 = vadd.f32 %v10189_v49, %v2149_v39  ;;  %v2150_v20 = vmul.f32 %v10182_v54, %v1582_v35 }
 0x2cf   : > { %v2735_v62 = vmul.f32 %v9855_v41, %v2350_v13  ;;  %v2351_v37 = vadd.f32 %v10189_v49, %v2152_v8  ;;  %8301 = vmatmul.mubr.bf16.gmra.mrb[176].mxu0 %v10204_v26  ;;  %8396 = vmatprep.mubr.bf16.mxu1 %v3081_v10  ;;  %vm2542_vm4 = vcmp.ge.f32.partialorder %v2350_v13, 0.0  ;;  %v10270_v8 = vpop.trf.xlu1 }
 0x2d0   : > { %v2733_v58 = vmul.f32 %v9855_v41, %v2348_v6  ;;  %v2349_v39 = vadd.f32 %v10189_v49, %v2150_v20  ;;  %8397 = vmatmul.mubr.bf16.gmra.mrb[64].mxu1 %v3082_v57  ;;  %8304 = vmatprep.mubr.bf16.mxu0 %v10225_v53  ;;  %vm2540_vm5 = vcmp.ge.f32.partialorder %v2348_v6, 0.0  ;;  %14559 = vst [vmem:[#allocation111_spill] sm:$0xff] %v10270_v8 }
 0x2d1   : > { %vm2543_vm6 = vcmp.ge.f32.partialorder %v2351_v37, 0.0  ;;  %v2736_v51 = vmul.f32 %v9855_v41, %v2351_v37  ;;  %v2927_v4 = vsel %vm2542_vm4, %v2350_v13, %v2735_v62 }
 0x2d2   : > { %vm2541_vm7 = vcmp.ge.f32.partialorder %v2349_v39, 0.0  ;;  %v2734_v43 = vmul.f32 %v9855_v41, %v2349_v39  ;;  %v8198_v28 = vpop.f32.mrb[72].mxu0  ;;  %v2925_v24 = vsel %vm2540_vm5, %v2348_v6, %v2733_v58 }
 0x2d3   : > { %v2155_v20 = vmul.f32 %v10182_v54, %v8198_v28  ;;  %v1595_v3 = vpop.f32.mrb[73].mxu0  ;;  %v2928_v25 = vsel %vm2543_vm6, %v2351_v37, %v2736_v51 }
 0x2d4   : > { %v2153_v31 = vmul.f32 %v10182_v54, %v1595_v3  ;;  %v8199_v33 = vpop.f32.mrb[74].mxu0  ;;  %v2926_v10 = vsel %vm2541_vm7, %v2349_v39, %v2734_v43  ;;  %v3084_v23 = vpack.c.bf16 %v2928_v25, %v2927_v4 }
 0x2d5   : > { %v2354_v17 = vadd.f32 %v10189_v49, %v2155_v20  ;;  %v2156_v14 = vmul.f32 %v10182_v54, %v8199_v33  ;;  %v1598_v57 = vpop.f32.mrb[75].mxu0  ;;  %v3083_v36 = vpack.c.bf16 %v2926_v10, %v2925_v24  ;;  %v10292_v24 = vpop.trf.xlu1 }
 0x2d6   : > { %v2352_v62 = vadd.f32 %v10189_v49, %v2153_v31  ;;  %v2154_v3 = vmul.f32 %v10182_v54, %v1598_v57  ;;  %14564 = vst [vmem:[#allocation112_spill] sm:$0xff] %v10292_v24 }
 0x2d7   : > { %v2739_v25 = vmul.f32 %v9855_v41, %v2354_v17  ;;  %v2355_v58 = vadd.f32 %v10189_v49, %v2156_v14  ;;  %8305 = vmatmul.mubr.bf16.gmra.mrb[180].mxu0 %v10248_v1  ;;  %8400 = vmatprep.mubr.bf16.mxu1 %v3083_v36  ;;  %vm2546_vm8 = vcmp.ge.f32.partialorder %v2354_v17, 0.0 }
 0x2d8   : > { %v2737_v31 = vmul.f32 %v9855_v41, %v2352_v62  ;;  %v2353_v39 = vadd.f32 %v10189_v49, %v2154_v3  ;;  %8401 = vmatmul.mubr.bf16.gmra.mrb[68].mxu1 %v3084_v23  ;;  %8308 = vmatprep.mubr.bf16.mxu0 %v10270_v8  ;;  %vm2544_vm9 = vcmp.ge.f32.partialorder %v2352_v62, 0.0 }
 0x2d9   : > { %vm2547_vm10 = vcmp.ge.f32.partialorder %v2355_v58, 0.0  ;;  %v2740_v14 = vmul.f32 %v9855_v41, %v2355_v58  ;;  %v2931_v0 = vsel %vm2546_vm8, %v2354_v17, %v2739_v25  ;;  %v10310_v10 = vpop.trf.xlu1 }
 0x2da   : > { %vm2545_vm11 = vcmp.ge.f32.partialorder %v2353_v39, 0.0  ;;  %v2738_v20 = vmul.f32 %v9855_v41, %v2353_v39  ;;  %v8202_v13 = vpop.f32.mrb[76].mxu0  ;;  %v2929_v21 = vsel %vm2544_vm9, %v2352_v62, %v2737_v31  ;;  %14568 = vst [vmem:[#allocation113_spill] sm:$0xff] %v10310_v10 }
 0x2db   : > { %v2159_v23 = vmul.f32 %v10182_v54, %v8202_v13  ;;  %v1611_v3 = vpop.f32.mrb[77].mxu0  ;;  %v2932_v37 = vsel %vm2547_vm10, %v2355_v58, %v2740_v14 }
 0x2dc   : > { %v2157_v51 = vmul.f32 %v10182_v54, %v1611_v3  ;;  %v8203_v6 = vpop.f32.mrb[78].mxu0  ;;  %v2930_v35 = vsel %vm2545_vm11, %v2353_v39, %v2738_v20  ;;  %v3086_v36 = vpack.c.bf16 %v2932_v37, %v2931_v0 }
 0x2dd   : > { %v2358_v4 = vadd.f32 %v10189_v49, %v2159_v23  ;;  %v2160_v28 = vmul.f32 %v10182_v54, %v8203_v6  ;;  %v1614_v7 = vpop.f32.mrb[79].mxu0  ;;  %v3085_v33 = vpack.c.bf16 %v2930_v35, %v2929_v21  ;;  %v10334_v57 = vpop.trf.xlu1 }
 0x2de   : > { %v2356_v58 = vadd.f32 %v10189_v49, %v2157_v51  ;;  %v2158_v62 = vmul.f32 %v10182_v54, %v1614_v7  ;;  %14573 = vst [vmem:[#allocation114_spill] sm:$0xff] %v10334_v57 }
 0x2df   : > { %v2743_v39 = vmul.f32 %v9855_v41, %v2358_v4  ;;  %v2359_v6 = vadd.f32 %v10189_v49, %v2160_v28  ;;  %8309 = vmatmul.mubr.bf16.gmra.mrb[184].mxu0 %v10292_v24  ;;  %8404 = vmatprep.mubr.bf16.mxu1 %v3085_v33  ;;  %vm2550_vm12 = vcmp.ge.f32.partialorder %v2358_v4, 0.0 }
 0x2e0   : > { %v2741_v35 = vmul.f32 %v9855_v41, %v2356_v58  ;;  %v2357_v51 = vadd.f32 %v10189_v49, %v2158_v62  ;;  %8405 = vmatmul.mubr.bf16.gmra.mrb[72].mxu1 %v3086_v36  ;;  %8312 = vmatprep.mubr.bf16.mxu0 %v10310_v10  ;;  %vm2548_vm13 = vcmp.ge.f32.partialorder %v2356_v58, 0.0 }
 0x2e1   : > { %vm2551_vm14 = vcmp.ge.f32.partialorder %v2359_v6, 0.0  ;;  %v2744_v20 = vmul.f32 %v9855_v41, %v2359_v6  ;;  %v2935_v0 = vsel %vm2550_vm12, %v2358_v4, %v2743_v39 }
 0x2e2   : > { %vm2549_vm15 = vcmp.ge.f32.partialorder %v2357_v51, 0.0  ;;  %v2742_v3 = vmul.f32 %v9855_v41, %v2357_v51  ;;  %v8206_v21 = vpop.f32.mrb[80].mxu0  ;;  %v2933_v23 = vsel %vm2548_vm13, %v2356_v58, %v2741_v35 }
 0x2e3   : > { %v2163_v36 = vmul.f32 %v10182_v54, %v8206_v21  ;;  %v1627_v62 = vpop.f32.mrb[81].mxu0  ;;  %v2936_v14 = vsel %vm2551_vm14, %v2359_v6, %v2744_v20 }
 0x2e4   : > { %v2161_v25 = vmul.f32 %v10182_v54, %v1627_v62  ;;  %v8207_v13 = vpop.f32.mrb[82].mxu0  ;;  %v2934_v33 = vsel %vm2549_vm15, %v2357_v51, %v2742_v3  ;;  %v3088_v7 = vpack.c.bf16 %v2936_v14, %v2935_v0 }
 0x2e5   : > { %v2362_v43 = vadd.f32 %v10189_v49, %v2163_v36  ;;  %v2164_v31 = vmul.f32 %v10182_v54, %v8207_v13  ;;  %v1630_v21 = vpop.f32.mrb[83].mxu0  ;;  %v3087_v28 = vpack.c.bf16 %v2934_v33, %v2933_v23 }
 0x2e6   : > { %v2360_v20 = vadd.f32 %v10189_v49, %v2161_v25  ;;  %v2162_v62 = vmul.f32 %v10182_v54, %v1630_v21 }
 0x2e7   : > { %v2747_v51 = vmul.f32 %v9855_v41, %v2362_v43  ;;  %v2363_v14 = vadd.f32 %v10189_v49, %v2164_v31  ;;  %8313 = vmatmul.mubr.bf16.gmra.mrb[188].mxu0 %v10334_v57  ;;  %8408 = vmatprep.mubr.bf16.mxu1 %v3087_v28  ;;  %vm2554_vm0 = vcmp.ge.f32.partialorder %v2362_v43, 0.0 }
 0x2e8   : > { %v2745_v23 = vmul.f32 %v9855_v41, %v2360_v20  ;;  %v2361_v25 = vadd.f32 %v10189_v49, %v2162_v62  ;;  %8409 = vmatmul.mubr.bf16.gmra.mrb[76].mxu1 %v3088_v7  ;;  %vm2552_vm1 = vcmp.ge.f32.partialorder %v2360_v20, 0.0 }
 0x2e9   : > { %vm2555_vm2 = vcmp.ge.f32.partialorder %v2363_v14, 0.0  ;;  %v2748_v36 = vmul.f32 %v9855_v41, %v2363_v14  ;;  %v2939_v7 = vsel %vm2554_vm0, %v2362_v43, %v2747_v51 }
 0x2ea   : > { %vm2553_vm3 = vcmp.ge.f32.partialorder %v2361_v25, 0.0  ;;  %v2746_v28 = vmul.f32 %v9855_v41, %v2361_v25  ;;  %v8210_v13 = vpop.f32.mrb[84].mxu0  ;;  %v2937_v35 = vsel %vm2552_vm1, %v2360_v20, %v2745_v23 }
 0x2eb   : > { %v2167_v6 = vmul.f32 %v10182_v54, %v8210_v13  ;;  %v1643_v62 = vpop.f32.mrb[85].mxu0  ;;  %v2940_v3 = vsel %vm2555_vm2, %v2363_v14, %v2748_v36 }
 0x2ec   : > { %v2165_v4 = vmul.f32 %v10182_v54, %v1643_v62  ;;  %v8211_v17 = vpop.f32.mrb[86].mxu0  ;;  %v2938_v39 = vsel %vm2553_vm3, %v2361_v25, %v2746_v28  ;;  %v3090_v21 = vpack.c.bf16 %v2940_v3, %v2939_v7 }
 0x2ed   : > { %v2366_v37 = vadd.f32 %v10189_v49, %v2167_v6  ;;  %v2168_v50 = vmul.f32 %v10182_v54, %v8211_v17  ;;  %v1646_v56 = vpop.f32.mrb[87].mxu0  ;;  %v3089_v58 = vpack.c.bf16 %v2938_v39, %v2937_v35 }
 0x2ee   : > { %v2364_v43 = vadd.f32 %v10189_v49, %v2165_v4  ;;  %v2166_v51 = vmul.f32 %v10182_v54, %v1646_v56 }
 0x2ef   : > { %v2751_v25 = vmul.f32 %v9855_v41, %v2366_v37  ;;  %v2367_v6 = vadd.f32 %v10189_v49, %v2168_v50  ;;  %8412 = vmatprep.mubr.bf16.mxu1 %v3089_v58  ;;  %vm2558_vm4 = vcmp.ge.f32.partialorder %v2366_v37, 0.0 }
 0x2f0   : > { %v2749_v39 = vmul.f32 %v9855_v41, %v2364_v43  ;;  %v2365_v35 = vadd.f32 %v10189_v49, %v2166_v51  ;;  %8413 = vmatmul.mubr.bf16.gmra.mrb[80].mxu1 %v3090_v21  ;;  %vm2556_vm5 = vcmp.ge.f32.partialorder %v2364_v43, 0.0 }
 0x2f1   : > { %vm2559_vm6 = vcmp.ge.f32.partialorder %v2367_v6, 0.0  ;;  %v2752_v56 = vmul.f32 %v9855_v41, %v2367_v6  ;;  %v2943_v21 = vsel %vm2558_vm4, %v2366_v37, %v2751_v25 }
 0x2f2   : > { %vm2557_vm7 = vcmp.ge.f32.partialorder %v2365_v35, 0.0  ;;  %v2750_v50 = vmul.f32 %v9855_v41, %v2365_v35  ;;  %v8214_v58 = vpop.f32.mrb[88].mxu0  ;;  %v2941_v17 = vsel %vm2556_vm5, %v2364_v43, %v2749_v39 }
 0x2f3   : > { %v2171_v23 = vmul.f32 %v10182_v54, %v8214_v58  ;;  %v1659_v51 = vpop.f32.mrb[89].mxu0  ;;  %v2944_v42 = vsel %vm2559_vm6, %v2367_v6, %v2752_v56 }
 0x2f4   : > { %v2169_v3 = vmul.f32 %v10182_v54, %v1659_v51  ;;  %v8215_v13 = vpop.f32.mrb[90].mxu0  ;;  %v2942_v0 = vsel %vm2557_vm7, %v2365_v35, %v2750_v50  ;;  %v3092_v28 = vpack.c.bf16 %v2944_v42, %v2943_v21 }
 0x2f5   : > { %v2370_v31 = vadd.f32 %v10189_v49, %v2171_v23  ;;  %v2172_v4 = vmul.f32 %v10182_v54, %v8215_v13  ;;  %v1662_v33 = vpop.f32.mrb[91].mxu0  ;;  %v3091_v7 = vpack.c.bf16 %v2942_v0, %v2941_v17 }
 0x2f6   : > { %v2368_v37 = vadd.f32 %v10189_v49, %v2169_v3  ;;  %v2170_v25 = vmul.f32 %v10182_v54, %v1662_v33 }
 0x2f7   : > { %v2755_v39 = vmul.f32 %v9855_v41, %v2370_v31  ;;  %v2371_v23 = vadd.f32 %v10189_v49, %v2172_v4  ;;  %8416 = vmatprep.mubr.bf16.mxu1 %v3091_v7  ;;  %vm2562_vm8 = vcmp.ge.f32.partialorder %v2370_v31, 0.0 }
 0x2f8   : > { %v2753_v0 = vmul.f32 %v9855_v41, %v2368_v37  ;;  %v2369_v17 = vadd.f32 %v10189_v49, %v2170_v25  ;;  %8417 = vmatmul.mubr.bf16.gmra.mrb[84].mxu1 %v3092_v28  ;;  %vm2560_vm9 = vcmp.ge.f32.partialorder %v2368_v37, 0.0 }
 0x2f9   : > { %vm2563_vm10 = vcmp.ge.f32.partialorder %v2371_v23, 0.0  ;;  %v2756_v33 = vmul.f32 %v9855_v41, %v2371_v23  ;;  %v2947_v28 = vsel %vm2562_vm8, %v2370_v31, %v2755_v39 }
 0x2fa   : > { %vm2561_vm11 = vcmp.ge.f32.partialorder %v2369_v17, 0.0  ;;  %v2754_v4 = vmul.f32 %v9855_v41, %v2369_v17  ;;  %v8218_v7 = vpop.f32.mrb[92].mxu0  ;;  %v2945_v42 = vsel %vm2560_vm9, %v2368_v37, %v2753_v0 }
 0x2fb   : > { %v2175_v14 = vmul.f32 %v10182_v54, %v8218_v7  ;;  %v1675_v25 = vpop.f32.mrb[93].mxu0  ;;  %v2948_v3 = vsel %vm2563_vm10, %v2371_v23, %v2756_v33 }
 0x2fc   : > { %v2173_v13 = vmul.f32 %v10182_v54, %v1675_v25  ;;  %v8219_v62 = vpop.f32.mrb[94].mxu0  ;;  %v2946_v43 = vsel %vm2561_vm11, %v2369_v17, %v2754_v4  ;;  %v3094_v56 = vpack.c.bf16 %v2948_v3, %v2947_v28 }
 0x2fd   : > { %v2374_v35 = vadd.f32 %v10189_v49, %v2175_v14  ;;  %v2176_v20 = vmul.f32 %v10182_v54, %v8219_v62  ;;  %v1678_v6 = vpop.f32.mrb[95].mxu0  ;;  %v3093_v21 = vpack.c.bf16 %v2946_v43, %v2945_v42 }
 0x2fe   : > { %v2372_v31 = vadd.f32 %v10189_v49, %v2173_v13  ;;  %v2174_v39 = vmul.f32 %v10182_v54, %v1678_v6 }
 0x2ff   : > { %v2759_v17 = vmul.f32 %v9855_v41, %v2374_v35  ;;  %v2375_v14 = vadd.f32 %v10189_v49, %v2176_v20  ;;  %8420 = vmatprep.mubr.bf16.mxu1 %v3093_v21  ;;  %vm2566_vm12 = vcmp.ge.f32.partialorder %v2374_v35, 0.0 }
 0x300   : > { %v2757_v43 = vmul.f32 %v9855_v41, %v2372_v31  ;;  %v2373_v42 = vadd.f32 %v10189_v49, %v2174_v39  ;;  %8421 = vmatmul.mubr.bf16.gmra.mrb[88].mxu1 %v3094_v56  ;;  %vm2564_vm13 = vcmp.ge.f32.partialorder %v2372_v31, 0.0 }
 0x301   : > { %vm2567_vm14 = vcmp.ge.f32.partialorder %v2375_v14, 0.0  ;;  %v2760_v6 = vmul.f32 %v9855_v41, %v2375_v14  ;;  %v2951_v56 = vsel %vm2566_vm12, %v2374_v35, %v2759_v17 }
 0x302   : > { %vm2565_vm15 = vcmp.ge.f32.partialorder %v2373_v42, 0.0  ;;  %v2758_v20 = vmul.f32 %v9855_v41, %v2373_v42  ;;  %v8222_v21 = vpop.f32.mrb[96].mxu0  ;;  %v2949_v36 = vsel %vm2564_vm13, %v2372_v31, %v2757_v43 }
 0x303   : > { %v2179_v62 = vmul.f32 %v10182_v54, %v8222_v21  ;;  %v1691_v39 = vpop.f32.mrb[97].mxu0  ;;  %v2952_v0 = vsel %vm2567_vm14, %v2375_v14, %v2760_v6 }
 0x304   : > { %v2177_v3 = vmul.f32 %v10182_v54, %v1691_v39  ;;  %v8223_v37 = vpop.f32.mrb[98].mxu0  ;;  %v2950_v7 = vsel %vm2565_vm15, %v2373_v42, %v2758_v20  ;;  %v3096_v33 = vpack.c.bf16 %v2952_v0, %v2951_v56 }
 0x305   : > { %v2378_v23 = vadd.f32 %v10189_v49, %v2179_v62  ;;  %v2180_v13 = vmul.f32 %v10182_v54, %v8223_v37  ;;  %v1694_v50 = vpop.f32.mrb[99].mxu0  ;;  %v3095_v28 = vpack.c.bf16 %v2950_v7, %v2949_v36 }
 0x306   : > { %v2376_v35 = vadd.f32 %v10189_v49, %v2177_v3  ;;  %v2178_v17 = vmul.f32 %v10182_v54, %v1694_v50 }
 0x307   : > { %v2763_v43 = vmul.f32 %v9855_v41, %v2378_v23  ;;  %v2379_v62 = vadd.f32 %v10189_v49, %v2180_v13  ;;  %8424 = vmatprep.mubr.bf16.mxu1 %v3095_v28  ;;  %vm2570_vm0 = vcmp.ge.f32.partialorder %v2378_v23, 0.0 }
 0x308   : > { %v2761_v36 = vmul.f32 %v9855_v41, %v2376_v35  ;;  %v2377_v7 = vadd.f32 %v10189_v49, %v2178_v17  ;;  %8425 = vmatmul.mubr.bf16.gmra.mrb[92].mxu1 %v3096_v33  ;;  %vm2568_vm1 = vcmp.ge.f32.partialorder %v2376_v35, 0.0 }
 0x309   : > { %vm2571_vm2 = vcmp.ge.f32.partialorder %v2379_v62, 0.0  ;;  %v2764_v50 = vmul.f32 %v9855_v41, %v2379_v62  ;;  %v2955_v33 = vsel %vm2570_vm0, %v2378_v23, %v2763_v43 }
 0x30a   : > { %vm2569_vm3 = vcmp.ge.f32.partialorder %v2377_v7, 0.0  ;;  %v2762_v13 = vmul.f32 %v9855_v41, %v2377_v7  ;;  %v8226_v28 = vpop.f32.mrb[100].mxu0  ;;  %v2953_v0 = vsel %vm2568_vm1, %v2376_v35, %v2761_v36 }
 0x30b   : > { %v2183_v31 = vmul.f32 %v10182_v54, %v8226_v28  ;;  %v1707_v17 = vpop.f32.mrb[101].mxu0  ;;  %v2956_v3 = vsel %vm2571_vm2, %v2379_v62, %v2764_v50  ;;  %vm5561_vm2 = vcmask 1046528  }
 0x30c   : > { %v2181_v37 = vmul.f32 %v10182_v54, %v1707_v17  ;;  %v8227_v58 = vpop.f32.mrb[102].mxu0  ;;  %v2954_v21 = vsel %vm2569_vm3, %v2377_v7, %v2762_v13  ;;  %v3098_v6 = vpack.c.bf16 %v2956_v3, %v2955_v33  ;;  %vm6329_vm3 = vcmask 1045504  }
 0x30d   : > { %v2382_v42 = vadd.f32 %v10189_v49, %v2183_v31  ;;  %v2184_v4 = vmul.f32 %v10182_v54, %v8227_v58  ;;  %v1710_v14 = vpop.f32.mrb[103].mxu0  ;;  %v3097_v56 = vpack.c.bf16 %v2954_v21, %v2953_v0 }
 0x30e   : > { %v2380_v23 = vadd.f32 %v10189_v49, %v2181_v37  ;;  %v2182_v43 = vmul.f32 %v10182_v54, %v1710_v14 }
 0x30f   : > { %v2767_v36 = vmul.f32 %v9855_v41, %v2382_v42  ;;  %v2383_v31 = vadd.f32 %v10189_v49, %v2184_v4  ;;  %8428 = vmatprep.mubr.bf16.mxu1 %v3097_v56  ;;  %vm2574_vm4 = vcmp.ge.f32.partialorder %v2382_v42, 0.0 }
 0x310   : > { %v2765_v21 = vmul.f32 %v9855_v41, %v2380_v23  ;;  %v2381_v0 = vadd.f32 %v10189_v49, %v2182_v43  ;;  %8429 = vmatmul.mubr.bf16.gmra.mrb[96].mxu1 %v3098_v6  ;;  %vm2572_vm5 = vcmp.ge.f32.partialorder %v2380_v23, 0.0 }
 0x311   : > { %vm2575_vm6 = vcmp.ge.f32.partialorder %v2383_v31, 0.0  ;;  %v2768_v14 = vmul.f32 %v9855_v41, %v2383_v31  ;;  %v2959_v6 = vsel %vm2574_vm4, %v2382_v42, %v2767_v36 }
 0x312   : > { %vm2573_vm7 = vcmp.ge.f32.partialorder %v2381_v0, 0.0  ;;  %v2766_v4 = vmul.f32 %v9855_v41, %v2381_v0  ;;  %v8230_v50 = vpop.f32.mrb[104].mxu0  ;;  %v2957_v62 = vsel %vm2572_vm5, %v2380_v23, %v2765_v21 }
 0x313   : > { %v2187_v56 = vmul.f32 %v10182_v54, %v8230_v50  ;;  %v1723_v17 = vpop.f32.mrb[105].mxu0  ;;  %v2960_v33 = vsel %vm2575_vm6, %v2383_v31, %v2768_v14 }
 0x314   : > { %v2185_v43 = vmul.f32 %v10182_v54, %v1723_v17  ;;  %v8231_v58 = vpop.f32.mrb[106].mxu0  ;;  %v2958_v37 = vsel %vm2573_vm7, %v2381_v0, %v2766_v4  ;;  %v3100_v7 = vpack.c.bf16 %v2960_v33, %v2959_v6 }
 0x315   : > { %v2386_v28 = vadd.f32 %v10189_v49, %v2187_v56  ;;  %v2188_v35 = vmul.f32 %v10182_v54, %v8231_v58  ;;  %v1726_v39 = vpop.f32.mrb[107].mxu0  ;;  %v3099_v13 = vpack.c.bf16 %v2958_v37, %v2957_v62 }
 0x316   : > { %v2384_v42 = vadd.f32 %v10189_v49, %v2185_v43  ;;  %v2186_v36 = vmul.f32 %v10182_v54, %v1726_v39 }
 0x317   : > { %v2771_v21 = vmul.f32 %v9855_v41, %v2386_v28  ;;  %v2387_v0 = vadd.f32 %v10189_v49, %v2188_v35  ;;  %8432 = vmatprep.mubr.bf16.mxu1 %v3099_v13  ;;  %vm2578_vm8 = vcmp.ge.f32.partialorder %v2386_v28, 0.0 }
 0x318   : > { %v2769_v62 = vmul.f32 %v9855_v41, %v2384_v42  ;;  %v2385_v37 = vadd.f32 %v10189_v49, %v2186_v36  ;;  %8433 = vmatmul.mubr.bf16.gmra.mrb[100].mxu1 %v3100_v7  ;;  %vm2576_vm9 = vcmp.ge.f32.partialorder %v2384_v42, 0.0 }
 0x319   : > { %vm2579_vm10 = vcmp.ge.f32.partialorder %v2387_v0, 0.0  ;;  %v2772_v39 = vmul.f32 %v9855_v41, %v2387_v0  ;;  %v2963_v7 = vsel %vm2578_vm8, %v2386_v28, %v2771_v21 }
 0x31a   : > { %vm2577_vm11 = vcmp.ge.f32.partialorder %v2385_v37, 0.0  ;;  %v2770_v35 = vmul.f32 %v9855_v41, %v2385_v37  ;;  %v8234_v13 = vpop.f32.mrb[108].mxu0  ;;  %v2961_v23 = vsel %vm2576_vm9, %v2384_v42, %v2769_v62 }
 0x31b   : > { %v2191_v6 = vmul.f32 %v10182_v54, %v8234_v13  ;;  %v1739_v33 = vpop.f32.mrb[109].mxu0  ;;  %v2964_v43 = vsel %vm2579_vm10, %v2387_v0, %v2772_v39  ;;  %v10517_v39 = vld [vmem:[#allocation13] ss:$0 sm:$0xff] }
 0x31c   : > { %v2189_v36 = vmul.f32 %v10182_v54, %v1739_v33  ;;  %v8235_v14 = vpop.f32.mrb[110].mxu0  ;;  %v2962_v58 = vsel %vm2577_vm11, %v2385_v37, %v2770_v35  ;;  %v3102_v4 = vpack.c.bf16 %v2964_v43, %v2963_v7  ;;  %v10524_v43 = vld [vmem:[#allocation15] ss:$0 sm:$0xff] }
 0x31d   : > { %v2390_v20 = vadd.f32 %v10189_v49, %v2191_v6  ;;  %v2192_v31 = vmul.f32 %v10182_v54, %v8235_v14  ;;  %v1742_v50 = vpop.f32.mrb[111].mxu0  ;;  %v3101_v17 = vpack.c.bf16 %v2962_v58, %v2961_v23 }
 0x31e   : > { %v2388_v28 = vadd.f32 %v10189_v49, %v2189_v36  ;;  %v2190_v21 = vmul.f32 %v10182_v54, %v1742_v50 }
 0x31f   : > { %v2775_v62 = vmul.f32 %v9855_v41, %v2390_v20  ;;  %v2391_v37 = vadd.f32 %v10189_v49, %v2192_v31  ;;  %8436 = vmatprep.mubr.bf16.mxu1 %v3101_v17  ;;  %vm2582_vm12 = vcmp.ge.f32.partialorder %v2390_v20, 0.0 }
 0x320   : > { %v2773_v58 = vmul.f32 %v9855_v41, %v2388_v28  ;;  %v2389_v14 = vadd.f32 %v10189_v49, %v2190_v21  ;;  %8437 = vmatmul.mubr.bf16.gmra.mrb[104].mxu1 %v3102_v4  ;;  %vm2580_vm13 = vcmp.ge.f32.partialorder %v2388_v28, 0.0 }
 0x321   : > { %vm2583_vm14 = vcmp.ge.f32.partialorder %v2391_v37, 0.0  ;;  %v2776_v50 = vmul.f32 %v9855_v41, %v2391_v37  ;;  %v2967_v36 = vsel %vm2582_vm12, %v2390_v20, %v2775_v62  ;;  %v10533_v62 = vld [vmem:[#allocation9] ss:$0 sm:$0xff] }
 0x322   : > { %vm2581_vm15 = vcmp.ge.f32.partialorder %v2389_v14, 0.0  ;;  %v2774_v17 = vmul.f32 %v9855_v41, %v2389_v14  ;;  %v8238_v6 = vpop.f32.mrb[112].mxu0  ;;  %v2965_v35 = vsel %vm2580_vm13, %v2388_v28, %v2773_v58 }
 0x323   : > { %v1755_v4 = vpop.f32.mrb[113].mxu0  ;;  %v8334_v7 = vpop.f32.mrb[0].mxu1  ;;  %v2968_v21 = vsel %vm2583_vm14, %v2391_v37, %v2776_v50  ;;  %v2195_v37 = vmul.f32 %v10533_v62, %v8238_v6 }
 0x324   : > { %v4019_v23 = vmul.f32 %v8334_v7, %v10517_v39  ;;  %v8239_v31 = vpop.f32.mrb[114].mxu0  ;;  %v3243_v0 = vpop.f32.mrb[1].mxu1  ;;  %v2966_v54 = vsel %vm2581_vm15, %v2389_v14, %v2774_v17  ;;  %v3104_v13 = vpack.c.bf16 %v2968_v21, %v2967_v36  ;;  %v2193_v17 = vmul.f32 %v10533_v62, %v1755_v4 }
 0x325   : > { %v4017_v42 = vmul.f32 %v10517_v39, %v3243_v0  ;;  %v1758_v56 = vpop.f32.mrb[115].mxu0  ;;  %v8335_v3 = vpop.f32.mrb[2].mxu1  ;;  %v3103_v59 = vpack.c.bf16 %v2966_v54, %v2965_v35  ;;  %v10541_v7 = vstv %s10510_s2  ;;  %v2196_v21 = vmul.f32 %v10533_v62, %v8239_v31  ;;  %v10556_v35 = vld [vmem:[#allocation10] ss:$0 sm:$0xff]  ;;  %s7577_s2 = scalar_lea.sflag [#allocation5], %s9559_s26 }
 0x326   : > { %v4218_v28 = vadd.f32 %v10524_v43, %v4019_v23  ;;  %v4020_v58 = vmul.f32 %v8335_v3, %v10517_v39  ;;  %v3246_v14 = vpop.f32.mrb[3].mxu1  ;;  %v14600_v23 = vunpack.c.l.bf16 %v9642_v63  ;;  %v14601_v4 = vunpack.c.l.bf16 %v9637_v60 }
 0x327   : > { %v4216_v0 = vadd.f32 %v10524_v43, %v4017_v42  ;;  %8440 = vmatprep.mubr.bf16.mxu1 %v3103_v59  ;;  %v10559_v6 = vadd.f32 %v10556_v35, %v2195_v37  ;;  %v14602_v31 = vunpack.c.h.bf16 %v9642_v63  ;;  %v2194_v37 = vmul.f32 %v10533_v62, %v1758_v56 }
 0x328   : > { %v4602_v36 = vadd.f32 %v14600_v23, %v4218_v28  ;;  %8441 = vmatmul.mubr.bf16.gmra.mrb[108].mxu1 %v3104_v13  ;;  %v4219_v42 = vadd.f32 %v10524_v43, %v4020_v58  ;;  %v10563_v23 = vadd.f32 %v10556_v35, %v2193_v17  ;;  %v4018_v58 = vmul.f32 %v10517_v39, %v3246_v14 }
 0x329   : > { %v4600_v20 = vadd.f32 %v14601_v4, %v4216_v0  ;;  %v10575_v33 = vadd.f32 %v10556_v35, %v2196_v21  ;;  %v10589_v21 = vmul.f32 %v9855_v41, %v10559_v6  ;;  %vm2586_vm6 = vcmp.ge.f32.partialorder %v10559_v6, 0.0 }
 0x32a   : > { %v4987_v13 = vmul.f32 %v10541_v7, %v4602_v36  ;;  %v8242_v28 = vpop.f32.mrb[116].mxu0  ;;  %vm4794_vm0 = vcmp.ge.f32.partialorder %v4602_v36, 0.0  ;;  %v4603_v0 = vadd.f32 %v14602_v31, %v4219_v42  ;;  %v10593_v54 = vmul.f32 %v9855_v41, %v10563_v23 }
 0x32b   : > { %v1771_v4 = vpop.f32.mrb[117].mxu0  ;;  %v8338_v59 = vpop.f32.mrb[4].mxu1  ;;  %v4985_v31 = vmul.f32 %v10541_v7, %v4600_v20  ;;  %vm4792_vm4 = vcmp.ge.f32.partialorder %v4600_v20, 0.0  ;;  %vm2584_vm5 = vcmp.ge.f32.partialorder %v10563_v23, 0.0  ;;  %vm2587_vm7 = vcmp.ge.f32.partialorder %v10575_v33, 0.0 }
 0x32c   : > { %v4023_v49 = vmul.f32 %v8338_v59, %v10517_v39  ;;  %v10572_v50 = vpop.f32.mrb[118].mxu0  ;;  %v3259_v17 = vpop.f32.mrb[5].mxu1  ;;  %vm4795_vm1 = vcmp.ge.f32.partialorder %v4603_v0, 0.0  ;;  %v5179_v42 = vsel %vm4794_vm0, %v4602_v36, %v4987_v13  ;;  %v4988_v56 = vmul.f32 %v10541_v7, %v4603_v0 }
 0x32d   : > { %v10577_v63 = vpop.f32.mrb[119].mxu0  ;;  %v10579_v14 = vpop.f32.mrb[6].mxu1  ;;  %v4217_v59 = vadd.f32 %v10524_v43, %v4018_v58  ;;  %v2393_v36 = vadd.f32 %v10556_v35, %v2194_v37  ;;  %v14603_v58 = vunpack.c.h.bf16 %v9637_v60  ;;  %v4021_v8 = vmul.f32 %v10517_v39, %v3259_v17 }
 0x32e   : > { %v10585_v3 = vpop.f32.mrb[7].mxu1  ;;  %v4222_v10 = vadd.f32 %v10524_v43, %v4023_v49  ;;  %v10599_v13 = vsel %vm4795_vm1, %v4603_v0, %v4988_v56  ;;  %v5565_v24 = vrot.slane %v5179_v42, 1  ;;  %v6333_v53 = vrot.slane %v5179_v42, 2 }
 0x32f   : > { %v4601_v57 = vadd.f32 %v14603_v58, %v4217_v59  ;;  %v14373_v1 = vrot.slane %v10599_v13, 1  ;;  %v14378_v26 = vrot.slane %v10599_v13, 2  ;;  %v10610_v49 = vmul.f32 %v9855_v41, %v10575_v33 }
 0x330   : > { %v5177_v0 = vsel %vm4792_vm4, %v4600_v20, %v4985_v31  ;;  %v2199_v59 = vmul.f32 %v10533_v62, %v8242_v28  ;;  %v14604_v58 = vunpack.c.l.bf16 %v9652_v5  ;;  %v2197_v18 = vmul.f32 %v10533_v62, %v1771_v4 }
 0x331   : > { %vm4793_vm8 = vcmp.ge.f32.partialorder %v4601_v57, 0.0  ;;  %v4986_v60 = vmul.f32 %v10541_v7, %v4601_v57  ;;  %v5568_v17 = vsel %vm5561_vm2, %v5565_v24, %v14373_v1  ;;  %v6336_v56 = vsel %vm6329_vm3, %v6333_v53, %v14378_v26 }
 0x332   : > { %v10613_v37 = vpop.f32.mrb[120].mxu0  ;;  %v10624_v48 = vadd.f32 %v14604_v58, %v4222_v10  ;;  %v6139_v55 = vmax.f32 %v5179_v42, %v5568_v17  ;;  %v4220_v1 = vadd.f32 %v10524_v43, %v4021_v8  ;;  %v5562_v26 = vrot.slane %v5177_v0, 1 }
 0x333   : > { %v10626_v20 = vpop.f32.mrb[121].mxu0  ;;  %v10628_v31 = vpop.f32.mrb[8].mxu1  ;;  %v5178_v40 = vsel %vm4793_vm8, %v4601_v57, %v4986_v60  ;;  %v6330_v28 = vrot.slane %v5177_v0, 2  ;;  %vm2585_vm9 = vcmp.ge.f32.partialorder %v2393_v36, 0.0  ;;  %v2778_v42 = vmul.f32 %v9855_v41, %v2393_v36 }
 0x334   : > { %v10632_v9 = vpop.f32.mrb[122].mxu0  ;;  %v10634_v61 = vpop.f32.mrb[9].mxu1  ;;  %v5563_v29 = vrot.slane %v5178_v40, 1  ;;  %v6331_v47 = vrot.slane %v5178_v40, 2  ;;  %v6907_v57 = vmax.f32 %v6139_v55, %v6336_v56  ;;  %v14605_v4 = vunpack.c.l.bf16 %v9647_v2 }
 0x335   : > { %v10636_v10 = vpop.f32.mrb[123].mxu0  ;;  %v10638_v58 = vpop.f32.mrb[10].mxu1  ;;  %v10650_v45 = vadd.f32 %v10556_v35, %v2199_v59  ;;  %v10653_v55 = vadd.f32 %v10556_v35, %v2197_v18  ;;  %vm4798_vm11 = vcmp.ge.f32.partialorder %v10624_v48, 0.0  ;;  %v4022_v18 = vmul.f32 %v10517_v39, %v10585_v3 }
 0x336   : > { %v4604_v60 = vadd.f32 %v14605_v4, %v4220_v1  ;;  %v10643_v8 = vpop.f32.mrb[11].mxu1  ;;  %v5564_v17 = vsel %vm5561_vm2, %v5562_v26, %v5563_v29  ;;  %v5566_v11 = vsel %vm5561_vm2, %v5563_v29, %v5565_v24  ;;  %v6332_v15 = vsel %vm6329_vm3, %v6330_v28, %v6331_v47  ;;  %7099 = vst [vmem:[#allocation2 + $0x10] sm:$0xff] %v6907_v57 }
 0x337   : > { %v6334_v44 = vsel %vm6329_vm3, %v6331_v47, %v6333_v53  ;;  %v6137_v52 = vmax.f32 %v5177_v0, %v5564_v17  ;;  %v6138_v25 = vmax.f32 %v5178_v40, %v5566_v11  ;;  %v2200_v26 = vmul.f32 %v10533_v62, %v10572_v50 }
 0x338   : > { %vm4796_vm10 = vcmp.ge.f32.partialorder %v4604_v60, 0.0  ;;  %v4989_v29 = vmul.f32 %v10541_v7, %v4604_v60  ;;  %v4991_v53 = vmul.f32 %v10541_v7, %v10624_v48  ;;  %v4024_v11 = vmul.f32 %v10579_v14, %v10517_v39 }
 0x339   : > { %v6905_v1 = vmax.f32 %v6137_v52, %v6332_v15  ;;  %v6906_v24 = vmax.f32 %v6138_v25, %v6334_v44  ;;  %v2969_v50 = vsel %vm2584_vm5, %v10563_v23, %v10593_v54  ;;  %v2970_v44 = vsel %vm2585_vm9, %v2393_v36, %v2778_v42 }
 0x33a   : > { %v10663_v47 = vpop.f32.mrb[124].mxu0  ;;  %v10665_v40 = vsel %vm4796_vm10, %v4604_v60, %v4989_v29  ;;  %v4223_v0 = vadd.f32 %v10524_v43, %v4024_v11  ;;  %v3105_v3 = vpack.c.bf16 %v2970_v44, %v2969_v50  ;;  %v2198_v54 = vmul.f32 %v10533_v62, %v10577_v63 }
 0x33b   : > { %v10674_v52 = vpop.f32.mrb[125].mxu0  ;;  %v10676_v15 = vpop.f32.mrb[12].mxu1  ;;  %7097 = vst [vmem:[#allocation2] sm:$0xff] %v6905_v1  ;;  %7098 = vst [vmem:[#allocation2 + $0x8] sm:$0xff] %v6906_v24  ;;  %v5569_v25 = vrot.slane %v10665_v40, 1  ;;  %v6337_v14 = vrot.slane %v10665_v40, 2  ;;  %v4221_v23 = vadd.f32 %v10524_v43, %v4022_v18  ;;  %v2971_v36 = vsel %vm2586_vm6, %v10559_v6, %v10589_v21 }
 0x33c   : > { %v10681_v56 = vpop.f32.mrb[126].mxu0  ;;  %v10683_v59 = vpop.f32.mrb[13].mxu1  ;;  %v2972_v28 = vsel %vm2587_vm7, %v10575_v33, %v10610_v49  ;;  %v14606_v4 = vrot.slane %v10599_v13, 1  ;;  %v14607_v60 = vrot.slane %v10599_v13, 2  ;;  %v14608_v29 = vunpack.c.h.bf16 %v9652_v5  ;;  %8444 = vmatprep.mubr.bf16.mxu1 %v3105_v3 }
 0x33d   : > { %v10696_v42 = vpop.f32.mrb[127].mxu0  ;;  %v10698_v57 = vpop.f32.mrb[14].mxu1  ;;  %v3106_v21 = vpack.c.bf16 %v2972_v28, %v2971_v36  ;;  %v10712_v33 = vmul.f32 %v9855_v41, %v10650_v45  ;;  %v5183_v49 = vsel %vm4798_vm11, %v10624_v48, %v4991_v53  ;;  %v14609_v11 = vunpack.c.h.bf16 %v9647_v2 }
 0x33e   : > { %v5570_v63 = vsel %vm5561_vm2, %v14606_v4, %v5569_v25  ;;  %v6338_v17 = vsel %vm6329_vm3, %v14607_v60, %v6337_v14  ;;  %v4607_v6 = vadd.f32 %v14608_v29, %v4223_v0  ;;  %v10708_v1 = vpop.f32.mrb[15].mxu1  ;;  %v10721_v5 = vadd.f32 %v10556_v35, %v2200_v26 }
 0x33f   : > { %v6140_v24 = vmax.f32 %v10599_v13, %v5570_v63  ;;  %v4605_v18 = vadd.f32 %v14609_v11, %v4221_v23  ;;  %8445 = vmatmul.mubr.bf16.gmra.mrb[112].mxu1 %v3106_v21  ;;  %v4027_v44 = vmul.f32 %v10628_v31, %v10517_v39  ;;  %vm2588_vm13 = vcmp.ge.f32.partialorder %v10653_v55, 0.0 }
 0x340   : > { %vm4799_vm12 = vcmp.ge.f32.partialorder %v4607_v6, 0.0  ;;  %v4992_v50 = vmul.f32 %v10541_v7, %v4607_v6  ;;  %v10729_v48 = vmul.f32 %v9855_v41, %v10653_v55  ;;  %vm2590_vm15 = vcmp.ge.f32.partialorder %v10650_v45, 0.0 }
 0x341   : > { %v6908_v13 = vmax.f32 %v6140_v24, %v6338_v17  ;;  %vm4797_vm14 = vcmp.ge.f32.partialorder %v4605_v18, 0.0  ;;  %v4990_v2 = vmul.f32 %v10541_v7, %v4605_v18  ;;  %v5573_v26 = vrot.slane %v5183_v49, 1 }
 0x342   : > { %v6341_v53 = vrot.slane %v5183_v49, 2  ;;  %v10733_v0 = vsel %vm4799_vm12, %v4607_v6, %v4992_v50  ;;  %v4226_v3 = vadd.f32 %v10524_v43, %v4027_v44  ;;  %v10736_v23 = vpop.f32.mrb[128].mxu0  ;;  %v2397_v31 = vadd.f32 %v10556_v35, %v2198_v54  ;;  %v7289_v63 = vld [vmem:[#allocation2] ss:$3 sm:$0xff] }
 0x343   : > { %7100 = vst [vmem:[#allocation2 + $0x18] sm:$0xff] %v6908_v13  ;;  %v14399_v36 = vrot.slane %v10733_v0, 1  ;;  %v14402_v28 = vrot.slane %v10733_v0, 2  ;;  %v5182_v4 = vsel %vm4797_vm14, %v4605_v18, %v4990_v2  ;;  %v10741_v60 = vpop.f32.mrb[129].mxu0  ;;  %v10743_v17 = vpop.f32.mrb[16].mxu1  ;;  %vm2591_vm0 = vcmp.ge.f32.partialorder %v10721_v5, 0.0 }
 0x344   : > { %v2784_v29 = vmul.f32 %v9855_v41, %v10721_v5  ;;  %v5571_v6 = vrot.slane %v5182_v4, 1  ;;  %v6339_v21 = vrot.slane %v5182_v4, 2  ;;  %7416 = vxpose.xlu0.b32.start [1/16] (narrow) %v7289_v63, 64  ;;  %v10748_v24 = vpop.f32.mrb[130].mxu0  ;;  %v10750_v54 = vpop.f32.mrb[17].mxu1  ;;  %v2203_v50 = vmul.f32 %v10533_v62, %v10613_v37 }
 0x345   : > { %v5576_v11 = vsel %vm5561_vm2, %v5573_v26, %v14399_v36  ;;  %v6344_v18 = vsel %vm6329_vm3, %v6341_v53, %v14402_v28  ;;  %v14610_v44 = vunpack.c.l.bf16 %v9664_v12  ;;  %v10762_v2 = vpop.f32.mrb[131].mxu0  ;;  %v10764_v63 = vpop.f32.mrb[18].mxu1  ;;  %vm2589_vm1 = vcmp.ge.f32.partialorder %v2397_v31, 0.0 }
 0x346   : > { %v6143_v51 = vmax.f32 %v5183_v49, %v5576_v11  ;;  %v5572_v46 = vsel %vm5561_vm2, %v5569_v25, %v5571_v6  ;;  %v5574_v38 = vsel %vm5561_vm2, %v5571_v6, %v5573_v26  ;;  %v6340_v36 = vsel %vm6329_vm3, %v6337_v14, %v6339_v21  ;;  %v10769_v32 = vpop.f32.mrb[19].mxu1 }
 0x347   : > { %v4610_v13 = vadd.f32 %v14610_v44, %v4226_v3  ;;  %v6141_v28 = vmax.f32 %v10665_v40, %v5572_v46  ;;  %v6142_v30 = vmax.f32 %v5182_v4, %v5574_v38  ;;  %v6342_v37 = vsel %vm6329_vm3, %v6339_v21, %v6341_v53 }
 0x348   : > { %v2201_v3 = vmul.f32 %v10533_v62, %v10626_v20  ;;  %v2782_v44 = vmul.f32 %v9855_v41, %v2397_v31  ;;  %v6911_v49 = vmax.f32 %v6143_v51, %v6344_v18  ;;  %v4025_v25 = vmul.f32 %v10517_v39, %v10634_v61 }
 0x349   : > { %v6909_v26 = vmax.f32 %v6141_v28, %v6340_v36  ;;  %v6910_v6 = vmax.f32 %v6142_v30, %v6342_v37  ;;  %v4995_v14 = vmul.f32 %v10541_v7, %v4610_v13  ;;  %v4028_v46 = vmul.f32 %v10638_v58, %v10517_v39 }
 0x34a   : > { %7103 = vst [vmem:[#allocation2 + $0x30] sm:$0xff] %v6911_v49  ;;  %v10782_v38 = vadd.f32 %v10556_v35, %v2203_v50  ;;  %vm4802_vm4 = vcmp.ge.f32.partialorder %v4610_v13, 0.0  ;;  %v4224_v20 = vadd.f32 %v10524_v43, %v4025_v25  ;;  %v4026_v51 = vmul.f32 %v10517_v39, %v10643_v8  ;;  %v10787_v40 = vpop.f32.mrb[132].mxu0  ;;  %v14611_v8 = vld [vmem:[#allocation28_spill] sm:$0xff] }
 0x34b   : > { %7101 = vst [vmem:[#allocation2 + $0x20] sm:$0xff] %v6909_v26  ;;  %7102 = vst [vmem:[#allocation2 + $0x28] sm:$0xff] %v6910_v6  ;;  %v10790_v30 = vadd.f32 %v10556_v35, %v2201_v3  ;;  %v2204_v61 = vmul.f32 %v10533_v62, %v10632_v9  ;;  %v2202_v58 = vmul.f32 %v10533_v62, %v10636_v10  ;;  %v10797_v36 = vpop.f32.mrb[133].mxu0  ;;  %v10799_v28 = vpop.f32.mrb[20].mxu1  ;;  %v14612_v4 = vunpack.c.l.bf16 %v14611_v8 }
 0x34c   : > { %v4227_v53 = vadd.f32 %v10524_v43, %v4028_v46  ;;  %v4225_v11 = vadd.f32 %v10524_v43, %v4026_v51  ;;  %v2973_v18 = vsel %vm2588_vm13, %v10653_v55, %v10729_v48  ;;  %v2974_v9 = vsel %vm2589_vm1, %v2397_v31, %v2782_v44  ;;  %v10809_v50 = vpop.f32.mrb[134].mxu0  ;;  %v10811_v10 = vpop.f32.mrb[21].mxu1 }
 0x34d   : > { %v4608_v21 = vadd.f32 %v14612_v4, %v4224_v20  ;;  %v5187_v37 = vsel %vm4802_vm4, %v4610_v13, %v4995_v14  ;;  %v14613_v3 = vunpack.c.h.bf16 %v9664_v12  ;;  %v3107_v25 = vpack.c.bf16 %v2974_v9, %v2973_v18  ;;  %v10820_v6 = vpop.f32.mrb[135].mxu0  ;;  %v10822_v55 = vpop.f32.mrb[22].mxu1 }
 0x34e   : > { %v2975_v26 = vsel %vm2590_vm15, %v10650_v45, %v10712_v33  ;;  %14614 = vst [vmem:[#allocation28_spill] sm:$0xff] %v10820_v6  ;;  %v14615_v31 = vunpack.c.h.bf16 %v14611_v8  ;;  %v2976_v12 = vsel %vm2591_vm0, %v10721_v5, %v2784_v29  ;;  %v10830_v13 = vpop.f32.mrb[23].mxu1  ;;  %v10833_v14 = vadd.f32 %v10556_v35, %v2204_v61 }
 0x34f   : > { %v4611_v49 = vadd.f32 %v14613_v3, %v4227_v53  ;;  %vm4800_vm5 = vcmp.ge.f32.partialorder %v4608_v21, 0.0  ;;  %v4993_v48 = vmul.f32 %v10541_v7, %v4608_v21  ;;  %8448 = vmatprep.mubr.bf16.mxu1 %v3107_v25  ;;  %v3108_v33 = vpack.c.bf16 %v2976_v12, %v2975_v26 }
 0x350   : > { %v4609_v44 = vadd.f32 %v14615_v31, %v4225_v11  ;;  %v2401_v20 = vadd.f32 %v10556_v35, %v2202_v58  ;;  %v5581_v53 = vrot.slane %v5187_v37, 1  ;;  %v6349_v29 = vrot.slane %v5187_v37, 2 }
 0x351   : > { %vm4803_vm6 = vcmp.ge.f32.partialorder %v4611_v49, 0.0  ;;  %v4996_v45 = vmul.f32 %v10541_v7, %v4611_v49  ;;  %v5185_v46 = vsel %vm4800_vm5, %v4608_v21, %v4993_v48  ;;  %8449 = vmatmul.mubr.bf16.gmra.mrb[116].mxu1 %v3108_v33  ;;  %vm2594_vm8 = vcmp.ge.f32.partialorder %v10782_v38, 0.0 }
 0x352   : > { %vm4801_vm7 = vcmp.ge.f32.partialorder %v4609_v44, 0.0  ;;  %v4994_v51 = vmul.f32 %v10541_v7, %v4609_v44  ;;  %v5577_v8 = vrot.slane %v5185_v46, 1  ;;  %v6345_v4 = vrot.slane %v5185_v46, 2  ;;  %v7291_v9 = vld [vmem:[#allocation2 + $0x18] ss:$3 sm:$0xff]  ;;  %v10842_v3 = vpop.f32.mrb[136].mxu0 }
 0x353   : > { %v10838_v5 = vsel %vm4803_vm6, %v4611_v49, %v4996_v45  ;;  %14616 = vst [vmem:[#allocation115_spill] sm:$0xff] %v10842_v3  ;;  %v14617_v58 = vrot.slane %v10733_v0, 1  ;;  %v14618_v25 = vrot.slane %v10733_v0, 2  ;;  %7417 = vxpose.xlu0.b32.cont [2/16] (narrow) %v7291_v9, 64  ;;  %v10851_v31 = vpop.f32.mrb[137].mxu0  ;;  %v10853_v12 = vpop.f32.mrb[24].mxu1  ;;  %v2786_v45 = vmul.f32 %v9855_v41, %v2401_v20 }
 0x354   : > { %v14409_v61 = vrot.slane %v10838_v5, 1  ;;  %v14410_v11 = vrot.slane %v10838_v5, 2  ;;  %v5186_v18 = vsel %vm4801_vm7, %v4609_v44, %v4994_v51  ;;  %14619 = vst [vmem:[#allocation116_spill] sm:$0xff] %v10851_v31  ;;  %14620 = vst [vmem:[#allocation117_spill] sm:$0xff] %v10853_v12  ;;  %vm2592_vm9 = vcmp.ge.f32.partialorder %v10790_v30, 0.0 }
 0x355   : > { %v5578_v21 = vsel %vm5561_vm2, %v14617_v58, %v5577_v8  ;;  %v6346_v49 = vsel %vm6329_vm3, %v14618_v25, %v6345_v4  ;;  %v5579_v26 = vrot.slane %v5186_v18, 1  ;;  %v6347_v48 = vrot.slane %v5186_v18, 2  ;;  %v10863_v58 = vpop.f32.mrb[138].mxu0  ;;  %v10865_v25 = vpop.f32.mrb[25].mxu1 }
 0x356   : > { %v6144_v44 = vmax.f32 %v10733_v0, %v5578_v21  ;;  %v5584_v33 = vsel %vm5561_vm2, %v5581_v53, %v14409_v61  ;;  %v6352_v51 = vsel %vm6329_vm3, %v6349_v29, %v14410_v11  ;;  %v10870_v21 = vpop.f32.mrb[139].mxu0  ;;  %v10872_v31 = vpop.f32.mrb[26].mxu1  ;;  %vm2593_vm10 = vcmp.ge.f32.partialorder %v2401_v20, 0.0 }
 0x357   : > { %v6147_v9 = vmax.f32 %v5187_v37, %v5584_v33  ;;  %v5580_v34 = vsel %vm5561_vm2, %v5577_v8, %v5579_v26  ;;  %v5582_v27 = vsel %vm5561_vm2, %v5579_v26, %v5581_v53  ;;  %v6348_v0 = vsel %vm6329_vm3, %v6345_v4, %v6347_v48  ;;  %v10875_v6 = vpop.f32.mrb[27].mxu1 }
 0x358   : > { %v6912_v61 = vmax.f32 %v6144_v44, %v6346_v49  ;;  %v6145_v12 = vmax.f32 %v5185_v46, %v5580_v34  ;;  %v6146_v3 = vmax.f32 %v5186_v18, %v5582_v27  ;;  %v6350_v11 = vsel %vm6329_vm3, %v6347_v48, %v6349_v29 }
 0x359   : > { %v2785_v37 = vmul.f32 %v9855_v41, %v10790_v30  ;;  %v6915_v53 = vmax.f32 %v6147_v9, %v6352_v51  ;;  %v2207_v26 = vmul.f32 %v10533_v62, %v10663_v47  ;;  %v4031_v27 = vmul.f32 %v10676_v15, %v10517_v39 }
 0x35a   : > { %7104 = vst [vmem:[#allocation2 + $0x38] sm:$0xff] %v6912_v61  ;;  %v6913_v8 = vmax.f32 %v6145_v12, %v6348_v0  ;;  %v6914_v4 = vmax.f32 %v6146_v3, %v6350_v11  ;;  %v2787_v34 = vmul.f32 %v9855_v41, %v10782_v38  ;;  %v4029_v46 = vmul.f32 %v10517_v39, %v10683_v59  ;;  %v10897_v18 = vpop.f32.mrb[140].mxu0 }
 0x35b   : > { %7107 = vst [vmem:[#allocation2 + $0x50] sm:$0xff] %v6915_v53  ;;  %v4032_v29 = vmul.f32 %v10698_v57, %v10517_v39  ;;  %v4030_v61 = vmul.f32 %v10517_v39, %v10708_v1  ;;  %vm2595_vm11 = vcmp.ge.f32.partialorder %v10833_v14, 0.0  ;;  %v2788_v47 = vmul.f32 %v9855_v41, %v10833_v14  ;;  %v10905_v49 = vpop.f32.mrb[141].mxu0  ;;  %v10907_v48 = vpop.f32.mrb[28].mxu1 }
 0x35c   : > { %7105 = vst [vmem:[#allocation2 + $0x40] sm:$0xff] %v6913_v8  ;;  %7106 = vst [vmem:[#allocation2 + $0x48] sm:$0xff] %v6914_v4  ;;  %v4230_v15 = vadd.f32 %v10524_v43, %v4031_v27  ;;  %v2978_v11 = vsel %vm2593_vm10, %v2401_v20, %v2786_v45  ;;  %v4228_v59 = vadd.f32 %v10524_v43, %v4029_v46  ;;  %v14621_v44 = vunpack.c.l.bf16 %v9677_v19  ;;  %v10916_v51 = vpop.f32.mrb[142].mxu0  ;;  %v10918_v9 = vpop.f32.mrb[29].mxu1 }
 0x35d   : > { %v4231_v57 = vadd.f32 %v10524_v43, %v4032_v29  ;;  %v4229_v3 = vadd.f32 %v10524_v43, %v4030_v61  ;;  %v2977_v1 = vsel %vm2592_vm9, %v10790_v30, %v2785_v37  ;;  %v10910_v12 = vadd.f32 %v10556_v35, %v2207_v26  ;;  %v10928_v4 = vpop.f32.mrb[143].mxu0  ;;  %v10930_v26 = vpop.f32.mrb[30].mxu1 }
 0x35e   : > { %v2205_v20 = vmul.f32 %v10533_v62, %v10674_v52  ;;  %v4614_v45 = vadd.f32 %v14621_v44, %v4230_v15  ;;  %v3109_v33 = vpack.c.bf16 %v2978_v11, %v2977_v1  ;;  %v2208_v30 = vmul.f32 %v10533_v62, %v10681_v56  ;;  %v10938_v61 = vpop.f32.mrb[31].mxu1 }
 0x35f   : > { %v14622_v0 = vunpack.c.l.bf16 %v9671_v16  ;;  %v2206_v53 = vmul.f32 %v10533_v62, %v10696_v42  ;;  %v14623_v8 = vunpack.c.h.bf16 %v9677_v19  ;;  %v14624_v46 = vunpack.c.h.bf16 %v9671_v16 }
 0x360   : > { %vm4806_vm12 = vcmp.ge.f32.partialorder %v4614_v45, 0.0  ;;  %v4999_v27 = vmul.f32 %v10541_v7, %v4614_v45  ;;  %8452 = vmatprep.mubr.bf16.mxu1 %v3109_v33  ;;  %v2979_v56 = vsel %vm2594_vm8, %v10782_v38, %v2787_v34  ;;  %v2980_v16 = vsel %vm2595_vm11, %v10833_v14, %v2788_v47 }
 0x361   : > { %v4612_v37 = vadd.f32 %v14622_v0, %v4228_v59  ;;  %v4615_v52 = vadd.f32 %v14623_v8, %v4231_v57  ;;  %v4613_v29 = vadd.f32 %v14624_v46, %v4229_v3  ;;  %v10953_v8 = vadd.f32 %v10556_v35, %v2205_v20 }
 0x362   : > { %v5191_v15 = vsel %vm4806_vm12, %v4614_v45, %v4999_v27  ;;  %v10950_v45 = vpop.f32.mrb[144].mxu0  ;;  %v10956_v14 = vadd.f32 %v10556_v35, %v2206_v53  ;;  %v14627_v46 = vrot.slane %v10838_v5, 1  ;;  %vm2598_vm0 = vcmp.ge.f32.partialorder %v10910_v12, 0.0 }
 0x363   : > { %vm4804_vm13 = vcmp.ge.f32.partialorder %v4612_v37, 0.0  ;;  %v4997_v19 = vmul.f32 %v10541_v7, %v4612_v37  ;;  %vm4807_vm14 = vcmp.ge.f32.partialorder %v4615_v52, 0.0  ;;  %v5000_v42 = vmul.f32 %v10541_v7, %v4615_v52  ;;  %v7293_v34 = vld [vmem:[#allocation2 + $0x30] ss:$3 sm:$0xff]  ;;  %v10961_v27 = vpop.f32.mrb[32].mxu1 }
 0x364   : > { %vm4805_vm15 = vcmp.ge.f32.partialorder %v4613_v29, 0.0  ;;  %v4998_v11 = vmul.f32 %v10541_v7, %v4613_v29  ;;  %v5589_v59 = vrot.slane %v5191_v15, 1  ;;  %v6357_v57 = vrot.slane %v5191_v15, 2  ;;  %7418 = vxpose.xlu0.b32.cont [3/16] (narrow) %v7293_v34, 64  ;;  %14626 = vst [vmem:[#allocation119_spill] sm:$0xff] %v10961_v27 }
 0x365   : > { %v5189_v3 = vsel %vm4804_vm13, %v4612_v37, %v4997_v19  ;;  %v10946_v38 = vsel %vm4807_vm14, %v4615_v52, %v5000_v42  ;;  %v3110_v37 = vpack.c.bf16 %v2980_v16, %v2979_v56  ;;  %v10959_v52 = vpop.f32.mrb[145].mxu0  ;;  %v14628_v42 = vrot.slane %v10838_v5, 2  ;;  %v10977_v56 = vpop.f32.mrb[33].mxu1 }
 0x366   : > { %v5585_v1 = vrot.slane %v5189_v3, 1  ;;  %v6353_v44 = vrot.slane %v5189_v3, 2  ;;  %v14411_v33 = vrot.slane %v10946_v38, 1  ;;  %v14412_v0 = vrot.slane %v10946_v38, 2  ;;  %14625 = vst [vmem:[#allocation118_spill] sm:$0xff] %v10959_v52  ;;  %14630 = vst [vmem:[#allocation121_spill] sm:$0xff] %v10977_v56 }
 0x367   : > { %v5190_v47 = vsel %vm4805_vm15, %v4613_v29, %v4998_v11  ;;  %v10975_v29 = vpop.f32.mrb[146].mxu0  ;;  %8453 = vmatmul.mubr.bf16.gmra.mrb[120].mxu1 %v3110_v37  ;;  %vm2596_vm1 = vcmp.ge.f32.partialorder %v10953_v8, 0.0  ;;  %vm2597_vm4 = vcmp.ge.f32.partialorder %v10956_v14, 0.0 }
 0x368   : > { %v5586_v19 = vsel %vm5561_vm2, %v14627_v46, %v5585_v1  ;;  %v6354_v34 = vsel %vm6329_vm3, %v14628_v42, %v6353_v44  ;;  %v5592_v20 = vsel %vm5561_vm2, %v5589_v59, %v14411_v33  ;;  %v6360_v53 = vsel %vm6329_vm3, %v6357_v57, %v14412_v0  ;;  %14629 = vst [vmem:[#allocation120_spill] sm:$0xff] %v10975_v29  ;;  %v10980_v27 = vpop.f32.mrb[147].mxu0  ;;  %v10982_v42 = vpop.f32.mrb[34].mxu1 }
 0x369   : > { %v6148_v11 = vmax.f32 %v10838_v5, %v5586_v19  ;;  %v6151_v16 = vmax.f32 %v5191_v15, %v5592_v20  ;;  %v5587_v46 = vrot.slane %v5190_v47, 1  ;;  %v6355_v52 = vrot.slane %v5190_v47, 2  ;;  %14631 = vst [vmem:[#allocation122_spill] sm:$0xff] %v10980_v27  ;;  %14632 = vst [vmem:[#allocation123_spill] sm:$0xff] %v10982_v42  ;;  %v10990_v56 = vpop.f32.mrb[35].mxu1 }
 0x36a   : > { %v2407_v33 = vadd.f32 %v10556_v35, %v2208_v30  ;;  %v2211_v0 = vmul.f32 %v10533_v62, %v10736_v23  ;;  %v4035_v29 = vmul.f32 %v10743_v17, %v10517_v39  ;;  %v2791_v23 = vmul.f32 %v9855_v41, %v10910_v12 }
 0x36b   : > { %v6916_v5 = vmax.f32 %v6148_v11, %v6354_v34  ;;  %v6919_v15 = vmax.f32 %v6151_v16, %v6360_v53  ;;  %v5588_v37 = vsel %vm5561_vm2, %v5585_v1, %v5587_v46  ;;  %v5590_v19 = vsel %vm5561_vm2, %v5587_v46, %v5589_v59  ;;  %v14634_v16 = vld [vmem:[#allocation29_spill] sm:$0xff] }
 0x36c   : > { %v6149_v20 = vmax.f32 %v5189_v3, %v5588_v37  ;;  %v6150_v27 = vmax.f32 %v5190_v47, %v5590_v19  ;;  %v6356_v42 = vsel %vm6329_vm3, %v6353_v44, %v6355_v52  ;;  %v6358_v30 = vsel %vm6329_vm3, %v6355_v52, %v6357_v57  ;;  %v11006_v47 = vpop.f32.mrb[148].mxu0 }
 0x36d   : > { %v2789_v17 = vmul.f32 %v9855_v41, %v10953_v8  ;;  %7108 = vst [vmem:[#allocation2 + $0x58] sm:$0xff] %v6916_v5  ;;  %v2790_v1 = vmul.f32 %v9855_v41, %v10956_v14  ;;  %7111 = vst [vmem:[#allocation2 + $0x70] sm:$0xff] %v6919_v15  ;;  %v2209_v44 = vmul.f32 %v10533_v62, %v10741_v60  ;;  %v11015_v11 = vpop.f32.mrb[149].mxu0  ;;  %vm2599_vm5 = vcmp.ge.f32.partialorder %v2407_v33, 0.0 }
 0x36e   : > { %v6917_v59 = vmax.f32 %v6149_v20, %v6356_v42  ;;  %v6918_v3 = vmax.f32 %v6150_v27, %v6358_v30  ;;  %v4234_v57 = vadd.f32 %v10524_v43, %v4035_v29  ;;  %v4033_v52 = vmul.f32 %v10517_v39, %v10750_v54  ;;  %14633 = vst [vmem:[#allocation124_spill] sm:$0xff] %v11015_v11  ;;  %v11017_v27 = vpop.f32.mrb[36].mxu1  ;;  %v11025_v42 = vpop.f32.mrb[150].mxu0 }
 0x36f   : > { %v4036_v34 = vmul.f32 %v10764_v63, %v10517_v39  ;;  %v4034_v53 = vmul.f32 %v10517_v39, %v10769_v32  ;;  %v2792_v60 = vmul.f32 %v9855_v41, %v2407_v33  ;;  %v11021_v29 = vadd.f32 %v10556_v35, %v2211_v0  ;;  %14636 = vst [vmem:[#allocation29_spill] sm:$0xff] %v11025_v42  ;;  %v11027_v63 = vpop.f32.mrb[37].mxu1  ;;  %v11034_v19 = vpop.f32.mrb[151].mxu0 }
 0x370   : > { %7109 = vst [vmem:[#allocation2 + $0x60] sm:$0xff] %v6917_v59  ;;  %7110 = vst [vmem:[#allocation2 + $0x68] sm:$0xff] %v6918_v3  ;;  %v14635_v54 = vunpack.c.l.bf16 %v14634_v16  ;;  %v4232_v32 = vadd.f32 %v10524_v43, %v4033_v52  ;;  %v2210_v5 = vmul.f32 %v10533_v62, %v10762_v2  ;;  %v11036_v0 = vpop.f32.mrb[38].mxu1  ;;  %v11039_v20 = vadd.f32 %v10556_v35, %v2209_v44 }
 0x371   : > { %v4235_v15 = vadd.f32 %v10524_v43, %v4036_v34  ;;  %v4233_v37 = vadd.f32 %v10524_v43, %v4034_v53  ;;  %14637 = vst [vmem:[#allocation125_spill] sm:$0xff] %v11034_v19  ;;  %v2982_v59 = vsel %vm2597_vm4, %v10956_v14, %v2790_v1  ;;  %v11045_v3 = vpop.f32.mrb[39].mxu1  ;;  %v2212_v2 = vmul.f32 %v10533_v62, %v10748_v24 }
 0x372   : > { %v4618_v46 = vadd.f32 %v14635_v54, %v4234_v57  ;;  %14638 = vst [vmem:[#allocation126_spill] sm:$0xff] %v11045_v3  ;;  %v14639_v57 = vld [vmem:[#allocation27_spill] sm:$0xff]  ;;  %v14641_v53 = vunpack.c.h.bf16 %v14634_v16  ;;  %v2981_v44 = vsel %vm2596_vm1, %v10953_v8, %v2789_v17  ;;  %v2984_v1 = vsel %vm2599_vm5, %v2407_v33, %v2792_v60  ;;  %v11068_v33 = vpop.f32.mrb[152].mxu0 }
 0x373   : > { %v14640_v52 = vunpack.c.l.bf16 %v14639_v57  ;;  %v14642_v42 = vunpack.c.h.bf16 %v14639_v57  ;;  %v3111_v14 = vpack.c.bf16 %v2982_v59, %v2981_v44  ;;  %v2983_v16 = vsel %vm2598_vm0, %v10910_v12, %v2791_v23 }
 0x374   : > { %vm4810_vm6 = vcmp.ge.f32.partialorder %v4618_v46, 0.0  ;;  %v5003_v30 = vmul.f32 %v10541_v7, %v4618_v46  ;;  %v4619_v54 = vadd.f32 %v14641_v53, %v4235_v15  ;;  %v7295_v3 = vld [vmem:[#allocation2 + $0x48] ss:$3 sm:$0xff]  ;;  %v3112_v15 = vpack.c.bf16 %v2984_v1, %v2983_v16 }
 0x375   : > { %v4616_v34 = vadd.f32 %v14640_v52, %v4232_v32  ;;  %v4617_v11 = vadd.f32 %v14642_v42, %v4233_v37  ;;  %v11061_v32 = vadd.f32 %v10556_v35, %v2210_v5  ;;  %7419 = vxpose.xlu0.b32.cont [4/16] (narrow) %v7295_v3, 64  ;;  %8456 = vmatprep.mubr.bf16.mxu1 %v3111_v14  ;;  %v11070_v5 = vpop.f32.mrb[153].mxu0  ;;  %v11072_v37 = vpop.f32.mrb[40].mxu1  ;;  %vm2602_vm10 = vcmp.ge.f32.partialorder %v11021_v29, 0.0 }
 0x376   : > { %v5195_v19 = vsel %vm4810_vm6, %v4618_v46, %v5003_v30  ;;  %vm4811_vm8 = vcmp.ge.f32.partialorder %v4619_v54, 0.0  ;;  %v5004_v8 = vmul.f32 %v10541_v7, %v4619_v54  ;;  %14643 = vst [vmem:[#allocation27_spill] sm:$0xff] %v11070_v5  ;;  %v11076_v57 = vpop.f32.mrb[154].mxu0  ;;  %v11078_v52 = vpop.f32.mrb[41].mxu1  ;;  %8457 = vmatmul.mubr.bf16.gmra.mrb[124].mxu1 %v3112_v15  ;;  %v14648_v16 = vrot.slane %v10946_v38, 2 }
 0x377   : > { %vm4808_vm7 = vcmp.ge.f32.partialorder %v4616_v34, 0.0  ;;  %v5001_v24 = vmul.f32 %v10541_v7, %v4616_v34  ;;  %vm4809_vm9 = vcmp.ge.f32.partialorder %v4617_v11, 0.0  ;;  %v5002_v17 = vmul.f32 %v10541_v7, %v4617_v11  ;;  %v7297_v3 = vld [vmem:[#allocation2 + $0x60] ss:$3 sm:$0xff]  ;;  %14644 = vst [vmem:[#allocation127_spill] sm:$0xff] %v11076_v57  ;;  %14645 = vst [vmem:[#allocation128_spill] sm:$0xff] %v11078_v52 }
 0x378   : > { %v5597_v60 = vrot.slane %v5195_v19, 1  ;;  %v6365_v46 = vrot.slane %v5195_v19, 2  ;;  %v11074_v23 = vsel %vm4811_vm8, %v4619_v54, %v5004_v8  ;;  %v11082_v1 = vpop.f32.mrb[155].mxu0  ;;  %v11086_v54 = vadd.f32 %v10556_v35, %v2212_v2 }
 0x379   : > { %v5193_v42 = vsel %vm4808_vm7, %v4616_v34, %v5001_v24  ;;  %v5194_v59 = vsel %vm4809_vm9, %v4617_v11, %v5002_v17  ;;  %v14413_v53 = vrot.slane %v11074_v23, 1  ;;  %v14414_v44 = vrot.slane %v11074_v23, 2  ;;  %7420 = vxpose.xlu0.b32.cont [5/16] (narrow) %v7297_v3, 64  ;;  %14646 = vst [vmem:[#allocation129_spill] sm:$0xff] %v11082_v1  ;;  %v11094_v17 = vpop.f32.mrb[42].mxu1 }
 0x37a   : > { %v5593_v30 = vrot.slane %v5193_v42, 1  ;;  %v6361_v12 = vrot.slane %v5193_v42, 2  ;;  %v5595_v34 = vrot.slane %v5194_v59, 1  ;;  %v6363_v14 = vrot.slane %v5194_v59, 2  ;;  %14649 = vst [vmem:[#allocation130_spill] sm:$0xff] %v11094_v17  ;;  %v11104_v1 = vpop.f32.mrb[43].mxu1 }
 0x37b   : > { %v14647_v11 = vrot.slane %v10946_v38, 1  ;;  %v5600_v3 = vsel %vm5561_vm2, %v5597_v60, %v14413_v53  ;;  %v6368_v2 = vsel %vm6329_vm3, %v6365_v46, %v14414_v44  ;;  %14650 = vst [vmem:[#allocation131_spill] sm:$0xff] %v11104_v1  ;;  %v2793_v44 = vmul.f32 %v9855_v41, %v11039_v20 }
 0x37c   : > { %v6362_v8 = vsel %vm6329_vm3, %v14648_v16, %v6361_v12  ;;  %v5596_v57 = vsel %vm5561_vm2, %v5593_v30, %v5595_v34  ;;  %v5598_v52 = vsel %vm5561_vm2, %v5595_v34, %v5597_v60  ;;  %v6364_v17 = vsel %vm6329_vm3, %v6361_v12, %v6363_v14 }
 0x37d   : > { %v5594_v24 = vsel %vm5561_vm2, %v14647_v11, %v5593_v30  ;;  %v6155_v11 = vmax.f32 %v5195_v19, %v5600_v3  ;;  %v6153_v16 = vmax.f32 %v5193_v42, %v5596_v57  ;;  %v6366_v53 = vsel %vm6329_vm3, %v6363_v14, %v6365_v46  ;;  %v11114_v19 = vpop.f32.mrb[156].mxu0 }
 0x37e   : > { %v6152_v15 = vmax.f32 %v10946_v38, %v5594_v24  ;;  %v2794_v38 = vmul.f32 %v9855_v41, %v11061_v32  ;;  %v6154_v24 = vmax.f32 %v5194_v59, %v5598_v52  ;;  %vm2601_vm11 = vcmp.ge.f32.partialorder %v11061_v32, 0.0  ;;  %v11121_v46 = vpop.f32.mrb[157].mxu0  ;;  %v11123_v59 = vpop.f32.mrb[44].mxu1 }
 0x37f   : > { %v6923_v30 = vmax.f32 %v6155_v11, %v6368_v2  ;;  %v6921_v1 = vmax.f32 %v6153_v16, %v6364_v17  ;;  %vm2600_vm12 = vcmp.ge.f32.partialorder %v11039_v20, 0.0  ;;  %v2215_v42 = vmul.f32 %v10533_v62, %v10787_v40 }
 0x380   : > { %v6920_v5 = vmax.f32 %v6152_v15, %v6362_v8  ;;  %v6922_v60 = vmax.f32 %v6154_v24, %v6366_v53  ;;  %v4039_v12 = vmul.f32 %v10799_v28, %v10517_v39  ;;  %v2795_v57 = vmul.f32 %v9855_v41, %v11021_v29  ;;  %v11133_v53 = vpop.f32.mrb[158].mxu0  ;;  %v11135_v28 = vpop.f32.mrb[45].mxu1 }
 0x381   : > { %7115 = vst [vmem:[#allocation2 + $0x90] sm:$0xff] %v6923_v30  ;;  %7113 = vst [vmem:[#allocation2 + $0x80] sm:$0xff] %v6921_v1  ;;  %v4037_v52 = vmul.f32 %v10517_v39, %v10811_v10  ;;  %v4038_v40 = vmul.f32 %v10517_v39, %v10830_v13  ;;  %vm2603_vm13 = vcmp.ge.f32.partialorder %v11086_v54, 0.0  ;;  %v2796_v34 = vmul.f32 %v9855_v41, %v11086_v54  ;;  %v11146_v1 = vpop.f32.mrb[46].mxu1 }
 0x382   : > { %7112 = vst [vmem:[#allocation2 + $0x78] sm:$0xff] %v6920_v5  ;;  %v4040_v5 = vmul.f32 %v10822_v55, %v10517_v39  ;;  %7114 = vst [vmem:[#allocation2 + $0x88] sm:$0xff] %v6922_v60  ;;  %v4238_v14 = vadd.f32 %v10524_v43, %v4039_v12  ;;  %v2986_v10 = vsel %vm2601_vm11, %v11061_v32, %v2794_v38  ;;  %v11144_v55 = vpop.f32.mrb[159].mxu0  ;;  %v11154_v15 = vpop.f32.mrb[47].mxu1  ;;  %v14652_v2 = vunpack.c.l.bf16 %v9683_v22  ;;  %v14655_v60 = vld [vmem:[#allocation28_spill] sm:$0xff] }
 0x383   : > { %14651 = vst [vmem:[#allocation132_spill] sm:$0xff] %v11144_v55  ;;  %v4236_v39 = vadd.f32 %v10524_v43, %v4037_v52  ;;  %v4237_v8 = vadd.f32 %v10524_v43, %v4038_v40  ;;  %v2985_v17 = vsel %vm2600_vm12, %v11039_v20, %v2793_v44  ;;  %v11157_v3 = vadd.f32 %v10556_v35, %v2215_v42  ;;  %v11179_v40 = vpop.f32.mrb[160].mxu0 }
 0x384   : > { %v4239_v13 = vadd.f32 %v10524_v43, %v4040_v5  ;;  %v2213_v32 = vmul.f32 %v10533_v62, %v10797_v36  ;;  %v4622_v11 = vadd.f32 %v14652_v2, %v4238_v14  ;;  %v3113_v16 = vpack.c.bf16 %v2986_v10, %v2985_v17  ;;  %v14653_v43 = vld [vmem:[#allocation30_spill] sm:$0xff] }
 0x385   : > { %v2216_v38 = vmul.f32 %v10533_v62, %v10809_v50  ;;  %v14654_v24 = vunpack.c.l.bf16 %v14653_v43  ;;  %v2214_v20 = vmul.f32 %v10533_v62, %v14655_v60  ;;  %v14656_v44 = vunpack.c.h.bf16 %v9683_v22  ;;  %14658 = vst [vmem:[#allocation30_spill] sm:$0xff] %v11179_v40 }
 0x386   : > { %vm4814_vm14 = vcmp.ge.f32.partialorder %v4622_v11, 0.0  ;;  %v5007_v12 = vmul.f32 %v10541_v7, %v4622_v11  ;;  %v14657_v36 = vunpack.c.h.bf16 %v14653_v43  ;;  %8460 = vmatprep.mubr.bf16.mxu1 %v3113_v16  ;;  %v2987_v50 = vsel %vm2602_vm10, %v11021_v29, %v2795_v57 }
 0x387   : > { %v4620_v30 = vadd.f32 %v14654_v24, %v4236_v39  ;;  %v4623_v42 = vadd.f32 %v14656_v44, %v4239_v13  ;;  %v2988_v10 = vsel %vm2603_vm13, %v11086_v54, %v2796_v34  ;;  %v11185_v39 = vpop.f32.mrb[161].mxu0  ;;  %v11187_v13 = vpop.f32.mrb[48].mxu1  ;;  %v11200_v44 = vadd.f32 %v10556_v35, %v2213_v32 }
 0x388   : > { %v4621_v52 = vadd.f32 %v14657_v36, %v4237_v8  ;;  %v5199_v22 = vsel %vm4814_vm14, %v4622_v11, %v5007_v12  ;;  %14659 = vst [vmem:[#allocation28_spill] sm:$0xff] %v11185_v39  ;;  %14660 = vst [vmem:[#allocation133_spill] sm:$0xff] %v11187_v13  ;;  %v11191_v16 = vpop.f32.mrb[162].mxu0  ;;  %v11193_v11 = vpop.f32.mrb[49].mxu1  ;;  %v3114_v12 = vpack.c.bf16 %v2988_v10, %v2987_v50  ;;  %v14666_v54 = vrot.slane %v11074_v23, 2 }
 0x389   : > { %vm4812_vm15 = vcmp.ge.f32.partialorder %v4620_v30, 0.0  ;;  %v5005_v5 = vmul.f32 %v10541_v7, %v4620_v30  ;;  %vm4815_vm0 = vcmp.ge.f32.partialorder %v4623_v42, 0.0  ;;  %v5008_v62 = vmul.f32 %v10541_v7, %v4623_v42  ;;  %v7299_v2 = vld [vmem:[#allocation2 + $0x78] ss:$3 sm:$0xff]  ;;  %14661 = vst [vmem:[#allocation134_spill] sm:$0xff] %v11191_v16  ;;  %14662 = vst [vmem:[#allocation135_spill] sm:$0xff] %v11193_v11 }
 0x38a   : > { %vm4813_vm1 = vcmp.ge.f32.partialorder %v4621_v52, 0.0  ;;  %v5006_v14 = vmul.f32 %v10541_v7, %v4621_v52  ;;  %v5605_v29 = vrot.slane %v5199_v22, 1  ;;  %v6373_v57 = vrot.slane %v5199_v22, 2  ;;  %7421 = vxpose.xlu0.b32.cont [6/16] (narrow) %v7299_v2, 64  ;;  %v11197_v34 = vpop.f32.mrb[163].mxu0  ;;  %v11206_v36 = vpop.f32.mrb[50].mxu1  ;;  %8461 = vmatmul.mubr.bf16.gmra.mrb[128].mxu1 %v3114_v12 }
 0x38b   : > { %v5197_v8 = vsel %vm4812_vm15, %v4620_v30, %v5005_v5  ;;  %v11189_v17 = vsel %vm4815_vm0, %v4623_v42, %v5008_v62  ;;  %14663 = vst [vmem:[#allocation136_spill] sm:$0xff] %v11197_v34  ;;  %v11203_v30 = vadd.f32 %v10556_v35, %v2214_v20  ;;  %14664 = vst [vmem:[#allocation137_spill] sm:$0xff] %v11206_v36  ;;  %v14665_v5 = vrot.slane %v11074_v23, 1  ;;  %v11227_v34 = vld [vmem:[#allocation9] ss:$0 sm:$0xff]  ;;  %v11237_v11 = vpop.f32.mrb[164].mxu0 }
 0x38c   : > { %v5601_v43 = vrot.slane %v5197_v8, 1  ;;  %v6369_v24 = vrot.slane %v5197_v8, 2  ;;  %v14415_v60 = vrot.slane %v11189_v17, 1  ;;  %v5198_v42 = vsel %vm4813_vm1, %v4621_v52, %v5006_v14  ;;  %v11220_v52 = vpop.f32.mrb[51].mxu1 }
 0x38d   : > { %v14667_v35 = vrot.slane %v11189_v17, 2  ;;  %14668 = vst [vmem:[#allocation138_spill] sm:$0xff] %v11220_v52  ;;  %v5603_v10 = vrot.slane %v5198_v42, 1  ;;  %v6371_v16 = vrot.slane %v5198_v42, 2  ;;  %vm2606_vm4 = vcmp.ge.f32.partialorder %v11157_v3, 0.0  ;;  %v14670_v52 = vld [vmem:[#allocation117_spill] sm:$0xff] }
 0x38e   : > { %v5602_v62 = vsel %vm5561_vm2, %v14665_v5, %v5601_v43  ;;  %v6370_v2 = vsel %vm6329_vm3, %v14666_v54, %v6369_v24  ;;  %v5608_v32 = vsel %vm5561_vm2, %v5605_v29, %v14415_v60  ;;  %v11224_v5 = vld [vmem:[#allocation10] ss:$0 sm:$0xff]  ;;  %v14669_v60 = vld [vmem:[#allocation115_spill] sm:$0xff]  ;;  %v11243_v55 = vpop.f32.mrb[52].mxu1  ;;  %vm2604_vm5 = vcmp.ge.f32.partialorder %v11200_v44, 0.0 }
 0x38f   : > { %v6376_v20 = vsel %vm6329_vm3, %v6373_v57, %v14667_v35  ;;  %v6156_v50 = vmax.f32 %v11074_v23, %v5602_v62  ;;  %v6159_v14 = vmax.f32 %v5199_v22, %v5608_v32  ;;  %v2415_v54 = vadd.f32 %v11224_v5, %v2216_v38  ;;  %v11231_v35 = vld [vmem:[#allocation13] ss:$0 sm:$0xff] }
 0x390   : > { %v2219_v36 = vmul.f32 %v11227_v34, %v14669_v60  ;;  %v4043_v23 = vmul.f32 %v11231_v35, %v14670_v52  ;;  %v5604_v12 = vsel %vm5561_vm2, %v5601_v43, %v5603_v10  ;;  %v5606_v32 = vsel %vm5561_vm2, %v5603_v10, %v5605_v29  ;;  %v11241_v60 = vpop.f32.mrb[165].mxu0  ;;  %v11258_v52 = vld [vmem:[#allocation15] ss:$0 sm:$0xff] }
 0x391   : > { %v6924_v22 = vmax.f32 %v6156_v50, %v6370_v2  ;;  %v6927_v62 = vmax.f32 %v6159_v14, %v6376_v20  ;;  %v6157_v39 = vmax.f32 %v5197_v8, %v5604_v12  ;;  %v6158_v38 = vmax.f32 %v5198_v42, %v5606_v32  ;;  %14671 = vst [vmem:[#allocation115_spill] sm:$0xff] %v11241_v60  ;;  %v11252_v43 = vpop.f32.mrb[166].mxu0  ;;  %v14673_v42 = vld [vmem:[#allocation116_spill] sm:$0xff] }
 0x392   : > { %v6372_v13 = vsel %vm6329_vm3, %v6369_v24, %v6371_v16  ;;  %v6374_v40 = vsel %vm6329_vm3, %v6371_v16, %v6373_v57  ;;  %v2799_v2 = vmul.f32 %v9855_v41, %v11157_v3  ;;  %v2797_v29 = vmul.f32 %v9855_v41, %v11200_v44  ;;  %14672 = vst [vmem:[#allocation117_spill] sm:$0xff] %v11252_v43  ;;  %v11254_v57 = vpop.f32.mrb[53].mxu1  ;;  %v11261_v14 = vpop.f32.mrb[167].mxu0  ;;  %v14676_v12 = vld [vmem:[#allocation32_spill] sm:$0xff] }
 0x393   : > { %7116 = vst [vmem:[#allocation2 + $0x98] sm:$0xff] %v6924_v22  ;;  %v2798_v8 = vmul.f32 %v9855_v41, %v11203_v30  ;;  %7119 = vst [vmem:[#allocation2 + $0xb0] sm:$0xff] %v6927_v62  ;;  %v6925_v16 = vmax.f32 %v6157_v39, %v6372_v13  ;;  %v6926_v24 = vmax.f32 %v6158_v38, %v6374_v40  ;;  %v11263_v10 = vpop.f32.mrb[54].mxu1  ;;  %vm2605_vm6 = vcmp.ge.f32.partialorder %v11203_v30, 0.0 }
 0x394   : > { %v2217_v20 = vmul.f32 %v11227_v34, %v14673_v42  ;;  %v4242_v50 = vadd.f32 %v11258_v52, %v4043_v23  ;;  %14674 = vst [vmem:[#allocation116_spill] sm:$0xff] %v11261_v14  ;;  %v4041_v22 = vmul.f32 %v11231_v35, %v10865_v25  ;;  %v4044_v39 = vmul.f32 %v11231_v35, %v10872_v31  ;;  %v11272_v13 = vpop.f32.mrb[55].mxu1 }
 0x395   : > { %v4042_v40 = vmul.f32 %v11231_v35, %v10875_v6  ;;  %14675 = vst [vmem:[#allocation139_spill] sm:$0xff] %v11272_v13  ;;  %vm2607_vm7 = vcmp.ge.f32.partialorder %v2415_v54, 0.0  ;;  %v2800_v23 = vmul.f32 %v9855_v41, %v2415_v54  ;;  %7117 = vst [vmem:[#allocation2 + $0xa0] sm:$0xff] %v6925_v16  ;;  %v11276_v62 = vadd.f32 %v11224_v5, %v2219_v36 }
 0x396   : > { %7118 = vst [vmem:[#allocation2 + $0xa8] sm:$0xff] %v6926_v24  ;;  %v14677_v32 = vunpack.c.l.bf16 %v14676_v12  ;;  %v4240_v25 = vadd.f32 %v11258_v52, %v4041_v22  ;;  %v2218_v31 = vmul.f32 %v11227_v34, %v10870_v21  ;;  %v4243_v6 = vadd.f32 %v11258_v52, %v4044_v39 }
 0x397   : > { %v4241_v42 = vadd.f32 %v11258_v52, %v4042_v40  ;;  %v11286_v14 = vadd.f32 %v11224_v5, %v2217_v20  ;;  %v2990_v36 = vsel %vm2605_vm6, %v11203_v30, %v2798_v8  ;;  %v2220_v24 = vmul.f32 %v11227_v34, %v10863_v58 }
 0x398   : > { %v4626_v38 = vadd.f32 %v14677_v32, %v4242_v50  ;;  %v14678_v50 = vld [vmem:[#allocation31_spill] sm:$0xff]  ;;  %v14680_v39 = vunpack.c.h.bf16 %v14676_v12  ;;  %v2989_v20 = vsel %vm2604_vm5, %v11200_v44, %v2797_v29  ;;  %v2992_v30 = vsel %vm2607_vm7, %v2415_v54, %v2800_v23 }
 0x399   : > { %v14679_v22 = vunpack.c.l.bf16 %v14678_v50  ;;  %v14681_v43 = vunpack.c.h.bf16 %v14678_v50  ;;  %v3115_v13 = vpack.c.bf16 %v2990_v36, %v2989_v20  ;;  %v11306_v8 = vadd.f32 %v11224_v5, %v2218_v31 }
 0x39a   : > { %vm4818_vm8 = vcmp.ge.f32.partialorder %v4626_v38, 0.0  ;;  %v5011_v16 = vmul.f32 %v10541_v7, %v4626_v38  ;;  %v4627_v32 = vadd.f32 %v14680_v39, %v4243_v6  ;;  %v2991_v12 = vsel %vm2606_vm4, %v11157_v3, %v2799_v2 }
 0x39b   : > { %v4624_v21 = vadd.f32 %v14679_v22, %v4240_v25  ;;  %v4625_v60 = vadd.f32 %v14681_v43, %v4241_v42  ;;  %8464 = vmatprep.mubr.bf16.mxu1 %v3115_v13  ;;  %v3116_v23 = vpack.c.bf16 %v2992_v30, %v2991_v12  ;;  %v11317_v22 = vpop.f32.mrb[168].mxu0  ;;  %vm2610_vm12 = vcmp.ge.f32.partialorder %v11276_v62, 0.0  ;;  %v11331_v30 = vpop.f32.mrb[56].mxu1 }
 0x39c   : > { %v5203_v40 = vsel %vm4818_vm8, %v4626_v38, %v5011_v16  ;;  %vm4819_vm10 = vcmp.ge.f32.partialorder %v4627_v32, 0.0  ;;  %v5012_v44 = vmul.f32 %v10541_v7, %v4627_v32  ;;  %v7301_v25 = vld [vmem:[#allocation2 + $0x90] ss:$3 sm:$0xff]  ;;  %v11321_v13 = vadd.f32 %v11224_v5, %v2220_v24  ;;  %v11329_v20 = vpop.f32.mrb[169].mxu0  ;;  %14685 = vst [vmem:[#allocation31_spill] sm:$0xff] %v11331_v30 }
 0x39d   : > { %vm4816_vm9 = vcmp.ge.f32.partialorder %v4624_v21, 0.0  ;;  %v5009_v58 = vmul.f32 %v10541_v7, %v4624_v21  ;;  %vm4817_vm11 = vcmp.ge.f32.partialorder %v4625_v60, 0.0  ;;  %v5010_v29 = vmul.f32 %v10541_v7, %v4625_v60  ;;  %7422 = vxpose.xlu0.b32.cont [7/16] (narrow) %v7301_v25, 64  ;;  %8465 = vmatmul.mubr.bf16.gmra.mrb[132].mxu1 %v3116_v23  ;;  %14684 = vst [vmem:[#allocation32_spill] sm:$0xff] %v11329_v20  ;;  %v11343_v23 = vpop.f32.mrb[57].mxu1 }
 0x39e   : > { %v5613_v43 = vrot.slane %v5203_v40, 1  ;;  %v6381_v38 = vrot.slane %v5203_v40, 2  ;;  %v11313_v31 = vsel %vm4819_vm10, %v4627_v32, %v5012_v44  ;;  %v11349_v20 = vpop.f32.mrb[58].mxu1  ;;  %vm2609_vm13 = vcmp.ge.f32.partialorder %v11306_v8, 0.0 }
 0x39f   : > { %v5201_v54 = vsel %vm4816_vm9, %v4624_v21, %v5009_v58  ;;  %v5202_v16 = vsel %vm4817_vm11, %v4625_v60, %v5010_v29  ;;  %v14416_v3 = vrot.slane %v11313_v31, 1  ;;  %v14417_v2 = vrot.slane %v11313_v31, 2  ;;  %v11341_v29 = vpop.f32.mrb[170].mxu0 }
 0x3a0   : > { %v5609_v6 = vrot.slane %v5201_v54, 1  ;;  %v6377_v42 = vrot.slane %v5201_v54, 2  ;;  %v5611_v36 = vrot.slane %v5202_v16, 1  ;;  %v6379_v50 = vrot.slane %v5202_v16, 2  ;;  %14686 = vst [vmem:[#allocation140_spill] sm:$0xff] %v11341_v29  ;;  %v11354_v29 = vpop.f32.mrb[59].mxu1 }
 0x3a1   : > { %v14682_v21 = vrot.slane %v11189_v17, 1  ;;  %v14683_v60 = vrot.slane %v11189_v17, 2  ;;  %v5616_v12 = vsel %vm5561_vm2, %v5613_v43, %v14416_v3  ;;  %v6384_v24 = vsel %vm6329_vm3, %v6381_v38, %v14417_v2 }
 0x3a2   : > { %v5612_v44 = vsel %vm5561_vm2, %v5609_v6, %v5611_v36  ;;  %v6163_v25 = vmax.f32 %v5203_v40, %v5616_v12  ;;  %v2802_v2 = vmul.f32 %v9855_v41, %v11306_v8  ;;  %v2801_v40 = vmul.f32 %v9855_v41, %v11286_v14 }
 0x3a3   : > { %v5610_v39 = vsel %vm5561_vm2, %v14682_v21, %v5609_v6  ;;  %v6378_v32 = vsel %vm6329_vm3, %v14683_v60, %v6377_v42  ;;  %v5614_v21 = vsel %vm5561_vm2, %v5611_v36, %v5613_v43  ;;  %v6161_v60 = vmax.f32 %v5201_v54, %v5612_v44  ;;  %v14687_v44 = vld [vmem:[#allocation36_spill] sm:$0xff] }
 0x3a4   : > { %v6160_v58 = vmax.f32 %v11189_v17, %v5610_v39  ;;  %v6380_v17 = vsel %vm6329_vm3, %v6377_v42, %v6379_v50  ;;  %v11347_v39 = vpop.f32.mrb[171].mxu0  ;;  %v6162_v30 = vmax.f32 %v5202_v16, %v5614_v21  ;;  %v6382_v6 = vsel %vm6329_vm3, %v6379_v50, %v6381_v38 }
 0x3a5   : > { %v6931_v43 = vmax.f32 %v6163_v25, %v6384_v24  ;;  %v6929_v54 = vmax.f32 %v6161_v60, %v6380_v17  ;;  %vm2608_vm14 = vcmp.ge.f32.partialorder %v11286_v14, 0.0  ;;  %v2223_v36 = vmul.f32 %v11227_v34, %v10897_v18  ;;  %v14689_v60 = vld [vmem:[#allocation34_spill] sm:$0xff] }
 0x3a6   : > { %v6928_v3 = vmax.f32 %v6160_v58, %v6378_v32  ;;  %v6930_v42 = vmax.f32 %v6162_v30, %v6382_v6  ;;  %v4047_v16 = vmul.f32 %v11231_v35, %v10907_v48  ;;  %v2803_v38 = vmul.f32 %v9855_v41, %v11276_v62 }
 0x3a7   : > { %7123 = vst [vmem:[#allocation2 + $0xd0] sm:$0xff] %v6931_v43  ;;  %7121 = vst [vmem:[#allocation2 + $0xc0] sm:$0xff] %v6929_v54  ;;  %v4045_v50 = vmul.f32 %v11231_v35, %v10918_v9  ;;  %v4048_v32 = vmul.f32 %v11231_v35, %v10930_v26  ;;  %vm2611_vm15 = vcmp.ge.f32.partialorder %v11321_v13, 0.0  ;;  %v2804_v18 = vmul.f32 %v9855_v41, %v11321_v13 }
 0x3a8   : > { %7120 = vst [vmem:[#allocation2 + $0xb8] sm:$0xff] %v6928_v3  ;;  %v4046_v3 = vmul.f32 %v11231_v35, %v10938_v61  ;;  %7122 = vst [vmem:[#allocation2 + $0xc8] sm:$0xff] %v6930_v42  ;;  %v4246_v48 = vadd.f32 %v11258_v52, %v4047_v16  ;;  %v2994_v30 = vsel %vm2609_vm13, %v11306_v8, %v2802_v2  ;;  %v14688_v25 = vunpack.c.l.bf16 %v14687_v44 }
 0x3a9   : > { %v4244_v9 = vadd.f32 %v11258_v52, %v4045_v50  ;;  %v4247_v58 = vadd.f32 %v11258_v52, %v4048_v32  ;;  %v2993_v61 = vsel %vm2608_vm14, %v11286_v14, %v2801_v40  ;;  %v11386_v12 = vadd.f32 %v11224_v5, %v2223_v36 }
 0x3aa   : > { %v4245_v26 = vadd.f32 %v11258_v52, %v4046_v3  ;;  %v2221_v24 = vmul.f32 %v11227_v34, %v10905_v49  ;;  %v4630_v21 = vadd.f32 %v14688_v25, %v4246_v48  ;;  %v3117_v8 = vpack.c.bf16 %v2994_v30, %v2993_v61 }
 0x3ab   : > { %v2224_v2 = vmul.f32 %v11227_v34, %v10916_v51  ;;  %v14690_v17 = vunpack.c.l.bf16 %v14689_v60  ;;  %v2222_v43 = vmul.f32 %v11227_v34, %v10928_v4  ;;  %v14691_v14 = vunpack.c.h.bf16 %v14687_v44  ;;  %v11416_v44 = vpop.f32.mrb[172].mxu0 }
 0x3ac   : > { %vm4822_vm0 = vcmp.ge.f32.partialorder %v4630_v21, 0.0  ;;  %v5015_v54 = vmul.f32 %v10541_v7, %v4630_v21  ;;  %v14692_v49 = vunpack.c.h.bf16 %v14689_v60  ;;  %8468 = vmatprep.mubr.bf16.mxu1 %v3117_v8  ;;  %v2995_v51 = vsel %vm2610_vm12, %v11276_v62, %v2803_v38  ;;  %v11422_v60 = vpop.f32.mrb[173].mxu0 }
 0x3ad   : > { %v4628_v6 = vadd.f32 %v14690_v17, %v4244_v9  ;;  %v4631_v40 = vadd.f32 %v14691_v14, %v4247_v58  ;;  %v2996_v3 = vsel %vm2611_vm15, %v11321_v13, %v2804_v18  ;;  %v11419_v25 = vadd.f32 %v11224_v5, %v2221_v24  ;;  %14693 = vst [vmem:[#allocation36_spill] sm:$0xff] %v11422_v60  ;;  %v11424_v17 = vpop.f32.mrb[60].mxu1 }
 0x3ae   : > { %v4629_v42 = vadd.f32 %v14692_v49, %v4245_v26  ;;  %v5207_v50 = vsel %vm4822_vm0, %v4630_v21, %v5015_v54  ;;  %v2421_v21 = vadd.f32 %v11224_v5, %v2222_v43  ;;  %v3118_v18 = vpack.c.bf16 %v2996_v3, %v2995_v51  ;;  %v11438_v49 = vpop.f32.mrb[174].mxu0 }
 0x3af   : > { %vm4820_vm1 = vcmp.ge.f32.partialorder %v4628_v6, 0.0  ;;  %v5013_v36 = vmul.f32 %v10541_v7, %v4628_v6  ;;  %vm4823_vm4 = vcmp.ge.f32.partialorder %v4631_v40, 0.0  ;;  %v5016_v4 = vmul.f32 %v10541_v7, %v4631_v40  ;;  %v7303_v16 = vld [vmem:[#allocation2 + $0xa8] ss:$3 sm:$0xff]  ;;  %v7305_v8 = vld [vmem:[#allocation2 + $0xc0] ss:$3 sm:$0xff] }
 0x3b0   : > { %vm4821_vm5 = vcmp.ge.f32.partialorder %v4629_v42, 0.0  ;;  %v5014_v32 = vmul.f32 %v10541_v7, %v4629_v42  ;;  %7423 = vxpose.xlu0.b32.cont [8/16] (narrow) %v7303_v16, 64  ;;  %v5621_v48 = vrot.slane %v5207_v50, 1  ;;  %v6389_v30 = vrot.slane %v5207_v50, 2  ;;  %14696 = vst [vmem:[#allocation34_spill] sm:$0xff] %v11438_v49  ;;  %8469 = vmatmul.mubr.bf16.gmra.mrb[136].mxu1 %v3118_v18 }
 0x3b1   : > { %v5205_v9 = vsel %vm4820_vm1, %v4628_v6, %v5013_v36  ;;  %v11412_v62 = vsel %vm4823_vm4, %v4631_v40, %v5016_v4  ;;  %v14694_v6 = vrot.slane %v11313_v31, 1  ;;  %v14695_v40 = vrot.slane %v11313_v31, 2 }
 0x3b2   : > { %v5617_v38 = vrot.slane %v5205_v9, 1  ;;  %v6385_v58 = vrot.slane %v5205_v9, 2  ;;  %v14419_v26 = vrot.slane %v11412_v62, 1  ;;  %v14418_v61 = vrot.slane %v11412_v62, 2 }
 0x3b3   : > { %v5206_v13 = vsel %vm4821_vm5, %v4629_v42, %v5014_v32  ;;  %v11440_v42 = vpop.f32.mrb[61].mxu1  ;;  %v11443_v32 = vpop.f32.mrb[175].mxu0  ;;  %vm2614_vm6 = vcmp.ge.f32.partialorder %v11386_v12, 0.0  ;;  %vm2612_vm7 = vcmp.ge.f32.partialorder %v11419_v25, 0.0  ;;  %vm2613_vm8 = vcmp.ge.f32.partialorder %v2421_v21, 0.0 }
 0x3b4   : > { %v5618_v14 = vsel %vm5561_vm2, %v14694_v6, %v5617_v38  ;;  %v6386_v54 = vsel %vm6329_vm3, %v14695_v40, %v6385_v58  ;;  %v5624_v24 = vsel %vm5561_vm2, %v5621_v48, %v14419_v26  ;;  %v6392_v43 = vsel %vm6329_vm3, %v6389_v30, %v14418_v61  ;;  %7424 = vxpose.xlu0.b32.cont [9/16] (narrow) %v7305_v8, 64  ;;  %v11445_v3 = vpop.f32.mrb[62].mxu1  ;;  %v14698_v40 = vld [vmem:[#allocation119_spill] sm:$0xff] }
 0x3b5   : > { %v6164_v51 = vmax.f32 %v11313_v31, %v5618_v14  ;;  %v6167_v36 = vmax.f32 %v5207_v50, %v5624_v24  ;;  %v5619_v4 = vrot.slane %v5206_v13, 1  ;;  %v6387_v16 = vrot.slane %v5206_v13, 2  ;;  %14697 = vst [vmem:[#allocation141_spill] sm:$0xff] %v11443_v32  ;;  %v11453_v26 = vpop.f32.mrb[63].mxu1 }
 0x3b6   : > { %v2423_v6 = vadd.f32 %v11224_v5, %v2224_v2  ;;  %v2227_v8 = vmul.f32 %v11227_v34, %v10950_v45  ;;  %v4051_v61 = vmul.f32 %v11231_v35, %v14698_v40  ;;  %v2807_v45 = vmul.f32 %v9855_v41, %v11386_v12 }
 0x3b7   : > { %v6932_v31 = vmax.f32 %v6164_v51, %v6386_v54  ;;  %v6935_v50 = vmax.f32 %v6167_v36, %v6392_v43  ;;  %v5620_v18 = vsel %vm5561_vm2, %v5617_v38, %v5619_v4  ;;  %v5622_v14 = vsel %vm5561_vm2, %v5619_v4, %v5621_v48  ;;  %v14701_v51 = vld [vmem:[#allocation123_spill] sm:$0xff] }
 0x3b8   : > { %v6165_v24 = vmax.f32 %v5205_v9, %v5620_v18  ;;  %v6166_v32 = vmax.f32 %v5206_v13, %v5622_v14  ;;  %v6388_v49 = vsel %vm6329_vm3, %v6385_v58, %v6387_v16  ;;  %v6390_v2 = vsel %vm6329_vm3, %v6387_v16, %v6389_v30  ;;  %v14699_v9 = vld [vmem:[#allocation118_spill] sm:$0xff]  ;;  %v14700_v30 = vld [vmem:[#allocation121_spill] sm:$0xff] }
 0x3b9   : > { %v2805_v40 = vmul.f32 %v9855_v41, %v11419_v25  ;;  %7124 = vst [vmem:[#allocation2 + $0xd8] sm:$0xff] %v6932_v31  ;;  %v2806_v54 = vmul.f32 %v9855_v41, %v2421_v21  ;;  %7127 = vst [vmem:[#allocation2 + $0xf0] sm:$0xff] %v6935_v50  ;;  %v2225_v13 = vmul.f32 %v11227_v34, %v14699_v9  ;;  %vm2615_vm9 = vcmp.ge.f32.partialorder %v2423_v6, 0.0  ;;  %v14704_v18 = vld [vmem:[#allocation122_spill] sm:$0xff] }
 0x3ba   : > { %v6933_v38 = vmax.f32 %v6165_v24, %v6388_v49  ;;  %v6934_v48 = vmax.f32 %v6166_v32, %v6390_v2  ;;  %v4250_v58 = vadd.f32 %v11258_v52, %v4051_v61  ;;  %v4049_v43 = vmul.f32 %v11231_v35, %v14700_v30  ;;  %v14702_v32 = vld [vmem:[#allocation35_spill] sm:$0xff] }
 0x3bb   : > { %v4052_v36 = vmul.f32 %v11231_v35, %v14701_v51  ;;  %v4050_v4 = vmul.f32 %v11231_v35, %v10990_v56  ;;  %v2808_v16 = vmul.f32 %v9855_v41, %v2423_v6  ;;  %v11476_v49 = vadd.f32 %v11224_v5, %v2227_v8 }
 0x3bc   : > { %7125 = vst [vmem:[#allocation2 + $0xe0] sm:$0xff] %v6933_v38  ;;  %7126 = vst [vmem:[#allocation2 + $0xe8] sm:$0xff] %v6934_v48  ;;  %v14703_v61 = vunpack.c.l.bf16 %v14702_v32  ;;  %v4248_v50 = vadd.f32 %v11258_v52, %v4049_v43  ;;  %v2226_v14 = vmul.f32 %v11227_v34, %v14704_v18  ;;  %v11486_v2 = vadd.f32 %v11224_v5, %v2225_v13  ;;  %v14705_v48 = vld [vmem:[#allocation120_spill] sm:$0xff] }
 0x3bd   : > { %v4251_v24 = vadd.f32 %v11258_v52, %v4052_v36  ;;  %v4249_v56 = vadd.f32 %v11258_v52, %v4050_v4  ;;  %v2998_v8 = vsel %vm2613_vm8, %v2421_v21, %v2806_v54  ;;  %v2228_v9 = vmul.f32 %v11227_v34, %v14705_v48 }
 0x3be   : > { %v4634_v31 = vadd.f32 %v14703_v61, %v4250_v58  ;;  %v14706_v58 = vld [vmem:[#allocation33_spill] sm:$0xff]  ;;  %v14708_v51 = vunpack.c.h.bf16 %v14702_v32  ;;  %v2997_v36 = vsel %vm2612_vm7, %v11419_v25, %v2805_v40  ;;  %v3000_v21 = vsel %vm2615_vm9, %v2423_v6, %v2808_v16 }
 0x3bf   : > { %v14707_v30 = vunpack.c.l.bf16 %v14706_v58  ;;  %v14709_v4 = vunpack.c.h.bf16 %v14706_v58  ;;  %v3119_v60 = vpack.c.bf16 %v2998_v8, %v2997_v36  ;;  %v11504_v48 = vadd.f32 %v11224_v5, %v2226_v14 }
 0x3c0   : > { %vm4826_vm10 = vcmp.ge.f32.partialorder %v4634_v31, 0.0  ;;  %v5019_v38 = vmul.f32 %v10541_v7, %v4634_v31  ;;  %v4635_v61 = vadd.f32 %v14708_v51, %v4251_v24  ;;  %v2999_v32 = vsel %vm2614_vm6, %v11386_v12, %v2807_v45  ;;  %v11515_v51 = vpop.f32.mrb[176].mxu0 }
 0x3c1   : > { %v4632_v43 = vadd.f32 %v14707_v30, %v4248_v50  ;;  %v4633_v18 = vadd.f32 %v14709_v4, %v4249_v56  ;;  %8472 = vmatprep.mubr.bf16.mxu1 %v3119_v60  ;;  %v3120_v16 = vpack.c.bf16 %v3000_v21, %v2999_v32  ;;  %vm2618_vm14 = vcmp.ge.f32.partialorder %v11476_v49, 0.0  ;;  %v11529_v21 = vpop.f32.mrb[64].mxu1 }
 0x3c2   : > { %v5211_v13 = vsel %vm4826_vm10, %v4634_v31, %v5019_v38  ;;  %vm4827_vm12 = vcmp.ge.f32.partialorder %v4635_v61, 0.0  ;;  %v5020_v25 = vmul.f32 %v10541_v7, %v4635_v61  ;;  %v11519_v60 = vadd.f32 %v11224_v5, %v2228_v9  ;;  %14713 = vst [vmem:[#allocation118_spill] sm:$0xff] %v11529_v21 }
 0x3c3   : > { %vm4824_vm11 = vcmp.ge.f32.partialorder %v4632_v43, 0.0  ;;  %v5017_v54 = vmul.f32 %v10541_v7, %v4632_v43  ;;  %vm4825_vm13 = vcmp.ge.f32.partialorder %v4633_v18, 0.0  ;;  %v5018_v40 = vmul.f32 %v10541_v7, %v4633_v18  ;;  %v7307_v24 = vld [vmem:[#allocation2 + $0xd8] ss:$3 sm:$0xff]  ;;  %8473 = vmatmul.mubr.bf16.gmra.mrb[140].mxu1 %v3120_v16  ;;  %v11541_v16 = vpop.f32.mrb[65].mxu1 }
 0x3c4   : > { %v5629_v31 = vrot.slane %v5211_v13, 1  ;;  %v6397_v50 = vrot.slane %v5211_v13, 2  ;;  %v11511_v14 = vsel %vm4827_vm12, %v4635_v61, %v5020_v25  ;;  %7425 = vxpose.xlu0.b32.cont [10/16] (narrow) %v7307_v24, 64  ;;  %v14711_v36 = vrot.slane %v11412_v62, 2  ;;  %v11547_v21 = vpop.f32.mrb[66].mxu1 }
 0x3c5   : > { %v5209_v6 = vsel %vm4824_vm11, %v4632_v43, %v5017_v54  ;;  %v5210_v8 = vsel %vm4825_vm13, %v4633_v18, %v5018_v40  ;;  %v14420_v12 = vrot.slane %v11511_v14, 1  ;;  %v14421_v45 = vrot.slane %v11511_v14, 2  ;;  %v11527_v18 = vpop.f32.mrb[177].mxu0 }
 0x3c6   : > { %v5625_v56 = vrot.slane %v5209_v6, 1  ;;  %v6393_v38 = vrot.slane %v5209_v6, 2  ;;  %v5627_v58 = vrot.slane %v5210_v8, 1  ;;  %v6395_v30 = vrot.slane %v5210_v8, 2  ;;  %14712 = vst [vmem:[#allocation119_spill] sm:$0xff] %v11527_v18  ;;  %v11539_v40 = vpop.f32.mrb[178].mxu0 }
 0x3c7   : > { %v14710_v43 = vrot.slane %v11412_v62, 1  ;;  %v5632_v32 = vsel %vm5561_vm2, %v5629_v31, %v14420_v12  ;;  %v6400_v9 = vsel %vm6329_vm3, %v6397_v50, %v14421_v45  ;;  %14714 = vst [vmem:[#allocation121_spill] sm:$0xff] %v11539_v40  ;;  %v2810_v45 = vmul.f32 %v9855_v41, %v11504_v48  ;;  %v11552_v40 = vpop.f32.mrb[67].mxu1 }
 0x3c8   : > { %v6394_v4 = vsel %vm6329_vm3, %v14711_v36, %v6393_v38  ;;  %v5628_v25 = vsel %vm5561_vm2, %v5625_v56, %v5627_v58  ;;  %v6171_v24 = vmax.f32 %v5211_v13, %v5632_v32  ;;  %v2809_v13 = vmul.f32 %v9855_v41, %v11486_v2 }
 0x3c9   : > { %v5626_v61 = vsel %vm5561_vm2, %v14710_v43, %v5625_v56  ;;  %v5630_v43 = vsel %vm5561_vm2, %v5627_v58, %v5629_v31  ;;  %v6169_v36 = vmax.f32 %v5209_v6, %v5628_v25  ;;  %v6398_v56 = vsel %vm6329_vm3, %v6395_v30, %v6397_v50 }
 0x3ca   : > { %v6168_v54 = vmax.f32 %v11412_v62, %v5626_v61  ;;  %v6396_v62 = vsel %vm6329_vm3, %v6393_v38, %v6395_v30  ;;  %v11545_v61 = vpop.f32.mrb[179].mxu0  ;;  %v6170_v18 = vmax.f32 %v5210_v8, %v5630_v43  ;;  %vm2617_vm15 = vcmp.ge.f32.partialorder %v11504_v48, 0.0 }
 0x3cb   : > { %v6939_v31 = vmax.f32 %v6171_v24, %v6400_v9  ;;  %v6937_v6 = vmax.f32 %v6169_v36, %v6396_v62  ;;  %vm2616_vm0 = vcmp.ge.f32.partialorder %v11486_v2, 0.0  ;;  %v2231_v58 = vmul.f32 %v11227_v34, %v11006_v47  ;;  %v14716_v24 = vld [vmem:[#allocation124_spill] sm:$0xff]  ;;  %v14717_v36 = vld [vmem:[#allocation38_spill] sm:$0xff] }
 0x3cc   : > { %v6936_v12 = vmax.f32 %v6168_v54, %v6394_v4  ;;  %v6938_v38 = vmax.f32 %v6170_v18, %v6398_v56  ;;  %v4055_v8 = vmul.f32 %v11231_v35, %v11017_v27  ;;  %v2811_v50 = vmul.f32 %v9855_v41, %v11476_v49  ;;  %v14715_v54 = vld [vmem:[#allocation126_spill] sm:$0xff] }
 0x3cd   : > { %7131 = vst [vmem:[#allocation2 + $0x110] sm:$0xff] %v6939_v31  ;;  %7129 = vst [vmem:[#allocation2 + $0x100] sm:$0xff] %v6937_v6  ;;  %v4053_v30 = vmul.f32 %v11231_v35, %v11027_v63  ;;  %v4056_v4 = vmul.f32 %v11231_v35, %v11036_v0  ;;  %vm2619_vm1 = vcmp.ge.f32.partialorder %v11519_v60, 0.0  ;;  %v2812_v47 = vmul.f32 %v9855_v41, %v11519_v60  ;;  %v14720_v6 = vld [vmem:[#allocation37_spill] sm:$0xff] }
 0x3ce   : > { %7128 = vst [vmem:[#allocation2 + $0xf8] sm:$0xff] %v6936_v12  ;;  %v4054_v12 = vmul.f32 %v11231_v35, %v14715_v54  ;;  %7130 = vst [vmem:[#allocation2 + $0x108] sm:$0xff] %v6938_v38  ;;  %v4254_v27 = vadd.f32 %v11258_v52, %v4055_v8  ;;  %v3002_v18 = vsel %vm2617_vm15, %v11504_v48, %v2810_v45  ;;  %v14718_v62 = vunpack.c.l.bf16 %v14717_v36  ;;  %v14719_v45 = vld [vmem:[#allocation29_spill] sm:$0xff] }
 0x3cf   : > { %v4252_v63 = vadd.f32 %v11258_v52, %v4053_v30  ;;  %v4255_v32 = vadd.f32 %v11258_v52, %v4056_v4  ;;  %v3001_v9 = vsel %vm2616_vm0, %v11486_v2, %v2809_v13  ;;  %v11584_v25 = vadd.f32 %v11224_v5, %v2231_v58  ;;  %v14722_v30 = vld [vmem:[#allocation125_spill] sm:$0xff] }
 0x3d0   : > { %v4253_v0 = vadd.f32 %v11258_v52, %v4054_v12  ;;  %v2229_v43 = vmul.f32 %v11227_v34, %v14716_v24  ;;  %v4638_v56 = vadd.f32 %v14718_v62, %v4254_v27  ;;  %v3121_v48 = vpack.c.bf16 %v3002_v18, %v3001_v9 }
 0x3d1   : > { %v2232_v31 = vmul.f32 %v11227_v34, %v14719_v45  ;;  %v14721_v38 = vunpack.c.l.bf16 %v14720_v6  ;;  %v2230_v4 = vmul.f32 %v11227_v34, %v14722_v30  ;;  %v14723_v2 = vunpack.c.h.bf16 %v14717_v36 }
 0x3d2   : > { %vm4830_vm4 = vcmp.ge.f32.partialorder %v4638_v56, 0.0  ;;  %v5023_v58 = vmul.f32 %v10541_v7, %v4638_v56  ;;  %v14724_v54 = vunpack.c.h.bf16 %v14720_v6  ;;  %8476 = vmatprep.mubr.bf16.mxu1 %v3121_v48  ;;  %v3003_v27 = vsel %vm2618_vm14, %v11476_v49, %v2811_v50 }
 0x3d3   : > { %v4636_v8 = vadd.f32 %v14721_v38, %v4252_v63  ;;  %v4639_v13 = vadd.f32 %v14723_v2, %v4255_v32  ;;  %v3004_v24 = vsel %vm2619_vm1, %v11519_v60, %v2812_v47  ;;  %v11614_v38 = vpop.f32.mrb[180].mxu0  ;;  %v11617_v30 = vadd.f32 %v11224_v5, %v2229_v43 }
 0x3d4   : > { %v4637_v12 = vadd.f32 %v14724_v54, %v4253_v0  ;;  %v5215_v9 = vsel %vm4830_vm4, %v4638_v56, %v5023_v58  ;;  %v2429_v60 = vadd.f32 %v11224_v5, %v2230_v4  ;;  %v3122_v2 = vpack.c.bf16 %v3004_v24, %v3003_v27 }
 0x3d5   : > { %vm4828_vm5 = vcmp.ge.f32.partialorder %v4636_v8, 0.0  ;;  %v5021_v18 = vmul.f32 %v10541_v7, %v4636_v8  ;;  %vm4831_vm6 = vcmp.ge.f32.partialorder %v4639_v13, 0.0  ;;  %v5024_v63 = vmul.f32 %v10541_v7, %v4639_v13  ;;  %v7309_v0 = vld [vmem:[#allocation2 + $0xf0] ss:$3 sm:$0xff] }
 0x3d6   : > { %vm4829_vm7 = vcmp.ge.f32.partialorder %v4637_v12, 0.0  ;;  %v5022_v32 = vmul.f32 %v10541_v7, %v4637_v12  ;;  %v5637_v36 = vrot.slane %v5215_v9, 1  ;;  %v6405_v62 = vrot.slane %v5215_v9, 2  ;;  %7426 = vxpose.xlu0.b32.cont [11/16] (narrow) %v7309_v0, 64  ;;  %8477 = vmatmul.mubr.bf16.gmra.mrb[144].mxu1 %v3122_v2 }
 0x3d7   : > { %v5213_v48 = vsel %vm4828_vm5, %v4636_v8, %v5021_v18  ;;  %v11610_v45 = vsel %vm4831_vm6, %v4639_v13, %v5024_v63  ;;  %v11621_v8 = vpop.f32.mrb[181].mxu0  ;;  %v11623_v13 = vpop.f32.mrb[68].mxu1  ;;  %v14727_v58 = vrot.slane %v11511_v14, 1  ;;  %v14728_v18 = vrot.slane %v11511_v14, 2 }
 0x3d8   : > { %v5633_v49 = vrot.slane %v5213_v48, 1  ;;  %v6401_v50 = vrot.slane %v5213_v48, 2  ;;  %v14422_v6 = vrot.slane %v11610_v45, 1  ;;  %v14423_v56 = vrot.slane %v11610_v45, 2  ;;  %14725 = vst [vmem:[#allocation123_spill] sm:$0xff] %v11621_v8  ;;  %14726 = vst [vmem:[#allocation35_spill] sm:$0xff] %v11623_v13 }
 0x3d9   : > { %v5214_v47 = vsel %vm4829_vm7, %v4637_v12, %v5022_v32  ;;  %v11637_v12 = vpop.f32.mrb[182].mxu0  ;;  %v11639_v27 = vpop.f32.mrb[69].mxu1  ;;  %vm2622_vm8 = vcmp.ge.f32.partialorder %v11584_v25, 0.0  ;;  %vm2620_vm9 = vcmp.ge.f32.partialorder %v11617_v30, 0.0  ;;  %vm2621_vm10 = vcmp.ge.f32.partialorder %v2429_v60, 0.0 }
 0x3da   : > { %v5634_v54 = vsel %vm5561_vm2, %v14727_v58, %v5633_v49  ;;  %v6402_v63 = vsel %vm6329_vm3, %v14728_v18, %v6401_v50  ;;  %v5640_v43 = vsel %vm5561_vm2, %v5637_v36, %v14422_v6  ;;  %v6408_v4 = vsel %vm6329_vm3, %v6405_v62, %v14423_v56  ;;  %14729 = vst [vmem:[#allocation122_spill] sm:$0xff] %v11637_v12  ;;  %v11642_v13 = vpop.f32.mrb[183].mxu0  ;;  %v11644_v18 = vpop.f32.mrb[70].mxu1 }
 0x3db   : > { %14730 = vst [vmem:[#allocation120_spill] sm:$0xff] %v11639_v27  ;;  %v6172_v32 = vmax.f32 %v11511_v14, %v5634_v54  ;;  %v6175_v24 = vmax.f32 %v5215_v9, %v5640_v43  ;;  %v5635_v0 = vrot.slane %v5214_v47, 1  ;;  %v6403_v58 = vrot.slane %v5214_v47, 2  ;;  %14731 = vst [vmem:[#allocation33_spill] sm:$0xff] %v11642_v13  ;;  %v11652_v12 = vpop.f32.mrb[71].mxu1 }
 0x3dc   : > { %14732 = vst [vmem:[#allocation126_spill] sm:$0xff] %v11644_v18  ;;  %v2431_v6 = vadd.f32 %v11224_v5, %v2232_v31  ;;  %v2235_v56 = vmul.f32 %v11227_v34, %v11068_v33  ;;  %v4059_v27 = vmul.f32 %v11231_v35, %v11072_v37  ;;  %14733 = vst [vmem:[#allocation124_spill] sm:$0xff] %v11652_v12 }
 0x3dd   : > { %v6940_v14 = vmax.f32 %v6172_v32, %v6402_v63  ;;  %v6943_v9 = vmax.f32 %v6175_v24, %v6408_v4  ;;  %v5636_v2 = vsel %vm5561_vm2, %v5633_v49, %v5635_v0  ;;  %v5638_v54 = vsel %vm5561_vm2, %v5635_v0, %v5637_v36  ;;  %v14736_v32 = vld [vmem:[#allocation130_spill] sm:$0xff]  ;;  %v14737_v0 = vld [vmem:[#allocation131_spill] sm:$0xff] }
 0x3de   : > { %v6173_v43 = vmax.f32 %v5213_v48, %v5636_v2  ;;  %v6174_v13 = vmax.f32 %v5214_v47, %v5638_v54  ;;  %v6404_v18 = vsel %vm6329_vm3, %v6401_v50, %v6403_v58  ;;  %v6406_v31 = vsel %vm6329_vm3, %v6403_v58, %v6405_v62  ;;  %v14734_v48 = vld [vmem:[#allocation27_spill] sm:$0xff]  ;;  %v14735_v62 = vld [vmem:[#allocation128_spill] sm:$0xff]  ;;  %v14740_v54 = vld [vmem:[#allocation129_spill] sm:$0xff] }
 0x3df   : > { %v2815_v33 = vmul.f32 %v9855_v41, %v11584_v25  ;;  %v2813_v37 = vmul.f32 %v9855_v41, %v11617_v30  ;;  %7132 = vst [vmem:[#allocation2 + $0x118] sm:$0xff] %v6940_v14  ;;  %v2814_v63 = vmul.f32 %v9855_v41, %v2429_v60  ;;  %7135 = vst [vmem:[#allocation2 + $0x130] sm:$0xff] %v6943_v9  ;;  %vm2623_vm11 = vcmp.ge.f32.partialorder %v2431_v6, 0.0 }
 0x3e0   : > { %v6941_v49 = vmax.f32 %v6173_v43, %v6404_v18  ;;  %v6942_v36 = vmax.f32 %v6174_v13, %v6406_v31  ;;  %v2233_v47 = vmul.f32 %v11227_v34, %v14734_v48  ;;  %v4258_v50 = vadd.f32 %v11258_v52, %v4059_v27  ;;  %v14738_v18 = vld [vmem:[#allocation40_spill] sm:$0xff] }
 0x3e1   : > { %v4057_v4 = vmul.f32 %v11231_v35, %v14735_v62  ;;  %v4060_v24 = vmul.f32 %v11231_v35, %v14736_v32  ;;  %v4058_v58 = vmul.f32 %v11231_v35, %v14737_v0  ;;  %v2816_v14 = vmul.f32 %v9855_v41, %v2431_v6  ;;  %v14742_v32 = vld [vmem:[#allocation39_spill] sm:$0xff] }
 0x3e2   : > { %7133 = vst [vmem:[#allocation2 + $0x120] sm:$0xff] %v6941_v49  ;;  %7134 = vst [vmem:[#allocation2 + $0x128] sm:$0xff] %v6942_v36  ;;  %v11675_v13 = vadd.f32 %v11224_v5, %v2235_v56  ;;  %v14739_v27 = vunpack.c.l.bf16 %v14738_v18  ;;  %v2234_v43 = vmul.f32 %v11227_v34, %v14740_v54  ;;  %v11685_v62 = vadd.f32 %v11224_v5, %v2233_v47  ;;  %v14741_v36 = vld [vmem:[#allocation127_spill] sm:$0xff] }
 0x3e3   : > { %v4256_v2 = vadd.f32 %v11258_v52, %v4057_v4  ;;  %v4259_v31 = vadd.f32 %v11258_v52, %v4060_v24  ;;  %v4257_v48 = vadd.f32 %v11258_v52, %v4058_v58  ;;  %v3006_v56 = vsel %vm2621_vm10, %v2429_v60, %v2814_v63 }
 0x3e4   : > { %v4642_v9 = vadd.f32 %v14739_v27, %v4258_v50  ;;  %v2236_v50 = vmul.f32 %v11227_v34, %v14741_v36  ;;  %v14743_v4 = vunpack.c.l.bf16 %v14742_v32  ;;  %v14744_v27 = vunpack.c.h.bf16 %v14738_v18 }
 0x3e5   : > { %v3005_v24 = vsel %vm2620_vm9, %v11617_v30, %v2813_v37  ;;  %v14745_v58 = vunpack.c.h.bf16 %v14742_v32  ;;  %v3008_v60 = vsel %vm2623_vm11, %v2431_v6, %v2816_v14  ;;  %v3007_v18 = vsel %vm2622_vm8, %v11584_v25, %v2815_v33 }
 0x3e6   : > { %vm4834_vm12 = vcmp.ge.f32.partialorder %v4642_v9, 0.0  ;;  %v5027_v49 = vmul.f32 %v10541_v7, %v4642_v9  ;;  %v4640_v0 = vadd.f32 %v14743_v4, %v4256_v2  ;;  %v4643_v54 = vadd.f32 %v14744_v27, %v4259_v31  ;;  %v7311_v63 = vld [vmem:[#allocation2 + $0x108] ss:$3 sm:$0xff] }
 0x3e7   : > { %v4641_v12 = vadd.f32 %v14745_v58, %v4257_v48  ;;  %v3123_v8 = vpack.c.bf16 %v3006_v56, %v3005_v24  ;;  %v11703_v2 = vadd.f32 %v11224_v5, %v2234_v43  ;;  %7427 = vxpose.xlu0.b32.cont [12/16] (narrow) %v7311_v63, 64  ;;  %v3124_v31 = vpack.c.bf16 %v3008_v60, %v3007_v18  ;;  %v11714_v24 = vpop.f32.mrb[184].mxu0  ;;  %v11728_v63 = vpop.f32.mrb[72].mxu1 }
 0x3e8   : > { %v5219_v47 = vsel %vm4834_vm12, %v4642_v9, %v5027_v49  ;;  %vm4832_vm13 = vcmp.ge.f32.partialorder %v4640_v0, 0.0  ;;  %v5025_v36 = vmul.f32 %v10541_v7, %v4640_v0  ;;  %vm4835_vm14 = vcmp.ge.f32.partialorder %v4643_v54, 0.0  ;;  %v11726_v60 = vpop.f32.mrb[185].mxu0  ;;  %14749 = vst [vmem:[#allocation29_spill] sm:$0xff] %v11728_v63 }
 0x3e9   : > { %v5028_v30 = vmul.f32 %v10541_v7, %v4643_v54  ;;  %vm4833_vm15 = vcmp.ge.f32.partialorder %v4641_v12, 0.0  ;;  %v5026_v37 = vmul.f32 %v10541_v7, %v4641_v12  ;;  %8480 = vmatprep.mubr.bf16.mxu1 %v3123_v8  ;;  %v5645_v6 = vrot.slane %v5219_v47, 1  ;;  %v7313_v32 = vld [vmem:[#allocation2 + $0x120] ss:$3 sm:$0xff]  ;;  %14748 = vst [vmem:[#allocation38_spill] sm:$0xff] %v11726_v60 }
 0x3ea   : > { %v6413_v14 = vrot.slane %v5219_v47, 2  ;;  %v5217_v9 = vsel %vm4832_vm13, %v4640_v0, %v5025_v36  ;;  %8481 = vmatmul.mubr.bf16.gmra.mrb[148].mxu1 %v3124_v31  ;;  %vm2626_vm0 = vcmp.ge.f32.partialorder %v11675_v13, 0.0  ;;  %v11718_v8 = vadd.f32 %v11224_v5, %v2236_v50  ;;  %v11740_v31 = vpop.f32.mrb[73].mxu1 }
 0x3eb   : > { %v5641_v48 = vrot.slane %v5217_v9, 1  ;;  %v6409_v49 = vrot.slane %v5217_v9, 2  ;;  %v11710_v43 = vsel %vm4835_vm14, %v4643_v54, %v5028_v30  ;;  %v5218_v56 = vsel %vm4833_vm15, %v4641_v12, %v5026_v37  ;;  %7428 = vxpose.xlu0.b32.cont [13/16] (narrow) %v7313_v32, 64  ;;  %v11738_v37 = vpop.f32.mrb[186].mxu0  ;;  %v11746_v63 = vpop.f32.mrb[74].mxu1 }
 0x3ec   : > { %v14424_v25 = vrot.slane %v11710_v43, 1  ;;  %v14425_v33 = vrot.slane %v11710_v43, 2  ;;  %v5643_v4 = vrot.slane %v5218_v56, 1  ;;  %v6411_v27 = vrot.slane %v5218_v56, 2  ;;  %14750 = vst [vmem:[#allocation37_spill] sm:$0xff] %v11738_v37  ;;  %v11751_v37 = vpop.f32.mrb[75].mxu1 }
 0x3ed   : > { %v14746_v0 = vrot.slane %v11610_v45, 1  ;;  %v14747_v54 = vrot.slane %v11610_v45, 2  ;;  %vm2625_vm1 = vcmp.ge.f32.partialorder %v11703_v2, 0.0  ;;  %vm2624_vm4 = vcmp.ge.f32.partialorder %v11685_v62, 0.0 }
 0x3ee   : > { %v5648_v18 = vsel %vm5561_vm2, %v5645_v6, %v14424_v25  ;;  %v6416_v50 = vsel %vm6329_vm3, %v6413_v14, %v14425_v33  ;;  %v5644_v30 = vsel %vm5561_vm2, %v5641_v48, %v5643_v4  ;;  %v2818_v33 = vmul.f32 %v9855_v41, %v11703_v2 }
 0x3ef   : > { %v5642_v12 = vsel %vm5561_vm2, %v14746_v0, %v5641_v48  ;;  %v6410_v58 = vsel %vm6329_vm3, %v14747_v54, %v6409_v49  ;;  %v6179_v32 = vmax.f32 %v5219_v47, %v5648_v18  ;;  %v5646_v0 = vsel %vm5561_vm2, %v5643_v4, %v5645_v6 }
 0x3f0   : > { %v6176_v36 = vmax.f32 %v11610_v45, %v5642_v12  ;;  %v6177_v54 = vmax.f32 %v5217_v9, %v5644_v30  ;;  %v6412_v45 = vsel %vm6329_vm3, %v6409_v49, %v6411_v27  ;;  %v11744_v12 = vpop.f32.mrb[187].mxu0  ;;  %v6178_v60 = vmax.f32 %v5218_v56, %v5646_v0  ;;  %v14753_v0 = vld [vmem:[#allocation42_spill] sm:$0xff] }
 0x3f1   : > { %v6414_v48 = vsel %vm6329_vm3, %v6411_v27, %v6413_v14  ;;  %v2817_v47 = vmul.f32 %v9855_v41, %v11685_v62  ;;  %v6947_v6 = vmax.f32 %v6179_v32, %v6416_v50  ;;  %v2239_v4 = vmul.f32 %v11227_v34, %v11114_v19  ;;  %v14751_v50 = vld [vmem:[#allocation44_spill] sm:$0xff] }
 0x3f2   : > { %v6944_v25 = vmax.f32 %v6176_v36, %v6410_v58  ;;  %v6945_v9 = vmax.f32 %v6177_v54, %v6412_v45  ;;  %v6946_v49 = vmax.f32 %v6178_v60, %v6414_v48  ;;  %v4063_v56 = vmul.f32 %v11231_v35, %v11123_v59  ;;  %v14755_v45 = vld [vmem:[#allocation132_spill] sm:$0xff] }
 0x3f3   : > { %v2819_v14 = vmul.f32 %v9855_v41, %v11675_v13  ;;  %7139 = vst [vmem:[#allocation2 + $0x150] sm:$0xff] %v6947_v6  ;;  %v4061_v27 = vmul.f32 %v11231_v35, %v11135_v28  ;;  %v4064_v58 = vmul.f32 %v11231_v35, %v11146_v1  ;;  %vm2627_vm5 = vcmp.ge.f32.partialorder %v11718_v8, 0.0 }
 0x3f4   : > { %7136 = vst [vmem:[#allocation2 + $0x138] sm:$0xff] %v6944_v25  ;;  %7137 = vst [vmem:[#allocation2 + $0x140] sm:$0xff] %v6945_v9  ;;  %v4062_v25 = vmul.f32 %v11231_v35, %v11154_v15  ;;  %v2820_v19 = vmul.f32 %v9855_v41, %v11718_v8  ;;  %v4262_v59 = vadd.f32 %v11258_v52, %v4063_v56  ;;  %v14752_v30 = vunpack.c.l.bf16 %v14751_v50 }
 0x3f5   : > { %7138 = vst [vmem:[#allocation2 + $0x148] sm:$0xff] %v6946_v49  ;;  %v3010_v60 = vsel %vm2625_vm1, %v11703_v2, %v2818_v33  ;;  %v4260_v28 = vadd.f32 %v11258_v52, %v4061_v27  ;;  %v4263_v36 = vadd.f32 %v11258_v52, %v4064_v58  ;;  %v3009_v15 = vsel %vm2624_vm4, %v11685_v62, %v2817_v47 }
 0x3f6   : > { %v4261_v1 = vadd.f32 %v11258_v52, %v4062_v25  ;;  %v11783_v35 = vadd.f32 %v11224_v5, %v2239_v4  ;;  %v2237_v18 = vmul.f32 %v11227_v34, %v11121_v46  ;;  %v4646_v32 = vadd.f32 %v14752_v30, %v4262_v59 }
 0x3f7   : > { %v3125_v2 = vpack.c.bf16 %v3010_v60, %v3009_v15  ;;  %v2240_v33 = vmul.f32 %v11227_v34, %v11133_v53  ;;  %v14754_v54 = vunpack.c.l.bf16 %v14753_v0  ;;  %v2238_v48 = vmul.f32 %v11227_v34, %v14755_v45  ;;  %v11813_v15 = vpop.f32.mrb[188].mxu0 }
 0x3f8   : > { %v14756_v62 = vunpack.c.h.bf16 %v14751_v50  ;;  %vm4838_vm6 = vcmp.ge.f32.partialorder %v4646_v32, 0.0  ;;  %v5031_v6 = vmul.f32 %v10541_v7, %v4646_v32  ;;  %v14757_v46 = vunpack.c.h.bf16 %v14753_v0 }
 0x3f9   : > { %v4644_v52 = vadd.f32 %v14754_v54, %v4260_v28  ;;  %8484 = vmatprep.mubr.bf16.mxu1 %v3125_v2  ;;  %v3011_v53 = vsel %vm2626_vm0, %v11675_v13, %v2819_v14  ;;  %v3012_v27 = vsel %vm2627_vm5, %v11718_v8, %v2820_v19  ;;  %v11816_v50 = vadd.f32 %v11224_v5, %v2237_v18  ;;  %v11824_v2 = vpop.f32.mrb[76].mxu1 }
 0x3fa   : > { %v4647_v47 = vadd.f32 %v14756_v62, %v4263_v36  ;;  %v4645_v9 = vadd.f32 %v14757_v46, %v4261_v1  ;;  %v5223_v4 = vsel %vm4838_vm6, %v4646_v32, %v5031_v6  ;;  %v11819_v8 = vadd.f32 %v11224_v5, %v2238_v48  ;;  %v11822_v32 = vpop.f32.mrb[189].mxu0  ;;  %14758 = vst [vmem:[#allocation125_spill] sm:$0xff] %v11824_v2  ;;  %v11840_v62 = vpop.f32.mrb[77].mxu1 }
 0x3fb   : > { %vm4836_vm7 = vcmp.ge.f32.partialorder %v4644_v52, 0.0  ;;  %v5029_v49 = vmul.f32 %v10541_v7, %v4644_v52  ;;  %v5653_v58 = vrot.slane %v5223_v4, 1  ;;  %v6421_v25 = vrot.slane %v5223_v4, 2  ;;  %v11838_v48 = vpop.f32.mrb[190].mxu0  ;;  %14762 = vst [vmem:[#allocation128_spill] sm:$0xff] %v11840_v62 }
 0x3fc   : > { %vm4839_vm8 = vcmp.ge.f32.partialorder %v4647_v47, 0.0  ;;  %v5032_v34 = vmul.f32 %v10541_v7, %v4647_v47  ;;  %vm4837_vm9 = vcmp.ge.f32.partialorder %v4645_v9, 0.0  ;;  %v5030_v56 = vmul.f32 %v10541_v7, %v4645_v9  ;;  %v7315_v13 = vld [vmem:[#allocation2 + $0x138] ss:$3 sm:$0xff]  ;;  %14761 = vst [vmem:[#allocation27_spill] sm:$0xff] %v11838_v48 }
 0x3fd   : > { %v5221_v59 = vsel %vm4836_vm7, %v4644_v52, %v5029_v49  ;;  %7429 = vxpose.xlu0.b32.cont [14/16] (narrow) %v7315_v13, 64  ;;  %v3126_v30 = vpack.c.bf16 %v3012_v27, %v3011_v53  ;;  %v14759_v0 = vrot.slane %v11710_v43, 1  ;;  %v14760_v52 = vrot.slane %v11710_v43, 2  ;;  %v11843_v53 = vpop.f32.mrb[191].mxu0  ;;  %v11845_v49 = vpop.f32.mrb[78].mxu1  ;;  %v14765_v13 = vld [vmem:[#allocation30_spill] sm:$0xff] }
 0x3fe   : > { %v11809_v60 = vsel %vm4839_vm8, %v4647_v47, %v5032_v34  ;;  %v5649_v14 = vrot.slane %v5221_v59, 1  ;;  %v6417_v28 = vrot.slane %v5221_v59, 2  ;;  %v5222_v19 = vsel %vm4837_vm9, %v4645_v9, %v5030_v56  ;;  %14763 = vst [vmem:[#allocation130_spill] sm:$0xff] %v11843_v53  ;;  %14764 = vst [vmem:[#allocation131_spill] sm:$0xff] %v11845_v49  ;;  %v11848_v34 = vld [vmem:[#allocation10] ss:$0 sm:$0xff] }
 0x3ff   : > { %v14427_v36 = vrot.slane %v11809_v60, 1  ;;  %v14426_v1 = vrot.slane %v11809_v60, 2  ;;  %v5651_v46 = vrot.slane %v5222_v19, 1  ;;  %v6419_v9 = vrot.slane %v5222_v19, 2  ;;  %8485 = vmatmul.mubr.bf16.gmra.mrb[152].mxu1 %v3126_v30  ;;  %v11851_v27 = vld [vmem:[#allocation9] ss:$0 sm:$0xff] }
 0x400   : > { %v5650_v54 = vsel %vm5561_vm2, %v14759_v0, %v5649_v14  ;;  %v6418_v45 = vsel %vm6329_vm3, %v14760_v52, %v6417_v28  ;;  %vm2630_vm10 = vcmp.ge.f32.partialorder %v11783_v35, 0.0  ;;  %v2439_v56 = vadd.f32 %v11848_v34, %v2240_v33 }
 0x401   : > { %v5656_v5 = vsel %vm5561_vm2, %v5653_v58, %v14427_v36  ;;  %v6424_v18 = vsel %vm6329_vm3, %v6421_v25, %v14426_v1  ;;  %v6180_v47 = vmax.f32 %v11710_v43, %v5650_v54  ;;  %v2243_v0 = vmul.f32 %v11851_v27, %v14765_v13  ;;  %v11855_v43 = vld [vmem:[#allocation13] ss:$0 sm:$0xff]  ;;  %v11859_v54 = vpop.f32.mrb[79].mxu1 }
 0x402   : > { %v6183_v6 = vmax.f32 %v5223_v4, %v5656_v5  ;;  %v14766_v4 = vld [vmem:[#allocation133_spill] sm:$0xff]  ;;  %14767 = vst [vmem:[#allocation40_spill] sm:$0xff] %v11859_v54  ;;  %v5652_v1 = vsel %vm5561_vm2, %v5649_v14, %v5651_v46  ;;  %v5654_v36 = vsel %vm5561_vm2, %v5651_v46, %v5653_v58  ;;  %v6420_v53 = vsel %vm6329_vm3, %v6417_v28, %v6419_v9 }
 0x403   : > { %v4067_v30 = vmul.f32 %v11855_v43, %v14766_v4  ;;  %v6948_v52 = vmax.f32 %v6180_v47, %v6418_v45  ;;  %v6181_v49 = vmax.f32 %v5221_v59, %v5652_v1  ;;  %v6182_v33 = vmax.f32 %v5222_v19, %v5654_v36  ;;  %v14768_v36 = vld [vmem:[#allocation28_spill] sm:$0xff]  ;;  %v11874_v1 = vld [vmem:[#allocation15] ss:$0 sm:$0xff]  ;;  %v14769_v19 = vld [vmem:[#allocation135_spill] sm:$0xff] }
 0x404   : > { %v6951_v5 = vmax.f32 %v6183_v6, %v6424_v18  ;;  %v6422_v62 = vsel %vm6329_vm3, %v6419_v9, %v6421_v25  ;;  %v2823_v13 = vmul.f32 %v9855_v41, %v11783_v35  ;;  %vm2628_vm11 = vcmp.ge.f32.partialorder %v11816_v50, 0.0  ;;  %v14770_v18 = vld [vmem:[#allocation137_spill] sm:$0xff]  ;;  %v14771_v6 = vld [vmem:[#allocation138_spill] sm:$0xff] }
 0x405   : > { %v2821_v4 = vmul.f32 %v9855_v41, %v11816_v50  ;;  %7140 = vst [vmem:[#allocation2 + $0x158] sm:$0xff] %v6948_v52  ;;  %v2822_v14 = vmul.f32 %v9855_v41, %v11819_v8  ;;  %v6949_v58 = vmax.f32 %v6181_v49, %v6420_v53  ;;  %v6950_v59 = vmax.f32 %v6182_v33, %v6422_v62  ;;  %v14772_v53 = vld [vmem:[#allocation43_spill] sm:$0xff] }
 0x406   : > { %7143 = vst [vmem:[#allocation2 + $0x170] sm:$0xff] %v6951_v5  ;;  %v2241_v28 = vmul.f32 %v11851_v27, %v14768_v36  ;;  %v4266_v25 = vadd.f32 %v11874_v1, %v4067_v30  ;;  %vm2629_vm12 = vcmp.ge.f32.partialorder %v11819_v8, 0.0  ;;  %v4065_v45 = vmul.f32 %v11855_v43, %v14769_v19  ;;  %v14774_v5 = vld [vmem:[#allocation136_spill] sm:$0xff] }
 0x407   : > { %v4068_v47 = vmul.f32 %v11855_v43, %v14770_v18  ;;  %v4066_v46 = vmul.f32 %v11855_v43, %v14771_v6  ;;  %vm2631_vm13 = vcmp.ge.f32.partialorder %v2439_v56, 0.0  ;;  %v2824_v62 = vmul.f32 %v9855_v41, %v2439_v56  ;;  %7141 = vst [vmem:[#allocation2 + $0x160] sm:$0xff] %v6949_v58  ;;  %7142 = vst [vmem:[#allocation2 + $0x168] sm:$0xff] %v6950_v59  ;;  %v14775_v59 = vld [vmem:[#allocation134_spill] sm:$0xff] }
 0x408   : > { %v11886_v9 = vadd.f32 %v11848_v34, %v2243_v0  ;;  %v14773_v49 = vunpack.c.l.bf16 %v14772_v53  ;;  %v4264_v52 = vadd.f32 %v11874_v1, %v4065_v45  ;;  %v2242_v33 = vmul.f32 %v11851_v27, %v14774_v5  ;;  %v14776_v45 = vld [vmem:[#allocation41_spill] sm:$0xff] }
 0x409   : > { %v4267_v36 = vadd.f32 %v11874_v1, %v4068_v47  ;;  %v4265_v19 = vadd.f32 %v11874_v1, %v4066_v46  ;;  %v11896_v18 = vadd.f32 %v11848_v34, %v2241_v28  ;;  %v3014_v0 = vsel %vm2629_vm12, %v11819_v8, %v2822_v14 }
 0x40a   : > { %v4650_v30 = vadd.f32 %v14773_v49, %v4266_v25  ;;  %v2244_v25 = vmul.f32 %v11851_v27, %v14775_v59  ;;  %v14777_v6 = vunpack.c.l.bf16 %v14776_v45  ;;  %v14778_v47 = vunpack.c.h.bf16 %v14772_v53 }
 0x40b   : > { %v3013_v28 = vsel %vm2628_vm11, %v11816_v50, %v2821_v4  ;;  %v14779_v54 = vunpack.c.h.bf16 %v14776_v45  ;;  %v3016_v8 = vsel %vm2631_vm13, %v2439_v56, %v2824_v62  ;;  %v2441_v59 = vadd.f32 %v11848_v34, %v2242_v33 }
 0x40c   : > { %vm4842_vm14 = vcmp.ge.f32.partialorder %v4650_v30, 0.0  ;;  %v5035_v58 = vmul.f32 %v10541_v7, %v4650_v30  ;;  %v4648_v49 = vadd.f32 %v14777_v6, %v4264_v52  ;;  %v4651_v5 = vadd.f32 %v14778_v47, %v4267_v36 }
 0x40d   : > { %v4649_v48 = vadd.f32 %v14779_v54, %v4265_v19  ;;  %v3127_v2 = vpack.c.bf16 %v3014_v0, %v3013_v28  ;;  %v3015_v53 = vsel %vm2630_vm10, %v11783_v35, %v2823_v13  ;;  %vm2634_vm4 = vcmp.ge.f32.partialorder %v11886_v9, 0.0 }
 0x40e   : > { %v5227_v46 = vsel %vm4842_vm14, %v4650_v30, %v5035_v58  ;;  %vm4840_vm15 = vcmp.ge.f32.partialorder %v4648_v49, 0.0  ;;  %v5033_v14 = vmul.f32 %v10541_v7, %v4648_v49  ;;  %vm4843_vm0 = vcmp.ge.f32.partialorder %v4651_v5, 0.0  ;;  %v7317_v62 = vld [vmem:[#allocation2 + $0x150] ss:$3 sm:$0xff] }
 0x40f   : > { %v5036_v52 = vmul.f32 %v10541_v7, %v4651_v5  ;;  %vm4841_vm1 = vcmp.ge.f32.partialorder %v4649_v48, 0.0  ;;  %v5034_v50 = vmul.f32 %v10541_v7, %v4649_v48  ;;  %8488 = vmatprep.mubr.bf16.mxu1 %v3127_v2  ;;  %v5661_v54 = vrot.slane %v5227_v46, 1  ;;  %7430 = vxpose.xlu0.b32.cont [15/16] (narrow) %v7317_v62, 64 }
 0x410   : > { %v6429_v4 = vrot.slane %v5227_v46, 2  ;;  %v5225_v30 = vsel %vm4840_vm15, %v4648_v49, %v5033_v14  ;;  %v3128_v56 = vpack.c.bf16 %v3016_v8, %v3015_v53  ;;  %v11927_v2 = vadd.f32 %v11848_v34, %v2244_v25 }
 0x411   : > { %v5657_v36 = vrot.slane %v5225_v30, 1  ;;  %v6425_v19 = vrot.slane %v5225_v30, 2  ;;  %v11921_v58 = vsel %vm4843_vm0, %v4651_v5, %v5036_v52  ;;  %v5226_v33 = vsel %vm4841_vm1, %v4649_v48, %v5034_v50  ;;  %v11935_v5 = vpop.f32.mrb[80].mxu1 }
 0x412   : > { %v14428_v35 = vrot.slane %v11921_v58, 1  ;;  %v6431_v13 = vrot.slane %v11921_v58, 2  ;;  %v5659_v0 = vrot.slane %v5226_v33, 1  ;;  %v6427_v45 = vrot.slane %v5226_v33, 2  ;;  %8489 = vmatmul.mubr.bf16.gmra.mrb[156].mxu1 %v3128_v56  ;;  %14782 = vst [vmem:[#allocation129_spill] sm:$0xff] %v11935_v5  ;;  %v11945_v53 = vpop.f32.mrb[81].mxu1 }
 0x413   : > { %v14780_v6 = vrot.slane %v11809_v60, 1  ;;  %v14781_v47 = vrot.slane %v11809_v60, 2  ;;  %vm2633_vm5 = vcmp.ge.f32.partialorder %v2441_v59, 0.0  ;;  %vm2632_vm6 = vcmp.ge.f32.partialorder %v11896_v18, 0.0 }
 0x414   : > { %v5664_v8 = vsel %vm5561_vm2, %v5661_v54, %v14428_v35  ;;  %v6432_v25 = vsel %vm6329_vm3, %v6429_v4, %v6431_v13  ;;  %v5660_v14 = vsel %vm5561_vm2, %v5657_v36, %v5659_v0  ;;  %v5662_v50 = vsel %vm5561_vm2, %v5659_v0, %v5661_v54 }
 0x415   : > { %v5658_v49 = vsel %vm5561_vm2, %v14780_v6, %v5657_v36  ;;  %v6426_v48 = vsel %vm6329_vm3, %v14781_v47, %v6425_v19  ;;  %v6187_v52 = vmax.f32 %v5227_v46, %v5664_v8  ;;  %v6185_v56 = vmax.f32 %v5225_v30, %v5660_v14  ;;  %v11949_v6 = vpop.f32.mrb[82].mxu1 }
 0x416   : > { %v6184_v28 = vmax.f32 %v11809_v60, %v5658_v49  ;;  %v6428_v62 = vsel %vm6329_vm3, %v6425_v19, %v6427_v45  ;;  %v2826_v49 = vmul.f32 %v9855_v41, %v2441_v59  ;;  %v6186_v47 = vmax.f32 %v5226_v33, %v5662_v50  ;;  %v11953_v5 = vpop.f32.mrb[83].mxu1 }
 0x417   : > { %v6430_v35 = vsel %vm6329_vm3, %v6427_v45, %v6429_v4  ;;  %v2825_v36 = vmul.f32 %v9855_v41, %v11896_v18  ;;  %v6955_v46 = vmax.f32 %v6187_v52, %v6432_v25  ;;  %v6953_v8 = vmax.f32 %v6185_v56, %v6428_v62  ;;  %v14783_v45 = vld [vmem:[#allocation139_spill] sm:$0xff]  ;;  %v14785_v56 = vld [vmem:[#allocation46_spill] sm:$0xff] }
 0x418   : > { %v6952_v60 = vmax.f32 %v6184_v28, %v6426_v48  ;;  %v6954_v54 = vmax.f32 %v6186_v47, %v6430_v35  ;;  %v2247_v30 = vmul.f32 %v11851_v27, %v11237_v11  ;;  %v4071_v19 = vmul.f32 %v11855_v43, %v11243_v55  ;;  %v14784_v52 = vld [vmem:[#allocation115_spill] sm:$0xff] }
 0x419   : > { %v2827_v4 = vmul.f32 %v9855_v41, %v11886_v9  ;;  %7147 = vst [vmem:[#allocation2 + $0x190] sm:$0xff] %v6955_v46  ;;  %7145 = vst [vmem:[#allocation2 + $0x180] sm:$0xff] %v6953_v8  ;;  %v4069_v33 = vmul.f32 %v11855_v43, %v11254_v57  ;;  %v4072_v0 = vmul.f32 %v11855_v43, %v11263_v10  ;;  %vm2635_vm7 = vcmp.ge.f32.partialorder %v11927_v2, 0.0  ;;  %v14788_v46 = vld [vmem:[#allocation45_spill] sm:$0xff] }
 0x41a   : > { %7144 = vst [vmem:[#allocation2 + $0x178] sm:$0xff] %v6952_v60  ;;  %v4070_v35 = vmul.f32 %v11855_v43, %v14783_v45  ;;  %v2828_v11 = vmul.f32 %v9855_v41, %v11927_v2  ;;  %7146 = vst [vmem:[#allocation2 + $0x188] sm:$0xff] %v6954_v54  ;;  %v4270_v55 = vadd.f32 %v11874_v1, %v4071_v19  ;;  %v14786_v62 = vunpack.c.l.bf16 %v14785_v56  ;;  %v14790_v19 = vld [vmem:[#allocation116_spill] sm:$0xff] }
 0x41b   : > { %v3018_v48 = vsel %vm2633_vm5, %v2441_v59, %v2826_v49  ;;  %v4268_v28 = vadd.f32 %v11874_v1, %v4069_v33  ;;  %v4271_v57 = vadd.f32 %v11874_v1, %v4072_v0  ;;  %v3017_v10 = vsel %vm2632_vm6, %v11896_v18, %v2825_v36  ;;  %v14787_v49 = vld [vmem:[#allocation117_spill] sm:$0xff] }
 0x41c   : > { %v4269_v25 = vadd.f32 %v11874_v1, %v4070_v35  ;;  %v11982_v14 = vadd.f32 %v11848_v34, %v2247_v30  ;;  %v2245_v50 = vmul.f32 %v11851_v27, %v14784_v52  ;;  %v4654_v60 = vadd.f32 %v14786_v62, %v4270_v55  ;;  %v12008_v52 = vpop.f32.mrb[84].mxu1 }
 0x41d   : > { %v3129_v59 = vpack.c.bf16 %v3018_v48, %v3017_v10  ;;  %v2248_v47 = vmul.f32 %v11851_v27, %v14787_v49  ;;  %v14789_v8 = vunpack.c.l.bf16 %v14788_v46  ;;  %v2246_v33 = vmul.f32 %v11851_v27, %v14790_v19  ;;  %v12012_v49 = vpop.f32.mrb[85].mxu1 }
 0x41e   : > { %v14791_v18 = vunpack.c.h.bf16 %v14785_v56  ;;  %vm4846_vm8 = vcmp.ge.f32.partialorder %v4654_v60, 0.0  ;;  %v5039_v30 = vmul.f32 %v10541_v7, %v4654_v60  ;;  %v14792_v0 = vunpack.c.h.bf16 %v14788_v46 }
 0x41f   : > { %v4652_v54 = vadd.f32 %v14789_v8, %v4268_v28  ;;  %8492 = vmatprep.mubr.bf16.mxu1 %v3129_v59  ;;  %v3019_v35 = vsel %vm2634_vm4, %v11886_v9, %v2827_v4  ;;  %vm2638_vm12 = vcmp.ge.f32.partialorder %v11982_v14, 0.0 }
 0x420   : > { %v4655_v36 = vadd.f32 %v14791_v18, %v4271_v57  ;;  %v4653_v45 = vadd.f32 %v14792_v0, %v4269_v25  ;;  %v5231_v10 = vsel %vm4846_vm8, %v4654_v60, %v5039_v30  ;;  %v3020_v25 = vsel %vm2635_vm7, %v11927_v2, %v2828_v11  ;;  %v12016_v18 = vpop.f32.mrb[86].mxu1 }
 0x421   : > { %vm4844_vm9 = vcmp.ge.f32.partialorder %v4652_v54, 0.0  ;;  %v5037_v55 = vmul.f32 %v10541_v7, %v4652_v54  ;;  %v7319_v28 = vld [vmem:[#allocation2 + $0x168] ss:$3 sm:$0xff]  ;;  %v5669_v56 = vrot.slane %v5231_v10, 1  ;;  %v6437_v9 = vrot.slane %v5231_v10, 2  ;;  %14793 = vst [vmem:[#allocation127_spill] sm:$0xff] %v12016_v18 }
 0x422   : > { %vm4847_vm10 = vcmp.ge.f32.partialorder %v4655_v36, 0.0  ;;  %v5040_v48 = vmul.f32 %v10541_v7, %v4655_v36  ;;  %vm4845_vm11 = vcmp.ge.f32.partialorder %v4653_v45, 0.0  ;;  %v5038_v57 = vmul.f32 %v10541_v7, %v4653_v45  ;;  %7431 = vxpose.xlu0.b32.end [16/16] (narrow) %v7319_v28, 64  ;;  %v7321_v59 = vld [vmem:[#allocation2 + $0x180] ss:$3 sm:$0xff]  ;;  %v12021_v30 = vpop.f32.mrb[87].mxu1 }
 0x423   : > { %v5229_v4 = vsel %vm4844_vm9, %v4652_v54, %v5037_v55  ;;  %7448 = vxpose.xlu1.b32.start [1/16] (narrow) %v7321_v59, 64  ;;  %v2444_v2 = vadd.f32 %v11848_v34, %v2245_v50  ;;  %v2445_v11 = vadd.f32 %v11848_v34, %v2246_v33  ;;  %14794 = vst [vmem:[#allocation39_spill] sm:$0xff] %v12021_v30  ;;  %v14795_v0 = vrot.slane %v11921_v58, 1  ;;  %v14796_v59 = vld [vmem:[#allocation31_spill] sm:$0xff]  ;;  %v12046_v18 = vpop.f32.mrb[88].mxu1 }
 0x424   : > { %v12010_v62 = vsel %vm4847_vm10, %v4655_v36, %v5040_v48  ;;  %v5665_v46 = vrot.slane %v5229_v4, 1  ;;  %v6433_v60 = vrot.slane %v5229_v4, 2  ;;  %v5230_v54 = vsel %vm4845_vm11, %v4653_v45, %v5038_v57 }
 0x425   : > { %v14429_v8 = vrot.slane %v12010_v62, 1  ;;  %v14430_v19 = vrot.slane %v12010_v62, 2  ;;  %v3130_v36 = vpack.c.bf16 %v3020_v25, %v3019_v35  ;;  %v5667_v35 = vrot.slane %v5230_v54, 1 }
 0x426   : > { %v5666_v55 = vsel %vm5561_vm2, %v14795_v0, %v5665_v46  ;;  %v6434_v48 = vsel %vm6329_vm3, %v6431_v13, %v6433_v60  ;;  %v6435_v57 = vrot.slane %v5230_v54, 2  ;;  %v2447_v25 = vadd.f32 %v11848_v34, %v2248_v47 }
 0x427   : > { %v5672_v28 = vsel %vm5561_vm2, %v5669_v56, %v14429_v8  ;;  %v6440_v50 = vsel %vm6329_vm3, %v6437_v9, %v14430_v19  ;;  %v6188_v33 = vmax.f32 %v11921_v58, %v5666_v55  ;;  %8493 = vmatmul.mubr.bf16.gmra.mrb[160].mxu1 %v3130_v36  ;;  %v2251_v13 = vmul.f32 %v11851_v27, %v11317_v22 }
 0x428   : > { %v6191_v45 = vmax.f32 %v5231_v10, %v5672_v28  ;;  %v4075_v0 = vmul.f32 %v11855_v43, %v14796_v59  ;;  %v5668_v19 = vsel %vm5561_vm2, %v5665_v46, %v5667_v35  ;;  %v5670_v58 = vsel %vm5561_vm2, %v5667_v35, %v5669_v56  ;;  %v12052_v46 = vpop.f32.mrb[89].mxu1 }
 0x429   : > { %v6956_v8 = vmax.f32 %v6188_v33, %v6434_v48  ;;  %v6189_v10 = vmax.f32 %v5229_v4, %v5668_v19  ;;  %v6190_v55 = vmax.f32 %v5230_v54, %v5670_v58  ;;  %v6436_v36 = vsel %vm6329_vm3, %v6433_v60, %v6435_v57  ;;  %v14797_v19 = vld [vmem:[#allocation32_spill] sm:$0xff]  ;;  %v12057_v54 = vpop.f32.mrb[90].mxu1 }
 0x42a   : > { %v6959_v30 = vmax.f32 %v6191_v45, %v6440_v50  ;;  %v6438_v28 = vsel %vm6329_vm3, %v6435_v57, %v6437_v9  ;;  %v2831_v22 = vmul.f32 %v9855_v41, %v11982_v14  ;;  %vm2636_vm13 = vcmp.ge.f32.partialorder %v2444_v2, 0.0  ;;  %14798 = vst [vmem:[#allocation44_spill] sm:$0xff] %v12057_v54  ;;  %v12065_v33 = vpop.f32.mrb[91].mxu1  ;;  %v14800_v57 = vld [vmem:[#allocation48_spill] sm:$0xff] }
 0x42b   : > { %v2829_v47 = vmul.f32 %v9855_v41, %v2444_v2  ;;  %7148 = vst [vmem:[#allocation2 + $0x198] sm:$0xff] %v6956_v8  ;;  %v2830_v48 = vmul.f32 %v9855_v41, %v2445_v11  ;;  %v6957_v56 = vmax.f32 %v6189_v10, %v6436_v36  ;;  %v6958_v4 = vmax.f32 %v6190_v55, %v6438_v28  ;;  %v14802_v36 = vld [vmem:[#allocation140_spill] sm:$0xff]  ;;  %v12093_v54 = vpop.f32.mrb[92].mxu1 }
 0x42c   : > { %7151 = vst [vmem:[#allocation2 + $0x1b0] sm:$0xff] %v6959_v30  ;;  %v2249_v60 = vmul.f32 %v11851_v27, %v14797_v19  ;;  %v4274_v9 = vadd.f32 %v11874_v1, %v4075_v0  ;;  %vm2637_vm14 = vcmp.ge.f32.partialorder %v2445_v11, 0.0  ;;  %v4073_v50 = vmul.f32 %v11855_v43, %v11343_v23  ;;  %14799 = vst [vmem:[#allocation42_spill] sm:$0xff] %v12065_v33 }
 0x42d   : > { %v4076_v8 = vmul.f32 %v11855_v43, %v11349_v20  ;;  %v4074_v30 = vmul.f32 %v11855_v43, %v11354_v29  ;;  %vm2639_vm15 = vcmp.ge.f32.partialorder %v2447_v25, 0.0  ;;  %v2832_v45 = vmul.f32 %v9855_v41, %v2447_v25  ;;  %7149 = vst [vmem:[#allocation2 + $0x1a0] sm:$0xff] %v6957_v56  ;;  %7150 = vst [vmem:[#allocation2 + $0x1a8] sm:$0xff] %v6958_v4  ;;  %v14803_v56 = vld [vmem:[#allocation47_spill] sm:$0xff] }
 0x42e   : > { %v12069_v35 = vadd.f32 %v11848_v34, %v2251_v13  ;;  %v14801_v59 = vunpack.c.l.bf16 %v14800_v57  ;;  %v4272_v23 = vadd.f32 %v11874_v1, %v4073_v50  ;;  %v2250_v20 = vmul.f32 %v11851_v27, %v11347_v39 }
 0x42f   : > { %v4275_v29 = vadd.f32 %v11874_v1, %v4076_v8  ;;  %v4273_v58 = vadd.f32 %v11874_v1, %v4074_v30  ;;  %v12079_v10 = vadd.f32 %v11848_v34, %v2249_v60  ;;  %v3022_v13 = vsel %vm2637_vm14, %v2445_v11, %v2830_v48 }
 0x430   : > { %v4658_v0 = vadd.f32 %v14801_v59, %v4274_v9  ;;  %v2252_v28 = vmul.f32 %v11851_v27, %v14802_v36  ;;  %v14804_v4 = vunpack.c.l.bf16 %v14803_v56  ;;  %v14805_v39 = vunpack.c.h.bf16 %v14800_v57 }
 0x431   : > { %v3021_v50 = vsel %vm2636_vm13, %v2444_v2, %v2829_v47  ;;  %v14806_v60 = vunpack.c.h.bf16 %v14803_v56  ;;  %v3024_v33 = vsel %vm2639_vm15, %v2447_v25, %v2832_v45  ;;  %v2449_v48 = vadd.f32 %v11848_v34, %v2250_v20 }
 0x432   : > { %vm4850_vm0 = vcmp.ge.f32.partialorder %v4658_v0, 0.0  ;;  %v5043_v55 = vmul.f32 %v10541_v7, %v4658_v0  ;;  %v4656_v19 = vadd.f32 %v14804_v4, %v4272_v23  ;;  %v4659_v9 = vadd.f32 %v14805_v39, %v4275_v29 }
 0x433   : > { %v4657_v30 = vadd.f32 %v14806_v60, %v4273_v58  ;;  %v3131_v59 = vpack.c.bf16 %v3022_v13, %v3021_v50  ;;  %v3023_v57 = vsel %vm2638_vm12, %v11982_v14, %v2831_v22  ;;  %vm2642_vm6 = vcmp.ge.f32.partialorder %v12069_v35, 0.0 }
 0x434   : > { %v5235_v8 = vsel %vm4850_vm0, %v4658_v0, %v5043_v55  ;;  %vm4848_vm1 = vcmp.ge.f32.partialorder %v4656_v19, 0.0  ;;  %v5041_v11 = vmul.f32 %v10541_v7, %v4656_v19  ;;  %vm4851_vm4 = vcmp.ge.f32.partialorder %v4659_v9, 0.0  ;;  %v12102_v0 = vpop.f32.mrb[93].mxu1  ;;  %v7323_v58 = vld [vmem:[#allocation2 + $0x198] ss:$3 sm:$0xff] }
 0x435   : > { %v5044_v2 = vmul.f32 %v10541_v7, %v4659_v9  ;;  %vm4849_vm5 = vcmp.ge.f32.partialorder %v4657_v30, 0.0  ;;  %v5042_v47 = vmul.f32 %v10541_v7, %v4657_v30  ;;  %8496 = vmatprep.mubr.bf16.mxu1 %v3131_v59  ;;  %v5677_v25 = vrot.slane %v5235_v8, 1  ;;  %7449 = vxpose.xlu1.b32.cont [2/16] (narrow) %v7323_v58, 64  ;;  %v12106_v14 = vpop.f32.mrb[94].mxu1 }
 0x436   : > { %v6445_v45 = vrot.slane %v5235_v8, 2  ;;  %v5233_v23 = vsel %vm4848_vm1, %v4656_v19, %v5041_v11  ;;  %v3132_v29 = vpack.c.bf16 %v3024_v33, %v3023_v57  ;;  %v12112_v33 = vadd.f32 %v11848_v34, %v2252_v28 }
 0x437   : > { %v5673_v55 = vrot.slane %v5233_v23, 1  ;;  %v6441_v20 = vrot.slane %v5233_v23, 2  ;;  %v12104_v13 = vsel %vm4851_vm4, %v4659_v9, %v5044_v2  ;;  %v5234_v36 = vsel %vm4849_vm5, %v4657_v30, %v5042_v47  ;;  %v12120_v30 = vpop.f32.mrb[95].mxu1 }
 0x438   : > { %v14431_v22 = vrot.slane %v12104_v13, 1  ;;  %v14432_v56 = vrot.slane %v12104_v13, 2  ;;  %v5675_v4 = vrot.slane %v5234_v36, 1  ;;  %v6443_v39 = vrot.slane %v5234_v36, 2  ;;  %8497 = vmatmul.mubr.bf16.gmra.mrb[164].mxu1 %v3132_v29  ;;  %14809 = vst [vmem:[#allocation132_spill] sm:$0xff] %v12120_v30 }
 0x439   : > { %v14807_v19 = vrot.slane %v12010_v62, 1  ;;  %v14808_v50 = vrot.slane %v12010_v62, 2  ;;  %vm2641_vm7 = vcmp.ge.f32.partialorder %v2449_v48, 0.0  ;;  %vm2640_vm8 = vcmp.ge.f32.partialorder %v12079_v10, 0.0 }
 0x43a   : > { %v5680_v11 = vsel %vm5561_vm2, %v5677_v25, %v14431_v22  ;;  %v6448_v28 = vsel %vm6329_vm3, %v6445_v45, %v14432_v56  ;;  %v5676_v57 = vsel %vm5561_vm2, %v5673_v55, %v5675_v4  ;;  %v5678_v47 = vsel %vm5561_vm2, %v5675_v4, %v5677_v25  ;;  %v12149_v4 = vpop.f32.mrb[96].mxu1 }
 0x43b   : > { %v5674_v9 = vsel %vm5561_vm2, %v14807_v19, %v5673_v55  ;;  %v6442_v60 = vsel %vm6329_vm3, %v14808_v50, %v6441_v20  ;;  %v6195_v2 = vmax.f32 %v5235_v8, %v5680_v11  ;;  %v6193_v29 = vmax.f32 %v5233_v23, %v5676_v57 }
 0x43c   : > { %v6192_v59 = vmax.f32 %v12010_v62, %v5674_v9  ;;  %v6444_v58 = vsel %vm6329_vm3, %v6441_v20, %v6443_v39  ;;  %v2834_v50 = vmul.f32 %v9855_v41, %v2449_v48  ;;  %v6194_v62 = vmax.f32 %v5234_v36, %v5678_v47 }
 0x43d   : > { %v6446_v9 = vsel %vm6329_vm3, %v6443_v39, %v6445_v45  ;;  %v2833_v22 = vmul.f32 %v9855_v41, %v12079_v10  ;;  %v6963_v30 = vmax.f32 %v6195_v2, %v6448_v28  ;;  %v6961_v56 = vmax.f32 %v6193_v29, %v6444_v58  ;;  %v12156_v39 = vpop.f32.mrb[97].mxu1  ;;  %v14811_v28 = vld [vmem:[#allocation52_spill] sm:$0xff]  ;;  %v14813_v29 = vld [vmem:[#allocation34_spill] sm:$0xff] }
 0x43e   : > { %v6960_v19 = vmax.f32 %v6192_v59, %v6442_v60  ;;  %v6962_v8 = vmax.f32 %v6194_v62, %v6446_v9  ;;  %v2255_v25 = vmul.f32 %v11851_v27, %v11416_v44  ;;  %v4079_v23 = vmul.f32 %v11855_v43, %v11424_v17  ;;  %v14810_v59 = vld [vmem:[#allocation36_spill] sm:$0xff]  ;;  %v12171_v47 = vpop.f32.mrb[98].mxu1  ;;  %v14816_v9 = vld [vmem:[#allocation141_spill] sm:$0xff] }
 0x43f   : > { %v2835_v55 = vmul.f32 %v9855_v41, %v12069_v35  ;;  %7155 = vst [vmem:[#allocation2 + $0x1d0] sm:$0xff] %v6963_v30  ;;  %7153 = vst [vmem:[#allocation2 + $0x1c0] sm:$0xff] %v6961_v56  ;;  %v4077_v45 = vmul.f32 %v11855_v43, %v11440_v42  ;;  %v4080_v20 = vmul.f32 %v11855_v43, %v11445_v3  ;;  %vm2643_vm9 = vcmp.ge.f32.partialorder %v12112_v33, 0.0 }
 0x440   : > { %7152 = vst [vmem:[#allocation2 + $0x1b8] sm:$0xff] %v6960_v19  ;;  %v4078_v36 = vmul.f32 %v11855_v43, %v11453_v26  ;;  %v2836_v44 = vmul.f32 %v9855_v41, %v12112_v33  ;;  %7154 = vst [vmem:[#allocation2 + $0x1c8] sm:$0xff] %v6962_v8  ;;  %v4278_v17 = vadd.f32 %v11874_v1, %v4079_v23  ;;  %v14814_v19 = vld [vmem:[#allocation50_spill] sm:$0xff] }
 0x441   : > { %v3026_v56 = vsel %vm2641_vm7, %v2449_v48, %v2834_v50  ;;  %v4276_v42 = vadd.f32 %v11874_v1, %v4077_v45  ;;  %v4279_v3 = vadd.f32 %v11874_v1, %v4080_v20  ;;  %v3025_v60 = vsel %vm2640_vm8, %v12079_v10, %v2833_v22 }
 0x442   : > { %v4277_v26 = vadd.f32 %v11874_v1, %v4078_v36  ;;  %v12165_v30 = vadd.f32 %v11848_v34, %v2255_v25  ;;  %v2253_v11 = vmul.f32 %v11851_v27, %v14810_v59  ;;  %v14812_v48 = vunpack.c.l.bf16 %v14811_v28 }
 0x443   : > { %v3133_v2 = vpack.c.bf16 %v3026_v56, %v3025_v60  ;;  %v2256_v58 = vmul.f32 %v11851_v27, %v14813_v29  ;;  %v14815_v50 = vunpack.c.l.bf16 %v14814_v19  ;;  %v2254_v10 = vmul.f32 %v11851_v27, %v14816_v9  ;;  %v12193_v60 = vpop.f32.mrb[99].mxu1 }
 0x444   : > { %v4662_v57 = vadd.f32 %v14812_v48, %v4278_v17  ;;  %v14817_v22 = vunpack.c.h.bf16 %v14811_v28  ;;  %v14818_v23 = vunpack.c.h.bf16 %v14814_v19  ;;  %v3027_v20 = vsel %vm2642_vm6, %v12069_v35, %v2835_v55 }
 0x445   : > { %v4660_v62 = vadd.f32 %v14815_v50, %v4276_v42  ;;  %8500 = vmatprep.mubr.bf16.mxu1 %v3133_v2  ;;  %v2452_v19 = vadd.f32 %v11848_v34, %v2253_v11  ;;  %v2453_v50 = vadd.f32 %v11848_v34, %v2254_v10  ;;  %v14819_v9 = vrot.slane %v12104_v13, 1 }
 0x446   : > { %v4663_v8 = vadd.f32 %v14817_v22, %v4279_v3  ;;  %vm4854_vm10 = vcmp.ge.f32.partialorder %v4662_v57, 0.0  ;;  %v5047_v25 = vmul.f32 %v10541_v7, %v4662_v57  ;;  %v4661_v45 = vadd.f32 %v14818_v23, %v4277_v26 }
 0x447   : > { %vm4852_vm11 = vcmp.ge.f32.partialorder %v4660_v62, 0.0  ;;  %v5045_v36 = vmul.f32 %v10541_v7, %v4660_v62  ;;  %v3028_v3 = vsel %vm2643_vm9, %v12112_v33, %v2836_v44  ;;  %v7325_v26 = vld [vmem:[#allocation2 + $0x1b0] ss:$3 sm:$0xff]  ;;  %v14820_v22 = vrot.slane %v12104_v13, 2 }
 0x448   : > { %vm4855_vm12 = vcmp.ge.f32.partialorder %v4663_v8, 0.0  ;;  %v5048_v17 = vmul.f32 %v10541_v7, %v4663_v8  ;;  %v5239_v56 = vsel %vm4854_vm10, %v4662_v57, %v5047_v25  ;;  %vm4853_vm13 = vcmp.ge.f32.partialorder %v4661_v45, 0.0  ;;  %7450 = vxpose.xlu1.b32.cont [3/16] (narrow) %v7325_v26, 64  ;;  %v14822_v26 = vld [vmem:[#allocation118_spill] sm:$0xff] }
 0x449   : > { %v5046_v42 = vmul.f32 %v10541_v7, %v4661_v45  ;;  %v5685_v59 = vrot.slane %v5239_v56, 1  ;;  %v6453_v28 = vrot.slane %v5239_v56, 2  ;;  %v5237_v35 = vsel %vm4852_vm11, %v4660_v62, %v5045_v36 }
 0x44a   : > { %v12195_v55 = vsel %vm4855_vm12, %v4663_v8, %v5048_v17  ;;  %v5681_v48 = vrot.slane %v5237_v35, 1  ;;  %v6449_v2 = vrot.slane %v5237_v35, 2  ;;  %v3134_v44 = vpack.c.bf16 %v3028_v3, %v3027_v20 }
 0x44b   : > { %v14434_v57 = vrot.slane %v12195_v55, 1  ;;  %v14433_v29 = vrot.slane %v12195_v55, 2  ;;  %v5238_v33 = vsel %vm4853_vm13, %v4661_v45, %v5046_v42  ;;  %vm2646_vm14 = vcmp.ge.f32.partialorder %v12165_v30, 0.0  ;;  %v14821_v42 = vld [vmem:[#allocation119_spill] sm:$0xff] }
 0x44c   : > { %v5682_v62 = vsel %vm5561_vm2, %v14819_v9, %v5681_v48  ;;  %v6450_v8 = vsel %vm6329_vm3, %v14820_v22, %v6449_v2  ;;  %v5683_v45 = vrot.slane %v5238_v33, 1  ;;  %v6451_v20 = vrot.slane %v5238_v33, 2  ;;  %8501 = vmatmul.mubr.bf16.gmra.mrb[168].mxu1 %v3134_v44  ;;  %v12223_v22 = vpop.f32.mrb[100].mxu1 }
 0x44d   : > { %v5688_v25 = vsel %vm5561_vm2, %v5685_v59, %v14434_v57  ;;  %v6456_v11 = vsel %vm6329_vm3, %v6453_v28, %v14433_v29  ;;  %v6196_v10 = vmax.f32 %v12104_v13, %v5682_v62  ;;  %v2455_v36 = vadd.f32 %v11848_v34, %v2256_v58 }
 0x44e   : > { %v6199_v23 = vmax.f32 %v5239_v56, %v5688_v25  ;;  %v2259_v17 = vmul.f32 %v11851_v27, %v11515_v51  ;;  %v2257_v3 = vmul.f32 %v11851_v27, %v14821_v42  ;;  %v4083_v9 = vmul.f32 %v11855_v43, %v14822_v26  ;;  %v12227_v25 = vpop.f32.mrb[101].mxu1 }
 0x44f   : > { %v6964_v13 = vmax.f32 %v6196_v10, %v6450_v8  ;;  %v5684_v62 = vsel %vm5561_vm2, %v5681_v48, %v5683_v45  ;;  %v5686_v44 = vsel %vm5561_vm2, %v5683_v45, %v5685_v59  ;;  %v6452_v51 = vsel %vm6329_vm3, %v6449_v2, %v6451_v20  ;;  %v12231_v42 = vpop.f32.mrb[102].mxu1 }
 0x450   : > { %v6967_v56 = vmax.f32 %v6199_v23, %v6456_v11  ;;  %v6197_v58 = vmax.f32 %v5237_v35, %v5684_v62  ;;  %v6198_v29 = vmax.f32 %v5238_v33, %v5686_v44  ;;  %v6454_v57 = vsel %vm6329_vm3, %v6451_v20, %v6453_v28  ;;  %v12238_v2 = vpop.f32.mrb[103].mxu1 }
 0x451   : > { %v2839_v26 = vmul.f32 %v9855_v41, %v12165_v30  ;;  %vm2644_vm15 = vcmp.ge.f32.partialorder %v2452_v19, 0.0  ;;  %v2837_v8 = vmul.f32 %v9855_v41, %v2452_v19  ;;  %7156 = vst [vmem:[#allocation2 + $0x1d8] sm:$0xff] %v6964_v13  ;;  %vm2645_vm0 = vcmp.ge.f32.partialorder %v2453_v50, 0.0  ;;  %14823 = vst [vmem:[#allocation30_spill] sm:$0xff] %v12238_v2 }
 0x452   : > { %7159 = vst [vmem:[#allocation2 + $0x1f0] sm:$0xff] %v6967_v56  ;;  %v2838_v59 = vmul.f32 %v9855_v41, %v2453_v50  ;;  %v6965_v48 = vmax.f32 %v6197_v58, %v6452_v51  ;;  %v6966_v35 = vmax.f32 %v6198_v29, %v6454_v57  ;;  %v4282_v33 = vadd.f32 %v11874_v1, %v4083_v9  ;;  %v14824_v29 = vld [vmem:[#allocation51_spill] sm:$0xff]  ;;  %v14826_v56 = vld [vmem:[#allocation121_spill] sm:$0xff] }
 0x453   : > { %v12241_v28 = vadd.f32 %v11848_v34, %v2259_v17  ;;  %v4081_v11 = vmul.f32 %v11855_v43, %v11541_v16  ;;  %v4084_v10 = vmul.f32 %v11855_v43, %v11547_v21  ;;  %v4082_v23 = vmul.f32 %v11855_v43, %v11552_v40  ;;  %v14827_v58 = vld [vmem:[#allocation49_spill] sm:$0xff] }
 0x454   : > { %vm2647_vm1 = vcmp.ge.f32.partialorder %v2455_v36, 0.0  ;;  %v2840_v45 = vmul.f32 %v9855_v41, %v2455_v36  ;;  %7157 = vst [vmem:[#allocation2 + $0x1e0] sm:$0xff] %v6965_v48  ;;  %7158 = vst [vmem:[#allocation2 + $0x1e8] sm:$0xff] %v6966_v35  ;;  %v12251_v57 = vadd.f32 %v11848_v34, %v2257_v3  ;;  %v14825_v20 = vunpack.c.l.bf16 %v14824_v29 }
 0x455   : > { %v4280_v9 = vadd.f32 %v11874_v1, %v4081_v11  ;;  %v2258_v16 = vmul.f32 %v11851_v27, %v11545_v61  ;;  %v4283_v21 = vadd.f32 %v11874_v1, %v4084_v10  ;;  %v4281_v40 = vadd.f32 %v11874_v1, %v4082_v23 }
 0x456   : > { %v4666_v17 = vadd.f32 %v14825_v20, %v4282_v33  ;;  %v2260_v62 = vmul.f32 %v11851_v27, %v14826_v56  ;;  %v3030_v3 = vsel %vm2645_vm0, %v2453_v50, %v2838_v59  ;;  %v12266_v44 = vmul.f32 %v9855_v41, %v12241_v28 }
 0x457   : > { %v14828_v51 = vunpack.c.l.bf16 %v14827_v58  ;;  %v14829_v61 = vunpack.c.h.bf16 %v14824_v29  ;;  %v3029_v33 = vsel %vm2644_vm15, %v2452_v19, %v2837_v8  ;;  %v14830_v10 = vunpack.c.h.bf16 %v14827_v58 }
 0x458   : > { %vm4858_vm4 = vcmp.ge.f32.partialorder %v4666_v17, 0.0  ;;  %v5051_v13 = vmul.f32 %v10541_v7, %v4666_v17  ;;  %v3135_v20 = vpack.c.bf16 %v3030_v3, %v3029_v33  ;;  %v3032_v56 = vsel %vm2647_vm1, %v2455_v36, %v2840_v45  ;;  %v7327_v50 = vld [vmem:[#allocation2 + $0x1c8] ss:$3 sm:$0xff] }
 0x459   : > { %v4664_v48 = vadd.f32 %v14828_v51, %v4280_v9  ;;  %v4667_v35 = vadd.f32 %v14829_v61, %v4283_v21  ;;  %v4665_v23 = vadd.f32 %v14830_v10, %v4281_v40  ;;  %v12278_v2 = vadd.f32 %v11848_v34, %v2258_v16  ;;  %7451 = vxpose.xlu1.b32.cont [4/16] (narrow) %v7327_v50, 64 }
 0x45a   : > { %v5243_v11 = vsel %vm4858_vm4, %v4666_v17, %v5051_v13  ;;  %v3031_v29 = vsel %vm2646_vm14, %v12165_v30, %v2839_v26  ;;  %8504 = vmatprep.mubr.bf16.mxu1 %v3135_v20  ;;  %vm2648_vm8 = vcmp.ge.f32.partialorder %v12251_v57, 0.0  ;;  %v12288_v26 = vpop.f32.mrb[104].mxu1  ;;  %vm2650_vm9 = vcmp.ge.f32.partialorder %v12241_v28, 0.0 }
 0x45b   : > { %vm4856_vm5 = vcmp.ge.f32.partialorder %v4664_v48, 0.0  ;;  %v5049_v59 = vmul.f32 %v10541_v7, %v4664_v48  ;;  %vm4859_vm6 = vcmp.ge.f32.partialorder %v4667_v35, 0.0  ;;  %v5052_v19 = vmul.f32 %v10541_v7, %v4667_v35  ;;  %v7329_v30 = vld [vmem:[#allocation2 + $0x1e0] ss:$3 sm:$0xff]  ;;  %v12292_v33 = vpop.f32.mrb[105].mxu1 }
 0x45c   : > { %vm4857_vm7 = vcmp.ge.f32.partialorder %v4665_v23, 0.0  ;;  %v5050_v8 = vmul.f32 %v10541_v7, %v4665_v23  ;;  %v5693_v36 = vrot.slane %v5243_v11, 1  ;;  %v6461_v45 = vrot.slane %v5243_v11, 2  ;;  %v12306_v50 = vpop.f32.mrb[106].mxu1 }
 0x45d   : > { %v5241_v17 = vsel %vm4856_vm5, %v4664_v48, %v5049_v59  ;;  %v3136_v9 = vpack.c.bf16 %v3032_v56, %v3031_v29  ;;  %v12286_v40 = vsel %vm4859_vm6, %v4667_v35, %v5052_v19  ;;  %7452 = vxpose.xlu1.b32.cont [5/16] (narrow) %v7329_v30, 64  ;;  %v12296_v48 = vadd.f32 %v11848_v34, %v2260_v62 }
 0x45e   : > { %v5689_v16 = vrot.slane %v5241_v17, 1  ;;  %v6457_v21 = vrot.slane %v5241_v17, 2  ;;  %v5242_v13 = vsel %vm4857_vm7, %v4665_v23, %v5050_v8  ;;  %v14435_v3 = vrot.slane %v12286_v40, 1  ;;  %14833 = vst [vmem:[#allocation133_spill] sm:$0xff] %v12306_v50  ;;  %v12316_v8 = vpop.f32.mrb[107].mxu1 }
 0x45f   : > { %v14436_v58 = vrot.slane %v12286_v40, 2  ;;  %v5691_v51 = vrot.slane %v5242_v13, 1  ;;  %v6459_v61 = vrot.slane %v5242_v13, 2  ;;  %8505 = vmatmul.mubr.bf16.gmra.mrb[172].mxu1 %v3136_v9  ;;  %v14831_v35 = vrot.slane %v12195_v55, 1  ;;  %14834 = vst [vmem:[#allocation28_spill] sm:$0xff] %v12316_v8 }
 0x460   : > { %v14832_v23 = vrot.slane %v12195_v55, 2  ;;  %v2263_v56 = vmul.f32 %v11851_v27, %v11614_v38  ;;  %v5696_v62 = vsel %vm5561_vm2, %v5693_v36, %v14435_v3  ;;  %vm2649_vm10 = vcmp.ge.f32.partialorder %v12278_v2, 0.0 }
 0x461   : > { %v5690_v10 = vsel %vm5561_vm2, %v14831_v35, %v5689_v16  ;;  %v6464_v29 = vsel %vm6329_vm3, %v6461_v45, %v14436_v58  ;;  %v5692_v19 = vsel %vm5561_vm2, %v5689_v16, %v5691_v51  ;;  %v6203_v9 = vmax.f32 %v5243_v11, %v5696_v62  ;;  %v14839_v62 = vld [vmem:[#allocation126_spill] sm:$0xff] }
 0x462   : > { %v6458_v20 = vsel %vm6329_vm3, %v14832_v23, %v6457_v21  ;;  %v6200_v59 = vmax.f32 %v12195_v55, %v5690_v10  ;;  %v5694_v30 = vsel %vm5561_vm2, %v5691_v51, %v5693_v36  ;;  %v6201_v38 = vmax.f32 %v5241_v17, %v5692_v19  ;;  %v14835_v17 = vld [vmem:[#allocation123_spill] sm:$0xff] }
 0x463   : > { %v6460_v35 = vsel %vm6329_vm3, %v6457_v21, %v6459_v61  ;;  %v2842_v55 = vmul.f32 %v9855_v41, %v12278_v2  ;;  %v6202_v10 = vmax.f32 %v5242_v13, %v5694_v30  ;;  %v6462_v3 = vsel %vm6329_vm3, %v6459_v61, %v6461_v45  ;;  %v14836_v51 = vld [vmem:[#allocation35_spill] sm:$0xff]  ;;  %v14837_v45 = vld [vmem:[#allocation122_spill] sm:$0xff] }
 0x464   : > { %v6968_v23 = vmax.f32 %v6200_v59, %v6458_v20  ;;  %v2841_v58 = vmul.f32 %v9855_v41, %v12251_v57  ;;  %v6971_v16 = vmax.f32 %v6203_v9, %v6464_v29  ;;  %v6969_v8 = vmax.f32 %v6201_v38, %v6460_v35  ;;  %v14838_v20 = vld [vmem:[#allocation120_spill] sm:$0xff] }
 0x465   : > { %v6970_v11 = vmax.f32 %v6202_v10, %v6462_v3  ;;  %v12327_v36 = vadd.f32 %v11848_v34, %v2263_v56  ;;  %v2261_v21 = vmul.f32 %v11851_v27, %v14835_v17  ;;  %v4087_v13 = vmul.f32 %v11855_v43, %v14836_v51  ;;  %v14840_v29 = vld [vmem:[#allocation124_spill] sm:$0xff]  ;;  %v12363_v51 = vpop.f32.mrb[108].mxu1 }
 0x466   : > { %7160 = vst [vmem:[#allocation2 + $0x1f8] sm:$0xff] %v6968_v23  ;;  %7163 = vst [vmem:[#allocation2 + $0x210] sm:$0xff] %v6971_v16  ;;  %v2264_v61 = vmul.f32 %v11851_v27, %v14837_v45  ;;  %v4085_v59 = vmul.f32 %v11855_v43, %v14838_v20  ;;  %v4088_v3 = vmul.f32 %v11855_v43, %v14839_v62  ;;  %vm2651_vm11 = vcmp.ge.f32.partialorder %v12296_v48, 0.0  ;;  %v14844_v45 = vld [vmem:[#allocation53_spill] sm:$0xff] }
 0x467   : > { %7161 = vst [vmem:[#allocation2 + $0x200] sm:$0xff] %v6969_v8  ;;  %v4086_v56 = vmul.f32 %v11855_v43, %v14840_v29  ;;  %v2844_v19 = vmul.f32 %v9855_v41, %v12296_v48  ;;  %7162 = vst [vmem:[#allocation2 + $0x208] sm:$0xff] %v6970_v11  ;;  %v4286_v8 = vadd.f32 %v11874_v1, %v4087_v13  ;;  %v14841_v11 = vld [vmem:[#allocation54_spill] sm:$0xff]  ;;  %v14845_v20 = vunpack.c.l.bf16 %v14844_v45 }
 0x468   : > { %v3034_v9 = vsel %vm2649_vm10, %v12278_v2, %v2842_v55  ;;  %v4284_v30 = vadd.f32 %v11874_v1, %v4085_v59  ;;  %v4287_v38 = vadd.f32 %v11874_v1, %v4088_v3  ;;  %v3033_v23 = vsel %vm2648_vm8, %v12251_v57, %v2841_v58  ;;  %14843 = vst [vmem:[#allocation135_spill] sm:$0xff] %v12363_v51  ;;  %v14846_v57 = vld [vmem:[#allocation33_spill] sm:$0xff] }
 0x469   : > { %v4285_v35 = vadd.f32 %v11874_v1, %v4086_v56  ;;  %v12356_v10 = vmul.f32 %v9855_v41, %v12327_v36  ;;  %v12359_v16 = vadd.f32 %v11848_v34, %v2261_v21  ;;  %v14842_v17 = vunpack.c.l.bf16 %v14841_v11  ;;  %v12374_v21 = vpop.f32.mrb[109].mxu1 }
 0x46a   : > { %v3137_v55 = vpack.c.bf16 %v3034_v9, %v3033_v23  ;;  %v12366_v13 = vadd.f32 %v11848_v34, %v2264_v61  ;;  %v4668_v59 = vadd.f32 %v14845_v20, %v4284_v30  ;;  %v2262_v58 = vmul.f32 %v11851_v27, %v14846_v57  ;;  %14848 = vst [vmem:[#allocation137_spill] sm:$0xff] %v12374_v21 }
 0x46b   : > { %v4670_v2 = vadd.f32 %v14842_v17, %v4286_v8  ;;  %v14847_v62 = vunpack.c.h.bf16 %v14841_v11  ;;  %v14849_v56 = vunpack.c.h.bf16 %v14844_v45  ;;  %v3035_v61 = vsel %vm2650_vm9, %v12241_v28, %v12266_v44 }
 0x46c   : > { %8508 = vmatprep.mubr.bf16.mxu1 %v3137_v55  ;;  %vm4860_vm13 = vcmp.ge.f32.partialorder %v4668_v59, 0.0  ;;  %v5053_v9 = vmul.f32 %v10541_v7, %v4668_v59  ;;  %vm2654_vm0 = vcmp.ge.f32.partialorder %v12327_v36, 0.0  ;;  %vm2652_vm1 = vcmp.ge.f32.partialorder %v12359_v16, 0.0 }
 0x46d   : > { %v4671_v3 = vadd.f32 %v14847_v62, %v4287_v38  ;;  %vm4862_vm12 = vcmp.ge.f32.partialorder %v4670_v2, 0.0  ;;  %v5055_v29 = vmul.f32 %v10541_v7, %v4670_v2  ;;  %v4669_v8 = vadd.f32 %v14849_v56, %v4285_v35  ;;  %v12385_v38 = vpop.f32.mrb[110].mxu1 }
 0x46e   : > { %14850 = vst [vmem:[#allocation138_spill] sm:$0xff] %v12385_v38  ;;  %v3036_v35 = vsel %vm2651_vm11, %v12296_v48, %v2844_v19  ;;  %v12391_v17 = vpop.f32.mrb[111].mxu1  ;;  %v5245_v44 = vsel %vm4860_vm13, %v4668_v59, %v5053_v9  ;;  %v7331_v20 = vld [vmem:[#allocation2 + $0x1f8] ss:$3 sm:$0xff]  ;;  %v2267_v48 = vmul.f32 %v11851_v27, %v11714_v24  ;;  %v14852_v19 = vrot.slane %v12286_v40, 1 }
 0x46f   : > { %vm4863_vm14 = vcmp.ge.f32.partialorder %v4671_v3, 0.0  ;;  %v5056_v30 = vmul.f32 %v10541_v7, %v4671_v3  ;;  %v5247_v23 = vsel %vm4862_vm12, %v4670_v2, %v5055_v29  ;;  %vm4861_vm15 = vcmp.ge.f32.partialorder %v4669_v8, 0.0  ;;  %14851 = vst [vmem:[#allocation43_spill] sm:$0xff] %v12391_v17  ;;  %7453 = vxpose.xlu1.b32.cont [6/16] (narrow) %v7331_v20, 64  ;;  %v14854_v20 = vld [vmem:[#allocation38_spill] sm:$0xff]  ;;  %v14856_v17 = vld [vmem:[#allocation37_spill] sm:$0xff] }
 0x470   : > { %v5054_v11 = vmul.f32 %v10541_v7, %v4669_v8  ;;  %v5701_v55 = vrot.slane %v5247_v23, 1  ;;  %v6469_v28 = vrot.slane %v5247_v23, 2  ;;  %v5697_v57 = vrot.slane %v5245_v44, 1 }
 0x471   : > { %v12393_v45 = vsel %vm4863_vm14, %v4671_v3, %v5056_v30  ;;  %v6465_v62 = vrot.slane %v5245_v44, 2  ;;  %v2461_v29 = vadd.f32 %v11848_v34, %v2262_v58  ;;  %v3138_v21 = vpack.c.bf16 %v3036_v35, %v3035_v61 }
 0x472   : > { %v14437_v56 = vrot.slane %v12393_v45, 1  ;;  %v14438_v2 = vrot.slane %v12393_v45, 2  ;;  %v5246_v38 = vsel %vm4861_vm15, %v4669_v8, %v5054_v11  ;;  %v5698_v59 = vsel %vm5561_vm2, %v14852_v19, %v5697_v57 }
 0x473   : > { %v14853_v3 = vrot.slane %v12286_v40, 2  ;;  %v6204_v8 = vmax.f32 %v12286_v40, %v5698_v59  ;;  %v5699_v24 = vrot.slane %v5246_v38, 1  ;;  %v6467_v11 = vrot.slane %v5246_v38, 2  ;;  %8509 = vmatmul.mubr.bf16.gmra.mrb[176].mxu1 %v3138_v21  ;;  %v12425_v59 = vpop.f32.mrb[112].mxu1 }
 0x474   : > { %v5704_v30 = vsel %vm5561_vm2, %v5701_v55, %v14437_v56  ;;  %v6472_v58 = vsel %vm6329_vm3, %v6469_v28, %v14438_v2  ;;  %v12415_v35 = vadd.f32 %v11848_v34, %v2267_v48  ;;  %v2265_v19 = vmul.f32 %v11851_v27, %v14854_v20  ;;  %v12429_v50 = vpop.f32.mrb[113].mxu1 }
 0x475   : > { %v6466_v9 = vsel %vm6329_vm3, %v14853_v3, %v6465_v62  ;;  %v6207_v61 = vmax.f32 %v5247_v23, %v5704_v30  ;;  %v14855_v3 = vld [vmem:[#allocation29_spill] sm:$0xff]  ;;  %v2268_v2 = vmul.f32 %v11851_v27, %v14856_v17  ;;  %v5700_v23 = vsel %vm5561_vm2, %v5697_v57, %v5699_v24  ;;  %v12435_v17 = vpop.f32.mrb[114].mxu1 }
 0x476   : > { %v4091_v56 = vmul.f32 %v11855_v43, %v14855_v3  ;;  %v6972_v51 = vmax.f32 %v6204_v8, %v6466_v9  ;;  %v5702_v21 = vsel %vm5561_vm2, %v5699_v24, %v5701_v55  ;;  %v6205_v30 = vmax.f32 %v5245_v44, %v5700_v23  ;;  %v12437_v44 = vld [vmem:[#allocation10] ss:$0 sm:$0xff]  ;;  %v12446_v9 = vld [vmem:[#allocation13] ss:$0 sm:$0xff]  ;;  %v12463_v24 = vld [vmem:[#allocation15] ss:$0 sm:$0xff] }
 0x477   : > { %v6975_v40 = vmax.f32 %v6207_v61, %v6472_v58  ;;  %v6206_v34 = vmax.f32 %v5246_v38, %v5702_v21  ;;  %v6468_v48 = vsel %vm6329_vm3, %v6465_v62, %v6467_v11  ;;  %v6470_v20 = vsel %vm6329_vm3, %v6467_v11, %v6469_v28  ;;  %v12466_v11 = vld [vmem:[#allocation9] ss:$0 sm:$0xff] }
 0x478   : > { %v2845_v27 = vmul.f32 %v9855_v41, %v12359_v16  ;;  %7164 = vst [vmem:[#allocation2 + $0x218] sm:$0xff] %v6972_v51  ;;  %vm2653_vm4 = vcmp.ge.f32.partialorder %v2461_v29, 0.0  ;;  %v2846_v43 = vmul.f32 %v9855_v41, %v2461_v29  ;;  %v6973_v55 = vmax.f32 %v6205_v30, %v6468_v48 }
 0x479   : > { %7167 = vst [vmem:[#allocation2 + $0x230] sm:$0xff] %v6975_v40  ;;  %v6974_v38 = vmax.f32 %v6206_v34, %v6470_v20  ;;  %v12440_v28 = vadd.f32 %v12437_v44, %v2265_v19  ;;  %v4290_v57 = vadd.f32 %v11874_v1, %v4091_v56  ;;  %v12444_v62 = vadd.f32 %v12437_v44, %v2268_v2  ;;  %v14857_v56 = vld [vmem:[#allocation56_spill] sm:$0xff]  ;;  %v12472_v40 = vpop.f32.mrb[115].mxu1 }
 0x47a   : > { %v4089_v51 = vmul.f32 %v12446_v9, %v11740_v31  ;;  %v4092_v58 = vmul.f32 %v12446_v9, %v11746_v63  ;;  %v4090_v8 = vmul.f32 %v12446_v9, %v11751_v37  ;;  %vm2655_vm5 = vcmp.ge.f32.partialorder %v12366_v13, 0.0  ;;  %7165 = vst [vmem:[#allocation2 + $0x220] sm:$0xff] %v6973_v55 }
 0x47b   : > { %v2848_v61 = vmul.f32 %v9855_v41, %v12366_v13  ;;  %7166 = vst [vmem:[#allocation2 + $0x228] sm:$0xff] %v6974_v38  ;;  %v12459_v1 = vmul.f32 %v9855_v41, %v12415_v35  ;;  %v14858_v2 = vunpack.c.l.bf16 %v14857_v56  ;;  %v2266_v37 = vmul.f32 %v12466_v11, %v11744_v12  ;;  %v14859_v12 = vld [vmem:[#allocation55_spill] sm:$0xff] }
 0x47c   : > { %v4288_v63 = vadd.f32 %v12463_v24, %v4089_v51  ;;  %v4291_v19 = vadd.f32 %v12463_v24, %v4092_v58  ;;  %v4289_v3 = vadd.f32 %v12463_v24, %v4090_v8  ;;  %v12476_v23 = vmul.f32 %v9855_v41, %v12440_v28 }
 0x47d   : > { %v4674_v31 = vadd.f32 %v14858_v2, %v4290_v57  ;;  %v3038_v30 = vsel %vm2653_vm4, %v2461_v29, %v2846_v43  ;;  %v12482_v34 = vmul.f32 %v9855_v41, %v12444_v62  ;;  %v14860_v48 = vunpack.c.l.bf16 %v14859_v12 }
 0x47e   : > { %v14861_v55 = vunpack.c.h.bf16 %v14857_v56  ;;  %v3037_v57 = vsel %vm2652_vm1, %v12359_v16, %v2845_v27  ;;  %v14862_v58 = vunpack.c.h.bf16 %v14859_v12  ;;  %v3040_v29 = vsel %vm2655_vm5, %v12366_v13, %v2848_v61 }
 0x47f   : > { %vm4866_vm6 = vcmp.ge.f32.partialorder %v4674_v31, 0.0  ;;  %v5059_v21 = vmul.f32 %v10541_v7, %v4674_v31  ;;  %v4672_v20 = vadd.f32 %v14860_v48, %v4288_v63  ;;  %v3139_v2 = vpack.c.bf16 %v3038_v30, %v3037_v57  ;;  %v12511_v57 = vpop.f32.mrb[116].mxu1 }
 0x480   : > { %v4675_v38 = vadd.f32 %v14861_v55, %v4291_v19  ;;  %v4673_v8 = vadd.f32 %v14862_v58, %v4289_v3  ;;  %v12498_v63 = vadd.f32 %v12437_v44, %v2266_v37  ;;  %v3039_v16 = vsel %vm2654_vm0, %v12327_v36, %v12356_v10 }
 0x481   : > { %v5251_v51 = vsel %vm4866_vm6, %v4674_v31, %v5059_v21  ;;  %vm4864_vm7 = vcmp.ge.f32.partialorder %v4672_v20, 0.0  ;;  %v5057_v43 = vmul.f32 %v10541_v7, %v4672_v20  ;;  %vm2656_vm8 = vcmp.ge.f32.partialorder %v12440_v28, 0.0  ;;  %8512 = vmatprep.mubr.bf16.mxu1 %v3139_v2  ;;  %v7333_v37 = vld [vmem:[#allocation2 + $0x210] ss:$3 sm:$0xff] }
 0x482   : > { %vm4867_vm9 = vcmp.ge.f32.partialorder %v4675_v38, 0.0  ;;  %v5060_v27 = vmul.f32 %v10541_v7, %v4675_v38  ;;  %vm4865_vm10 = vcmp.ge.f32.partialorder %v4673_v8, 0.0  ;;  %v5058_v56 = vmul.f32 %v10541_v7, %v4673_v8  ;;  %7454 = vxpose.xlu1.b32.cont [7/16] (narrow) %v7333_v37, 64 }
 0x483   : > { %v5709_v13 = vrot.slane %v5251_v51, 1  ;;  %v6477_v61 = vrot.slane %v5251_v51, 2  ;;  %v5249_v31 = vsel %vm4864_vm7, %v4672_v20, %v5057_v43  ;;  %v3140_v19 = vpack.c.bf16 %v3040_v29, %v3039_v16  ;;  %v12524_v43 = vpop.f32.mrb[117].mxu1 }
 0x484   : > { %v5705_v3 = vrot.slane %v5249_v31, 1  ;;  %v6473_v21 = vrot.slane %v5249_v31, 2  ;;  %v12507_v30 = vsel %vm4867_vm9, %v4675_v38, %v5060_v27  ;;  %v5250_v12 = vsel %vm4865_vm10, %v4673_v8, %v5058_v56  ;;  %14865 = vst [vmem:[#allocation136_spill] sm:$0xff] %v12524_v43  ;;  %v12534_v37 = vpop.f32.mrb[118].mxu1 }
 0x485   : > { %v14439_v36 = vrot.slane %v12507_v30, 1  ;;  %v14440_v10 = vrot.slane %v12507_v30, 2  ;;  %v5707_v48 = vrot.slane %v5250_v12, 1  ;;  %v6475_v55 = vrot.slane %v5250_v12, 2  ;;  %8513 = vmatmul.mubr.bf16.gmra.mrb[180].mxu1 %v3140_v19  ;;  %14866 = vst [vmem:[#allocation134_spill] sm:$0xff] %v12534_v37 }
 0x486   : > { %vm2658_vm11 = vcmp.ge.f32.partialorder %v12415_v35, 0.0  ;;  %v14863_v20 = vrot.slane %v12393_v45, 1  ;;  %v14864_v38 = vrot.slane %v12393_v45, 2  ;;  %v2271_v2 = vmul.f32 %v12466_v11, %v11813_v15 }
 0x487   : > { %v2269_v29 = vmul.f32 %v12466_v11, %v11822_v32  ;;  %v5712_v27 = vsel %vm5561_vm2, %v5709_v13, %v14439_v36  ;;  %v6480_v56 = vsel %vm6329_vm3, %v6477_v61, %v14440_v10  ;;  %v5708_v19 = vsel %vm5561_vm2, %v5705_v3, %v5707_v48 }
 0x488   : > { %v5706_v58 = vsel %vm5561_vm2, %v14863_v20, %v5705_v3  ;;  %v6474_v8 = vsel %vm6329_vm3, %v14864_v38, %v6473_v21  ;;  %vm2659_vm12 = vcmp.ge.f32.partialorder %v12444_v62, 0.0  ;;  %v6211_v15 = vmax.f32 %v5251_v51, %v5712_v27  ;;  %v14871_v27 = vld [vmem:[#allocation131_spill] sm:$0xff] }
 0x489   : > { %v6208_v16 = vmax.f32 %v12393_v45, %v5706_v58  ;;  %v5710_v32 = vsel %vm5561_vm2, %v5707_v48, %v5709_v13  ;;  %v6209_v20 = vmax.f32 %v5249_v31, %v5708_v19  ;;  %v6476_v45 = vsel %vm6329_vm3, %v6473_v21, %v6475_v55  ;;  %v12539_v58 = vpop.f32.mrb[119].mxu1  ;;  %v14867_v21 = vld [vmem:[#allocation125_spill] sm:$0xff] }
 0x48a   : > { %v2850_v36 = vmul.f32 %v9855_v41, %v12498_v63  ;;  %v6210_v43 = vmax.f32 %v5250_v12, %v5710_v32  ;;  %v6478_v10 = vsel %vm6329_vm3, %v6475_v55, %v6477_v61  ;;  %vm2657_vm13 = vcmp.ge.f32.partialorder %v12498_v63, 0.0  ;;  %v14869_v61 = vld [vmem:[#allocation128_spill] sm:$0xff] }
 0x48b   : > { %v6976_v38 = vmax.f32 %v6208_v16, %v6474_v8  ;;  %v6979_v3 = vmax.f32 %v6211_v15, %v6480_v56  ;;  %v6977_v37 = vmax.f32 %v6209_v20, %v6476_v45  ;;  %v12546_v51 = vadd.f32 %v12437_v44, %v2271_v2  ;;  %v14868_v8 = vld [vmem:[#allocation27_spill] sm:$0xff]  ;;  %v14870_v16 = vld [vmem:[#allocation130_spill] sm:$0xff] }
 0x48c   : > { %v6978_v13 = vmax.f32 %v6210_v43, %v6478_v10  ;;  %v12549_v31 = vadd.f32 %v12437_v44, %v2269_v29  ;;  %v4095_v48 = vmul.f32 %v12446_v9, %v14867_v21  ;;  %v2272_v12 = vmul.f32 %v12466_v11, %v14868_v8  ;;  %v14872_v43 = vld [vmem:[#allocation40_spill] sm:$0xff] }
 0x48d   : > { %7168 = vst [vmem:[#allocation2 + $0x238] sm:$0xff] %v6976_v38  ;;  %7171 = vst [vmem:[#allocation2 + $0x250] sm:$0xff] %v6979_v3  ;;  %v4093_v55 = vmul.f32 %v12446_v9, %v14869_v61  ;;  %v2270_v2 = vmul.f32 %v12466_v11, %v14870_v16  ;;  %v4096_v10 = vmul.f32 %v12446_v9, %v14871_v27  ;;  %v12580_v38 = vpop.f32.mrb[120].mxu1  ;;  %vm2662_vm6 = vcmp.ge.f32.partialorder %v12546_v51, 0.0 }
 0x48e   : > { %7169 = vst [vmem:[#allocation2 + $0x240] sm:$0xff] %v6977_v37  ;;  %v4094_v29 = vmul.f32 %v12446_v9, %v14872_v43  ;;  %7170 = vst [vmem:[#allocation2 + $0x248] sm:$0xff] %v6978_v13  ;;  %v4294_v56 = vadd.f32 %v12463_v24, %v4095_v48  ;;  %v12565_v19 = vadd.f32 %v12437_v44, %v2272_v12  ;;  %v14876_v48 = vld [vmem:[#allocation58_spill] sm:$0xff]  ;;  %vm2660_vm15 = vcmp.ge.f32.partialorder %v12549_v31, 0.0 }
 0x48f   : > { %v3041_v37 = vsel %vm2656_vm8, %v12440_v28, %v12476_v23  ;;  %v3042_v11 = vsel %vm2657_vm13, %v12498_v63, %v2850_v36  ;;  %v4292_v15 = vadd.f32 %v12463_v24, %v4093_v55  ;;  %v12576_v32 = vadd.f32 %v12437_v44, %v2270_v2  ;;  %v14873_v23 = vld [vmem:[#allocation60_spill] sm:$0xff]  ;;  %v12592_v44 = vpop.f32.mrb[121].mxu1 }
 0x490   : > { %v4295_v20 = vadd.f32 %v12463_v24, %v4096_v10  ;;  %v4293_v45 = vadd.f32 %v12463_v24, %v4094_v29  ;;  %v12584_v3 = vmul.f32 %v9855_v41, %v12546_v51  ;;  %v12588_v28 = vmul.f32 %v9855_v41, %v12549_v31  ;;  %14875 = vst [vmem:[#allocation41_spill] sm:$0xff] %v12592_v44 }
 0x491   : > { %v14874_v63 = vunpack.c.l.bf16 %v14873_v23  ;;  %v3141_v13 = vpack.c.bf16 %v3042_v11, %v3041_v37  ;;  %v12596_v21 = vmul.f32 %v9855_v41, %v12565_v19  ;;  %v14877_v8 = vunpack.c.l.bf16 %v14876_v48 }
 0x492   : > { %v12602_v61 = vmul.f32 %v9855_v41, %v12576_v32  ;;  %v14878_v55 = vunpack.c.h.bf16 %v14873_v23  ;;  %v14879_v27 = vunpack.c.h.bf16 %v14876_v48  ;;  %v3043_v43 = vsel %vm2658_vm11, %v12415_v35, %v12459_v1  ;;  %v12622_v1 = vpop.f32.mrb[122].mxu1 }
 0x493   : > { %v4678_v36 = vadd.f32 %v14874_v63, %v4294_v56  ;;  %v4676_v12 = vadd.f32 %v14877_v8, %v4292_v15  ;;  %8516 = vmatprep.mubr.bf16.mxu1 %v3141_v13  ;;  %vm2661_vm1 = vcmp.ge.f32.partialorder %v12576_v32, 0.0  ;;  %v3044_v35 = vsel %vm2659_vm12, %v12444_v62, %v12482_v34  ;;  %14880 = vst [vmem:[#allocation139_spill] sm:$0xff] %v12622_v1  ;;  %v12630_v8 = vpop.f32.mrb[123].mxu1 }
 0x494   : > { %v4679_v16 = vadd.f32 %v14878_v55, %v4295_v20  ;;  %v4677_v10 = vadd.f32 %v14879_v27, %v4293_v45  ;;  %v7335_v56 = vld [vmem:[#allocation2 + $0x228] ss:$3 sm:$0xff]  ;;  %vm2663_vm7 = vcmp.ge.f32.partialorder %v12565_v19, 0.0  ;;  %14881 = vst [vmem:[#allocation115_spill] sm:$0xff] %v12630_v8  ;;  %v3142_v34 = vpack.c.bf16 %v3044_v35, %v3043_v43 }
 0x495   : > { %vm4870_vm14 = vcmp.ge.f32.partialorder %v4678_v36, 0.0  ;;  %v5063_v2 = vmul.f32 %v10541_v7, %v4678_v36  ;;  %vm4868_vm0 = vcmp.ge.f32.partialorder %v4676_v12, 0.0  ;;  %v5061_v41 = vmul.f32 %v10541_v7, %v4676_v12  ;;  %7455 = vxpose.xlu1.b32.cont [8/16] (narrow) %v7335_v56, 64  ;;  %v14882_v55 = vld [vmem:[#allocation129_spill] sm:$0xff] }
 0x496   : > { %vm4871_vm4 = vcmp.ge.f32.partialorder %v4679_v16, 0.0  ;;  %v5064_v29 = vmul.f32 %v10541_v7, %v4679_v16  ;;  %vm4869_vm5 = vcmp.ge.f32.partialorder %v4677_v10, 0.0  ;;  %v5062_v11 = vmul.f32 %v10541_v7, %v4677_v10  ;;  %8517 = vmatmul.mubr.bf16.gmra.mrb[184].mxu1 %v3142_v34 }
 0x497   : > { %v5255_v37 = vsel %vm4870_vm14, %v4678_v36, %v5063_v2  ;;  %v5253_v45 = vsel %vm4868_vm0, %v4676_v12, %v5061_v41  ;;  %v4099_v2 = vmul.f32 %v12446_v9, %v14882_v55  ;;  %v4097_v12 = vmul.f32 %v12446_v9, %v11945_v53 }
 0x498   : > { %v5717_v15 = vrot.slane %v5255_v37, 1  ;;  %v6485_v20 = vrot.slane %v5255_v37, 2  ;;  %v12625_v23 = vsel %vm4871_vm4, %v4679_v16, %v5064_v29  ;;  %v5713_v63 = vrot.slane %v5253_v45, 1  ;;  %v7337_v16 = vld [vmem:[#allocation2 + $0x240] ss:$3 sm:$0xff] }
 0x499   : > { %v6481_v36 = vrot.slane %v5253_v45, 2  ;;  %v14441_v13 = vrot.slane %v12625_v23, 1  ;;  %v14442_v48 = vrot.slane %v12625_v23, 2  ;;  %v5254_v62 = vsel %vm4869_vm5, %v4677_v10, %v5062_v11  ;;  %7456 = vxpose.xlu1.b32.cont [9/16] (narrow) %v7337_v16, 64 }
 0x49a   : > { %v14883_v27 = vrot.slane %v12507_v30, 1  ;;  %v14884_v29 = vrot.slane %v12507_v30, 2  ;;  %v5715_v35 = vrot.slane %v5254_v62, 1  ;;  %v6483_v55 = vrot.slane %v5254_v62, 2 }
 0x49b   : > { %v5720_v10 = vsel %vm5561_vm2, %v5717_v15, %v14441_v13  ;;  %v6488_v43 = vsel %vm6329_vm3, %v6485_v20, %v14442_v48  ;;  %v4296_v8 = vadd.f32 %v12463_v24, %v4097_v12  ;;  %v4098_v13 = vmul.f32 %v12446_v9, %v11953_v5  ;;  %v14887_v5 = vld [vmem:[#allocation57_spill] sm:$0xff] }
 0x49c   : > { %v5714_v41 = vsel %vm5561_vm2, %v14883_v27, %v5713_v63  ;;  %v6482_v56 = vsel %vm6329_vm3, %v14884_v29, %v6481_v36  ;;  %v6215_v11 = vmax.f32 %v5255_v37, %v5720_v10  ;;  %v4298_v27 = vadd.f32 %v12463_v24, %v4099_v2  ;;  %v12660_v10 = vpop.f32.mrb[124].mxu1 }
 0x49d   : > { %v6212_v53 = vmax.f32 %v12507_v30, %v5714_v41  ;;  %v4100_v29 = vmul.f32 %v12446_v9, %v11949_v6  ;;  %v5716_v16 = vsel %vm5561_vm2, %v5713_v63, %v5715_v35  ;;  %v5718_v30 = vsel %vm5561_vm2, %v5715_v35, %v5717_v15  ;;  %v14885_v6 = vld [vmem:[#allocation59_spill] sm:$0xff] }
 0x49e   : > { %v6983_v44 = vmax.f32 %v6215_v11, %v6488_v43  ;;  %v6213_v37 = vmax.f32 %v5253_v45, %v5716_v16  ;;  %v6214_v41 = vmax.f32 %v5254_v62, %v5718_v30  ;;  %v6484_v34 = vsel %vm6329_vm3, %v6481_v36, %v6483_v55  ;;  %v12668_v45 = vpop.f32.mrb[125].mxu1 }
 0x49f   : > { %v6980_v1 = vmax.f32 %v6212_v53, %v6482_v56  ;;  %v6486_v2 = vsel %vm6329_vm3, %v6483_v55, %v6485_v20  ;;  %v14886_v12 = vunpack.c.l.bf16 %v14885_v6  ;;  %v14888_v56 = vunpack.c.l.bf16 %v14887_v5 }
 0x4a0   : > { %7175 = vst [vmem:[#allocation2 + $0x270] sm:$0xff] %v6983_v44  ;;  %v4299_v63 = vadd.f32 %v12463_v24, %v4100_v29  ;;  %v4297_v15 = vadd.f32 %v12463_v24, %v4098_v13  ;;  %v6981_v62 = vmax.f32 %v6213_v37, %v6484_v34  ;;  %v6982_v36 = vmax.f32 %v6214_v41, %v6486_v2 }
 0x4a1   : > { %7172 = vst [vmem:[#allocation2 + $0x258] sm:$0xff] %v6980_v1  ;;  %v4682_v48 = vadd.f32 %v14886_v12, %v4298_v27  ;;  %v4680_v43 = vadd.f32 %v14888_v56, %v4296_v8  ;;  %v3045_v1 = vsel %vm2660_vm15, %v12549_v31, %v12588_v28  ;;  %v3046_v44 = vsel %vm2661_vm1, %v12576_v32, %v12602_v61  ;;  %v12680_v8 = vpop.f32.mrb[126].mxu1 }
 0x4a2   : > { %7173 = vst [vmem:[#allocation2 + $0x260] sm:$0xff] %v6981_v62  ;;  %7174 = vst [vmem:[#allocation2 + $0x268] sm:$0xff] %v6982_v36  ;;  %v14889_v53 = vunpack.c.h.bf16 %v14885_v6  ;;  %v14890_v31 = vunpack.c.h.bf16 %v14887_v5  ;;  %v3143_v35 = vpack.c.bf16 %v3046_v44, %v3045_v1  ;;  %v3047_v32 = vsel %vm2662_vm6, %v12546_v51, %v12584_v3  ;;  %v12690_v61 = vpop.f32.mrb[127].mxu1  ;;  %v14893_v44 = vld [vmem:[#allocation62_spill] sm:$0xff] }
 0x4a3   : > { %vm4874_vm8 = vcmp.ge.f32.partialorder %v4682_v48, 0.0  ;;  %v5067_v20 = vmul.f32 %v10541_v7, %v4682_v48  ;;  %vm4872_vm9 = vcmp.ge.f32.partialorder %v4680_v43, 0.0  ;;  %v5065_v13 = vmul.f32 %v10541_v7, %v4680_v43 }
 0x4a4   : > { %v4683_v11 = vadd.f32 %v14889_v53, %v4299_v63  ;;  %v4681_v28 = vadd.f32 %v14890_v31, %v4297_v15  ;;  %v3048_v29 = vsel %vm2663_vm7, %v12565_v19, %v12596_v21  ;;  %v4103_v16 = vmul.f32 %v12446_v9, %v12008_v52  ;;  %8520 = vmatprep.mubr.bf16.mxu1 %v3143_v35 }
 0x4a5   : > { %v5259_v55 = vsel %vm4874_vm8, %v4682_v48, %v5067_v20  ;;  %v5257_v27 = vsel %vm4872_vm9, %v4680_v43, %v5065_v13  ;;  %v14891_v48 = vrot.slane %v12625_v23, 1  ;;  %v14892_v19 = vrot.slane %v12625_v23, 2 }
 0x4a6   : > { %v5725_v30 = vrot.slane %v5259_v55, 1  ;;  %v6493_v37 = vrot.slane %v5259_v55, 2  ;;  %v5721_v41 = vrot.slane %v5257_v27, 1  ;;  %v6489_v34 = vrot.slane %v5257_v27, 2 }
 0x4a7   : > { %vm4875_vm10 = vcmp.ge.f32.partialorder %v4683_v11, 0.0  ;;  %v5068_v51 = vmul.f32 %v10541_v7, %v4683_v11  ;;  %vm4873_vm11 = vcmp.ge.f32.partialorder %v4681_v28, 0.0  ;;  %v5066_v3 = vmul.f32 %v10541_v7, %v4681_v28 }
 0x4a8   : > { %v5722_v2 = vsel %vm5561_vm2, %v14891_v48, %v5721_v41  ;;  %v6490_v21 = vsel %vm6329_vm3, %v14892_v19, %v6489_v34  ;;  %v3144_v52 = vpack.c.bf16 %v3048_v29, %v3047_v32  ;;  %v4302_v6 = vadd.f32 %v12463_v24, %v4103_v16 }
 0x4a9   : > { %v6216_v12 = vmax.f32 %v12625_v23, %v5722_v2  ;;  %v12708_v5 = vsel %vm4875_vm10, %v4683_v11, %v5068_v51  ;;  %v5258_v56 = vsel %vm4873_vm11, %v4681_v28, %v5066_v3  ;;  %v4101_v43 = vmul.f32 %v12446_v9, %v12012_v49  ;;  %v14895_v23 = vld [vmem:[#allocation127_spill] sm:$0xff]  ;;  %v12719_v28 = vpop.f32.mrb[128].mxu1 }
 0x4aa   : > { %v5727_v63 = vrot.slane %v12708_v5, 1  ;;  %v6495_v15 = vrot.slane %v12708_v5, 2  ;;  %v5723_v62 = vrot.slane %v5258_v56, 1  ;;  %v6491_v36 = vrot.slane %v5258_v56, 2  ;;  %8521 = vmatmul.mubr.bf16.gmra.mrb[188].mxu1 %v3144_v52  ;;  %v7339_v31 = vld [vmem:[#allocation2 + $0x258] ss:$3 sm:$0xff] }
 0x4ab   : > { %v6984_v1 = vmax.f32 %v6216_v12, %v6490_v21  ;;  %v14894_v20 = vunpack.c.l.bf16 %v14893_v44  ;;  %v4300_v53 = vadd.f32 %v12463_v24, %v4101_v43  ;;  %v4104_v11 = vmul.f32 %v12446_v9, %v14895_v23  ;;  %7457 = vxpose.xlu1.b32.cont [10/16] (narrow) %v7339_v31, 64  ;;  %v12725_v16 = vpop.f32.mrb[129].mxu1  ;;  %v14896_v52 = vld [vmem:[#allocation61_spill] sm:$0xff] }
 0x4ac   : > { %v5728_v49 = vsel %vm5561_vm2, %v5725_v30, %v5727_v63  ;;  %v6496_v35 = vsel %vm6329_vm3, %v6493_v37, %v6495_v15  ;;  %v5724_v32 = vsel %vm5561_vm2, %v5721_v41, %v5723_v62  ;;  %v5726_v29 = vsel %vm5561_vm2, %v5723_v62, %v5725_v30  ;;  %v12732_v41 = vpop.f32.mrb[130].mxu1 }
 0x4ad   : > { %v4686_v13 = vadd.f32 %v14894_v20, %v4302_v6  ;;  %7176 = vst [vmem:[#allocation2 + $0x278] sm:$0xff] %v6984_v1  ;;  %v6219_v51 = vmax.f32 %v5259_v55, %v5728_v49  ;;  %v6217_v3 = vmax.f32 %v5257_v27, %v5724_v32  ;;  %v6218_v48 = vmax.f32 %v5258_v56, %v5726_v29  ;;  %v12738_v56 = vpop.f32.mrb[131].mxu1 }
 0x4ae   : > { %v6492_v2 = vsel %vm6329_vm3, %v6489_v34, %v6491_v36  ;;  %v6494_v19 = vsel %vm6329_vm3, %v6491_v36, %v6493_v37  ;;  %v14897_v6 = vunpack.c.l.bf16 %v14896_v52  ;;  %v4303_v1 = vadd.f32 %v12463_v24, %v4104_v11  ;;  %v14898_v34 = vld [vmem:[#allocation39_spill] sm:$0xff] }
 0x4af   : > { %vm4878_vm12 = vcmp.ge.f32.partialorder %v4686_v13, 0.0  ;;  %v5071_v21 = vmul.f32 %v10541_v7, %v4686_v13  ;;  %v6987_v30 = vmax.f32 %v6219_v51, %v6496_v35  ;;  %v6985_v43 = vmax.f32 %v6217_v3, %v6492_v2  ;;  %v14900_v35 = vld [vmem:[#allocation44_spill] sm:$0xff] }
 0x4b0   : > { %v4684_v12 = vadd.f32 %v14897_v6, %v4300_v53  ;;  %v6986_v62 = vmax.f32 %v6218_v48, %v6494_v19  ;;  %v4102_v37 = vmul.f32 %v12446_v9, %v14898_v34  ;;  %v14899_v53 = vunpack.c.h.bf16 %v14893_v44 }
 0x4b1   : > { %v5263_v55 = vsel %vm4878_vm12, %v4686_v13, %v5071_v21  ;;  %7179 = vst [vmem:[#allocation2 + $0x290] sm:$0xff] %v6987_v30  ;;  %7177 = vst [vmem:[#allocation2 + $0x280] sm:$0xff] %v6985_v43  ;;  %v4107_v11 = vmul.f32 %v12446_v9, %v12046_v18  ;;  %v4105_v49 = vmul.f32 %v12446_v9, %v12052_v46  ;;  %v14901_v44 = vunpack.c.h.bf16 %v14896_v52 }
 0x4b2   : > { %vm4876_vm13 = vcmp.ge.f32.partialorder %v4684_v12, 0.0  ;;  %v5069_v27 = vmul.f32 %v10541_v7, %v4684_v12  ;;  %7178 = vst [vmem:[#allocation2 + $0x288] sm:$0xff] %v6986_v62  ;;  %v5733_v36 = vrot.slane %v5263_v55, 1  ;;  %v6501_v20 = vrot.slane %v5263_v55, 2 }
 0x4b3   : > { %v4687_v23 = vadd.f32 %v14899_v53, %v4303_v1  ;;  %v4301_v31 = vadd.f32 %v12463_v24, %v4102_v37  ;;  %v4108_v32 = vmul.f32 %v12446_v9, %v14900_v35  ;;  %v4306_v2 = vadd.f32 %v12463_v24, %v4107_v11 }
 0x4b4   : > { %v5261_v13 = vsel %vm4876_vm13, %v4684_v12, %v5069_v27  ;;  %v4304_v18 = vadd.f32 %v12463_v24, %v4105_v49  ;;  %v14902_v12 = vld [vmem:[#allocation42_spill] sm:$0xff]  ;;  %v14903_v27 = vld [vmem:[#allocation64_spill] sm:$0xff] }
 0x4b5   : > { %v5729_v29 = vrot.slane %v5261_v13, 1  ;;  %v6497_v51 = vrot.slane %v5261_v13, 2  ;;  %vm4879_vm14 = vcmp.ge.f32.partialorder %v4687_v23, 0.0  ;;  %v5072_v3 = vmul.f32 %v10541_v7, %v4687_v23 }
 0x4b6   : > { %v4685_v48 = vadd.f32 %v14901_v44, %v4301_v31  ;;  %v4307_v19 = vadd.f32 %v12463_v24, %v4108_v32  ;;  %v4106_v30 = vmul.f32 %v12446_v9, %v14902_v12  ;;  %v14904_v34 = vunpack.c.l.bf16 %v14903_v27 }
 0x4b7   : > { %v5730_v21 = vsel %vm5561_vm2, %v5727_v63, %v5729_v29  ;;  %v6498_v46 = vsel %vm6329_vm3, %v6495_v15, %v6497_v51  ;;  %v12757_v6 = vsel %vm4879_vm14, %v4687_v23, %v5072_v3  ;;  %v14905_v63 = vld [vmem:[#allocation63_spill] sm:$0xff]  ;;  %v14907_v23 = vunpack.c.h.bf16 %v14903_v27 }
 0x4b8   : > { %v6220_v43 = vmax.f32 %v12708_v5, %v5730_v21  ;;  %v5735_v52 = vrot.slane %v12757_v6, 1  ;;  %v6503_v62 = vrot.slane %v12757_v6, 2  ;;  %vm4877_vm15 = vcmp.ge.f32.partialorder %v4685_v48, 0.0  ;;  %v7341_v32 = vld [vmem:[#allocation2 + $0x270] ss:$3 sm:$0xff] }
 0x4b9   : > { %v5070_v1 = vmul.f32 %v10541_v7, %v4685_v48  ;;  %v4690_v37 = vadd.f32 %v14904_v34, %v4306_v2  ;;  %v14906_v53 = vunpack.c.l.bf16 %v14905_v63  ;;  %v4691_v11 = vadd.f32 %v14907_v23, %v4307_v19  ;;  %7458 = vxpose.xlu1.b32.cont [11/16] (narrow) %v7341_v32, 64 }
 0x4ba   : > { %v6988_v31 = vmax.f32 %v6220_v43, %v6498_v46  ;;  %v5736_v49 = vsel %vm5561_vm2, %v5733_v36, %v5735_v52  ;;  %v6504_v5 = vsel %vm6329_vm3, %v6501_v20, %v6503_v62  ;;  %v4305_v35 = vadd.f32 %v12463_v24, %v4106_v30  ;;  %v12776_v46 = vpop.f32.mrb[132].mxu1 }
 0x4bb   : > { %v4688_v15 = vadd.f32 %v14906_v53, %v4304_v18  ;;  %v6223_v3 = vmax.f32 %v5263_v55, %v5736_v49  ;;  %v5262_v44 = vsel %vm4877_vm15, %v4685_v48, %v5070_v1  ;;  %vm4882_vm0 = vcmp.ge.f32.partialorder %v4690_v37, 0.0  ;;  %v12779_v27 = vpop.f32.mrb[133].mxu1 }
 0x4bc   : > { %v5075_v21 = vmul.f32 %v10541_v7, %v4690_v37  ;;  %7180 = vst [vmem:[#allocation2 + $0x298] sm:$0xff] %v6988_v31  ;;  %v5731_v2 = vrot.slane %v5262_v44, 1  ;;  %v6499_v18 = vrot.slane %v5262_v44, 2  ;;  %vm4883_vm4 = vcmp.ge.f32.partialorder %v4691_v11, 0.0  ;;  %v12785_v53 = vpop.f32.mrb[134].mxu1 }
 0x4bd   : > { %vm4880_vm1 = vcmp.ge.f32.partialorder %v4688_v15, 0.0  ;;  %v5073_v19 = vmul.f32 %v10541_v7, %v4688_v15  ;;  %v6991_v12 = vmax.f32 %v6223_v3, %v6504_v5  ;;  %v5076_v30 = vmul.f32 %v10541_v7, %v4691_v11  ;;  %v12787_v5 = vpop.f32.mrb[135].mxu1 }
 0x4be   : > { %v5267_v43 = vsel %vm4882_vm0, %v4690_v37, %v5075_v21  ;;  %v5732_v55 = vsel %vm5561_vm2, %v5729_v29, %v5731_v2  ;;  %v5734_v48 = vsel %vm5561_vm2, %v5731_v2, %v5733_v36  ;;  %v6500_v1 = vsel %vm6329_vm3, %v6497_v51, %v6499_v18 }
 0x4bf   : > { %v6502_v34 = vsel %vm6329_vm3, %v6499_v18, %v6501_v20  ;;  %7183 = vst [vmem:[#allocation2 + $0x2b0] sm:$0xff] %v6991_v12  ;;  %v6221_v23 = vmax.f32 %v5261_v13, %v5732_v55  ;;  %v6222_v31 = vmax.f32 %v5262_v44, %v5734_v48  ;;  %v5741_v49 = vrot.slane %v5267_v43, 1 }
 0x4c0   : > { %v6509_v37 = vrot.slane %v5267_v43, 2  ;;  %v5265_v32 = vsel %vm4880_vm1, %v4688_v15, %v5073_v19  ;;  %v12790_v3 = vsel %vm4883_vm4, %v4691_v11, %v5076_v30  ;;  %v14908_v29 = vunpack.c.h.bf16 %v14905_v63 }
 0x4c1   : > { %v4111_v51 = vmul.f32 %v12446_v9, %v12093_v54  ;;  %v6989_v20 = vmax.f32 %v6221_v23, %v6500_v1  ;;  %v6990_v21 = vmax.f32 %v6222_v31, %v6502_v34  ;;  %v5737_v2 = vrot.slane %v5265_v32, 1  ;;  %v14909_v34 = vld [vmem:[#allocation68_spill] sm:$0xff] }
 0x4c2   : > { %v4689_v36 = vadd.f32 %v14908_v29, %v4305_v35  ;;  %v6505_v18 = vrot.slane %v5265_v32, 2  ;;  %v5743_v13 = vrot.slane %v12790_v3, 1  ;;  %v6511_v44 = vrot.slane %v12790_v3, 2 }
 0x4c3   : > { %7181 = vst [vmem:[#allocation2 + $0x2a0] sm:$0xff] %v6989_v20  ;;  %7182 = vst [vmem:[#allocation2 + $0x2a8] sm:$0xff] %v6990_v21  ;;  %v5738_v15 = vsel %vm5561_vm2, %v5735_v52, %v5737_v2  ;;  %v4310_v11 = vadd.f32 %v12463_v24, %v4111_v51  ;;  %v4109_v54 = vmul.f32 %v12446_v9, %v12102_v0  ;;  %v7343_v35 = vld [vmem:[#allocation2 + $0x288] ss:$3 sm:$0xff]  ;;  %v14910_v23 = vunpack.c.l.bf16 %v14909_v34  ;;  %v12813_v0 = vpop.f32.mrb[136].mxu1 }
 0x4c4   : > { %vm4881_vm5 = vcmp.ge.f32.partialorder %v4689_v36, 0.0  ;;  %v5074_v12 = vmul.f32 %v10541_v7, %v4689_v36  ;;  %v6506_v63 = vsel %vm6329_vm3, %v6503_v62, %v6505_v18  ;;  %v6224_v19 = vmax.f32 %v12757_v6, %v5738_v15  ;;  %7459 = vxpose.xlu1.b32.cont [12/16] (narrow) %v7343_v35, 64  ;;  %v14911_v20 = vld [vmem:[#allocation132_spill] sm:$0xff]  ;;  %v12823_v35 = vpop.f32.mrb[137].mxu1 }
 0x4c5   : > { %v5744_v30 = vsel %vm5561_vm2, %v5741_v49, %v5743_v13  ;;  %v6512_v55 = vsel %vm6329_vm3, %v6509_v37, %v6511_v44  ;;  %v4694_v31 = vadd.f32 %v14910_v23, %v4310_v11  ;;  %v4308_v6 = vadd.f32 %v12463_v24, %v4109_v54 }
 0x4c6   : > { %v5266_v48 = vsel %vm4881_vm5, %v4689_v36, %v5074_v12  ;;  %v6227_v52 = vmax.f32 %v5267_v43, %v5744_v30  ;;  %v6992_v29 = vmax.f32 %v6224_v19, %v6506_v63  ;;  %v4112_v51 = vmul.f32 %v12446_v9, %v12106_v14  ;;  %v14912_v19 = vld [vmem:[#allocation66_spill] sm:$0xff] }
 0x4c7   : > { %v5739_v62 = vrot.slane %v5266_v48, 1  ;;  %v6507_v1 = vrot.slane %v5266_v48, 2  ;;  %v4110_v21 = vmul.f32 %v12446_v9, %v14911_v20  ;;  %vm4886_vm6 = vcmp.ge.f32.partialorder %v4694_v31, 0.0 }
 0x4c8   : > { %v6995_v15 = vmax.f32 %v6227_v52, %v6512_v55  ;;  %7184 = vst [vmem:[#allocation2 + $0x2b8] sm:$0xff] %v6992_v29  ;;  %v5079_v14 = vmul.f32 %v10541_v7, %v4694_v31  ;;  %v14913_v30 = vunpack.c.l.bf16 %v14912_v19  ;;  %v12831_v52 = vpop.f32.mrb[138].mxu1 }
 0x4c9   : > { %v5740_v36 = vsel %vm5561_vm2, %v5737_v2, %v5739_v62  ;;  %v5742_v43 = vsel %vm5561_vm2, %v5739_v62, %v5741_v49  ;;  %v6508_v12 = vsel %vm6329_vm3, %v6505_v18, %v6507_v1  ;;  %v6510_v54 = vsel %vm6329_vm3, %v6507_v1, %v6509_v37  ;;  %v12837_v1 = vpop.f32.mrb[139].mxu1 }
 0x4ca   : > { %v6225_v11 = vmax.f32 %v5265_v32, %v5740_v36  ;;  %v6226_v63 = vmax.f32 %v5266_v48, %v5742_v43  ;;  %7187 = vst [vmem:[#allocation2 + $0x2d0] sm:$0xff] %v6995_v15  ;;  %v4692_v55 = vadd.f32 %v14913_v30, %v4308_v6  ;;  %v4311_v2 = vadd.f32 %v12463_v24, %v4112_v51  ;;  %v7345_v48 = vld [vmem:[#allocation2 + $0x2a0] ss:$3 sm:$0xff] }
 0x4cb   : > { %v4309_v49 = vadd.f32 %v12463_v24, %v4110_v21  ;;  %v4115_v32 = vmul.f32 %v12446_v9, %v12149_v4  ;;  %v4113_v37 = vmul.f32 %v12446_v9, %v12156_v39  ;;  %14914 = vst [vmem:[#allocation46_spill] sm:$0xff] %v12837_v1  ;;  %v5271_v23 = vsel %vm4886_vm6, %v4694_v31, %v5079_v14 }
 0x4cc   : > { %v6993_v18 = vmax.f32 %v6225_v11, %v6508_v12  ;;  %v6994_v62 = vmax.f32 %v6226_v63, %v6510_v54  ;;  %vm4884_vm7 = vcmp.ge.f32.partialorder %v4692_v55, 0.0  ;;  %v5077_v29 = vmul.f32 %v10541_v7, %v4692_v55  ;;  %7460 = vxpose.xlu1.b32.cont [13/16] (narrow) %v7345_v48, 64  ;;  %v14917_v54 = vld [vmem:[#allocation67_spill] sm:$0xff] }
 0x4cd   : > { %v14915_v6 = vunpack.c.h.bf16 %v14909_v34  ;;  %v5749_v20 = vrot.slane %v5271_v23, 1  ;;  %v6517_v21 = vrot.slane %v5271_v23, 2  ;;  %v14916_v4 = vunpack.c.h.bf16 %v14912_v19  ;;  %v14919_v19 = vld [vmem:[#allocation65_spill] sm:$0xff] }
 0x4ce   : > { %7185 = vst [vmem:[#allocation2 + $0x2c0] sm:$0xff] %v6993_v18  ;;  %7186 = vst [vmem:[#allocation2 + $0x2c8] sm:$0xff] %v6994_v62  ;;  %v4314_v39 = vadd.f32 %v12463_v24, %v4115_v32  ;;  %v5269_v36 = vsel %vm4884_vm7, %v4692_v55, %v5077_v29  ;;  %v4312_v43 = vadd.f32 %v12463_v24, %v4113_v37  ;;  %v14918_v14 = vunpack.c.l.bf16 %v14917_v54 }
 0x4cf   : > { %v4695_v51 = vadd.f32 %v14915_v6, %v4311_v2  ;;  %v4693_v15 = vadd.f32 %v14916_v4, %v4309_v49  ;;  %v5745_v12 = vrot.slane %v5269_v36, 1  ;;  %v6513_v11 = vrot.slane %v5269_v36, 2 }
 0x4d0   : > { %v4698_v30 = vadd.f32 %v14918_v14, %v4314_v39  ;;  %v14920_v2 = vunpack.c.l.bf16 %v14919_v19  ;;  %v4116_v55 = vmul.f32 %v12446_v9, %v12171_v47  ;;  %v12868_v39 = vpop.f32.mrb[140].mxu1 }
 0x4d1   : > { %vm4887_vm8 = vcmp.ge.f32.partialorder %v4695_v51, 0.0  ;;  %v5080_v31 = vmul.f32 %v10541_v7, %v4695_v51  ;;  %vm4885_vm9 = vcmp.ge.f32.partialorder %v4693_v15, 0.0  ;;  %v5078_v34 = vmul.f32 %v10541_v7, %v4693_v15 }
 0x4d2   : > { %v4696_v49 = vadd.f32 %v14920_v2, %v4312_v43  ;;  %v5746_v18 = vsel %vm5561_vm2, %v5743_v13, %v5745_v12  ;;  %v6514_v62 = vsel %vm6329_vm3, %v6511_v44, %v6513_v11  ;;  %vm4890_vm10 = vcmp.ge.f32.partialorder %v4698_v30, 0.0  ;;  %v12872_v2 = vpop.f32.mrb[141].mxu1 }
 0x4d3   : > { %v12848_v63 = vsel %vm4887_vm8, %v4695_v51, %v5080_v31  ;;  %v6228_v48 = vmax.f32 %v12790_v3, %v5746_v18  ;;  %v5270_v29 = vsel %vm4885_vm9, %v4693_v15, %v5078_v34  ;;  %v5083_v6 = vmul.f32 %v10541_v7, %v4698_v30  ;;  %v12878_v1 = vpop.f32.mrb[142].mxu1 }
 0x4d4   : > { %v5751_v32 = vrot.slane %v12848_v63, 1  ;;  %v6519_v37 = vrot.slane %v12848_v63, 2  ;;  %v5747_v4 = vrot.slane %v5270_v29, 1  ;;  %v6515_v13 = vrot.slane %v5270_v29, 2 }
 0x4d5   : > { %v6996_v31 = vmax.f32 %v6228_v48, %v6514_v62  ;;  %v12870_v43 = vsel %vm4890_vm10, %v4698_v30, %v5083_v6  ;;  %vm4888_vm11 = vcmp.ge.f32.partialorder %v4696_v49, 0.0  ;;  %v7347_v14 = vld [vmem:[#allocation2 + $0x2b8] ss:$3 sm:$0xff]  ;;  %v12881_v6 = vpop.f32.mrb[143].mxu1 }
 0x4d6   : > { %v5752_v47 = vsel %vm5561_vm2, %v5749_v20, %v5751_v32  ;;  %v6520_v51 = vsel %vm6329_vm3, %v6517_v21, %v6519_v37  ;;  %v5748_v3 = vsel %vm5561_vm2, %v5745_v12, %v5747_v4  ;;  %v5750_v15 = vsel %vm5561_vm2, %v5747_v4, %v5749_v20  ;;  %7461 = vxpose.xlu1.b32.cont [14/16] (narrow) %v7347_v14, 64 }
 0x4d7   : > { %v6231_v44 = vmax.f32 %v5271_v23, %v5752_v47  ;;  %v6516_v34 = vsel %vm6329_vm3, %v6513_v11, %v6515_v13  ;;  %v6518_v18 = vsel %vm6329_vm3, %v6515_v13, %v6517_v21  ;;  %7188 = vst [vmem:[#allocation2 + $0x2d8] sm:$0xff] %v6996_v31  ;;  %v6229_v23 = vmax.f32 %v5269_v36, %v5748_v3 }
 0x4d8   : > { %v6230_v30 = vmax.f32 %v5270_v29, %v5750_v15  ;;  %v5757_v48 = vrot.slane %v12870_v43, 1  ;;  %v6525_v47 = vrot.slane %v12870_v43, 2  ;;  %v5081_v12 = vmul.f32 %v10541_v7, %v4696_v49 }
 0x4d9   : > { %v6999_v62 = vmax.f32 %v6231_v44, %v6520_v51  ;;  %v4315_v20 = vadd.f32 %v12463_v24, %v4116_v55  ;;  %v4114_v21 = vmul.f32 %v12446_v9, %v12193_v60  ;;  %v6997_v11 = vmax.f32 %v6229_v23, %v6516_v34 }
 0x4da   : > { %v6998_v4 = vmax.f32 %v6230_v30, %v6518_v18  ;;  %v4119_v36 = vmul.f32 %v12446_v9, %v12223_v22  ;;  %v4117_v29 = vmul.f32 %v12446_v9, %v12227_v25  ;;  %v5273_v51 = vsel %vm4888_vm11, %v4696_v49, %v5081_v12  ;;  %v14923_v18 = vld [vmem:[#allocation70_spill] sm:$0xff]  ;;  %v14925_v30 = vld [vmem:[#allocation69_spill] sm:$0xff] }
 0x4db   : > { %7191 = vst [vmem:[#allocation2 + $0x2f0] sm:$0xff] %v6999_v62  ;;  %v14921_v13 = vunpack.c.h.bf16 %v14917_v54  ;;  %v4313_v44 = vadd.f32 %v12463_v24, %v4114_v21  ;;  %v4120_v55 = vmul.f32 %v12446_v9, %v12231_v42  ;;  %7189 = vst [vmem:[#allocation2 + $0x2e0] sm:$0xff] %v6997_v11  ;;  %v5753_v60 = vrot.slane %v5273_v51, 1 }
 0x4dc   : > { %7190 = vst [vmem:[#allocation2 + $0x2e8] sm:$0xff] %v6998_v4  ;;  %v6521_v14 = vrot.slane %v5273_v51, 2  ;;  %v4318_v3 = vadd.f32 %v12463_v24, %v4119_v36  ;;  %v4316_v22 = vadd.f32 %v12463_v24, %v4117_v29  ;;  %v14922_v49 = vunpack.c.h.bf16 %v14919_v19 }
 0x4dd   : > { %v4699_v31 = vadd.f32 %v14921_v13, %v4315_v20  ;;  %v4319_v15 = vadd.f32 %v12463_v24, %v4120_v55  ;;  %v5754_v34 = vsel %vm5561_vm2, %v5751_v32, %v5753_v60  ;;  %v14924_v62 = vunpack.c.l.bf16 %v14923_v18 }
 0x4de   : > { %v4697_v54 = vadd.f32 %v14922_v49, %v4313_v44  ;;  %v6522_v42 = vsel %vm6329_vm3, %v6519_v37, %v6521_v14  ;;  %v14926_v12 = vunpack.c.l.bf16 %v14925_v30  ;;  %v6232_v21 = vmax.f32 %v12848_v63, %v5754_v34 }
 0x4df   : > { %vm4891_vm12 = vcmp.ge.f32.partialorder %v4699_v31, 0.0  ;;  %v5084_v25 = vmul.f32 %v10541_v7, %v4699_v31  ;;  %v4702_v23 = vadd.f32 %v14924_v62, %v4318_v3  ;;  %v14927_v49 = vunpack.c.h.bf16 %v14923_v18 }
 0x4e0   : > { %v4700_v20 = vadd.f32 %v14926_v12, %v4316_v22  ;;  %vm4889_vm13 = vcmp.ge.f32.partialorder %v4697_v54, 0.0  ;;  %v5082_v4 = vmul.f32 %v10541_v7, %v4697_v54  ;;  %v7000_v32 = vmax.f32 %v6232_v21, %v6522_v42  ;;  %v12923_v42 = vpop.f32.mrb[144].mxu1 }
 0x4e1   : > { %v5276_v11 = vsel %vm4891_vm12, %v4699_v31, %v5084_v25  ;;  %vm4894_vm14 = vcmp.ge.f32.partialorder %v4702_v23, 0.0  ;;  %v5087_v29 = vmul.f32 %v10541_v7, %v4702_v23  ;;  %v4703_v34 = vadd.f32 %v14927_v49, %v4319_v15 }
 0x4e2   : > { %v5759_v19 = vrot.slane %v5276_v11, 1  ;;  %v6527_v36 = vrot.slane %v5276_v11, 2  ;;  %v5274_v13 = vsel %vm4889_vm13, %v4697_v54, %v5082_v4  ;;  %vm4892_vm15 = vcmp.ge.f32.partialorder %v4700_v20, 0.0  ;;  %7192 = vst [vmem:[#allocation2 + $0x2f8] sm:$0xff] %v7000_v32  ;;  %v7349_v54 = vld [vmem:[#allocation2 + $0x2d0] ss:$3 sm:$0xff] }
 0x4e3   : > { %v5085_v37 = vmul.f32 %v10541_v7, %v4700_v20  ;;  %v5755_v3 = vrot.slane %v5274_v13, 1  ;;  %v6523_v63 = vrot.slane %v5274_v13, 2  ;;  %v12917_v22 = vsel %vm4894_vm14, %v4702_v23, %v5087_v29  ;;  %7462 = vxpose.xlu1.b32.cont [15/16] (narrow) %v7349_v54, 64 }
 0x4e4   : > { %v5760_v44 = vsel %vm5561_vm2, %v5757_v48, %v5759_v19  ;;  %v6528_v55 = vsel %vm6329_vm3, %v6525_v47, %v6527_v36  ;;  %v5765_v18 = vrot.slane %v12917_v22, 1  ;;  %v6533_v32 = vrot.slane %v12917_v22, 2 }
 0x4e5   : > { %v6235_v31 = vmax.f32 %v12870_v43, %v5760_v44  ;;  %v12919_v25 = vsel %vm4892_vm15, %v4700_v20, %v5085_v37  ;;  %v5756_v62 = vsel %vm5561_vm2, %v5753_v60, %v5755_v3  ;;  %v5758_v12 = vsel %vm5561_vm2, %v5755_v3, %v5757_v48  ;;  %v12929_v43 = vpop.f32.mrb[145].mxu1 }
 0x4e6   : > { %v6524_v21 = vsel %vm6329_vm3, %v6521_v14, %v6523_v63  ;;  %v6526_v4 = vsel %vm6329_vm3, %v6523_v63, %v6525_v47  ;;  %v6233_v20 = vmax.f32 %v5273_v51, %v5756_v62  ;;  %v6234_v29 = vmax.f32 %v5274_v13, %v5758_v12  ;;  %v12932_v15 = vpop.f32.mrb[146].mxu1  ;;  %v14928_v51 = vld [vmem:[#allocation30_spill] sm:$0xff]  ;;  %v14929_v12 = vld [vmem:[#allocation133_spill] sm:$0xff] }
 0x4e7   : > { %v7003_v23 = vmax.f32 %v6235_v31, %v6528_v55  ;;  %v5761_v60 = vrot.slane %v12919_v25, 1  ;;  %v6529_v48 = vrot.slane %v12919_v25, 2  ;;  %vm4895_vm0 = vcmp.ge.f32.partialorder %v4703_v34, 0.0  ;;  %v12937_v14 = vpop.f32.mrb[147].mxu1 }
 0x4e8   : > { %v7001_v47 = vmax.f32 %v6233_v20, %v6524_v21  ;;  %v7002_v37 = vmax.f32 %v6234_v29, %v6526_v4  ;;  %v5088_v44 = vmul.f32 %v10541_v7, %v4703_v34  ;;  %v4118_v13 = vmul.f32 %v12446_v9, %v14928_v51  ;;  %v14931_v29 = vld [vmem:[#allocation28_spill] sm:$0xff] }
 0x4e9   : > { %7195 = vst [vmem:[#allocation2 + $0x310] sm:$0xff] %v7003_v23  ;;  %v5762_v55 = vsel %vm5561_vm2, %v5759_v19, %v5761_v60  ;;  %v6530_v3 = vsel %vm6329_vm3, %v6527_v36, %v6529_v48  ;;  %v4123_v63 = vmul.f32 %v12446_v9, %v12288_v26  ;;  %v4121_v31 = vmul.f32 %v12446_v9, %v12292_v33  ;;  %v7351_v23 = vld [vmem:[#allocation2 + $0x2e8] ss:$3 sm:$0xff] }
 0x4ea   : > { %7193 = vst [vmem:[#allocation2 + $0x300] sm:$0xff] %v7001_v47  ;;  %7194 = vst [vmem:[#allocation2 + $0x308] sm:$0xff] %v7002_v37  ;;  %v6236_v49 = vmax.f32 %v5276_v11, %v5762_v55  ;;  %v12948_v54 = vsel %vm4895_vm0, %v4703_v34, %v5088_v44  ;;  %v4317_v62 = vadd.f32 %v12463_v24, %v4118_v13  ;;  %v14930_v20 = vunpack.c.h.bf16 %v14925_v30  ;;  %v14932_v51 = vld [vmem:[#allocation72_spill] sm:$0xff] }
 0x4eb   : > { %v4124_v21 = vmul.f32 %v12446_v9, %v14929_v12  ;;  %v5767_v19 = vrot.slane %v12948_v54, 1  ;;  %v6535_v36 = vrot.slane %v12948_v54, 2  ;;  %v4322_v4 = vadd.f32 %v12463_v24, %v4123_v63  ;;  %7463 = vxpose.xlu1.b32.end [16/16] (narrow) %v7351_v23, 64 }
 0x4ec   : > { %v4320_v26 = vadd.f32 %v12463_v24, %v4121_v31  ;;  %v7004_v33 = vmax.f32 %v6236_v49, %v6530_v3  ;;  %v4701_v11 = vadd.f32 %v14930_v20, %v4317_v62  ;;  %v4122_v47 = vmul.f32 %v12446_v9, %v14931_v29  ;;  %v14934_v3 = vld [vmem:[#allocation71_spill] sm:$0xff]  ;;  %v12976_v62 = vpop.f32.mrb[148].mxu1 }
 0x4ed   : > { %v4323_v34 = vadd.f32 %v12463_v24, %v4124_v21  ;;  %v5768_v37 = vsel %vm5561_vm2, %v5765_v18, %v5767_v19  ;;  %v6536_v44 = vsel %vm6329_vm3, %v6533_v32, %v6535_v36  ;;  %v14933_v13 = vunpack.c.l.bf16 %v14932_v51 }
 0x4ee   : > { %v14935_v30 = vunpack.c.l.bf16 %v14934_v3  ;;  %7196 = vst [vmem:[#allocation2 + $0x318] sm:$0xff] %v7004_v33  ;;  %v6239_v24 = vmax.f32 %v12917_v22, %v5768_v37  ;;  %vm4893_vm1 = vcmp.ge.f32.partialorder %v4701_v11, 0.0  ;;  %v5086_v9 = vmul.f32 %v10541_v7, %v4701_v11 }
 0x4ef   : > { %v4706_v55 = vadd.f32 %v14933_v13, %v4322_v4  ;;  %v14936_v31 = vunpack.c.h.bf16 %v14932_v51  ;;  %v12980_v4 = vpop.f32.mrb[149].mxu1 }
 0x4f0   : > { %v4704_v63 = vadd.f32 %v14935_v30, %v4320_v26  ;;  %14937 = vst [vmem:[#allocation117_spill] sm:$0xff] %v12980_v4  ;;  %v7007_v26 = vmax.f32 %v6239_v24, %v6536_v44  ;;  %v5278_v23 = vsel %vm4893_vm1, %v4701_v11, %v5086_v9  ;;  %v12987_v13 = vpop.f32.mrb[150].mxu1 }
 0x4f1   : > { %v4707_v49 = vadd.f32 %v14936_v31, %v4323_v34  ;;  %vm4898_vm4 = vcmp.ge.f32.partialorder %v4706_v55, 0.0  ;;  %v5091_v12 = vmul.f32 %v10541_v7, %v4706_v55  ;;  %v5763_v20 = vrot.slane %v5278_v23, 1  ;;  %v7353_v51 = vld [vmem:[#allocation2 + $0x300] ss:$3 sm:$0xff]  ;;  %14938 = vst [vmem:[#allocation45_spill] sm:$0xff] %v12987_v13 }
 0x4f2   : > { %vm4896_vm5 = vcmp.ge.f32.partialorder %v4704_v63, 0.0  ;;  %v5089_v21 = vmul.f32 %v10541_v7, %v4704_v63  ;;  %v6531_v29 = vrot.slane %v5278_v23, 2  ;;  %7199 = vst [vmem:[#allocation2 + $0x330] sm:$0xff] %v7007_v26  ;;  %7480 = vxpose.xlu0.b32.start [1/16] (narrow) %v7353_v51, 64 }
 0x4f3   : > { %vm4899_vm6 = vcmp.ge.f32.partialorder %v4707_v49, 0.0  ;;  %v5092_v33 = vmul.f32 %v10541_v7, %v4707_v49  ;;  %v12983_v37 = vsel %vm4898_vm4, %v4706_v55, %v5091_v12  ;;  %v5764_v24 = vsel %vm5561_vm2, %v5761_v60, %v5763_v20  ;;  %v13001_v12 = vpop.f32.mrb[151].mxu1 }
 0x4f4   : > { %v12985_v34 = vsel %vm4896_vm5, %v4704_v63, %v5089_v21  ;;  %v5773_v30 = vrot.slane %v12983_v37, 1  ;;  %v6541_v31 = vrot.slane %v12983_v37, 2  ;;  %v5766_v55 = vsel %vm5561_vm2, %v5763_v20, %v5765_v18  ;;  %14939 = vst [vmem:[#allocation116_spill] sm:$0xff] %v13001_v12  ;;  %v13010_v18 = vld [vmem:[#allocation15] ss:$0 sm:$0xff] }
 0x4f5   : > { %v5769_v44 = vrot.slane %v12985_v34, 1  ;;  %v6537_v11 = vrot.slane %v12985_v34, 2  ;;  %v6532_v63 = vsel %vm6329_vm3, %v6529_v48, %v6531_v29  ;;  %v6534_v9 = vsel %vm6329_vm3, %v6531_v29, %v6533_v32  ;;  %v13013_v48 = vld [vmem:[#allocation13] ss:$0 sm:$0xff]  ;;  %v14940_v32 = vld [vmem:[#allocation135_spill] sm:$0xff] }
 0x4f6   : > { %v6237_v21 = vmax.f32 %v12919_v25, %v5764_v24  ;;  %v6238_v26 = vmax.f32 %v5278_v23, %v5766_v55  ;;  %v13008_v4 = vsel %vm4899_vm6, %v4707_v49, %v5092_v33  ;;  %v4321_v22 = vadd.f32 %v13010_v18, %v4122_v47 }
 0x4f7   : > { %v5770_v13 = vsel %vm5561_vm2, %v5767_v19, %v5769_v44  ;;  %v6538_v51 = vsel %vm6329_vm3, %v6535_v36, %v6537_v11  ;;  %v4127_v20 = vmul.f32 %v13013_v48, %v14940_v32  ;;  %v14444_v19 = vrot.slane %v13008_v4, 1 }
 0x4f8   : > { %v6240_v60 = vmax.f32 %v12948_v54, %v5770_v13  ;;  %v7005_v25 = vmax.f32 %v6237_v21, %v6532_v63  ;;  %v7006_v23 = vmax.f32 %v6238_v26, %v6534_v9  ;;  %v14443_v36 = vrot.slane %v13008_v4, 2  ;;  %v14942_v13 = vld [vmem:[#allocation137_spill] sm:$0xff]  ;;  %v14943_v63 = vld [vmem:[#allocation138_spill] sm:$0xff] }
 0x4f9   : > { %v14941_v54 = vunpack.c.h.bf16 %v14934_v3  ;;  %v4326_v33 = vadd.f32 %v13010_v18, %v4127_v20  ;;  %v4125_v47 = vmul.f32 %v13013_v48, %v14942_v13  ;;  %v5776_v24 = vsel %vm5561_vm2, %v5773_v30, %v14444_v19  ;;  %v14944_v3 = vld [vmem:[#allocation43_spill] sm:$0xff]  ;;  %v13038_v20 = vpop.f32.mrb[152].mxu1 }
 0x4fa   : > { %v7008_v29 = vmax.f32 %v6240_v60, %v6538_v51  ;;  %7197 = vst [vmem:[#allocation2 + $0x320] sm:$0xff] %v7005_v25  ;;  %7198 = vst [vmem:[#allocation2 + $0x328] sm:$0xff] %v7006_v23  ;;  %v6544_v55 = vsel %vm6329_vm3, %v6541_v31, %v14443_v36  ;;  %v4128_v9 = vmul.f32 %v13013_v48, %v14943_v63  ;;  %v14945_v60 = vld [vmem:[#allocation76_spill] sm:$0xff] }
 0x4fb   : > { %v4705_v49 = vadd.f32 %v14941_v54, %v4321_v22  ;;  %v4126_v21 = vmul.f32 %v13013_v48, %v14944_v3  ;;  %v6243_v26 = vmax.f32 %v12983_v37, %v5776_v24  ;;  %v14946_v22 = vunpack.c.l.bf16 %v14945_v60  ;;  %14947 = vst [vmem:[#allocation31_spill] sm:$0xff] %v13038_v20 }
 0x4fc   : > { %7200 = vst [vmem:[#allocation2 + $0x338] sm:$0xff] %v7008_v29  ;;  %v4324_v25 = vadd.f32 %v13010_v18, %v4125_v47  ;;  %v4327_v23 = vadd.f32 %v13010_v18, %v4128_v9  ;;  %v4131_v13 = vmul.f32 %v13013_v48, %v12425_v59  ;;  %v13045_v29 = vpop.f32.mrb[153].mxu1  ;;  %v14951_v47 = vunpack.c.h.bf16 %v14945_v60 }
 0x4fd   : > { %vm4897_vm7 = vcmp.ge.f32.partialorder %v4705_v49, 0.0  ;;  %v5090_v51 = vmul.f32 %v10541_v7, %v4705_v49  ;;  %v4710_v32 = vadd.f32 %v14946_v22, %v4326_v33  ;;  %v4325_v54 = vadd.f32 %v13010_v18, %v4126_v21  ;;  %14948 = vst [vmem:[#allocation32_spill] sm:$0xff] %v13045_v29  ;;  %v14949_v22 = vld [vmem:[#allocation74_spill] sm:$0xff]  ;;  %v13052_v20 = vpop.f32.mrb[154].mxu1 }
 0x4fe   : > { %v7011_v37 = vmax.f32 %v6243_v26, %v6544_v55  ;;  %v14950_v36 = vunpack.c.l.bf16 %v14949_v22  ;;  %v4711_v9 = vadd.f32 %v14951_v47, %v4327_v23  ;;  %14952 = vst [vmem:[#allocation48_spill] sm:$0xff] %v13052_v20  ;;  %v14953_v59 = vunpack.c.h.bf16 %v14949_v22  ;;  %v13072_v22 = vpop.f32.mrb[155].mxu1 }
 0x4ff   : > { %v5282_v24 = vsel %vm4897_vm7, %v4705_v49, %v5090_v51  ;;  %vm4902_vm8 = vcmp.ge.f32.partialorder %v4710_v32, 0.0  ;;  %v5095_v63 = vmul.f32 %v10541_v7, %v4710_v32  ;;  %v4330_v49 = vadd.f32 %v13010_v18, %v4131_v13  ;;  %14956 = vst [vmem:[#allocation140_spill] sm:$0xff] %v13072_v22  ;;  %v13095_v12 = vpop.f32.mrb[156].mxu1 }
 0x500   : > { %v5771_v3 = vrot.slane %v5282_v24, 1  ;;  %v6539_v33 = vrot.slane %v5282_v24, 2  ;;  %v4708_v19 = vadd.f32 %v14950_v36, %v4324_v25  ;;  %7203 = vst [vmem:[#allocation2 + $0x350] sm:$0xff] %v7011_v37  ;;  %v4709_v29 = vadd.f32 %v14953_v59, %v4325_v54 }
 0x501   : > { %v5287_v21 = vsel %vm4902_vm8, %v4710_v32, %v5095_v63  ;;  %v4129_v55 = vmul.f32 %v13013_v48, %v12429_v50  ;;  %v7355_v63 = vld [vmem:[#allocation2 + $0x318] ss:$3 sm:$0xff]  ;;  %vm4903_vm10 = vcmp.ge.f32.partialorder %v4711_v9, 0.0  ;;  %v5096_v50 = vmul.f32 %v10541_v7, %v4711_v9 }
 0x502   : > { %v5772_v26 = vsel %vm5561_vm2, %v5769_v44, %v5771_v3  ;;  %v5774_v51 = vsel %vm5561_vm2, %v5771_v3, %v5773_v30  ;;  %v6540_v36 = vsel %vm6329_vm3, %v6537_v11, %v6539_v33  ;;  %v6542_v60 = vsel %vm6329_vm3, %v6539_v33, %v6541_v31  ;;  %7481 = vxpose.xlu0.b32.cont [2/16] (narrow) %v7355_v63, 64 }
 0x503   : > { %v6241_v25 = vmax.f32 %v12985_v34, %v5772_v26  ;;  %v6242_v23 = vmax.f32 %v5282_v24, %v5774_v51  ;;  %v5781_v32 = vrot.slane %v5287_v21, 1  ;;  %v6549_v37 = vrot.slane %v5287_v21, 2  ;;  %v14954_v34 = vld [vmem:[#allocation75_spill] sm:$0xff] }
 0x504   : > { %vm4900_vm9 = vcmp.ge.f32.partialorder %v4708_v19, 0.0  ;;  %v5093_v54 = vmul.f32 %v10541_v7, %v4708_v19  ;;  %vm4901_vm11 = vcmp.ge.f32.partialorder %v4709_v29, 0.0  ;;  %v5094_v30 = vmul.f32 %v10541_v7, %v4709_v29 }
 0x505   : > { %v7009_v44 = vmax.f32 %v6241_v25, %v6540_v36  ;;  %v7010_v13 = vmax.f32 %v6242_v23, %v6542_v60  ;;  %v13067_v31 = vsel %vm4903_vm10, %v4711_v9, %v5096_v50  ;;  %v14955_v24 = vunpack.c.l.bf16 %v14954_v34  ;;  %v14957_v9 = vld [vmem:[#allocation73_spill] sm:$0xff] }
 0x506   : > { %v5285_v11 = vsel %vm4900_vm9, %v4708_v19, %v5093_v54  ;;  %v4328_v33 = vadd.f32 %v13010_v18, %v4129_v55  ;;  %v5783_v26 = vrot.slane %v13067_v31, 1  ;;  %v6551_v51 = vrot.slane %v13067_v31, 2 }
 0x507   : > { %v4714_v3 = vadd.f32 %v14955_v24, %v4330_v49  ;;  %7201 = vst [vmem:[#allocation2 + $0x340] sm:$0xff] %v7009_v44  ;;  %7202 = vst [vmem:[#allocation2 + $0x348] sm:$0xff] %v7010_v13  ;;  %v5777_v47 = vrot.slane %v5285_v11, 1  ;;  %v6545_v59 = vrot.slane %v5285_v11, 2  ;;  %v5286_v36 = vsel %vm4901_vm11, %v4709_v29, %v5094_v30 }
 0x508   : > { %v14958_v60 = vunpack.c.l.bf16 %v14957_v9  ;;  %v14959_v49 = vrot.slane %v13008_v4, 1  ;;  %v14960_v23 = vrot.slane %v13008_v4, 2  ;;  %v5784_v54 = vsel %vm5561_vm2, %v5781_v32, %v5783_v26 }
 0x509   : > { %vm4906_vm12 = vcmp.ge.f32.partialorder %v4714_v3, 0.0  ;;  %v5099_v19 = vmul.f32 %v10541_v7, %v4714_v3  ;;  %v6552_v50 = vsel %vm6329_vm3, %v6549_v37, %v6551_v51  ;;  %v6247_v44 = vmax.f32 %v5287_v21, %v5784_v54 }
 0x50a   : > { %v4712_v25 = vadd.f32 %v14958_v60, %v4328_v33  ;;  %v5778_v55 = vsel %vm5561_vm2, %v14959_v49, %v5777_v47  ;;  %v6546_v63 = vsel %vm6329_vm3, %v14960_v23, %v6545_v59  ;;  %v5779_v13 = vrot.slane %v5286_v36, 1 }
 0x50b   : > { %v6244_v29 = vmax.f32 %v13008_v4, %v5778_v55  ;;  %v6547_v30 = vrot.slane %v5286_v36, 2  ;;  %v13088_v24 = vsel %vm4906_vm12, %v4714_v3, %v5099_v19  ;;  %v4132_v60 = vmul.f32 %v13013_v48, %v12435_v17  ;;  %v13099_v19 = vpop.f32.mrb[157].mxu1 }
 0x50c   : > { %vm4904_vm13 = vcmp.ge.f32.partialorder %v4712_v25, 0.0  ;;  %v5097_v33 = vmul.f32 %v10541_v7, %v4712_v25  ;;  %v7015_v22 = vmax.f32 %v6247_v44, %v6552_v50  ;;  %v5780_v23 = vsel %vm5561_vm2, %v5777_v47, %v5779_v13 }
 0x50d   : > { %v7012_v49 = vmax.f32 %v6244_v29, %v6546_v63  ;;  %v5782_v20 = vsel %vm5561_vm2, %v5779_v13, %v5781_v32  ;;  %v6245_v4 = vmax.f32 %v5285_v11, %v5780_v23  ;;  %v6548_v55 = vsel %vm6329_vm3, %v6545_v59, %v6547_v30  ;;  %v13107_v11 = vpop.f32.mrb[158].mxu1  ;;  %v14962_v13 = vld [vmem:[#allocation136_spill] sm:$0xff] }
 0x50e   : > { %v6246_v21 = vmax.f32 %v5286_v36, %v5782_v20  ;;  %v6550_v3 = vsel %vm6329_vm3, %v6547_v30, %v6549_v37  ;;  %7207 = vst [vmem:[#allocation2 + $0x370] sm:$0xff] %v7015_v22  ;;  %v5789_v17 = vrot.slane %v13088_v24, 1  ;;  %v6557_v63 = vrot.slane %v13088_v24, 2  ;;  %v7357_v54 = vld [vmem:[#allocation2 + $0x330] ss:$3 sm:$0xff]  ;;  %v13111_v22 = vpop.f32.mrb[159].mxu1 }
 0x50f   : > { %7204 = vst [vmem:[#allocation2 + $0x358] sm:$0xff] %v7012_v49  ;;  %v13104_v47 = vsel %vm4904_vm13, %v4712_v25, %v5097_v33  ;;  %v4331_v32 = vadd.f32 %v13010_v18, %v4132_v60  ;;  %v7013_v20 = vmax.f32 %v6245_v4, %v6548_v55  ;;  %7482 = vxpose.xlu0.b32.cont [3/16] (narrow) %v7357_v54, 64  ;;  %v14961_v50 = vunpack.c.h.bf16 %v14954_v34  ;;  %v14963_v49 = vld [vmem:[#allocation134_spill] sm:$0xff] }
 0x510   : > { %v7014_v59 = vmax.f32 %v6246_v21, %v6550_v3  ;;  %v5785_v37 = vrot.slane %v13104_v47, 1  ;;  %v6553_v36 = vrot.slane %v13104_v47, 2  ;;  %v4130_v25 = vmul.f32 %v13013_v48, %v12472_v40 }
 0x511   : > { %v4715_v29 = vadd.f32 %v14961_v50, %v4331_v32  ;;  %v4135_v44 = vmul.f32 %v13013_v48, %v12511_v57  ;;  %v4133_v30 = vmul.f32 %v13013_v48, %v14962_v13  ;;  %7205 = vst [vmem:[#allocation2 + $0x360] sm:$0xff] %v7013_v20  ;;  %v4136_v23 = vmul.f32 %v13013_v48, %v14963_v49  ;;  %v14965_v50 = vld [vmem:[#allocation78_spill] sm:$0xff]  ;;  %v14967_v13 = vld [vmem:[#allocation77_spill] sm:$0xff] }
 0x512   : > { %7206 = vst [vmem:[#allocation2 + $0x368] sm:$0xff] %v7014_v59  ;;  %v5786_v33 = vsel %vm5561_vm2, %v5783_v26, %v5785_v37  ;;  %v6554_v60 = vsel %vm6329_vm3, %v6551_v51, %v6553_v36  ;;  %v4134_v34 = vmul.f32 %v13013_v48, %v12539_v58  ;;  %v4329_v4 = vadd.f32 %v13010_v18, %v4130_v25 }
 0x513   : > { %v6248_v40 = vmax.f32 %v13067_v31, %v5786_v33  ;;  %vm4907_vm14 = vcmp.ge.f32.partialorder %v4715_v29, 0.0  ;;  %v5100_v57 = vmul.f32 %v10541_v7, %v4715_v29  ;;  %v4334_v21 = vadd.f32 %v13010_v18, %v4135_v44 }
 0x514   : > { %v4332_v55 = vadd.f32 %v13010_v18, %v4133_v30  ;;  %v4335_v26 = vadd.f32 %v13010_v18, %v4136_v23  ;;  %v4333_v51 = vadd.f32 %v13010_v18, %v4134_v34  ;;  %v14964_v58 = vunpack.c.h.bf16 %v14957_v9 }
 0x515   : > { %v7016_v3 = vmax.f32 %v6248_v40, %v6554_v60  ;;  %v13134_v32 = vsel %vm4907_vm14, %v4715_v29, %v5100_v57  ;;  %v4139_v31 = vmul.f32 %v13013_v48, %v12580_v38  ;;  %v14966_v25 = vunpack.c.l.bf16 %v14965_v50 }
 0x516   : > { %v4713_v54 = vadd.f32 %v14964_v58, %v4329_v4  ;;  %v5791_v20 = vrot.slane %v13134_v32, 1  ;;  %v6559_v59 = vrot.slane %v13134_v32, 2  ;;  %v14968_v30 = vunpack.c.l.bf16 %v14967_v13  ;;  %v7359_v49 = vld [vmem:[#allocation2 + $0x348] ss:$3 sm:$0xff]  ;;  %v13158_v4 = vpop.f32.mrb[160].mxu1 }
 0x517   : > { %v4718_v44 = vadd.f32 %v14966_v25, %v4334_v21  ;;  %7208 = vst [vmem:[#allocation2 + $0x378] sm:$0xff] %v7016_v3  ;;  %v14969_v9 = vunpack.c.h.bf16 %v14965_v50  ;;  %v14970_v38 = vunpack.c.h.bf16 %v14967_v13  ;;  %7483 = vxpose.xlu0.b32.cont [4/16] (narrow) %v7359_v49, 64 }
 0x518   : > { %v4716_v33 = vadd.f32 %v14968_v30, %v4332_v55  ;;  %vm4905_vm15 = vcmp.ge.f32.partialorder %v4713_v54, 0.0  ;;  %v5098_v29 = vmul.f32 %v10541_v7, %v4713_v54  ;;  %v5792_v34 = vsel %vm5561_vm2, %v5789_v17, %v5791_v20 }
 0x519   : > { %v4719_v60 = vadd.f32 %v14969_v9, %v4335_v26  ;;  %v4717_v23 = vadd.f32 %v14970_v38, %v4333_v51  ;;  %v6560_v40 = vsel %vm6329_vm3, %v6557_v63, %v6559_v59  ;;  %vm4910_vm0 = vcmp.ge.f32.partialorder %v4718_v44, 0.0  ;;  %v13162_v51 = vpop.f32.mrb[161].mxu1  ;;  %v7361_v25 = vld [vmem:[#allocation2 + $0x360] ss:$3 sm:$0xff] }
 0x51a   : > { %v5103_v57 = vmul.f32 %v10541_v7, %v4718_v44  ;;  %v6251_v21 = vmax.f32 %v13088_v24, %v5792_v34  ;;  %v5290_v55 = vsel %vm4905_vm15, %v4713_v54, %v5098_v29  ;;  %vm4908_vm1 = vcmp.ge.f32.partialorder %v4716_v33, 0.0  ;;  %v13164_v13 = vpop.f32.mrb[162].mxu1 }
 0x51b   : > { %v5101_v26 = vmul.f32 %v10541_v7, %v4716_v33  ;;  %v5787_v3 = vrot.slane %v5290_v55, 1  ;;  %v6555_v58 = vrot.slane %v5290_v55, 2  ;;  %vm4911_vm4 = vcmp.ge.f32.partialorder %v4719_v60, 0.0  ;;  %14971 = vst [vmem:[#allocation47_spill] sm:$0xff] %v13164_v13  ;;  %7484 = vxpose.xlu0.b32.cont [5/16] (narrow) %v7361_v25, 64 }
 0x51c   : > { %v5295_v50 = vsel %vm4910_vm0, %v4718_v44, %v5103_v57  ;;  %v7019_v30 = vmax.f32 %v6251_v21, %v6560_v40  ;;  %v13174_v57 = vpop.f32.mrb[163].mxu1  ;;  %vm4909_vm5 = vcmp.ge.f32.partialorder %v4717_v23, 0.0  ;;  %v5102_v25 = vmul.f32 %v10541_v7, %v4717_v23 }
 0x51d   : > { %v5797_v49 = vrot.slane %v5295_v50, 1  ;;  %v6565_v9 = vrot.slane %v5295_v50, 2  ;;  %v5293_v38 = vsel %vm4908_vm1, %v4716_v33, %v5101_v26  ;;  %v5788_v34 = vsel %vm5561_vm2, %v5785_v37, %v5787_v3  ;;  %14972 = vst [vmem:[#allocation36_spill] sm:$0xff] %v13174_v57 }
 0x51e   : > { %v5790_v54 = vsel %vm5561_vm2, %v5787_v3, %v5789_v17  ;;  %v6556_v29 = vsel %vm6329_vm3, %v6553_v36, %v6555_v58  ;;  %v6558_v44 = vsel %vm6329_vm3, %v6555_v58, %v6557_v63  ;;  %7211 = vst [vmem:[#allocation2 + $0x390] sm:$0xff] %v7019_v30  ;;  %v6249_v40 = vmax.f32 %v13104_v47, %v5788_v34  ;;  %v14973_v30 = vld [vmem:[#allocation80_spill] sm:$0xff] }
 0x51f   : > { %v6250_v21 = vmax.f32 %v5290_v55, %v5790_v54  ;;  %v5793_v33 = vrot.slane %v5293_v38, 1  ;;  %v6561_v26 = vrot.slane %v5293_v38, 2  ;;  %v5104_v37 = vmul.f32 %v10541_v7, %v4719_v60 }
 0x520   : > { %v4338_v17 = vadd.f32 %v13010_v18, %v4139_v31  ;;  %v7017_v36 = vmax.f32 %v6249_v40, %v6556_v29  ;;  %v5294_v55 = vsel %vm4909_vm5, %v4717_v23, %v5102_v25  ;;  %v14974_v34 = vunpack.c.l.bf16 %v14973_v30 }
 0x521   : > { %v7018_v3 = vmax.f32 %v6250_v21, %v6558_v44  ;;  %v5794_v24 = vsel %vm5561_vm2, %v5791_v20, %v5793_v33  ;;  %v6562_v63 = vsel %vm6329_vm3, %v6559_v59, %v6561_v26  ;;  %v13184_v47 = vsel %vm4911_vm4, %v4719_v60, %v5104_v37 }
 0x522   : > { %v6252_v58 = vmax.f32 %v13134_v32, %v5794_v24  ;;  %v4722_v54 = vadd.f32 %v14974_v34, %v4338_v17  ;;  %7209 = vst [vmem:[#allocation2 + $0x380] sm:$0xff] %v7017_v36  ;;  %v5799_v57 = vrot.slane %v13184_v47, 1  ;;  %v14445_v31 = vrot.slane %v13184_v47, 2  ;;  %v14975_v32 = vld [vmem:[#allocation41_spill] sm:$0xff]  ;;  %v13202_v24 = vpop.f32.mrb[164].mxu1 }
 0x523   : > { %7210 = vst [vmem:[#allocation2 + $0x388] sm:$0xff] %v7018_v3  ;;  %v5795_v29 = vrot.slane %v5294_v55, 1  ;;  %v6563_v44 = vrot.slane %v5294_v55, 2  ;;  %v4137_v60 = vmul.f32 %v13013_v48, %v14975_v32  ;;  %14976 = vst [vmem:[#allocation52_spill] sm:$0xff] %v13202_v24  ;;  %v14977_v32 = vld [vmem:[#allocation139_spill] sm:$0xff] }
 0x524   : > { %v7020_v20 = vmax.f32 %v6252_v58, %v6562_v63  ;;  %vm4914_vm6 = vcmp.ge.f32.partialorder %v4722_v54, 0.0  ;;  %v5107_v59 = vmul.f32 %v10541_v7, %v4722_v54  ;;  %v5800_v23 = vsel %vm5561_vm2, %v5797_v49, %v5799_v57 }
 0x525   : > { %v6568_v40 = vsel %vm6329_vm3, %v6565_v9, %v14445_v31  ;;  %v5796_v21 = vsel %vm5561_vm2, %v5793_v33, %v5795_v29  ;;  %v5798_v37 = vsel %vm5561_vm2, %v5795_v29, %v5797_v49  ;;  %v6255_v25 = vmax.f32 %v5295_v50, %v5800_v23  ;;  %v13210_v33 = vpop.f32.mrb[165].mxu1 }
 0x526   : > { %7212 = vst [vmem:[#allocation2 + $0x398] sm:$0xff] %v7020_v20  ;;  %v6253_v17 = vmax.f32 %v5293_v38, %v5796_v21  ;;  %v6254_v36 = vmax.f32 %v5294_v55, %v5798_v37  ;;  %v6564_v3 = vsel %vm6329_vm3, %v6561_v26, %v6563_v44  ;;  %v6566_v63 = vsel %vm6329_vm3, %v6563_v44, %v6565_v9  ;;  %v13213_v55 = vpop.f32.mrb[166].mxu1  ;;  %v14980_v20 = vld [vmem:[#allocation79_spill] sm:$0xff] }
 0x527   : > { %v13205_v58 = vsel %vm4914_vm6, %v4722_v54, %v5107_v59  ;;  %v4336_v34 = vadd.f32 %v13010_v18, %v4137_v60  ;;  %v4140_v31 = vmul.f32 %v13013_v48, %v14977_v32  ;;  %14978 = vst [vmem:[#allocation34_spill] sm:$0xff] %v13210_v33  ;;  %v7023_v49 = vmax.f32 %v6255_v25, %v6568_v40  ;;  %v14982_v59 = vld [vmem:[#allocation115_spill] sm:$0xff] }
 0x528   : > { %v7021_v29 = vmax.f32 %v6253_v17, %v6564_v3  ;;  %v7022_v50 = vmax.f32 %v6254_v36, %v6566_v63  ;;  %v5805_v38 = vrot.slane %v13205_v58, 1  ;;  %14979 = vst [vmem:[#allocation50_spill] sm:$0xff] %v13213_v55  ;;  %v6573_v26 = vrot.slane %v13205_v58, 2 }
 0x529   : > { %v14981_v9 = vunpack.c.l.bf16 %v14980_v20  ;;  %v4339_v44 = vadd.f32 %v13010_v18, %v4140_v31  ;;  %v4138_v60 = vmul.f32 %v13013_v48, %v14982_v59  ;;  %7215 = vst [vmem:[#allocation2 + $0x3b0] sm:$0xff] %v7023_v49  ;;  %v4143_v23 = vmul.f32 %v13013_v48, %v12660_v10  ;;  %v13229_v31 = vpop.f32.mrb[167].mxu1 }
 0x52a   : > { %7213 = vst [vmem:[#allocation2 + $0x3a0] sm:$0xff] %v7021_v29  ;;  %7214 = vst [vmem:[#allocation2 + $0x3a8] sm:$0xff] %v7022_v50  ;;  %v4141_v40 = vmul.f32 %v13013_v48, %v12668_v45  ;;  %v4144_v21 = vmul.f32 %v13013_v48, %v12680_v8  ;;  %v4142_v37 = vmul.f32 %v13013_v48, %v12690_v61  ;;  %v7363_v25 = vld [vmem:[#allocation2 + $0x378] ss:$3 sm:$0xff]  ;;  %v14984_v36 = vunpack.c.h.bf16 %v14973_v30 }
 0x52b   : > { %v4720_v54 = vadd.f32 %v14981_v9, %v4336_v34  ;;  %14983 = vst [vmem:[#allocation141_spill] sm:$0xff] %v13229_v31  ;;  %v4337_v10 = vadd.f32 %v13010_v18, %v4138_v60  ;;  %7485 = vxpose.xlu0.b32.cont [6/16] (narrow) %v7363_v25, 64  ;;  %v4342_v45 = vadd.f32 %v13010_v18, %v4143_v23  ;;  %v14985_v49 = vunpack.c.h.bf16 %v14980_v20  ;;  %v14986_v9 = vld [vmem:[#allocation84_spill] sm:$0xff]  ;;  %v14988_v60 = vld [vmem:[#allocation82_spill] sm:$0xff] }
 0x52c   : > { %v4723_v3 = vadd.f32 %v14984_v36, %v4339_v44  ;;  %v4340_v63 = vadd.f32 %v13010_v18, %v4141_v40  ;;  %v4343_v8 = vadd.f32 %v13010_v18, %v4144_v21  ;;  %v4341_v61 = vadd.f32 %v13010_v18, %v4142_v37 }
 0x52d   : > { %vm4912_vm7 = vcmp.ge.f32.partialorder %v4720_v54, 0.0  ;;  %v5105_v17 = vmul.f32 %v10541_v7, %v4720_v54  ;;  %v4721_v29 = vadd.f32 %v14985_v49, %v4337_v10  ;;  %v14987_v44 = vunpack.c.l.bf16 %v14986_v9 }
 0x52e   : > { %vm4915_vm8 = vcmp.ge.f32.partialorder %v4723_v3, 0.0  ;;  %v5108_v32 = vmul.f32 %v10541_v7, %v4723_v3  ;;  %v14989_v23 = vunpack.c.l.bf16 %v14988_v60 }
 0x52f   : > { %v5297_v34 = vsel %vm4912_vm7, %v4720_v54, %v5105_v17  ;;  %v4726_v59 = vadd.f32 %v14987_v44, %v4342_v45  ;;  %vm4913_vm9 = vcmp.ge.f32.partialorder %v4721_v29, 0.0  ;;  %v5106_v21 = vmul.f32 %v10541_v7, %v4721_v29 }
 0x530   : > { %v5801_v30 = vrot.slane %v5297_v34, 1  ;;  %v6569_v50 = vrot.slane %v5297_v34, 2  ;;  %v4724_v25 = vadd.f32 %v14989_v23, %v4340_v63  ;;  %v13246_v40 = vsel %vm4915_vm8, %v4723_v3, %v5108_v32 }
 0x531   : > { %v14990_v54 = vunpack.c.h.bf16 %v14986_v9  ;;  %v14991_v17 = vrot.slane %v13184_v47, 2  ;;  %v5807_v10 = vrot.slane %v13246_v40, 1  ;;  %v6575_v45 = vrot.slane %v13246_v40, 2  ;;  %v7365_v49 = vld [vmem:[#allocation2 + $0x390] ss:$3 sm:$0xff] }
 0x532   : > { %v5802_v20 = vsel %vm5561_vm2, %v5799_v57, %v5801_v30  ;;  %v5298_v63 = vsel %vm4913_vm9, %v4721_v29, %v5106_v21  ;;  %vm4918_vm10 = vcmp.ge.f32.partialorder %v4726_v59, 0.0  ;;  %v5111_v32 = vmul.f32 %v10541_v7, %v4726_v59  ;;  %7486 = vxpose.xlu0.b32.cont [7/16] (narrow) %v7365_v49, 64 }
 0x533   : > { %v4727_v37 = vadd.f32 %v14990_v54, %v4343_v8  ;;  %v6570_v36 = vsel %vm6329_vm3, %v14991_v17, %v6569_v50  ;;  %v6256_v3 = vmax.f32 %v13184_v47, %v5802_v20  ;;  %v5808_v8 = vsel %vm5561_vm2, %v5805_v38, %v5807_v10 }
 0x534   : > { %v6576_v9 = vsel %vm6329_vm3, %v6573_v26, %v6575_v45  ;;  %v5803_v57 = vrot.slane %v5298_v63, 1  ;;  %v6571_v44 = vrot.slane %v5298_v63, 2  ;;  %v6259_v54 = vmax.f32 %v13205_v58, %v5808_v8 }
 0x535   : > { %v7024_v23 = vmax.f32 %v6256_v3, %v6570_v36  ;;  %v5303_v17 = vsel %vm4918_vm10, %v4726_v59, %v5111_v32  ;;  %vm4916_vm11 = vcmp.ge.f32.partialorder %v4724_v25, 0.0  ;;  %v5109_v36 = vmul.f32 %v10541_v7, %v4724_v25 }
 0x536   : > { %v5804_v31 = vsel %vm5561_vm2, %v5801_v30, %v5803_v57  ;;  %v5806_v47 = vsel %vm5561_vm2, %v5803_v57, %v5805_v38  ;;  %v6572_v29 = vsel %vm6329_vm3, %v6569_v50, %v6571_v44  ;;  %v6574_v21 = vsel %vm6329_vm3, %v6571_v44, %v6573_v26  ;;  %v13274_v50 = vpop.f32.mrb[168].mxu1 }
 0x537   : > { %7216 = vst [vmem:[#allocation2 + $0x3b8] sm:$0xff] %v7024_v23  ;;  %v7027_v20 = vmax.f32 %v6259_v54, %v6576_v9  ;;  %v6257_v55 = vmax.f32 %v5297_v34, %v5804_v31  ;;  %v6258_v33 = vmax.f32 %v5298_v63, %v5806_v47  ;;  %v5813_v24 = vrot.slane %v5303_v17, 1 }
 0x538   : > { %v6581_v13 = vrot.slane %v5303_v17, 2  ;;  %vm4919_vm12 = vcmp.ge.f32.partialorder %v4727_v37, 0.0  ;;  %v5112_v58 = vmul.f32 %v10541_v7, %v4727_v37  ;;  %v14992_v38 = vunpack.c.h.bf16 %v14988_v60 }
 0x539   : > { %7219 = vst [vmem:[#allocation2 + $0x3d0] sm:$0xff] %v7027_v20  ;;  %v7025_v59 = vmax.f32 %v6257_v55, %v6572_v29  ;;  %v7026_v30 = vmax.f32 %v6258_v33, %v6574_v21  ;;  %v4147_v26 = vmul.f32 %v13013_v48, %v12719_v28  ;;  %v5301_v31 = vsel %vm4916_vm11, %v4724_v25, %v5109_v36  ;;  %v13283_v55 = vpop.f32.mrb[169].mxu1  ;;  %v14994_v29 = vld [vmem:[#allocation83_spill] sm:$0xff] }
 0x53a   : > { %v4725_v3 = vadd.f32 %v14992_v38, %v4341_v61  ;;  %v13277_v34 = vsel %vm4919_vm12, %v4727_v37, %v5112_v58  ;;  %v4145_v63 = vmul.f32 %v13013_v48, %v12725_v16  ;;  %v4148_v32 = vmul.f32 %v13013_v48, %v12732_v41  ;;  %v13287_v49 = vpop.f32.mrb[170].mxu1 }
 0x53b   : > { %7217 = vst [vmem:[#allocation2 + $0x3c0] sm:$0xff] %v7025_v59  ;;  %7218 = vst [vmem:[#allocation2 + $0x3c8] sm:$0xff] %v7026_v30  ;;  %v5809_v33 = vrot.slane %v5301_v31, 1  ;;  %v6577_v61 = vrot.slane %v5301_v31, 2  ;;  %v5815_v28 = vrot.slane %v13277_v34, 1  ;;  %v6583_v60 = vrot.slane %v13277_v34, 2 }
 0x53c   : > { %vm4917_vm13 = vcmp.ge.f32.partialorder %v4725_v3, 0.0  ;;  %v5110_v25 = vmul.f32 %v10541_v7, %v4725_v3  ;;  %v4346_v16 = vadd.f32 %v13010_v18, %v4147_v26  ;;  %v4344_v37 = vadd.f32 %v13010_v18, %v4145_v63  ;;  %v13292_v41 = vpop.f32.mrb[171].mxu1  ;;  %v14996_v30 = vld [vmem:[#allocation81_spill] sm:$0xff] }
 0x53d   : > { %14993 = vst [vmem:[#allocation119_spill] sm:$0xff] %v13292_v41  ;;  %v5810_v8 = vsel %vm5561_vm2, %v5807_v10, %v5809_v33  ;;  %v6578_v9 = vsel %vm6329_vm3, %v6575_v45, %v6577_v61  ;;  %v5816_v57 = vsel %vm5561_vm2, %v5813_v24, %v5815_v28  ;;  %v6584_v44 = vsel %vm6329_vm3, %v6581_v13, %v6583_v60 }
 0x53e   : > { %v6260_v23 = vmax.f32 %v13246_v40, %v5810_v8  ;;  %v6263_v54 = vmax.f32 %v5303_v17, %v5816_v57  ;;  %v5302_v47 = vsel %vm4917_vm13, %v4725_v3, %v5110_v25  ;;  %v14995_v21 = vunpack.c.l.bf16 %v14994_v29  ;;  %v7367_v36 = vld [vmem:[#allocation2 + $0x3a8] ss:$3 sm:$0xff] }
 0x53f   : > { %v5811_v58 = vrot.slane %v5302_v47, 1  ;;  %v6579_v59 = vrot.slane %v5302_v47, 2  ;;  %v14997_v38 = vunpack.c.l.bf16 %v14996_v30  ;;  %v4347_v10 = vadd.f32 %v13010_v18, %v4148_v32  ;;  %7487 = vxpose.xlu0.b32.cont [8/16] (narrow) %v7367_v36, 64 }
 0x540   : > { %v4730_v20 = vadd.f32 %v14995_v21, %v4346_v16  ;;  %v7028_v45 = vmax.f32 %v6260_v23, %v6578_v9  ;;  %v7031_v63 = vmax.f32 %v6263_v54, %v6584_v44 }
 0x541   : > { %v4728_v26 = vadd.f32 %v14997_v38, %v4344_v37  ;;  %v5812_v40 = vsel %vm5561_vm2, %v5809_v33, %v5811_v58  ;;  %v5814_v17 = vsel %vm5561_vm2, %v5811_v58, %v5813_v24  ;;  %v6580_v3 = vsel %vm6329_vm3, %v6577_v61, %v6579_v59 }
 0x542   : > { %vm4922_vm14 = vcmp.ge.f32.partialorder %v4730_v20, 0.0  ;;  %v5115_v41 = vmul.f32 %v10541_v7, %v4730_v20  ;;  %v6582_v25 = vsel %vm6329_vm3, %v6579_v59, %v6581_v13  ;;  %7220 = vst [vmem:[#allocation2 + $0x3d8] sm:$0xff] %v7028_v45  ;;  %7223 = vst [vmem:[#allocation2 + $0x3f0] sm:$0xff] %v7031_v63  ;;  %v6261_v16 = vmax.f32 %v5301_v31, %v5812_v40  ;;  %v7369_v32 = vld [vmem:[#allocation2 + $0x3c0] ss:$3 sm:$0xff] }
 0x543   : > { %v6262_v37 = vmax.f32 %v5302_v47, %v5814_v17  ;;  %vm4920_vm15 = vcmp.ge.f32.partialorder %v4728_v26, 0.0  ;;  %v5113_v33 = vmul.f32 %v10541_v7, %v4728_v26  ;;  %v14998_v24 = vunpack.c.h.bf16 %v14994_v29  ;;  %7488 = vxpose.xlu0.b32.cont [9/16] (narrow) %v7369_v32, 64  ;;  %v15000_v17 = vld [vmem:[#allocation86_spill] sm:$0xff]  ;;  %v13343_v32 = vpop.f32.mrb[172].mxu1 }
 0x544   : > { %v13309_v8 = vsel %vm4922_vm14, %v4730_v20, %v5115_v41  ;;  %v7029_v61 = vmax.f32 %v6261_v16, %v6580_v3  ;;  %v4146_v31 = vmul.f32 %v13013_v48, %v12738_v56  ;;  %v4151_v41 = vmul.f32 %v13013_v48, %v12776_v46  ;;  %v15002_v16 = vld [vmem:[#allocation85_spill] sm:$0xff] }
 0x545   : > { %v5821_v9 = vrot.slane %v13309_v8, 1  ;;  %v14446_v57 = vrot.slane %v13309_v8, 2  ;;  %v4731_v44 = vadd.f32 %v14998_v24, %v4347_v10  ;;  %v7030_v13 = vmax.f32 %v6262_v37, %v6582_v25 }
 0x546   : > { %v13320_v23 = vsel %vm4920_vm15, %v4728_v26, %v5113_v33  ;;  %v4149_v47 = vmul.f32 %v13013_v48, %v12779_v27  ;;  %7221 = vst [vmem:[#allocation2 + $0x3e0] sm:$0xff] %v7029_v61  ;;  %v4345_v20 = vadd.f32 %v13010_v18, %v4146_v31  ;;  %v4350_v56 = vadd.f32 %v13010_v18, %v4151_v41 }
 0x547   : > { %vm4923_vm0 = vcmp.ge.f32.partialorder %v4731_v44, 0.0  ;;  %v5116_v54 = vmul.f32 %v10541_v7, %v4731_v44  ;;  %7222 = vst [vmem:[#allocation2 + $0x3e8] sm:$0xff] %v7030_v13  ;;  %v5817_v29 = vrot.slane %v13320_v23, 1  ;;  %v6585_v21 = vrot.slane %v13320_v23, 2 }
 0x548   : > { %v4348_v46 = vadd.f32 %v13010_v18, %v4149_v47  ;;  %v4152_v58 = vmul.f32 %v13013_v48, %v12785_v53  ;;  %v4150_v59 = vmul.f32 %v13013_v48, %v12787_v5  ;;  %v14999_v63 = vunpack.c.h.bf16 %v14996_v30  ;;  %v13353_v30 = vpop.f32.mrb[173].mxu1 }
 0x549   : > { %v5308_v36 = vsel %vm4923_vm0, %v4731_v44, %v5116_v54  ;;  %v5818_v27 = vsel %vm5561_vm2, %v5815_v28, %v5817_v29  ;;  %v6586_v38 = vsel %vm6329_vm3, %v6583_v60, %v6585_v21  ;;  %v15001_v3 = vunpack.c.l.bf16 %v15000_v17  ;;  %v13357_v61 = vpop.f32.mrb[174].mxu1 }
 0x54a   : > { %v5823_v26 = vrot.slane %v5308_v36, 1  ;;  %v6591_v10 = vrot.slane %v5308_v36, 2  ;;  %v6264_v45 = vmax.f32 %v13277_v34, %v5818_v27  ;;  %v4729_v40 = vadd.f32 %v14999_v63, %v4345_v20  ;;  %v13361_v41 = vpop.f32.mrb[175].mxu1 }
 0x54b   : > { %v4734_v25 = vadd.f32 %v15001_v3, %v4350_v56  ;;  %v15003_v37 = vunpack.c.l.bf16 %v15002_v16  ;;  %v4351_v34 = vadd.f32 %v13010_v18, %v4152_v58  ;;  %v4349_v60 = vadd.f32 %v13010_v18, %v4150_v59 }
 0x54c   : > { %v5824_v5 = vsel %vm5561_vm2, %v5821_v9, %v5823_v26  ;;  %v6592_v28 = vsel %vm6329_vm3, %v14446_v57, %v6591_v10  ;;  %v7032_v33 = vmax.f32 %v6264_v45, %v6586_v38  ;;  %vm4921_vm1 = vcmp.ge.f32.partialorder %v4729_v40, 0.0 }
 0x54d   : > { %v4732_v53 = vadd.f32 %v15003_v37, %v4348_v46  ;;  %v6267_v24 = vmax.f32 %v13309_v8, %v5824_v5  ;;  %v5114_v44 = vmul.f32 %v10541_v7, %v4729_v40  ;;  %vm4926_vm4 = vcmp.ge.f32.partialorder %v4734_v25, 0.0 }
 0x54e   : > { %v5119_v13 = vmul.f32 %v10541_v7, %v4734_v25  ;;  %7224 = vst [vmem:[#allocation2 + $0x3f8] sm:$0xff] %v7032_v33  ;;  %v15004_v20 = vunpack.c.h.bf16 %v15000_v17  ;;  %v15005_v46 = vunpack.c.h.bf16 %v15002_v16  ;;  %v7371_v59 = vld [vmem:[#allocation2 + $0x3d8] ss:$3 sm:$0xff]  ;;  %v15006_v16 = vrot.slane %v13309_v8, 2 }
 0x54f   : > { %vm4924_vm5 = vcmp.ge.f32.partialorder %v4732_v53, 0.0  ;;  %v5117_v31 = vmul.f32 %v10541_v7, %v4732_v53  ;;  %v7035_v54 = vmax.f32 %v6267_v24, %v6592_v28  ;;  %v5306_v47 = vsel %vm4921_vm1, %v4729_v40, %v5114_v44  ;;  %7489 = vxpose.xlu0.b32.cont [10/16] (narrow) %v7371_v59, 64  ;;  %v15007_v59 = vld [vmem:[#allocation88_spill] sm:$0xff] }
 0x550   : > { %v4735_v56 = vadd.f32 %v15004_v20, %v4351_v34  ;;  %v4733_v58 = vadd.f32 %v15005_v46, %v4349_v60  ;;  %v5819_v27 = vrot.slane %v5306_v47, 1  ;;  %v6587_v38 = vrot.slane %v5306_v47, 2 }
 0x551   : > { %v5311_v45 = vsel %vm4926_vm4, %v4734_v25, %v5119_v13  ;;  %v5309_v63 = vsel %vm4924_vm5, %v4732_v53, %v5117_v31  ;;  %7227 = vst [vmem:[#allocation2 + $0x410] sm:$0xff] %v7035_v54  ;;  %v4155_v8 = vmul.f32 %v13013_v48, %v12813_v0 }
 0x552   : > { %v5829_v3 = vrot.slane %v5311_v45, 1  ;;  %v6597_v37 = vrot.slane %v5311_v45, 2  ;;  %v5825_v5 = vrot.slane %v5309_v63, 1  ;;  %v6593_v57 = vrot.slane %v5309_v63, 2 }
 0x553   : > { %v5820_v28 = vsel %vm5561_vm2, %v5817_v29, %v5819_v27  ;;  %v5822_v40 = vsel %vm5561_vm2, %v5819_v27, %v5821_v9  ;;  %v6588_v17 = vsel %vm6329_vm3, %v6585_v21, %v6587_v38  ;;  %v6590_v34 = vsel %vm6329_vm3, %v6587_v38, %v15006_v16 }
 0x554   : > { %v6265_v25 = vmax.f32 %v13320_v23, %v5820_v28  ;;  %v6266_v53 = vmax.f32 %v5306_v47, %v5822_v40  ;;  %v5826_v60 = vsel %vm5561_vm2, %v5823_v26, %v5825_v5  ;;  %v6594_v33 = vsel %vm6329_vm3, %v6591_v10, %v6593_v57  ;;  %v15009_v28 = vld [vmem:[#allocation46_spill] sm:$0xff] }
 0x555   : > { %v6268_v24 = vmax.f32 %v5308_v36, %v5826_v60  ;;  %vm4927_vm6 = vcmp.ge.f32.partialorder %v4735_v56, 0.0  ;;  %v5120_v29 = vmul.f32 %v10541_v7, %v4735_v56  ;;  %vm4925_vm7 = vcmp.ge.f32.partialorder %v4733_v58, 0.0 }
 0x556   : > { %v7033_v44 = vmax.f32 %v6265_v25, %v6588_v17  ;;  %v7034_v9 = vmax.f32 %v6266_v53, %v6590_v34  ;;  %v5118_v21 = vmul.f32 %v10541_v7, %v4733_v58  ;;  %v4153_v23 = vmul.f32 %v13013_v48, %v12823_v35 }
 0x557   : > { %v7036_v13 = vmax.f32 %v6268_v24, %v6594_v33  ;;  %v13382_v31 = vsel %vm4927_vm6, %v4735_v56, %v5120_v29  ;;  %v4156_v36 = vmul.f32 %v13013_v48, %v12831_v52  ;;  %v4354_v47 = vadd.f32 %v13010_v18, %v4155_v8  ;;  %v15010_v29 = vld [vmem:[#allocation87_spill] sm:$0xff] }
 0x558   : > { %7225 = vst [vmem:[#allocation2 + $0x400] sm:$0xff] %v7033_v44  ;;  %7226 = vst [vmem:[#allocation2 + $0x408] sm:$0xff] %v7034_v9  ;;  %v5831_v26 = vrot.slane %v13382_v31, 1  ;;  %v6599_v10 = vrot.slane %v13382_v31, 2  ;;  %v5310_v54 = vsel %vm4925_vm7, %v4733_v58, %v5118_v21  ;;  %v4352_v56 = vadd.f32 %v13010_v18, %v4153_v23  ;;  %v13412_v23 = vpop.f32.mrb[176].mxu1 }
 0x559   : > { %7228 = vst [vmem:[#allocation2 + $0x418] sm:$0xff] %v7036_v13  ;;  %v5827_v0 = vrot.slane %v5310_v54, 1  ;;  %v6595_v20 = vrot.slane %v5310_v54, 2  ;;  %v4355_v46 = vadd.f32 %v13010_v18, %v4156_v36  ;;  %v15008_v27 = vunpack.c.l.bf16 %v15007_v59 }
 0x55a   : > { %v5832_v35 = vsel %vm5561_vm2, %v5829_v3, %v5831_v26  ;;  %v6600_v52 = vsel %vm6329_vm3, %v6597_v37, %v6599_v10  ;;  %v4154_v40 = vmul.f32 %v13013_v48, %v15009_v28  ;;  %v15011_v44 = vunpack.c.l.bf16 %v15010_v29 }
 0x55b   : > { %v4738_v38 = vadd.f32 %v15008_v27, %v4354_v47  ;;  %v6271_v58 = vmax.f32 %v5311_v45, %v5832_v35  ;;  %v5828_v17 = vsel %vm5561_vm2, %v5825_v5, %v5827_v0  ;;  %v5830_v16 = vsel %vm5561_vm2, %v5827_v0, %v5829_v3 }
 0x55c   : > { %v6596_v34 = vsel %vm6329_vm3, %v6593_v57, %v6595_v20  ;;  %v6269_v25 = vmax.f32 %v5309_v63, %v5828_v17  ;;  %v6270_v53 = vmax.f32 %v5310_v54, %v5830_v16  ;;  %v6598_v60 = vsel %vm6329_vm3, %v6595_v20, %v6597_v37 }
 0x55d   : > { %vm4930_vm8 = vcmp.ge.f32.partialorder %v4738_v38, 0.0  ;;  %v7039_v33 = vmax.f32 %v6271_v58, %v6600_v52  ;;  %v5123_v24 = vmul.f32 %v10541_v7, %v4738_v38  ;;  %v4736_v9 = vadd.f32 %v15011_v44, %v4352_v56 }
 0x55e   : > { %v15012_v21 = vunpack.c.h.bf16 %v15007_v59  ;;  %v7037_v8 = vmax.f32 %v6269_v25, %v6596_v34  ;;  %v7038_v5 = vmax.f32 %v6270_v53, %v6598_v60  ;;  %v4353_v3 = vadd.f32 %v13010_v18, %v4154_v40  ;;  %v15014_v34 = vld [vmem:[#allocation92_spill] sm:$0xff] }
 0x55f   : > { %v4159_v57 = vmul.f32 %v13013_v48, %v12868_v39  ;;  %7231 = vst [vmem:[#allocation2 + $0x430] sm:$0xff] %v7039_v33  ;;  %v5315_v63 = vsel %vm4930_vm8, %v4738_v38, %v5123_v24  ;;  %vm4928_vm9 = vcmp.ge.f32.partialorder %v4736_v9, 0.0  ;;  %v5121_v37 = vmul.f32 %v10541_v7, %v4736_v9  ;;  %v7373_v13 = vld [vmem:[#allocation2 + $0x3f0] ss:$3 sm:$0xff]  ;;  %v13417_v39 = vpop.f32.mrb[177].mxu1 }
 0x560   : > { %v4739_v45 = vadd.f32 %v15012_v21, %v4355_v46  ;;  %7229 = vst [vmem:[#allocation2 + $0x420] sm:$0xff] %v7037_v8  ;;  %7230 = vst [vmem:[#allocation2 + $0x428] sm:$0xff] %v7038_v5  ;;  %v5837_v36 = vrot.slane %v5315_v63, 1  ;;  %v6605_v54 = vrot.slane %v5315_v63, 2  ;;  %v15013_v0 = vunpack.c.h.bf16 %v15010_v29  ;;  %7490 = vxpose.xlu0.b32.cont [11/16] (narrow) %v7373_v13, 64  ;;  %v13424_v27 = vpop.f32.mrb[178].mxu1 }
 0x561   : > { %v5313_v56 = vsel %vm4928_vm9, %v4736_v9, %v5121_v37  ;;  %v4358_v46 = vadd.f32 %v13010_v18, %v4159_v57  ;;  %v4157_v35 = vmul.f32 %v13013_v48, %v12872_v2  ;;  %v4160_v52 = vmul.f32 %v13013_v48, %v12878_v1  ;;  %v7375_v59 = vld [vmem:[#allocation2 + $0x408] ss:$3 sm:$0xff]  ;;  %v13429_v58 = vpop.f32.mrb[179].mxu1 }
 0x562   : > { %vm4931_vm10 = vcmp.ge.f32.partialorder %v4739_v45, 0.0  ;;  %v5124_v47 = vmul.f32 %v10541_v7, %v4739_v45  ;;  %v4737_v20 = vadd.f32 %v15013_v0, %v4353_v3  ;;  %v5833_v38 = vrot.slane %v5313_v56, 1 }
 0x563   : > { %v6601_v28 = vrot.slane %v5313_v56, 2  ;;  %v15015_v25 = vunpack.c.l.bf16 %v15014_v34  ;;  %v4356_v60 = vadd.f32 %v13010_v18, %v4157_v35  ;;  %v4359_v33 = vadd.f32 %v13010_v18, %v4160_v52 }
 0x564   : > { %v13427_v40 = vsel %vm4931_vm10, %v4739_v45, %v5124_v47  ;;  %vm4929_vm11 = vcmp.ge.f32.partialorder %v4737_v20, 0.0  ;;  %v5122_v2 = vmul.f32 %v10541_v7, %v4737_v20  ;;  %v5834_v48 = vsel %vm5561_vm2, %v5831_v26, %v5833_v38  ;;  %7491 = vxpose.xlu0.b32.cont [12/16] (narrow) %v7375_v59, 64 }
 0x565   : > { %v5839_v17 = vrot.slane %v13427_v40, 1  ;;  %v6607_v16 = vrot.slane %v13427_v40, 2  ;;  %v4742_v1 = vadd.f32 %v15015_v25, %v4358_v46  ;;  %v6602_v53 = vsel %vm6329_vm3, %v6599_v10, %v6601_v28  ;;  %v15016_v10 = vld [vmem:[#allocation90_spill] sm:$0xff] }
 0x566   : > { %v6272_v24 = vmax.f32 %v13382_v31, %v5834_v48  ;;  %v5314_v9 = vsel %vm4929_vm11, %v4737_v20, %v5122_v2  ;;  %v15017_v3 = vunpack.c.l.bf16 %v15016_v10  ;;  %v15018_v18 = vunpack.c.h.bf16 %v15014_v34 }
 0x567   : > { %v5840_v29 = vsel %vm5561_vm2, %v5837_v36, %v5839_v17  ;;  %v6608_v44 = vsel %vm6329_vm3, %v6605_v54, %v6607_v16  ;;  %v5835_v45 = vrot.slane %v5314_v9, 1  ;;  %v6603_v8 = vrot.slane %v5314_v9, 2  ;;  %v7377_v13 = vld [vmem:[#allocation2 + $0x420] ss:$3 sm:$0xff] }
 0x568   : > { %v6275_v21 = vmax.f32 %v5315_v63, %v5840_v29  ;;  %vm4934_vm12 = vcmp.ge.f32.partialorder %v4742_v1, 0.0  ;;  %v7040_v5 = vmax.f32 %v6272_v24, %v6602_v53  ;;  %v5127_v26 = vmul.f32 %v10541_v7, %v4742_v1  ;;  %7492 = vxpose.xlu0.b32.cont [13/16] (narrow) %v7377_v13, 64 }
 0x569   : > { %v4740_v57 = vadd.f32 %v15017_v3, %v4356_v60  ;;  %v4743_v37 = vadd.f32 %v15018_v18, %v4359_v33  ;;  %v5836_v47 = vsel %vm5561_vm2, %v5833_v38, %v5835_v45  ;;  %v5838_v0 = vsel %vm5561_vm2, %v5835_v45, %v5837_v36 }
 0x56a   : > { %v7043_v31 = vmax.f32 %v6275_v21, %v6608_v44  ;;  %v6604_v63 = vsel %vm6329_vm3, %v6601_v28, %v6603_v8  ;;  %7232 = vst [vmem:[#allocation2 + $0x438] sm:$0xff] %v7040_v5  ;;  %v6273_v20 = vmax.f32 %v5313_v56, %v5836_v47  ;;  %v6274_v46 = vmax.f32 %v5314_v9, %v5838_v0  ;;  %v13460_v56 = vld [vmem:[#allocation13] ss:$0 sm:$0xff]  ;;  %v13476_v44 = vld [vmem:[#allocation15] ss:$0 sm:$0xff]  ;;  %v13484_v5 = vpop.f32.mrb[180].mxu1 }
 0x56b   : > { %v6606_v35 = vsel %vm6329_vm3, %v6603_v8, %v6605_v54  ;;  %v13452_v52 = vsel %vm4934_vm12, %v4742_v1, %v5127_v26  ;;  %vm4932_vm13 = vcmp.ge.f32.partialorder %v4740_v57, 0.0  ;;  %v5125_v38 = vmul.f32 %v10541_v7, %v4740_v57  ;;  %v15022_v47 = vld [vmem:[#allocation89_spill] sm:$0xff] }
 0x56c   : > { %7235 = vst [vmem:[#allocation2 + $0x450] sm:$0xff] %v7043_v31  ;;  %v5845_v59 = vrot.slane %v13452_v52, 1  ;;  %v6613_v2 = vrot.slane %v13452_v52, 2  ;;  %v7041_v34 = vmax.f32 %v6273_v20, %v6604_v63  ;;  %v7042_v36 = vmax.f32 %v6274_v46, %v6606_v35 }
 0x56d   : > { %vm4935_vm14 = vcmp.ge.f32.partialorder %v4743_v37, 0.0  ;;  %v5128_v28 = vmul.f32 %v10541_v7, %v4743_v37  ;;  %v13458_v25 = vsel %vm4932_vm13, %v4740_v57, %v5125_v38  ;;  %v4158_v54 = vmul.f32 %v13460_v56, %v12881_v6 }
 0x56e   : > { %v4163_v1 = vmul.f32 %v13460_v56, %v12923_v42  ;;  %v4161_v48 = vmul.f32 %v13460_v56, %v12929_v43  ;;  %7233 = vst [vmem:[#allocation2 + $0x440] sm:$0xff] %v7041_v34  ;;  %7234 = vst [vmem:[#allocation2 + $0x448] sm:$0xff] %v7042_v36  ;;  %v5841_v53 = vrot.slane %v13458_v25, 1  ;;  %v6609_v60 = vrot.slane %v13458_v25, 2 }
 0x56f   : > { %v13470_v33 = vsel %vm4935_vm14, %v4743_v37, %v5128_v28  ;;  %v4164_v24 = vmul.f32 %v13460_v56, %v12932_v15  ;;  %v4357_v42 = vadd.f32 %v13476_v44, %v4158_v54  ;;  %v15020_v37 = vld [vmem:[#allocation91_spill] sm:$0xff]  ;;  %v4162_v38 = vmul.f32 %v13460_v56, %v12937_v14 }
 0x570   : > { %v5847_v29 = vrot.slane %v13470_v33, 1  ;;  %v6615_v6 = vrot.slane %v13470_v33, 2  ;;  %v4362_v43 = vadd.f32 %v13476_v44, %v4163_v1  ;;  %v5842_v9 = vsel %vm5561_vm2, %v5839_v17, %v5841_v53 }
 0x571   : > { %v6610_v21 = vsel %vm6329_vm3, %v6607_v16, %v6609_v60  ;;  %v4360_v45 = vadd.f32 %v13476_v44, %v4161_v48  ;;  %v4363_v8 = vadd.f32 %v13476_v44, %v4164_v24  ;;  %v6276_v15 = vmax.f32 %v13427_v40, %v5842_v9  ;;  %v13495_v16 = vpop.f32.mrb[181].mxu1 }
 0x572   : > { %v5848_v26 = vsel %vm5561_vm2, %v5845_v59, %v5847_v29  ;;  %v6616_v3 = vsel %vm6329_vm3, %v6613_v2, %v6615_v6  ;;  %v15019_v17 = vunpack.c.h.bf16 %v15016_v10  ;;  %v15021_v13 = vunpack.c.l.bf16 %v15020_v37  ;;  %v13504_v46 = vpop.f32.mrb[182].mxu1 }
 0x573   : > { %v6279_v18 = vmax.f32 %v13452_v52, %v5848_v26  ;;  %v15023_v40 = vunpack.c.l.bf16 %v15022_v47  ;;  %v15024_v63 = vunpack.c.h.bf16 %v15020_v37  ;;  %v7044_v35 = vmax.f32 %v6276_v15, %v6610_v21  ;;  %v13509_v34 = vpop.f32.mrb[183].mxu1 }
 0x574   : > { %v4741_v57 = vadd.f32 %v15019_v17, %v4357_v42  ;;  %v4746_v31 = vadd.f32 %v15021_v13, %v4362_v43  ;;  %v4361_v14 = vadd.f32 %v13476_v44, %v4162_v38  ;;  %v15026_v38 = vld [vmem:[#allocation117_spill] sm:$0xff] }
 0x575   : > { %v4744_v0 = vadd.f32 %v15023_v40, %v4360_v45  ;;  %v4747_v20 = vadd.f32 %v15024_v63, %v4363_v8  ;;  %v7047_v36 = vmax.f32 %v6279_v18, %v6616_v3  ;;  %7236 = vst [vmem:[#allocation2 + $0x458] sm:$0xff] %v7044_v35  ;;  %v7379_v24 = vld [vmem:[#allocation2 + $0x438] ss:$3 sm:$0xff] }
 0x576   : > { %vm4933_vm15 = vcmp.ge.f32.partialorder %v4741_v57, 0.0  ;;  %v5126_v10 = vmul.f32 %v10541_v7, %v4741_v57  ;;  %vm4938_vm0 = vcmp.ge.f32.partialorder %v4746_v31, 0.0  ;;  %v5131_v28 = vmul.f32 %v10541_v7, %v4746_v31  ;;  %7493 = vxpose.xlu0.b32.cont [14/16] (narrow) %v7379_v24, 64 }
 0x577   : > { %vm4936_vm1 = vcmp.ge.f32.partialorder %v4744_v0, 0.0  ;;  %v5129_v1 = vmul.f32 %v10541_v7, %v4744_v0  ;;  %vm4939_vm4 = vcmp.ge.f32.partialorder %v4747_v20, 0.0  ;;  %v5132_v48 = vmul.f32 %v10541_v7, %v4747_v20  ;;  %7239 = vst [vmem:[#allocation2 + $0x470] sm:$0xff] %v7047_v36  ;;  %v15027_v36 = vld [vmem:[#allocation45_spill] sm:$0xff] }
 0x578   : > { %v5318_v54 = vsel %vm4933_vm15, %v4741_v57, %v5126_v10  ;;  %v5323_v9 = vsel %vm4938_vm0, %v4746_v31, %v5131_v28  ;;  %v4168_v28 = vmul.f32 %v13460_v56, %v15027_v36 }
 0x579   : > { %v5843_v42 = vrot.slane %v5318_v54, 1  ;;  %v6611_v43 = vrot.slane %v5318_v54, 2  ;;  %v5853_v21 = vrot.slane %v5323_v9, 1  ;;  %v6621_v45 = vrot.slane %v5323_v9, 2 }
 0x57a   : > { %v5321_v8 = vsel %vm4936_vm1, %v4744_v0, %v5129_v1  ;;  %v13515_v15 = vsel %vm4939_vm4, %v4747_v20, %v5132_v48  ;;  %v15029_v48 = vld [vmem:[#allocation31_spill] sm:$0xff] }
 0x57b   : > { %v5844_v26 = vsel %vm5561_vm2, %v5841_v53, %v5843_v42  ;;  %v5846_v3 = vsel %vm5561_vm2, %v5843_v42, %v5845_v59  ;;  %v6612_v17 = vsel %vm6329_vm3, %v6609_v60, %v6611_v43  ;;  %v6614_v57 = vsel %vm6329_vm3, %v6611_v43, %v6613_v2 }
 0x57c   : > { %v6277_v18 = vmax.f32 %v13458_v25, %v5844_v26  ;;  %v6278_v37 = vmax.f32 %v5318_v54, %v5846_v3  ;;  %v5849_v13 = vrot.slane %v5321_v8, 1  ;;  %v6617_v31 = vrot.slane %v5321_v8, 2  ;;  %v15028_v54 = vld [vmem:[#allocation116_spill] sm:$0xff] }
 0x57d   : > { %v5855_v40 = vrot.slane %v13515_v15, 1  ;;  %v6623_v0 = vrot.slane %v13515_v15, 2  ;;  %v15025_v53 = vunpack.c.h.bf16 %v15022_v47  ;;  %v4167_v59 = vmul.f32 %v13460_v56, %v12976_v62 }
 0x57e   : > { %v7045_v60 = vmax.f32 %v6277_v18, %v6612_v17  ;;  %v7046_v20 = vmax.f32 %v6278_v37, %v6614_v57  ;;  %v5850_v52 = vsel %vm5561_vm2, %v5847_v29, %v5849_v13  ;;  %v6618_v2 = vsel %vm6329_vm3, %v6615_v6, %v6617_v31 }
 0x57f   : > { %v4745_v63 = vadd.f32 %v15025_v53, %v4361_v14  ;;  %v6280_v25 = vmax.f32 %v13470_v33, %v5850_v52  ;;  %v5856_v35 = vsel %vm5561_vm2, %v5853_v21, %v5855_v40  ;;  %v6624_v47 = vsel %vm6329_vm3, %v6621_v45, %v6623_v0 }
 0x580   : > { %7237 = vst [vmem:[#allocation2 + $0x460] sm:$0xff] %v7045_v60  ;;  %7238 = vst [vmem:[#allocation2 + $0x468] sm:$0xff] %v7046_v20  ;;  %v6283_v62 = vmax.f32 %v5323_v9, %v5856_v35  ;;  %v4366_v29 = vadd.f32 %v13476_v44, %v4167_v59  ;;  %v4165_v6 = vmul.f32 %v13460_v56, %v15026_v38  ;;  %v15030_v9 = vld [vmem:[#allocation94_spill] sm:$0xff]  ;;  %v15032_v59 = vld [vmem:[#allocation93_spill] sm:$0xff] }
 0x581   : > { %vm4937_vm5 = vcmp.ge.f32.partialorder %v4745_v63, 0.0  ;;  %v5130_v10 = vmul.f32 %v10541_v7, %v4745_v63  ;;  %v7048_v33 = vmax.f32 %v6280_v25, %v6618_v2  ;;  %v4166_v1 = vmul.f32 %v13460_v56, %v15028_v54 }
 0x582   : > { %v4171_v24 = vmul.f32 %v13460_v56, %v15029_v48  ;;  %v7051_v42 = vmax.f32 %v6283_v62, %v6624_v47  ;;  %v15031_v14 = vunpack.c.l.bf16 %v15030_v9  ;;  %v4364_v3 = vadd.f32 %v13476_v44, %v4165_v6 }
 0x583   : > { %v5322_v43 = vsel %vm4937_vm5, %v4745_v63, %v5130_v10  ;;  %7240 = vst [vmem:[#allocation2 + $0x478] sm:$0xff] %v7048_v33  ;;  %v4367_v18 = vadd.f32 %v13476_v44, %v4168_v28  ;;  %v4365_v37 = vadd.f32 %v13476_v44, %v4166_v1  ;;  %v15033_v60 = vunpack.c.l.bf16 %v15032_v59  ;;  %v15036_v1 = vld [vmem:[#allocation96_spill] sm:$0xff] }
 0x584   : > { %v4750_v26 = vadd.f32 %v15031_v14, %v4366_v29  ;;  %v5851_v17 = vrot.slane %v5322_v43, 1  ;;  %v6619_v57 = vrot.slane %v5322_v43, 2  ;;  %7243 = vst [vmem:[#allocation2 + $0x490] sm:$0xff] %v7051_v42  ;;  %v4370_v63 = vadd.f32 %v13476_v44, %v4171_v24  ;;  %v13564_v29 = vpop.f32.mrb[184].mxu1 }
 0x585   : > { %v4748_v20 = vadd.f32 %v15033_v60, %v4364_v3  ;;  %v15034_v36 = vunpack.c.h.bf16 %v15030_v9  ;;  %v13569_v54 = vpop.f32.mrb[185].mxu1  ;;  %v15037_v48 = vunpack.c.l.bf16 %v15036_v1  ;;  %v15038_v9 = vld [vmem:[#allocation32_spill] sm:$0xff] }
 0x586   : > { %vm4942_vm6 = vcmp.ge.f32.partialorder %v4750_v26, 0.0  ;;  %v5135_v53 = vmul.f32 %v10541_v7, %v4750_v26  ;;  %v5852_v52 = vsel %vm5561_vm2, %v5849_v13, %v5851_v17  ;;  %v5854_v2 = vsel %vm5561_vm2, %v5851_v17, %v5853_v21  ;;  %v13575_v42 = vpop.f32.mrb[186].mxu1 }
 0x587   : > { %v6620_v25 = vsel %vm6329_vm3, %v6617_v31, %v6619_v57  ;;  %v6622_v35 = vsel %vm6329_vm3, %v6619_v57, %v6621_v45  ;;  %v6281_v47 = vmax.f32 %v5321_v8, %v5852_v52  ;;  %v6282_v62 = vmax.f32 %v5322_v43, %v5854_v2  ;;  %v7381_v13 = vld [vmem:[#allocation2 + $0x450] ss:$3 sm:$0xff]  ;;  %v13580_v3 = vpop.f32.mrb[187].mxu1 }
 0x588   : > { %v5327_v10 = vsel %vm4942_vm6, %v4750_v26, %v5135_v53  ;;  %vm4940_vm7 = vcmp.ge.f32.partialorder %v4748_v20, 0.0  ;;  %v5133_v33 = vmul.f32 %v10541_v7, %v4748_v20  ;;  %v4751_v28 = vadd.f32 %v15034_v36, %v4367_v18  ;;  %7494 = vxpose.xlu0.b32.cont [15/16] (narrow) %v7381_v13, 64 }
 0x589   : > { %v5861_v38 = vrot.slane %v5327_v10, 1  ;;  %v6629_v6 = vrot.slane %v5327_v10, 2  ;;  %v7049_v21 = vmax.f32 %v6281_v47, %v6620_v25  ;;  %v7050_v31 = vmax.f32 %v6282_v62, %v6622_v35  ;;  %v15039_v62 = vld [vmem:[#allocation95_spill] sm:$0xff] }
 0x58a   : > { %v15035_v45 = vunpack.c.h.bf16 %v15032_v59  ;;  %v4754_v24 = vadd.f32 %v15037_v48, %v4370_v63  ;;  %v5325_v43 = vsel %vm4940_vm7, %v4748_v20, %v5133_v33  ;;  %vm4943_vm8 = vcmp.ge.f32.partialorder %v4751_v28, 0.0 }
 0x58b   : > { %v5136_v14 = vmul.f32 %v10541_v7, %v4751_v28  ;;  %v4169_v26 = vmul.f32 %v13460_v56, %v15038_v9  ;;  %7241 = vst [vmem:[#allocation2 + $0x480] sm:$0xff] %v7049_v21  ;;  %7242 = vst [vmem:[#allocation2 + $0x488] sm:$0xff] %v7050_v31  ;;  %v5857_v17 = vrot.slane %v5325_v43, 1  ;;  %v6625_v57 = vrot.slane %v5325_v43, 2 }
 0x58c   : > { %v4749_v8 = vadd.f32 %v15035_v45, %v4365_v37  ;;  %v7383_v37 = vld [vmem:[#allocation2 + $0x468] ss:$3 sm:$0xff]  ;;  %vm4946_vm10 = vcmp.ge.f32.partialorder %v4754_v24, 0.0  ;;  %v5139_v59 = vmul.f32 %v10541_v7, %v4754_v24  ;;  %v15040_v33 = vunpack.c.l.bf16 %v15039_v62 }
 0x58d   : > { %v13583_v53 = vsel %vm4943_vm8, %v4751_v28, %v5136_v14  ;;  %v4368_v60 = vadd.f32 %v13476_v44, %v4169_v26  ;;  %v5858_v20 = vsel %vm5561_vm2, %v5855_v40, %v5857_v17  ;;  %v6626_v63 = vsel %vm6329_vm3, %v6623_v0, %v6625_v57  ;;  %7495 = vxpose.xlu0.b32.end [16/16] (narrow) %v7383_v37, 64 }
 0x58e   : > { %vm4941_vm9 = vcmp.ge.f32.partialorder %v4749_v8, 0.0  ;;  %v5134_v18 = vmul.f32 %v10541_v7, %v4749_v8  ;;  %v5863_v52 = vrot.slane %v13583_v53, 1  ;;  %v6631_v2 = vrot.slane %v13583_v53, 2 }
 0x58f   : > { %v6284_v25 = vmax.f32 %v13515_v15, %v5858_v20  ;;  %v13596_v47 = vsel %vm4946_vm10, %v4754_v24, %v5139_v59  ;;  %v4752_v36 = vadd.f32 %v15040_v33, %v4368_v60  ;;  %v15041_v59 = vld [vmem:[#allocation48_spill] sm:$0xff] }
 0x590   : > { %v5326_v35 = vsel %vm4941_vm9, %v4749_v8, %v5134_v18  ;;  %v5864_v28 = vsel %vm5561_vm2, %v5861_v38, %v5863_v52  ;;  %v6632_v40 = vsel %vm6329_vm3, %v6629_v6, %v6631_v2  ;;  %v5869_v45 = vrot.slane %v13596_v47, 1  ;;  %v15042_v20 = vld [vmem:[#allocation140_spill] sm:$0xff] }
 0x591   : > { %v5859_v13 = vrot.slane %v5326_v35, 1  ;;  %v6627_v21 = vrot.slane %v5326_v35, 2  ;;  %v7052_v0 = vmax.f32 %v6284_v25, %v6626_v63  ;;  %v6287_v31 = vmax.f32 %v5327_v10, %v5864_v28  ;;  %v13619_v25 = vpop.f32.mrb[188].mxu1 }
 0x592   : > { %v6637_v48 = vrot.slane %v13596_v47, 2  ;;  %vm4944_vm11 = vcmp.ge.f32.partialorder %v4752_v36, 0.0  ;;  %v7385_v37 = vld [vmem:[#allocation2 + $0x480] ss:$3 sm:$0xff]  ;;  %v5137_v10 = vmul.f32 %v10541_v7, %v4752_v36  ;;  %v4172_v60 = vmul.f32 %v13460_v56, %v15041_v59 }
 0x593   : > { %v5860_v15 = vsel %vm5561_vm2, %v5857_v17, %v5859_v13  ;;  %v5862_v8 = vsel %vm5561_vm2, %v5859_v13, %v5861_v38  ;;  %v6628_v24 = vsel %vm6329_vm3, %v6625_v57, %v6627_v21  ;;  %v6630_v14 = vsel %vm6329_vm3, %v6627_v21, %v6629_v6  ;;  %7244 = vst [vmem:[#allocation2 + $0x498] sm:$0xff] %v7052_v0  ;;  %v15047_v59 = vld [vmem:[#allocation98_spill] sm:$0xff] }
 0x594   : > { %v7055_v9 = vmax.f32 %v6287_v31, %v6632_v40  ;;  %v6285_v26 = vmax.f32 %v5325_v43, %v5860_v15  ;;  %v6286_v18 = vmax.f32 %v5326_v35, %v5862_v8  ;;  %v4170_v17 = vmul.f32 %v13460_v56, %v15042_v20  ;;  %7512 = vxpose.xlu1.b32.start [1/16] (narrow) %v7385_v37, 64  ;;  %v13626_v40 = vpop.f32.mrb[189].mxu1 }
 0x595   : > { %v4175_v38 = vmul.f32 %v13460_v56, %v13095_v12  ;;  %v4173_v43 = vmul.f32 %v13460_v56, %v13099_v19  ;;  %v4176_v63 = vmul.f32 %v13460_v56, %v13107_v11  ;;  %v13621_v35 = vsel %vm4944_vm11, %v4752_v36, %v5137_v10  ;;  %v13632_v36 = vpop.f32.mrb[190].mxu1 }
 0x596   : > { %7247 = vst [vmem:[#allocation2 + $0x4b0] sm:$0xff] %v7055_v9  ;;  %v7053_v6 = vmax.f32 %v6285_v26, %v6628_v24  ;;  %v7054_v57 = vmax.f32 %v6286_v18, %v6630_v14  ;;  %v4371_v33 = vadd.f32 %v13476_v44, %v4172_v60  ;;  %v4369_v28 = vadd.f32 %v13476_v44, %v4170_v17  ;;  %v15045_v24 = vld [vmem:[#allocation100_spill] sm:$0xff]  ;;  %v13642_v18 = vpop.f32.mrb[191].mxu1 }
 0x597   : > { %v4374_v12 = vadd.f32 %v13476_v44, %v4175_v38  ;;  %v5865_v13 = vrot.slane %v13621_v35, 1  ;;  %v6633_v19 = vrot.slane %v13621_v35, 2  ;;  %v4372_v11 = vadd.f32 %v13476_v44, %v4173_v43  ;;  %v7432_v43 = vpop.trf.xlu0 }
 0x598   : > { %7245 = vst [vmem:[#allocation2 + $0x4a0] sm:$0xff] %v7053_v6  ;;  %7246 = vst [vmem:[#allocation2 + $0x4a8] sm:$0xff] %v7054_v57  ;;  %v4375_v21 = vadd.f32 %v13476_v44, %v4176_v63  ;;  %v15043_v0 = vunpack.c.h.bf16 %v15036_v1  ;;  %v15044_v15 = vunpack.c.h.bf16 %v15039_v62  ;;  %v15046_v14 = vunpack.c.l.bf16 %v15045_v24  ;;  %v7464_v63 = vpop.trf.xlu1 }
 0x599   : > { %v4174_v26 = vmul.f32 %v13460_v56, %v13111_v22  ;;  %v5866_v37 = vsel %vm5561_vm2, %v5863_v52, %v5865_v13  ;;  %v6634_v10 = vsel %vm6329_vm3, %v6631_v2, %v6633_v19  ;;  %v15048_v60 = vunpack.c.l.bf16 %v15047_v59  ;;  %7544 = vst [vmem:[%s13660_s16] sm:$0xff] %v7432_v43  ;;  %7545 = vst [vmem:[%s13660_s16 + $0x8] sm:$0xff] %v7464_v63 }
 0x59a   : > { %v4755_v31 = vadd.f32 %v15043_v0, %v4371_v33  ;;  %v4753_v8 = vadd.f32 %v15044_v15, %v4369_v28  ;;  %v4758_v9 = vadd.f32 %v15046_v14, %v4374_v12  ;;  %v15049_v20 = vunpack.c.h.bf16 %v15045_v24 }
 0x59b   : > { %v4756_v1 = vadd.f32 %v15048_v60, %v4372_v11  ;;  %v6288_v17 = vmax.f32 %v13583_v53, %v5866_v37 }
 0x59c   : > { %v4759_v62 = vadd.f32 %v15049_v20, %v4375_v21  ;;  %vm4947_vm12 = vcmp.ge.f32.partialorder %v4755_v31, 0.0  ;;  %v5140_v38 = vmul.f32 %v10541_v7, %v4755_v31  ;;  %vm4945_vm13 = vcmp.ge.f32.partialorder %v4753_v8, 0.0 }
 0x59d   : > { %v5138_v22 = vmul.f32 %v10541_v7, %v4753_v8  ;;  %vm4950_vm14 = vcmp.ge.f32.partialorder %v4758_v9, 0.0  ;;  %v5143_v52 = vmul.f32 %v10541_v7, %v4758_v9  ;;  %vm4948_vm15 = vcmp.ge.f32.partialorder %v4756_v1, 0.0 }
 0x59e   : > { %v7056_v2 = vmax.f32 %v6288_v17, %v6634_v10  ;;  %v5332_v6 = vsel %vm4947_vm12, %v4755_v31, %v5140_v38  ;;  %v5141_v57 = vmul.f32 %v10541_v7, %v4756_v1  ;;  %vm4951_vm0 = vcmp.ge.f32.partialorder %v4759_v62, 0.0  ;;  %v7433_v17 = vpop.trf.xlu0  ;;  %v7465_v38 = vpop.trf.xlu1 }
 0x59f   : > { %v5871_v33 = vrot.slane %v5332_v6, 1  ;;  %v6639_v53 = vrot.slane %v5332_v6, 2  ;;  %v5330_v28 = vsel %vm4945_vm13, %v4753_v8, %v5138_v22  ;;  %v13656_v12 = vsel %vm4950_vm14, %v4758_v9, %v5143_v52  ;;  %v7387_v24 = vld [vmem:[#allocation2 + $0x498] ss:$3 sm:$0xff]  ;;  %7546 = vst [vmem:[%s13660_s16 + $0x10] sm:$0xff] %v7433_v17  ;;  %7547 = vst [vmem:[%s13660_s16 + $0x18] sm:$0xff] %v7465_v38 }
 0x5a0   : > { %7248 = vst [vmem:[#allocation2 + $0x4b8] sm:$0xff] %v7056_v2  ;;  %v5867_v11 = vrot.slane %v5330_v28, 1  ;;  %v6635_v21 = vrot.slane %v5330_v28, 2  ;;  %v5877_v0 = vrot.slane %v13656_v12, 1  ;;  %v6645_v15 = vrot.slane %v13656_v12, 2  ;;  %7513 = vxpose.xlu1.b32.cont [2/16] (narrow) %v7387_v24, 64 }
 0x5a1   : > { %v5872_v31 = vsel %vm5561_vm2, %v5869_v45, %v5871_v33  ;;  %v6640_v8 = vsel %vm6329_vm3, %v6637_v48, %v6639_v53  ;;  %v13671_v14 = vsel %vm4948_vm15, %v4756_v1, %v5141_v57  ;;  %v5144_v9 = vmul.f32 %v10541_v7, %v4759_v62  ;;  %v15052_v17 = vld [vmem:[#allocation36_spill] sm:$0xff] }
 0x5a2   : > { %v6291_v37 = vmax.f32 %v13596_v47, %v5872_v31  ;;  %v5868_v10 = vsel %vm5561_vm2, %v5865_v13, %v5867_v11  ;;  %v5870_v60 = vsel %vm5561_vm2, %v5867_v11, %v5869_v45  ;;  %v6636_v20 = vsel %vm6329_vm3, %v6633_v19, %v6635_v21  ;;  %v7434_v24 = vpop.trf.xlu0  ;;  %v7466_v31 = vpop.trf.xlu1 }
 0x5a3   : > { %v6289_v22 = vmax.f32 %v13621_v35, %v5868_v10  ;;  %v6290_v52 = vmax.f32 %v5330_v28, %v5870_v60  ;;  %v6638_v1 = vsel %vm6329_vm3, %v6635_v21, %v6637_v48  ;;  %v5873_v2 = vrot.slane %v13671_v14, 1  ;;  %7548 = vst [vmem:[%s13660_s16 + $0x20] sm:$0xff] %v7434_v24  ;;  %7549 = vst [vmem:[%s13660_s16 + $0x28] sm:$0xff] %v7466_v31 }
 0x5a4   : > { %v7059_v13 = vmax.f32 %v6291_v37, %v6640_v8  ;;  %v6641_v57 = vrot.slane %v13671_v14, 2  ;;  %v13689_v45 = vsel %vm4951_vm0, %v4759_v62, %v5144_v9  ;;  %v4373_v19 = vadd.f32 %v13476_v44, %v4174_v26 }
 0x5a5   : > { %v7057_v43 = vmax.f32 %v6289_v22, %v6636_v20  ;;  %v7058_v63 = vmax.f32 %v6290_v52, %v6638_v1  ;;  %v5874_v35 = vsel %vm5561_vm2, %v5871_v33, %v5873_v2  ;;  %v5879_v47 = vrot.slane %v13689_v45, 1  ;;  %v15053_v22 = vld [vmem:[#allocation52_spill] sm:$0xff]  ;;  %v15054_v1 = vld [vmem:[#allocation34_spill] sm:$0xff] }
 0x5a6   : > { %7251 = vst [vmem:[#allocation2 + $0x4d0] sm:$0xff] %v7059_v13  ;;  %v6292_v48 = vmax.f32 %v5332_v6, %v5874_v35  ;;  %v6642_v28 = vsel %vm6329_vm3, %v6639_v53, %v6641_v57  ;;  %v6647_v11 = vrot.slane %v13689_v45, 2  ;;  %v15050_v21 = vunpack.c.h.bf16 %v15047_v59  ;;  %v15051_v53 = vld [vmem:[#allocation47_spill] sm:$0xff] }
 0x5a7   : > { %7249 = vst [vmem:[#allocation2 + $0x4c0] sm:$0xff] %v7057_v43  ;;  %7250 = vst [vmem:[#allocation2 + $0x4c8] sm:$0xff] %v7058_v63  ;;  %v5880_v26 = vsel %vm5561_vm2, %v5877_v0, %v5879_v47  ;;  %v4179_v6 = vmul.f32 %v13460_v56, %v13158_v4  ;;  %v4177_v33 = vmul.f32 %v13460_v56, %v13162_v51  ;;  %v7467_v43 = vpop.trf.xlu1  ;;  %v15055_v35 = vld [vmem:[#allocation99_spill] sm:$0xff] }
 0x5a8   : > { %v4757_v62 = vadd.f32 %v15050_v21, %v4373_v19  ;;  %v4180_v59 = vmul.f32 %v13460_v56, %v15051_v53  ;;  %v7060_v8 = vmax.f32 %v6292_v48, %v6642_v28  ;;  %v6295_v9 = vmax.f32 %v13656_v12, %v5880_v26  ;;  %v7435_v19 = vpop.trf.xlu0  ;;  %v15057_v21 = vld [vmem:[#allocation97_spill] sm:$0xff]  ;;  %7551 = vst [vmem:[%s13660_s16 + $0x38] sm:$0xff] %v7467_v43 }
 0x5a9   : > { %v6648_v37 = vsel %vm6329_vm3, %v6645_v15, %v6647_v11  ;;  %v4378_v51 = vadd.f32 %v13476_v44, %v4179_v6  ;;  %v4376_v10 = vadd.f32 %v13476_v44, %v4177_v33  ;;  %v4178_v38 = vmul.f32 %v13460_v56, %v15052_v17  ;;  %7550 = vst [vmem:[%s13660_s16 + $0x30] sm:$0xff] %v7435_v19 }
 0x5aa   : > { %vm4949_vm1 = vcmp.ge.f32.partialorder %v4757_v62, 0.0  ;;  %v5142_v4 = vmul.f32 %v10541_v7, %v4757_v62  ;;  %v4379_v60 = vadd.f32 %v13476_v44, %v4180_v59  ;;  %7252 = vst [vmem:[#allocation2 + $0x4d8] sm:$0xff] %v7060_v8  ;;  %v7063_v20 = vmax.f32 %v6295_v9, %v6648_v37 }
 0x5ab   : > { %v4183_v52 = vmul.f32 %v13460_v56, %v15053_v22  ;;  %v4181_v13 = vmul.f32 %v13460_v56, %v15054_v1  ;;  %v15056_v48 = vunpack.c.l.bf16 %v15055_v35  ;;  %v15058_v24 = vunpack.c.l.bf16 %v15057_v21  ;;  %v7468_v17 = vpop.trf.xlu1 }
 0x5ac   : > { %v5334_v63 = vsel %vm4949_vm1, %v4757_v62, %v5142_v4  ;;  %v15059_v26 = vunpack.c.h.bf16 %v15055_v35  ;;  %7255 = vst [vmem:[#allocation2 + $0x4f0] sm:$0xff] %v7063_v20  ;;  %v4377_v59 = vadd.f32 %v13476_v44, %v4178_v38  ;;  %v7436_v20 = vpop.trf.xlu0  ;;  %7553 = vst [vmem:[%s13660_s16 + $0x48] sm:$0xff] %v7468_v17 }
 0x5ad   : > { %v4762_v28 = vadd.f32 %v15056_v48, %v4378_v51  ;;  %v4760_v31 = vadd.f32 %v15058_v24, %v4376_v10  ;;  %v5875_v33 = vrot.slane %v5334_v63, 1  ;;  %v6643_v53 = vrot.slane %v5334_v63, 2  ;;  %7552 = vst [vmem:[%s13660_s16 + $0x40] sm:$0xff] %v7436_v20  ;;  %v15061_v24 = vld [vmem:[#allocation102_spill] sm:$0xff] }
 0x5ae   : > { %v4763_v6 = vadd.f32 %v15059_v26, %v4379_v60  ;;  %v4382_v8 = vadd.f32 %v13476_v44, %v4183_v52  ;;  %v7389_v60 = vld [vmem:[#allocation2 + $0x4b0] ss:$3 sm:$0xff]  ;;  %v15060_v48 = vunpack.c.h.bf16 %v15057_v21 }
 0x5af   : > { %vm4954_vm4 = vcmp.ge.f32.partialorder %v4762_v28, 0.0  ;;  %v5147_v62 = vmul.f32 %v10541_v7, %v4762_v28  ;;  %vm4952_vm5 = vcmp.ge.f32.partialorder %v4760_v31, 0.0  ;;  %v5145_v9 = vmul.f32 %v10541_v7, %v4760_v31  ;;  %7514 = vxpose.xlu1.b32.cont [3/16] (narrow) %v7389_v60, 64 }
 0x5b0   : > { %v5876_v37 = vsel %vm5561_vm2, %v5873_v2, %v5875_v33  ;;  %v5878_v4 = vsel %vm5561_vm2, %v5875_v33, %v5877_v0  ;;  %v6644_v51 = vsel %vm6329_vm3, %v6641_v57, %v6643_v53  ;;  %v6646_v10 = vsel %vm6329_vm3, %v6643_v53, %v6645_v15  ;;  %v7437_v33 = vpop.trf.xlu0  ;;  %v7469_v53 = vpop.trf.xlu1 }
 0x5b1   : > { %v6293_v38 = vmax.f32 %v13671_v14, %v5876_v37  ;;  %v6294_v22 = vmax.f32 %v5334_v63, %v5878_v4  ;;  %v5339_v52 = vsel %vm4954_vm4, %v4762_v28, %v5147_v62  ;;  %v13748_v1 = vsel %vm4952_vm5, %v4760_v31, %v5145_v9  ;;  %v7391_v14 = vld [vmem:[#allocation2 + $0x4c8] ss:$3 sm:$0xff]  ;;  %v15063_v37 = vld [vmem:[#allocation50_spill] sm:$0xff]  ;;  %7554 = vst [vmem:[%s13660_s16 + $0x50] sm:$0xff] %v7437_v33 }
 0x5b2   : > { %v5885_v2 = vrot.slane %v5339_v52, 1  ;;  %v6653_v0 = vrot.slane %v5339_v52, 2  ;;  %v5881_v57 = vrot.slane %v13748_v1, 1  ;;  %v6649_v12 = vrot.slane %v13748_v1, 2  ;;  %7555 = vst [vmem:[%s13660_s16 + $0x58] sm:$0xff] %v7469_v53 }
 0x5b3   : > { %v7061_v19 = vmax.f32 %v6293_v38, %v6644_v51  ;;  %v7062_v15 = vmax.f32 %v6294_v22, %v6646_v10  ;;  %vm4955_vm6 = vcmp.ge.f32.partialorder %v4763_v6, 0.0  ;;  %v5148_v43 = vmul.f32 %v10541_v7, %v4763_v6  ;;  %7515 = vxpose.xlu1.b32.cont [4/16] (narrow) %v7391_v14, 64 }
 0x5b4   : > { %v5882_v63 = vsel %vm5561_vm2, %v5879_v47, %v5881_v57  ;;  %v6650_v35 = vsel %vm6329_vm3, %v6647_v11, %v6649_v12  ;;  %v4761_v28 = vadd.f32 %v15060_v48, %v4377_v59  ;;  %v15062_v31 = vunpack.c.l.bf16 %v15061_v24  ;;  %v7438_v38 = vpop.trf.xlu0  ;;  %v7470_v22 = vpop.trf.xlu1 }
 0x5b5   : > { %7253 = vst [vmem:[#allocation2 + $0x4e0] sm:$0xff] %v7061_v19  ;;  %7254 = vst [vmem:[#allocation2 + $0x4e8] sm:$0xff] %v7062_v15  ;;  %v6296_v62 = vmax.f32 %v13689_v45, %v5882_v63  ;;  %v13766_v9 = vsel %vm4955_vm6, %v4763_v6, %v5148_v43  ;;  %v4380_v47 = vadd.f32 %v13476_v44, %v4181_v13  ;;  %v15064_v13 = vld [vmem:[#allocation101_spill] sm:$0xff] }
 0x5b6   : > { %v4766_v26 = vadd.f32 %v15062_v31, %v4382_v8  ;;  %v4184_v4 = vmul.f32 %v13460_v56, %v15063_v37  ;;  %v5887_v11 = vrot.slane %v13766_v9, 1  ;;  %v6655_v21 = vrot.slane %v13766_v9, 2  ;;  %7556 = vst [vmem:[%s13660_s16 + $0x60] sm:$0xff] %v7438_v38  ;;  %7557 = vst [vmem:[%s13660_s16 + $0x68] sm:$0xff] %v7470_v22 }
 0x5b7   : > { %vm4953_vm7 = vcmp.ge.f32.partialorder %v4761_v28, 0.0  ;;  %v5146_v59 = vmul.f32 %v10541_v7, %v4761_v28  ;;  %v7064_v8 = vmax.f32 %v6296_v62, %v6650_v35  ;;  %v15065_v6 = vunpack.c.l.bf16 %v15064_v13 }
 0x5b8   : > { %vm4958_vm8 = vcmp.ge.f32.partialorder %v4766_v26, 0.0  ;;  %v5151_v45 = vmul.f32 %v10541_v7, %v4766_v26  ;;  %v5888_v10 = vsel %vm5561_vm2, %v5885_v2, %v5887_v11  ;;  %v6656_v60 = vsel %vm6329_vm3, %v6653_v0, %v6655_v21 }
 0x5b9   : > { %v4764_v51 = vadd.f32 %v15065_v6, %v4380_v47  ;;  %v5338_v20 = vsel %vm4953_vm7, %v4761_v28, %v5146_v59  ;;  %v4383_v17 = vadd.f32 %v13476_v44, %v4184_v4  ;;  %7256 = vst [vmem:[#allocation2 + $0x4f8] sm:$0xff] %v7064_v8  ;;  %v6299_v19 = vmax.f32 %v5339_v52, %v5888_v10  ;;  %v7439_v4 = vpop.trf.xlu0  ;;  %v7471_v59 = vpop.trf.xlu1  ;;  %v15067_v6 = vld [vmem:[#allocation141_spill] sm:$0xff] }
 0x5ba   : > { %v5883_v15 = vrot.slane %v5338_v20, 1  ;;  %v6651_v43 = vrot.slane %v5338_v20, 2  ;;  %v13782_v14 = vsel %vm4958_vm8, %v4766_v26, %v5151_v45  ;;  %7558 = vst [vmem:[%s13660_s16 + $0x70] sm:$0xff] %v7439_v4  ;;  %7559 = vst [vmem:[%s13660_s16 + $0x78] sm:$0xff] %v7471_v59  ;;  %v4185_v10 = vmul.f32 %v13460_v56, %v13283_v55 }
 0x5bb   : > { %v5893_v63 = vrot.slane %v13782_v14, 1  ;;  %v6661_v35 = vrot.slane %v13782_v14, 2  ;;  %vm4956_vm9 = vcmp.ge.f32.partialorder %v4764_v51, 0.0  ;;  %v5149_v48 = vmul.f32 %v10541_v7, %v4764_v51 }
 0x5bc   : > { %v7067_v28 = vmax.f32 %v6299_v19, %v6656_v60  ;;  %v5884_v31 = vsel %vm5561_vm2, %v5881_v57, %v5883_v15  ;;  %v5886_v33 = vsel %vm5561_vm2, %v5883_v15, %v5885_v2  ;;  %v6652_v52 = vsel %vm6329_vm3, %v6649_v12, %v6651_v43  ;;  %v7393_v37 = vld [vmem:[#allocation2 + $0x4e0] ss:$3 sm:$0xff] }
 0x5bd   : > { %v6297_v26 = vmax.f32 %v13748_v1, %v5884_v31  ;;  %v6298_v53 = vmax.f32 %v5338_v20, %v5886_v33  ;;  %v6654_v62 = vsel %vm6329_vm3, %v6651_v43, %v6653_v0  ;;  %v13794_v47 = vsel %vm4956_vm9, %v4764_v51, %v5149_v48  ;;  %7516 = vxpose.xlu1.b32.cont [5/16] (narrow) %v7393_v37, 64  ;;  %v15070_v33 = vld [vmem:[#allocation104_spill] sm:$0xff] }
 0x5be   : > { %7259 = vst [vmem:[#allocation2 + $0x510] sm:$0xff] %v7067_v28  ;;  %v5889_v8 = vrot.slane %v13794_v47, 1  ;;  %v6657_v57 = vrot.slane %v13794_v47, 2  ;;  %v15066_v2 = vunpack.c.h.bf16 %v15061_v24  ;;  %v4182_v12 = vmul.f32 %v13460_v56, %v15067_v6 }
 0x5bf   : > { %v7065_v1 = vmax.f32 %v6297_v26, %v6652_v52  ;;  %v7066_v0 = vmax.f32 %v6298_v53, %v6654_v62  ;;  %v4187_v51 = vmul.f32 %v13460_v56, %v13274_v50  ;;  %v4384_v50 = vadd.f32 %v13476_v44, %v4185_v10  ;;  %v15072_v53 = vld [vmem:[#allocation103_spill] sm:$0xff] }
 0x5c0   : > { %v4767_v45 = vadd.f32 %v15066_v2, %v4383_v17  ;;  %v5890_v60 = vsel %vm5561_vm2, %v5887_v11, %v5889_v8  ;;  %v6658_v20 = vsel %vm6329_vm3, %v6655_v21, %v6657_v57  ;;  %v4381_v38 = vadd.f32 %v13476_v44, %v4182_v12  ;;  %v15068_v11 = vld [vmem:[#allocation119_spill] sm:$0xff] }
 0x5c1   : > { %7257 = vst [vmem:[#allocation2 + $0x500] sm:$0xff] %v7065_v1  ;;  %7258 = vst [vmem:[#allocation2 + $0x508] sm:$0xff] %v7066_v0  ;;  %v6300_v17 = vmax.f32 %v13766_v9, %v5890_v60  ;;  %v4386_v22 = vadd.f32 %v13476_v44, %v4187_v51  ;;  %v4188_v55 = vmul.f32 %v13460_v56, %v13287_v49  ;;  %v15069_v28 = vunpack.c.h.bf16 %v15064_v13 }
 0x5c2   : > { %vm4959_vm10 = vcmp.ge.f32.partialorder %v4767_v45, 0.0  ;;  %v5152_v24 = vmul.f32 %v10541_v7, %v4767_v45  ;;  %v4186_v21 = vmul.f32 %v13460_v56, %v15068_v11  ;;  %v4191_v15 = vmul.f32 %v13460_v56, %v13343_v32 }
 0x5c3   : > { %v7068_v43 = vmax.f32 %v6300_v17, %v6658_v20  ;;  %v4765_v31 = vadd.f32 %v15069_v28, %v4381_v38  ;;  %v15071_v52 = vunpack.c.l.bf16 %v15070_v33  ;;  %v15073_v62 = vunpack.c.l.bf16 %v15072_v53 }
 0x5c4   : > { %v13815_v19 = vsel %vm4959_vm10, %v4767_v45, %v5152_v24  ;;  %v4387_v37 = vadd.f32 %v13476_v44, %v4188_v55  ;;  %v4385_v4 = vadd.f32 %v13476_v44, %v4186_v21  ;;  %v15074_v1 = vunpack.c.h.bf16 %v15070_v33 }
 0x5c5   : > { %v5895_v9 = vrot.slane %v13815_v19, 1  ;;  %v6663_v48 = vrot.slane %v13815_v19, 2  ;;  %v4770_v26 = vadd.f32 %v15071_v52, %v4386_v22  ;;  %v4768_v49 = vadd.f32 %v15073_v62, %v4384_v50  ;;  %7260 = vst [vmem:[#allocation2 + $0x518] sm:$0xff] %v7068_v43 }
 0x5c6   : > { %vm4957_vm11 = vcmp.ge.f32.partialorder %v4765_v31, 0.0  ;;  %v5150_v59 = vmul.f32 %v10541_v7, %v4765_v31  ;;  %v4771_v0 = vadd.f32 %v15074_v1, %v4387_v37  ;;  %v15075_v51 = vunpack.c.h.bf16 %v15072_v53 }
 0x5c7   : > { %v5896_v32 = vsel %vm5561_vm2, %v5893_v63, %v5895_v9  ;;  %v6664_v13 = vsel %vm6329_vm3, %v6661_v35, %v6663_v48  ;;  %vm4962_vm12 = vcmp.ge.f32.partialorder %v4770_v26, 0.0  ;;  %v5155_v45 = vmul.f32 %v10541_v7, %v4770_v26 }
 0x5c8   : > { %v6303_v2 = vmax.f32 %v13782_v14, %v5896_v32  ;;  %vm4960_vm13 = vcmp.ge.f32.partialorder %v4768_v49, 0.0  ;;  %v5342_v6 = vsel %vm4957_vm11, %v4765_v31, %v5150_v59  ;;  %v5153_v12 = vmul.f32 %v10541_v7, %v4768_v49  ;;  %v7395_v38 = vld [vmem:[#allocation2 + $0x4f8] ss:$3 sm:$0xff] }
 0x5c9   : > { %v4769_v10 = vadd.f32 %v15075_v51, %v4385_v4  ;;  %v5891_v20 = vrot.slane %v5342_v6, 1  ;;  %v6659_v24 = vrot.slane %v5342_v6, 2  ;;  %v5347_v17 = vsel %vm4962_vm12, %v4770_v26, %v5155_v45  ;;  %7517 = vxpose.xlu1.b32.cont [6/16] (narrow) %v7395_v38, 64  ;;  %v15076_v4 = vld [vmem:[#allocation108_spill] sm:$0xff] }
 0x5ca   : > { %v7071_v60 = vmax.f32 %v6303_v2, %v6664_v13  ;;  %v5901_v22 = vrot.slane %v5347_v17, 1  ;;  %v6669_v50 = vrot.slane %v5347_v17, 2  ;;  %v5345_v55 = vsel %vm4960_vm13, %v4768_v49, %v5153_v12 }
 0x5cb   : > { %vm4963_vm14 = vcmp.ge.f32.partialorder %v4771_v0, 0.0  ;;  %v5892_v11 = vsel %vm5561_vm2, %v5889_v8, %v5891_v20  ;;  %v5894_v21 = vsel %vm5561_vm2, %v5891_v20, %v5893_v63  ;;  %v6660_v43 = vsel %vm6329_vm3, %v6657_v57, %v6659_v24 }
 0x5cc   : > { %7263 = vst [vmem:[#allocation2 + $0x530] sm:$0xff] %v7071_v60  ;;  %v6662_v28 = vsel %vm6329_vm3, %v6659_v24, %v6661_v35  ;;  %v6301_v31 = vmax.f32 %v13794_v47, %v5892_v11  ;;  %v6302_v33 = vmax.f32 %v5342_v6, %v5894_v21  ;;  %v5897_v52 = vrot.slane %v5345_v55, 1 }
 0x5cd   : > { %v6665_v26 = vrot.slane %v5345_v55, 2  ;;  %v5156_v53 = vmul.f32 %v10541_v7, %v4771_v0  ;;  %vm4961_vm15 = vcmp.ge.f32.partialorder %v4769_v10, 0.0  ;;  %v5154_v8 = vmul.f32 %v10541_v7, %v4769_v10 }
 0x5ce   : > { %v4390_v62 = vadd.f32 %v13476_v44, %v4191_v15  ;;  %v7069_v49 = vmax.f32 %v6301_v31, %v6660_v43  ;;  %v7070_v63 = vmax.f32 %v6302_v33, %v6662_v28  ;;  %v5898_v57 = vsel %vm5561_vm2, %v5895_v9, %v5897_v52 }
 0x5cf   : > { %v6666_v14 = vsel %vm6329_vm3, %v6663_v48, %v6665_v26  ;;  %v6304_v35 = vmax.f32 %v13815_v19, %v5898_v57  ;;  %v13863_v47 = vsel %vm4963_vm14, %v4771_v0, %v5156_v53  ;;  %v5346_v37 = vsel %vm4961_vm15, %v4769_v10, %v5154_v8 }
 0x5d0   : > { %v15077_v32 = vunpack.c.l.bf16 %v15076_v4  ;;  %7261 = vst [vmem:[#allocation2 + $0x520] sm:$0xff] %v7069_v49  ;;  %7262 = vst [vmem:[#allocation2 + $0x528] sm:$0xff] %v7070_v63  ;;  %v5903_v59 = vrot.slane %v13863_v47, 1  ;;  %v6671_v15 = vrot.slane %v13863_v47, 2  ;;  %v5899_v2 = vrot.slane %v5346_v37, 1 }
 0x5d1   : > { %v6667_v45 = vrot.slane %v5346_v37, 2  ;;  %v7072_v9 = vmax.f32 %v6304_v35, %v6666_v14  ;;  %v4189_v19 = vmul.f32 %v13460_v56, %v13353_v30  ;;  %v4192_v11 = vmul.f32 %v13460_v56, %v13357_v61 }
 0x5d2   : > { %v4774_v13 = vadd.f32 %v15077_v32, %v4390_v62  ;;  %v5904_v6 = vsel %vm5561_vm2, %v5901_v22, %v5903_v59  ;;  %v6672_v12 = vsel %vm6329_vm3, %v6669_v50, %v6671_v15  ;;  %v5900_v1 = vsel %vm5561_vm2, %v5897_v52, %v5899_v2 }
 0x5d3   : > { %v5902_v0 = vsel %vm5561_vm2, %v5899_v2, %v5901_v22  ;;  %7264 = vst [vmem:[#allocation2 + $0x538] sm:$0xff] %v7072_v9  ;;  %v6307_v51 = vmax.f32 %v5347_v17, %v5904_v6  ;;  %v6305_v10 = vmax.f32 %v5345_v55, %v5900_v1  ;;  %v6668_v20 = vsel %vm6329_vm3, %v6665_v26, %v6667_v45  ;;  %v15078_v55 = vld [vmem:[#allocation106_spill] sm:$0xff] }
 0x5d4   : > { %vm4966_vm0 = vcmp.ge.f32.partialorder %v4774_v13, 0.0  ;;  %v5159_v48 = vmul.f32 %v10541_v7, %v4774_v13  ;;  %v6306_v60 = vmax.f32 %v5346_v37, %v5902_v0  ;;  %v6670_v30 = vsel %vm6329_vm3, %v6667_v45, %v6669_v50  ;;  %v15082_v45 = vld [vmem:[#allocation107_spill] sm:$0xff] }
 0x5d5   : > { %v4388_v38 = vadd.f32 %v13476_v44, %v4189_v19  ;;  %v7075_v21 = vmax.f32 %v6307_v51, %v6672_v12  ;;  %v7073_v43 = vmax.f32 %v6305_v10, %v6668_v20  ;;  %v15079_v31 = vunpack.c.l.bf16 %v15078_v55  ;;  %v15084_v19 = vld [vmem:[#allocation105_spill] sm:$0xff] }
 0x5d6   : > { %v13882_v24 = vsel %vm4966_vm0, %v4774_v13, %v5159_v48  ;;  %v7074_v28 = vmax.f32 %v6306_v60, %v6670_v30  ;;  %v4391_v52 = vadd.f32 %v13476_v44, %v4192_v11  ;;  %v4190_v50 = vmul.f32 %v13460_v56, %v13361_v41 }
 0x5d7   : > { %v5909_v22 = vrot.slane %v13882_v24, 1  ;;  %v6677_v17 = vrot.slane %v13882_v24, 2  ;;  %v4772_v33 = vadd.f32 %v15079_v31, %v4388_v38  ;;  %7267 = vst [vmem:[#allocation2 + $0x550] sm:$0xff] %v7075_v21  ;;  %7265 = vst [vmem:[#allocation2 + $0x540] sm:$0xff] %v7073_v43  ;;  %v4195_v61 = vmul.f32 %v13460_v56, %v13412_v23  ;;  %v7397_v62 = vld [vmem:[#allocation2 + $0x510] ss:$3 sm:$0xff]  ;;  %v7496_v23 = vpop.trf.xlu0 }
 0x5d8   : > { %7266 = vst [vmem:[#allocation2 + $0x548] sm:$0xff] %v7074_v28  ;;  %v4193_v26 = vmul.f32 %v13460_v56, %v13417_v39  ;;  %v4196_v53 = vmul.f32 %v13460_v56, %v13424_v27  ;;  %v4194_v8 = vmul.f32 %v13460_v56, %v13429_v58  ;;  %v15080_v49 = vunpack.c.h.bf16 %v15076_v4  ;;  %7518 = vxpose.xlu1.b32.cont [7/16] (narrow) %v7397_v62, 64 }
 0x5d9   : > { %vm4964_vm1 = vcmp.ge.f32.partialorder %v4772_v33, 0.0  ;;  %v5157_v41 = vmul.f32 %v10541_v7, %v4772_v33  ;;  %v4389_v57 = vadd.f32 %v13476_v44, %v4190_v50  ;;  %v4394_v14 = vadd.f32 %v13476_v44, %v4195_v61  ;;  %7560 = vst [vmem:[%s13660_s16 + $0x80] sm:$0xff] %v7496_v23 }
 0x5da   : > { %v4775_v63 = vadd.f32 %v15080_v49, %v4391_v52  ;;  %v4392_v39 = vadd.f32 %v13476_v44, %v4193_v26  ;;  %v4395_v27 = vadd.f32 %v13476_v44, %v4196_v53  ;;  %v4393_v35 = vadd.f32 %v13476_v44, %v4194_v8  ;;  %v7399_v32 = vld [vmem:[#allocation2 + $0x528] ss:$3 sm:$0xff] }
 0x5db   : > { %v5349_v58 = vsel %vm4964_vm1, %v4772_v33, %v5157_v41  ;;  %v15081_v37 = vunpack.c.h.bf16 %v15078_v55  ;;  %v15083_v9 = vunpack.c.l.bf16 %v15082_v45  ;;  %v15085_v6 = vunpack.c.l.bf16 %v15084_v19 }
 0x5dc   : > { %vm4967_vm4 = vcmp.ge.f32.partialorder %v4775_v63, 0.0  ;;  %v5160_v56 = vmul.f32 %v10541_v7, %v4775_v63  ;;  %v5905_v13 = vrot.slane %v5349_v58, 1  ;;  %v6673_v2 = vrot.slane %v5349_v58, 2  ;;  %7519 = vxpose.xlu1.b32.cont [8/16] (narrow) %v7399_v32, 64 }
 0x5dd   : > { %v4773_v4 = vadd.f32 %v15081_v37, %v4389_v57  ;;  %v4778_v48 = vadd.f32 %v15083_v9, %v4394_v14  ;;  %v4776_v12 = vadd.f32 %v15085_v6, %v4392_v39  ;;  %v15086_v0 = vunpack.c.h.bf16 %v15082_v45  ;;  %v13944_v39 = vld [vmem:[#allocation13] ss:$0 sm:$0xff]  ;;  %v7497_v9 = vpop.trf.xlu0 }
 0x5de   : > { %v13918_v1 = vsel %vm4967_vm4, %v4775_v63, %v5160_v56  ;;  %v5906_v10 = vsel %vm5561_vm2, %v5903_v59, %v5905_v13  ;;  %v6674_v60 = vsel %vm6329_vm3, %v6671_v15, %v6673_v2  ;;  %v4197_v56 = vmul.f32 %v13944_v39, %v13495_v16  ;;  %7562 = vst [vmem:[%s13660_s16 + $0x90] sm:$0xff] %v7497_v9 }
 0x5df   : > { %vm4965_vm5 = vcmp.ge.f32.partialorder %v4773_v4, 0.0  ;;  %v5158_v44 = vmul.f32 %v10541_v7, %v4773_v4  ;;  %v4779_v51 = vadd.f32 %v15086_v0, %v4395_v27  ;;  %v5911_v20 = vrot.slane %v13918_v1, 1  ;;  %v7401_v31 = vld [vmem:[#allocation2 + $0x540] ss:$3 sm:$0xff] }
 0x5e0   : > { %v6679_v30 = vrot.slane %v13918_v1, 2  ;;  %v6308_v38 = vmax.f32 %v13863_v47, %v5906_v10  ;;  %vm4970_vm6 = vcmp.ge.f32.partialorder %v4778_v48, 0.0  ;;  %v5163_v21 = vmul.f32 %v10541_v7, %v4778_v48  ;;  %7520 = vxpose.xlu1.b32.cont [9/16] (narrow) %v7401_v31, 64 }
 0x5e1   : > { %v5350_v11 = vsel %vm4965_vm5, %v4773_v4, %v5158_v44  ;;  %v5912_v43 = vsel %vm5561_vm2, %v5909_v22, %v5911_v20  ;;  %vm4968_vm7 = vcmp.ge.f32.partialorder %v4776_v12, 0.0  ;;  %v5161_v63 = vmul.f32 %v10541_v7, %v4776_v12  ;;  %v7498_v31 = vpop.trf.xlu0 }
 0x5e2   : > { %v6680_v28 = vsel %vm6329_vm3, %v6677_v17, %v6679_v30  ;;  %v5907_v55 = vrot.slane %v5350_v11, 1  ;;  %v6675_v59 = vrot.slane %v5350_v11, 2  ;;  %v7076_v33 = vmax.f32 %v6308_v38, %v6674_v60  ;;  %7564 = vst [vmem:[%s13660_s16 + $0xa0] sm:$0xff] %v7498_v31 }
 0x5e3   : > { %v6311_v15 = vmax.f32 %v13882_v24, %v5912_v43  ;;  %v5355_v52 = vsel %vm4970_vm6, %v4778_v48, %v5163_v21  ;;  %vm4971_vm8 = vcmp.ge.f32.partialorder %v4779_v51, 0.0  ;;  %v5164_v24 = vmul.f32 %v10541_v7, %v4779_v51 }
 0x5e4   : > { %v5908_v50 = vsel %vm5561_vm2, %v5905_v13, %v5907_v55  ;;  %v5910_v47 = vsel %vm5561_vm2, %v5907_v55, %v5909_v22  ;;  %v6676_v61 = vsel %vm6329_vm3, %v6673_v2, %v6675_v59  ;;  %v6678_v26 = vsel %vm6329_vm3, %v6675_v59, %v6677_v17  ;;  %7268 = vst [vmem:[#allocation2 + $0x558] sm:$0xff] %v7076_v33  ;;  %v13958_v2 = vld [vmem:[#allocation15] ss:$0 sm:$0xff] }
 0x5e5   : > { %v7079_v53 = vmax.f32 %v6311_v15, %v6680_v28  ;;  %v6309_v8 = vmax.f32 %v5349_v58, %v5908_v50  ;;  %v6310_v62 = vmax.f32 %v5350_v11, %v5910_v47  ;;  %v5917_v41 = vrot.slane %v5355_v52, 1 }
 0x5e6   : > { %v6685_v49 = vrot.slane %v5355_v52, 2  ;;  %v15087_v22 = vunpack.c.h.bf16 %v15084_v19  ;;  %v4199_v17 = vmul.f32 %v13944_v39, %v13484_v5  ;;  %v5353_v27 = vsel %vm4968_vm7, %v4776_v12, %v5161_v63 }
 0x5e7   : > { %7271 = vst [vmem:[#allocation2 + $0x570] sm:$0xff] %v7079_v53  ;;  %v7077_v57 = vmax.f32 %v6309_v8, %v6676_v61  ;;  %v7078_v23 = vmax.f32 %v6310_v62, %v6678_v26  ;;  %v13949_v58 = vsel %vm4971_vm8, %v4779_v51, %v5164_v24  ;;  %v4200_v37 = vmul.f32 %v13944_v39, %v13504_v46  ;;  %v15088_v51 = vld [vmem:[#allocation110_spill] sm:$0xff] }
 0x5e8   : > { %v4777_v14 = vadd.f32 %v15087_v22, %v4393_v35  ;;  %v5913_v4 = vrot.slane %v5353_v27, 1  ;;  %v6681_v35 = vrot.slane %v5353_v27, 2  ;;  %v5919_v32 = vrot.slane %v13949_v58, 1  ;;  %v7499_v22 = vpop.trf.xlu0 }
 0x5e9   : > { %7269 = vst [vmem:[#allocation2 + $0x560] sm:$0xff] %v7077_v57  ;;  %7270 = vst [vmem:[#allocation2 + $0x568] sm:$0xff] %v7078_v23  ;;  %v6687_v13 = vrot.slane %v13949_v58, 2  ;;  %v4398_v45 = vadd.f32 %v13958_v2, %v4199_v17  ;;  %v4396_v16 = vadd.f32 %v13958_v2, %v4197_v56  ;;  %v15089_v10 = vunpack.c.l.bf16 %v15088_v51 }
 0x5ea   : > { %vm4969_vm9 = vcmp.ge.f32.partialorder %v4777_v14, 0.0  ;;  %v5162_v5 = vmul.f32 %v10541_v7, %v4777_v14  ;;  %v5914_v46 = vsel %vm5561_vm2, %v5911_v20, %v5913_v4  ;;  %v6682_v48 = vsel %vm6329_vm3, %v6679_v30, %v6681_v35  ;;  %v15090_v30 = vld [vmem:[#allocation109_spill] sm:$0xff]  ;;  %7566 = vst [vmem:[%s13660_s16 + $0xb0] sm:$0xff] %v7499_v22 }
 0x5eb   : > { %v5920_v19 = vsel %vm5561_vm2, %v5917_v41, %v5919_v32  ;;  %v6688_v6 = vsel %vm6329_vm3, %v6685_v49, %v6687_v13  ;;  %v6312_v12 = vmax.f32 %v13918_v1, %v5914_v46  ;;  %v4782_v60 = vadd.f32 %v15089_v10, %v4398_v45 }
 0x5ec   : > { %v6315_v44 = vmax.f32 %v5355_v52, %v5920_v19  ;;  %v5354_v0 = vsel %vm4969_vm9, %v4777_v14, %v5162_v5  ;;  %v15091_v11 = vunpack.c.l.bf16 %v15090_v30  ;;  %v4399_v43 = vadd.f32 %v13958_v2, %v4200_v37 }
 0x5ed   : > { %v5915_v20 = vrot.slane %v5354_v0, 1  ;;  %v6683_v38 = vrot.slane %v5354_v0, 2  ;;  %v7080_v28 = vmax.f32 %v6312_v12, %v6682_v48  ;;  %vm4974_vm10 = vcmp.ge.f32.partialorder %v4782_v60, 0.0  ;;  %v7500_v48 = vpop.trf.xlu0  ;;  %v15094_v12 = vld [vmem:[#allocation112_spill] sm:$0xff] }
 0x5ee   : > { %v4780_v21 = vadd.f32 %v15091_v11, %v4396_v16  ;;  %v7083_v55 = vmax.f32 %v6315_v44, %v6688_v6  ;;  %v5167_v59 = vmul.f32 %v10541_v7, %v4782_v60  ;;  %v4198_v57 = vmul.f32 %v13944_v39, %v13509_v34  ;;  %7568 = vst [vmem:[%s13660_s16 + $0xc0] sm:$0xff] %v7500_v48 }
 0x5ef   : > { %v5916_v1 = vsel %vm5561_vm2, %v5913_v4, %v5915_v20  ;;  %v5918_v33 = vsel %vm5561_vm2, %v5915_v20, %v5917_v41  ;;  %v6684_v15 = vsel %vm6329_vm3, %v6681_v35, %v6683_v38  ;;  %v6686_v52 = vsel %vm6329_vm3, %v6683_v38, %v6685_v49  ;;  %7272 = vst [vmem:[#allocation2 + $0x578] sm:$0xff] %v7080_v28 }
 0x5f0   : > { %7275 = vst [vmem:[#allocation2 + $0x590] sm:$0xff] %v7083_v55  ;;  %v6313_v50 = vmax.f32 %v5353_v27, %v5916_v1  ;;  %v6314_v47 = vmax.f32 %v5354_v0, %v5918_v33  ;;  %v13983_v61 = vsel %vm4974_vm10, %v4782_v60, %v5167_v59  ;;  %vm4972_vm11 = vcmp.ge.f32.partialorder %v4780_v21, 0.0  ;;  %v7403_v26 = vld [vmem:[#allocation2 + $0x558] ss:$3 sm:$0xff] }
 0x5f1   : > { %v5925_v53 = vrot.slane %v13983_v61, 1  ;;  %v6693_v8 = vrot.slane %v13983_v61, 2  ;;  %v5165_v62 = vmul.f32 %v10541_v7, %v4780_v21  ;;  %v15092_v41 = vunpack.c.h.bf16 %v15088_v51  ;;  %7521 = vxpose.xlu1.b32.cont [10/16] (narrow) %v7403_v26, 64  ;;  %v15096_v0 = vld [vmem:[#allocation111_spill] sm:$0xff] }
 0x5f2   : > { %v7081_v49 = vmax.f32 %v6313_v50, %v6684_v15  ;;  %v7082_v24 = vmax.f32 %v6314_v47, %v6686_v52  ;;  %v4203_v23 = vmul.f32 %v13944_v39, %v13564_v29  ;;  %v4201_v27 = vmul.f32 %v13944_v39, %v13569_v54 }
 0x5f3   : > { %v4783_v63 = vadd.f32 %v15092_v41, %v4399_v43  ;;  %v13994_v14 = vsel %vm4972_vm11, %v4780_v21, %v5165_v62  ;;  %v4397_v34 = vadd.f32 %v13958_v2, %v4198_v57  ;;  %v4204_v5 = vmul.f32 %v13944_v39, %v13575_v42  ;;  %v7501_v43 = vpop.trf.xlu0 }
 0x5f4   : > { %7273 = vst [vmem:[#allocation2 + $0x580] sm:$0xff] %v7081_v49  ;;  %7274 = vst [vmem:[#allocation2 + $0x588] sm:$0xff] %v7082_v24  ;;  %v5921_v56 = vrot.slane %v13994_v14, 1  ;;  %v6689_v37 = vrot.slane %v13994_v14, 2  ;;  %v4402_v29 = vadd.f32 %v13958_v2, %v4203_v23  ;;  %v4400_v35 = vadd.f32 %v13958_v2, %v4201_v27 }
 0x5f5   : > { %vm4975_vm12 = vcmp.ge.f32.partialorder %v4783_v63, 0.0  ;;  %v5168_v17 = vmul.f32 %v10541_v7, %v4783_v63  ;;  %v4202_v54 = vmul.f32 %v13944_v39, %v13580_v3  ;;  %v15093_v42 = vunpack.c.h.bf16 %v15090_v30  ;;  %7570 = vst [vmem:[%s13660_s16 + $0xd0] sm:$0xff] %v7501_v43  ;;  %v15102_v43 = vld [vmem:[#allocation113_spill] sm:$0xff] }
 0x5f6   : > { %v5922_v45 = vsel %vm5561_vm2, %v5919_v32, %v5921_v56  ;;  %v6690_v16 = vsel %vm6329_vm3, %v6687_v13, %v6689_v37  ;;  %v15095_v3 = vunpack.c.l.bf16 %v15094_v12  ;;  %v15097_v51 = vunpack.c.l.bf16 %v15096_v0 }
 0x5f7   : > { %v14004_v4 = vsel %vm4975_vm12, %v4783_v63, %v5168_v17  ;;  %v6316_v19 = vmax.f32 %v13949_v58, %v5922_v45  ;;  %v4781_v6 = vadd.f32 %v15093_v42, %v4397_v34  ;;  %v4403_v58 = vadd.f32 %v13958_v2, %v4204_v5  ;;  %v7502_v17 = vpop.trf.xlu0 }
 0x5f8   : > { %v5927_v9 = vrot.slane %v14004_v4, 1  ;;  %v6695_v46 = vrot.slane %v14004_v4, 2  ;;  %v4786_v44 = vadd.f32 %v15095_v3, %v4402_v29  ;;  %v4784_v32 = vadd.f32 %v15097_v51, %v4400_v35  ;;  %7572 = vst [vmem:[%s13660_s16 + $0xe0] sm:$0xff] %v7502_v17 }
 0x5f9   : > { %v4401_v60 = vadd.f32 %v13958_v2, %v4202_v54  ;;  %v7084_v20 = vmax.f32 %v6316_v19, %v6690_v16  ;;  %vm4973_vm13 = vcmp.ge.f32.partialorder %v4781_v6, 0.0  ;;  %v5166_v30 = vmul.f32 %v10541_v7, %v4781_v6 }
 0x5fa   : > { %v5928_v13 = vsel %vm5561_vm2, %v5925_v53, %v5927_v9  ;;  %v6696_v10 = vsel %vm6329_vm3, %v6693_v8, %v6695_v46  ;;  %vm4978_vm14 = vcmp.ge.f32.partialorder %v4786_v44, 0.0  ;;  %v5171_v11 = vmul.f32 %v10541_v7, %v4786_v44 }
 0x5fb   : > { %v6319_v38 = vmax.f32 %v13983_v61, %v5928_v13  ;;  %vm4976_vm15 = vcmp.ge.f32.partialorder %v4784_v32, 0.0  ;;  %v5169_v21 = vmul.f32 %v10541_v7, %v4784_v32  ;;  %7276 = vst [vmem:[#allocation2 + $0x598] sm:$0xff] %v7084_v20  ;;  %v5358_v55 = vsel %vm4973_vm13, %v4781_v6, %v5166_v30  ;;  %v7405_v15 = vld [vmem:[#allocation2 + $0x570] ss:$3 sm:$0xff] }
 0x5fc   : > { %v15098_v59 = vunpack.c.h.bf16 %v15094_v12  ;;  %v15099_v1 = vunpack.c.h.bf16 %v15096_v0  ;;  %v5923_v52 = vrot.slane %v5358_v55, 1  ;;  %v6691_v50 = vrot.slane %v5358_v55, 2  ;;  %7522 = vxpose.xlu1.b32.cont [11/16] (narrow) %v7405_v15, 64 }
 0x5fd   : > { %v7087_v28 = vmax.f32 %v6319_v38, %v6696_v10  ;;  %v5363_v47 = vsel %vm4978_vm14, %v4786_v44, %v5171_v11  ;;  %v5361_v26 = vsel %vm4976_vm15, %v4784_v32, %v5169_v21  ;;  %v4205_v45 = vmul.f32 %v13944_v39, %v13626_v40  ;;  %v15100_v44 = vld [vmem:[#allocation114_spill] sm:$0xff] }
 0x5fe   : > { %v4787_v31 = vadd.f32 %v15098_v59, %v4403_v58  ;;  %v4785_v33 = vadd.f32 %v15099_v1, %v4401_v60  ;;  %v5933_v62 = vrot.slane %v5363_v47, 1  ;;  %v6701_v41 = vrot.slane %v5363_v47, 2 }
 0x5ff   : > { %7279 = vst [vmem:[#allocation2 + $0x5b0] sm:$0xff] %v7087_v28  ;;  %v5929_v63 = vrot.slane %v5361_v26, 1  ;;  %v6697_v49 = vrot.slane %v5361_v26, 2  ;;  %v5924_v24 = vsel %vm5561_vm2, %v5921_v56, %v5923_v52  ;;  %v5926_v57 = vsel %vm5561_vm2, %v5923_v52, %v5925_v53 }
 0x600   : > { %v6692_v23 = vsel %vm6329_vm3, %v6689_v37, %v6691_v50  ;;  %v6694_v22 = vsel %vm6329_vm3, %v6691_v50, %v6693_v8  ;;  %v6317_v27 = vmax.f32 %v13994_v14, %v5924_v24  ;;  %v6318_v34 = vmax.f32 %v5358_v55, %v5926_v57 }
 0x601   : > { %v5930_v29 = vsel %vm5561_vm2, %v5927_v9, %v5929_v63  ;;  %v6698_v35 = vsel %vm6329_vm3, %v6695_v46, %v6697_v49  ;;  %vm4979_vm0 = vcmp.ge.f32.partialorder %v4787_v31, 0.0  ;;  %v5172_v53 = vmul.f32 %v10541_v7, %v4787_v31  ;;  %v7503_v9 = vpop.trf.xlu0 }
 0x602   : > { %v6320_v56 = vmax.f32 %v14004_v4, %v5930_v29  ;;  %vm4977_vm1 = vcmp.ge.f32.partialorder %v4785_v33, 0.0  ;;  %v7085_v37 = vmax.f32 %v6317_v27, %v6692_v23  ;;  %v7086_v5 = vmax.f32 %v6318_v34, %v6694_v22  ;;  %v7407_v16 = vld [vmem:[#allocation2 + $0x588] ss:$3 sm:$0xff]  ;;  %7574 = vst [vmem:[%s13660_s16 + $0xf0] sm:$0xff] %v7503_v9 }
 0x603   : > { %v5170_v61 = vmul.f32 %v10541_v7, %v4785_v33  ;;  %v4207_v8 = vmul.f32 %v13944_v39, %v13619_v25  ;;  %v14061_v54 = vsel %vm4979_vm0, %v4787_v31, %v5172_v53  ;;  %v4208_v4 = vmul.f32 %v13944_v39, %v13632_v36  ;;  %7523 = vxpose.xlu1.b32.cont [12/16] (narrow) %v7407_v16, 64 }
 0x604   : > { %v7088_v14 = vmax.f32 %v6320_v56, %v6698_v35  ;;  %7277 = vst [vmem:[#allocation2 + $0x5a0] sm:$0xff] %v7085_v37  ;;  %7278 = vst [vmem:[#allocation2 + $0x5a8] sm:$0xff] %v7086_v5  ;;  %v5935_v46 = vrot.slane %v14061_v54, 1  ;;  %v6703_v48 = vrot.slane %v14061_v54, 2  ;;  %v4404_v40 = vadd.f32 %v13958_v2, %v4205_v45 }
 0x605   : > { %v5362_v19 = vsel %vm4977_vm1, %v4785_v33, %v5170_v61  ;;  %v4406_v25 = vadd.f32 %v13958_v2, %v4207_v8  ;;  %v4407_v36 = vadd.f32 %v13958_v2, %v4208_v4  ;;  %v15101_v0 = vunpack.c.l.bf16 %v15100_v44 }
 0x606   : > { %7280 = vst [vmem:[#allocation2 + $0x5b8] sm:$0xff] %v7088_v14  ;;  %v5931_v42 = vrot.slane %v5362_v19, 1  ;;  %v6699_v6 = vrot.slane %v5362_v19, 2  ;;  %v5936_v12 = vsel %vm5561_vm2, %v5933_v62, %v5935_v46  ;;  %v6704_v3 = vsel %vm6329_vm3, %v6701_v41, %v6703_v48 }
 0x607   : > { %v4790_v51 = vadd.f32 %v15101_v0, %v4406_v25  ;;  %v4206_v32 = vmul.f32 %v13944_v39, %v13642_v18  ;;  %v6323_v13 = vmax.f32 %v5363_v47, %v5936_v12  ;;  %v15103_v28 = vunpack.c.l.bf16 %v15102_v43 }
 0x608   : > { %v5932_v10 = vsel %vm5561_vm2, %v5929_v63, %v5931_v42  ;;  %v5934_v58 = vsel %vm5561_vm2, %v5931_v42, %v5933_v62  ;;  %v6700_v60 = vsel %vm6329_vm3, %v6697_v49, %v6699_v6  ;;  %v6702_v30 = vsel %vm6329_vm3, %v6699_v6, %v6701_v41 }
 0x609   : > { %v6321_v20 = vmax.f32 %v5361_v26, %v5932_v10  ;;  %v6322_v38 = vmax.f32 %v5362_v19, %v5934_v58  ;;  %vm4982_vm4 = vcmp.ge.f32.partialorder %v4790_v51, 0.0  ;;  %v7091_v11 = vmax.f32 %v6323_v13, %v6704_v3 }
 0x60a   : > { %v5175_v21 = vmul.f32 %v10541_v7, %v4790_v51  ;;  %v4788_v55 = vadd.f32 %v15103_v28, %v4404_v40  ;;  %v15104_v18 = vunpack.c.h.bf16 %v15100_v44  ;;  %v4597_v59 = vunpack.c.h.bf16 %v15102_v43 }
 0x60b   : > { %v7089_v31 = vmax.f32 %v6321_v20, %v6700_v60  ;;  %v7090_v1 = vmax.f32 %v6322_v38, %v6702_v30  ;;  %v4405_v33 = vadd.f32 %v13958_v2, %v4206_v32  ;;  %7283 = vst [vmem:[#allocation2 + $0x5d0] sm:$0xff] %v7091_v11  ;;  %v7409_v50 = vld [vmem:[#allocation2 + $0x5a0] ss:$3 sm:$0xff] }
 0x60c   : > { %v4791_v39 = vadd.f32 %v15104_v18, %v4407_v36  ;;  %v5367_v15 = vsel %vm4982_vm4, %v4790_v51, %v5175_v21  ;;  %vm4980_vm5 = vcmp.ge.f32.partialorder %v4788_v55, 0.0  ;;  %v5173_v52 = vmul.f32 %v10541_v7, %v4788_v55  ;;  %7524 = vxpose.xlu1.b32.cont [13/16] (narrow) %v7409_v50, 64 }
 0x60d   : > { %7281 = vst [vmem:[#allocation2 + $0x5c0] sm:$0xff] %v7089_v31  ;;  %7282 = vst [vmem:[#allocation2 + $0x5c8] sm:$0xff] %v7090_v1  ;;  %v4789_v26 = vadd.f32 %v4597_v59, %v4405_v33  ;;  %v5941_v62 = vrot.slane %v5367_v15, 1  ;;  %v6709_v63 = vrot.slane %v5367_v15, 2 }
 0x60e   : > { %vm4983_vm6 = vcmp.ge.f32.partialorder %v4791_v39, 0.0  ;;  %v5176_v47 = vmul.f32 %v10541_v7, %v4791_v39  ;;  %v5365_v41 = vsel %vm4980_vm5, %v4788_v55, %v5173_v52 }
 0x60f   : > { %v5937_v49 = vrot.slane %v5365_v41, 1  ;;  %v6705_v24 = vrot.slane %v5365_v41, 2  ;;  %vm4981_vm7 = vcmp.ge.f32.partialorder %v4789_v26, 0.0  ;;  %v5174_v22 = vmul.f32 %v10541_v7, %v4789_v26 }
 0x610   : > { %v5368_v57 = vsel %vm4983_vm6, %v4791_v39, %v5176_v47 }
 0x611   : > { %v5943_v2 = vrot.slane %v5368_v57, 1  ;;  %v6711_v23 = vrot.slane %v5368_v57, 2  ;;  %v5938_v17 = vsel %vm5561_vm2, %v5935_v46, %v5937_v49  ;;  %v6706_v27 = vsel %vm6329_vm3, %v6703_v48, %v6705_v24 }
 0x612   : > { %v6324_v34 = vmax.f32 %v14061_v54, %v5938_v17  ;;  %v5366_v37 = vsel %vm4981_vm7, %v4789_v26, %v5174_v22 }
 0x613   : > { %v5944_v29 = vsel %vm5561_vm2, %v5941_v62, %v5943_v2  ;;  %v6328_v35 = vmax.f32 %v5368_v57, %v5943_v2  ;;  %v6712_v56 = vsel %vm6329_vm3, %v6709_v63, %v6711_v23  ;;  %v5939_v8 = vrot.slane %v5366_v37, 1 }
 0x614   : > { %v6327_v53 = vmax.f32 %v5367_v15, %v5944_v29  ;;  %v7092_v5 = vmax.f32 %v6324_v34, %v6706_v27  ;;  %v6707_v14 = vrot.slane %v5366_v37, 2  ;;  %v7411_v45 = vld [vmem:[#allocation2 + $0x5b8] ss:$3 sm:$0xff] }
 0x615   : > { %v7096_v61 = vmax.f32 %v6328_v35, %v6711_v23  ;;  %7525 = vxpose.xlu1.b32.cont [14/16] (narrow) %v7411_v45, 64  ;;  %v5940_v7 = vsel %vm5561_vm2, %v5937_v49, %v5939_v8  ;;  %v5942_v54 = vsel %vm5561_vm2, %v5939_v8, %v5941_v62 }
 0x616   : > { %v7095_v4 = vmax.f32 %v6327_v53, %v6712_v56  ;;  %7284 = vst [vmem:[#allocation2 + $0x5d8] sm:$0xff] %v7092_v5  ;;  %v6708_v16 = vsel %vm6329_vm3, %v6705_v24, %v6707_v14  ;;  %v6710_v9 = vsel %vm6329_vm3, %v6707_v14, %v6709_v63  ;;  %v6325_v46 = vmax.f32 %v5365_v41, %v5940_v7 }
 0x617   : > { %7288 = vst [vmem:[#allocation2 + $0x5f8] sm:$0x3f] %v7096_v61  ;;  %v6326_v48 = vmax.f32 %v5366_v37, %v5942_v54 }
 0x618   : > { %7287 = vst [vmem:[#allocation2 + $0x5f0] sm:$0xff] %v7095_v4  ;;  %v7093_v19 = vmax.f32 %v6325_v46, %v6708_v16 }
 0x619   : > { %v7094_v25 = vmax.f32 %v6326_v48, %v6710_v9 }
 0x61a   : > { %7285 = vst [vmem:[#allocation2 + $0x5e0] sm:$0xff] %v7093_v19 }
 0x61b   : > { %7286 = vst [vmem:[#allocation2 + $0x5e8] sm:$0xff] %v7094_v25 }
 0x621   : > { %v7413_v42 = vld [vmem:[#allocation2 + $0x5d0] ss:$3 sm:$0xff] }
 0x622   : > { %7526 = vxpose.xlu1.b32.cont [15/16] (narrow) %v7413_v42, 64  ;;  %v7415_v6 = vld [vmem:[#allocation2 + $0x5e8] ss:$3 sm:$0xff] }
 0x626   : > { %7527 = vxpose.xlu1.b32.end [16/16] (narrow) %v7415_v6, 64 }
 0x66a   : > { %v7528_v40 = vpop.trf.xlu1 }
 0x66b   : > { %7561 = vst [vmem:[%s13660_s16 + $0x88] sm:$0xff] %v7528_v40 }
 0x66e   : > { %v7529_v36 = vpop.trf.xlu1 }
 0x66f   : > { %7563 = vst [vmem:[%s13660_s16 + $0x98] sm:$0xff] %v7529_v36 }
 0x672   : > { %v7530_v12 = vpop.trf.xlu1 }
 0x673   : > { %7565 = vst [vmem:[%s13660_s16 + $0xa8] sm:$0xff] %v7530_v12 }
 0x676   : > { %v7531_v3 = vpop.trf.xlu1 }
 0x677   : > { %7567 = vst [vmem:[%s13660_s16 + $0xb8] sm:$0xff] %v7531_v3 }
 0x67a   : > { %v7532_v44 = vpop.trf.xlu1 }
 0x67b   : > { %7569 = vst [vmem:[%s13660_s16 + $0xc8] sm:$0xff] %v7532_v44 }
 0x67e   : > { %v7533_v0 = vpop.trf.xlu1 }
 0x67f   : > { %7571 = vst [vmem:[%s13660_s16 + $0xd8] sm:$0xff] %v7533_v0 }
 0x682   : > { %v7534_v51 = vpop.trf.xlu1 }
 0x683   : > { %7573 = vst [vmem:[%s13660_s16 + $0xe8] sm:$0xff] %v7534_v51 }
 0x686   : > { %v7535_v32 = vpop.trf.xlu1 }
 0x687   : > { %7575 = vst [vmem:[%s13660_s16 + $0xf8] sm:$0xff] %v7535_v32 }
 0x688   : > { %9090 = shalt.err (!%p9087_p0)
}
 0x689   : > { %s9091_s16 = scalar_lea.hbm %s14115_s1, 4096  ;;  %s9095_s3 = scalar_lea.hbm %s15107_s8, 16384 }
 0x68a   : > { %p9092_p4 = scmp.ne.s32.totalorder %s14115_s1, %s9091_s16  ;;  %p9096_p9 = scmp.lt.u32.totalorder %s14115_s1, %s15107_s8 }
 0x68b   : > { %p9097_p2 = scmp.lt.u32.totalorder %s9095_s3, %s9091_s16  ;;  %p9099_p1 = scmp.lt.u32.totalorder %s9091_s16, %s14115_s1 }
 0x68c   : > { %p9093_p6 = pnand %p9092_p4, %p15108_p11 }
 0x68d   : > { %p9098_p3 = por %p9097_p2, %p9096_p9 }
 0x68e   : > { %p9094_p8 = pneg %p9093_p6 }
 0x68f   : > { %p9100_p7 = por %p9099_p1, %p9098_p3 }
 0x691   : > { %p9101_p5 = pnand %p9100_p7, %p9094_p8 }
 0x693   : > { %9104 = shalt.err (!%p9101_p5)
}
 0x694   : > { %s9207_s14 = smov 256   ;;  %s9208_s19 = smov 512  }
 0x695   : > { %s9209_s30 = smov 16  }
 0x696   : > { %8557 = dma.vmem_to_hbm [thread:$0]  (%p15108_p11), %s14117_s15, 4096, %s14115_s1, %s7577_s2, %s9207_s14, %s9208_s19, %s9209_s30  }
 0x697 PF: > { %p8604_p10 = scmp.ge.s32.totalorder %s9191_s12, 2  ;;  %s7608_s22 = sand.u32 1, %s9163_s27  }
 0x698   : > { %p15109_p12 = scmp.ne.s32.totalorder %s14467_s17, 0  ;;  %s7609_s16 = scalar_lea.sflag [#allocation5], %s7608_s22 }
 0x69a   : > { %p8586_p13 = pnand %p8604_p10, %p15109_p12 }
 0x69c   : > { %9158 = dma.done.wait (!%p8586_p13), %s7609_s16, 4096  }
 0x69d   : > { %9160 = vsyncadd (!%p8586_p13), %s7609_s16, 4294963200  ;;  %s28_s12 = sadd.s32 1, %s9191_s12   ;;  %s15110_s27 = smov %s9167_s28 }
 0x69e   : > { %p25_p0 = scmp.ge.s32.totalorder %s28_s12, 6   ;;  %s15111_s28 = smov %s9171_s29 }
 0x69f   : > { %s15112_s29 = smov %s9511_s24  ;;  %s15113_s30 = smov %s9183_s10 }
 0x6a0   : > { %s15114_s9 = smov %s9187_s11  ;;  %s15115_s10 = smov %s15118_s25 }
 0x6a1   : > { %s15116_s11 = smov %s15122_s18  ;;  %27 = sbr.rel (!%p25_p0) target bundleno = 16 (0x10), region = 189 }
 0x6a8   :  { %7614 = vsyncpa [#allocation4], 1 }
 0x6a9   :  { %7616 = vsyncpa [#allocation4 + $0x1], 1 }
 0x6aa   :  { %7617 = vsyncpa [#allocation8], 1 }
 0x6ab   :  { %7618 = vsyncpa [#allocation11], 1 }
 0x6ac   :  { %7619 = vsyncpa [#allocation14], 1 }
 0x6ad   :  { %7620 = vsyncpa [#allocation5], 1 }
 0x6ae   :  { %7622 = vsyncpa [#allocation5 + $0x1], 1 }
 0x6af   :  { %7623 = vsyncpa [#allocation6], 1 }
 0x6b0   :  { %7625 = vsyncpa [#allocation6 + $0x1], 1 }

</bundles_post_ra>
